<compile_context>
chip_gen: v6e
topology: v6e:2x2x1
jax: 0.10.0
libtpu: 0.0.40
codegen_flags: <defaults>
</compile_context>

<pallas_src>
import numpy as np
import jax
import jax.numpy as jnp
from jax.experimental import pallas as pl
from jax.experimental.pallas import tpu as pltpu

D_MODEL = 768
NUM_HEADS = 8
HEAD_DIM = D_MODEL // NUM_HEADS          # 96
HEAD_PAD = 128                           # pad each head to a full 128-lane vreg
DIM_FF = 2048
LN_EPS = 1e-5

_QKV = 3 * NUM_HEADS * HEAD_PAD          # 3072 (padded QKV width)
_CTX = NUM_HEADS * HEAD_PAD              # 1024 (padded concat-heads width)
_VMEM_LIMIT = 40 * 1024 * 1024           # leaves headroom on v7x's 64 MiB VMEM


def _round_up(n, m):
    return ((n + m - 1) // m) * m


def _const_spec(shape):
    """BlockSpec for a grid-invariant operand: single-buffered (no 2x copy)."""
    nd = len(shape)
    return pl.BlockSpec(shape, lambda *_: (0,) * nd,
                        pipeline_mode=pl.Buffered(1))


def _pick_batch_block(B, S, target_rows=256):
    """Largest divisor of B with B_BLK*S <= target_rows; prefer >= 2 steps."""
    best = 1
    for d in range(1, B + 1):
        if B % d == 0 and d * S <= target_rows:
            best = d
    if best == B and B > 1:               # keep both TensorCores busy on v7x
        for d in range(best - 1, 0, -1):
            if B % d == 0:
                best = d
                break
    return best


# --------------------------------------------------------------------------
# Kernel A: QKV proj + per-head attention + out-proj + residual + LayerNorm1
# (one block of B_BLK batch elements per grid step)
# --------------------------------------------------------------------------
def _attn_ln_kernel(x_ref, wqkv_ref, bqkv_ref, wo_ref, bo_ref, g1_ref, b1_ref,
                    o_ref, ctx_ref):
    bb, s, e = x_ref.shape
    x = x_ref[...].reshape(bb * s, e)                       # (M, E) float32
    xb = x.astype(jnp.bfloat16)

    # Fused, head-padded QKV projection: (M, E) @ (E, 3*H*128) -> (M, 3072)
    qkv = jnp.dot(xb, wqkv_ref[...],
                  preferred_element_type=jnp.float32) + bqkv_ref[...]

    scale = 1.0 / float(np.sqrt(HEAD_DIM))
    for h in range(NUM_HEADS):
        qs = h * HEAD_PAD
        ks = (NUM_HEADS + h) * HEAD_PAD
        vs = (2 * NUM_HEADS + h) * HEAD_PAD
        q = (qkv[:, qs:qs + HEAD_PAD] * scale).reshape(bb, s, HEAD_PAD)
        k = qkv[:, ks:ks + HEAD_PAD].reshape(bb, s, HEAD_PAD)
        v = qkv[:, vs:vs + HEAD_PAD].reshape(bb, s, HEAD_PAD)

        # scores: padded tail lanes of q/k are exact zeros -> result is exact
        sc = jnp.einsum('bqd,bkd->bqk', q.astype(jnp.bfloat16),
                        k.astype(jnp.bfloat16),
                        preferred_element_type=jnp.float32)       # (bb, s, s)
        m = jnp.max(sc, axis=-1, keepdims=True)
        ez = jnp.exp(sc - m)
        denom = jnp.sum(ez, axis=-1, keepdims=True)
        p = ez * pl.reciprocal(denom, approx=True)                # EUP slot
        ctx_h = jnp.einsum('bqk,bkd->bqd', p.astype(jnp.bfloat16),
                           v.astype(jnp.bfloat16),
                           preferred_element_type=jnp.float32)    # (bb, s, 128)
        # lane-aligned 128-wide column store into the concat-heads scratch
        ctx_ref[:, h * HEAD_PAD:(h + 1) * HEAD_PAD] = (
            ctx_h.reshape(bb * s, HEAD_PAD).astype(ctx_ref.dtype))

    attn = jnp.dot(ctx_ref[...], wo_ref[...],
                   preferred_element_type=jnp.float32) + bo_ref[...]

    # residual (dropout1 == identity in eval) + LayerNorm1, float32 math
    r = x + attn
    mean = jnp.mean(r, axis=-1, keepdims=True)
    cen = r - mean
    var = jnp.mean(cen * cen, axis=-1, keepdims=True)
    y = cen * jax.lax.rsqrt(var + LN_EPS) * g1_ref[...] + b1_ref[...]
    o_ref[...] = y.reshape(bb, s, e).astype(o_ref.dtype)


# --------------------------------------------------------------------------
# Kernel B: position-wise FFN + residual + LayerNorm2 (one token tile / step)
# --------------------------------------------------------------------------
def _ffn_ln_kernel(x_ref, w1_ref, b1_ref, w2_ref, b2_ref, g2_ref, be2_ref,
                   o_ref):
    x = x_ref[...]                                               # (TB, E) f32
    h = jnp.dot(x.astype(jnp.bfloat16), w1_ref[...],
                preferred_element_type=jnp.float32) + b1_ref[...]
    h = jnp.maximum(h, 0.0)                                      # ReLU
    y = jnp.dot(h.astype(jnp.bfloat16), w2_ref[...],
                preferred_element_type=jnp.float32) + b2_ref[...]

    r = x + y                                                    # dropout2 == id
    mean = jnp.mean(r, axis=-1, keepdims=True)
    cen = r - mean
    var = jnp.mean(cen * cen, axis=-1, keepdims=True)
    o_ref[...] = (cen * jax.lax.rsqrt(var + LN_EPS) * g2_ref[...]
                  + be2_ref[...]).astype(o_ref.dtype)


# --------------------------------------------------------------------------
# One-time parameter preparation: transpose, per-head 96->128 zero padding,
# and bf16 cast of the matmul weights (biases / LN params stay f32).
# --------------------------------------------------------------------------
def prepare_params(in_proj_w, in_proj_b, out_proj_w, out_proj_b,
                   ln1_g, ln1_b, ff_w1, ff_b1, ff_w2, ff_b2, ln2_g, ln2_b):
    E, H, Dh, Dp = D_MODEL, NUM_HEADS, HEAD_DIM, HEAD_PAD

    # in_proj: (3E, E) rows ordered [q | k | v], heads contiguous inside each.
    w3 = in_proj_w.reshape(3, H, Dh, E)                 # (3, H, 96, E)
    w3t = jnp.transpose(w3, (3, 0, 1, 2))               # (E, 3, H, 96)
    wqkv_t = jnp.pad(w3t, ((0, 0), (0, 0), (0, 0), (0, Dp - Dh))
                     ).reshape(E, 3 * H * Dp)           # (E, 3072)
    bqkv = jnp.pad(in_proj_b.reshape(3, H, Dh),
                   ((0, 0), (0, 0), (0, Dp - Dh))).reshape(1, 3 * H * Dp)

    # out_proj: (E, E) -> padded (H*128, E) so padded ctx columns hit zero rows.
    wo_t = jnp.pad(out_proj_w.T.reshape(H, Dh, E),
                   ((0, 0), (0, Dp - Dh), (0, 0))).reshape(H * Dp, E)

    return dict(
        wqkv_t=wqkv_t.astype(jnp.bfloat16),
        bqkv=bqkv.astype(jnp.float32),
        wo_t=wo_t.astype(jnp.bfloat16),
        bo=out_proj_b.reshape(1, E).astype(jnp.float32),
        g1=ln1_g.reshape(1, E), b1=ln1_b.reshape(1, E),
        w1_t=ff_w1.T.astype(jnp.bfloat16),
        bb1=ff_b1.reshape(1, DIM_FF).astype(jnp.float32),
        w2_t=ff_w2.T.astype(jnp.bfloat16),
        bb2=ff_b2.reshape(1, E).astype(jnp.float32),
        g2=ln2_g.reshape(1, E), b2=ln2_b.reshape(1, E),
    )


# --------------------------------------------------------------------------
# Forward wrapper
# --------------------------------------------------------------------------
def transformer_encoder_layer_forward(data, prep, *, token_tile=512):
    """data: (S, B, E) float32 — PyTorch batch_first=False convention."""
    S, B, E = data.shape
    assert E == D_MODEL
    # TODO(synk): the two wrapper transposes could be folded into kernel A/B
    # index maps (one in-kernel sublane transpose per block) to drop two HBM
    # passes; kept as plain transposes for robustness.
    x = jnp.transpose(data, (1, 0, 2))                  # (B, S, E)

    b_blk = _pick_batch_block(B, S)
    m_rows = b_blk * S

    flops_a = B * (2 * S * E * _QKV
                   + NUM_HEADS * 4 * S * S * HEAD_PAD
                   + 2 * S * _CTX * E)
    bytes_a = (4 * 2 * B * S * E                        # f32 activations in/out
               + 2 * (E * _QKV + _CTX * E)              # bf16 weights
               + 4 * (_QKV + 5 * E))

    attn_out = pl.pallas_call(
        _attn_ln_kernel,
        out_shape=jax.ShapeDtypeStruct((B, S, E), jnp.float32),
        grid_spec=pltpu.PrefetchScalarGridSpec(
            num_scalar_prefetch=0,
            grid=(B // b_blk,),
            in_specs=[
                pl.BlockSpec((b_blk, S, E), lambda b: (b, 0, 0)),
                _const_spec((E, _QKV)),
                _const_spec((1, _QKV)),
                _const_spec((_CTX, E)),
                _const_spec((1, E)),
                _const_spec((1, E)),
                _const_spec((1, E)),
            ],
            out_specs=pl.BlockSpec((b_blk, S, E), lambda b: (b, 0, 0)),
            scratch_shapes=[pltpu.VMEM((m_rows, _CTX), jnp.bfloat16)],
        ),
        compiler_params=pltpu.CompilerParams(
            dimension_semantics=("parallel",),
            vmem_limit_bytes=_VMEM_LIMIT,
        ),
        cost_estimate=pl.CostEstimate(
            flops=flops_a,
            transcendentals=B * (NUM_HEADS * S * S + NUM_HEADS * S + S),
            bytes_accessed=bytes_a,
        ),
    )(x, prep["wqkv_t"], prep["bqkv"], prep["wo_t"], prep["bo"],
      prep["g1"], prep["b1"])

    # ---- FFN block: flatten tokens, tile rows, auto-pipelined DMA ----
    N = B * S
    tb = min(token_tile, _round_up(N, 8))
    if N > 8 and _round_up(N, tb) // tb < 2:
        tb = max(8, _round_up(tb // 2, 8))              # >=2 steps for 2-TC chips
    n_pad = _round_up(N, tb)
    tok = attn_out.reshape(N, E)
    if n_pad != N:
        tok = jnp.pad(tok, ((0, n_pad - N), (0, 0)))

    flops_b = n_pad * 4 * E * DIM_FF
    bytes_b = (4 * 2 * n_pad * E + 2 * 2 * E * DIM_FF + 4 * (DIM_FF + 3 * E))

    ffn_out = pl.pallas_call(
        _ffn_ln_kernel,
        out_shape=jax.ShapeDtypeStruct((n_pad, E), jnp.float32),
        grid_spec=pltpu.PrefetchScalarGridSpec(
            num_scalar_prefetch=0,
            grid=(n_pad // tb,),
            in_specs=[
                pl.BlockSpec((tb, E), lambda i: (i, 0)),
                _const_spec((E, DIM_FF)),
                _const_spec((1, DIM_FF)),
                _const_spec((DIM_FF, E)),
                _const_spec((1, E)),
                _const_spec((1, E)),
                _const_spec((1, E)),
            ],
            out_specs=pl.BlockSpec((tb, E), lambda i: (i, 0)),
        ),
        compiler_params=pltpu.CompilerParams(
            dimension_semantics=("parallel",),
            vmem_limit_bytes=_VMEM_LIMIT,
        ),
        cost_estimate=pl.CostEstimate(
            flops=flops_b, transcendentals=2 * n_pad, bytes_accessed=bytes_b),
    )(tok, prep["w1_t"], prep["bb1"], prep["w2_t"], prep["bb2"],
      prep["g2"], prep["b2"])

    out = ffn_out[:N].reshape(B, S, E)
    return jnp.transpose(out, (1, 0, 2))                # back to (S, B, E)


# --------------------------------------------------------------------------
# Pure-JAX float32 reference (PyTorch TransformerEncoderLayer, eval mode)
# --------------------------------------------------------------------------
def _reference_forward(data, raw):
    (in_w, in_b, out_w, out_b, g1, b1, w1, bb1, w2, bb2, g2, b2) = raw
    S, B, E = data.shape
    H, Dh = NUM_HEADS, HEAD_DIM

    qkv = jnp.einsum('sbe,fe->sbf', data, in_w) + in_b
    q, k, v = jnp.split(qkv, 3, axis=-1)

    def heads(t):
        return jnp.transpose(t.reshape(S, B, H, Dh), (1, 2, 0, 3))  # (B,H,S,Dh)

    qh, kh, vh = heads(q), heads(k), heads(v)
    s = jnp.einsum('bhsd,bhtd->bhst', qh, kh) / np.sqrt(Dh)
    p = jax.nn.softmax(s, axis=-1)
    ctx = jnp.einsum('bhst,bhtd->bhsd', p, vh)
    ctx = jnp.transpose(ctx, (2, 0, 1, 3)).reshape(S, B, E)
    attn = jnp.einsum('sbe,fe->sbf', ctx, out_w) + out_b

    def ln(x, g, b):
        m = jnp.mean(x, axis=-1, keepdims=True)
        var = jnp.mean((x - m) ** 2, axis=-1, keepdims=True)
        return (x - m) / jnp.sqrt(var + LN_EPS) * g + b

    h1 = ln(data + attn, g1, b1)
    ff = jnp.maximum(jnp.einsum('sbe,fe->sbf', h1, w1) + bb1, 0.0)
    ff = jnp.einsum('sbf,ef->sbe', ff, w2) + bb2
    return ln(h1 + ff, g2, b2)


if __name__ == "__main__":
    S, B = 8, 2                      # small seq / batch; d_model fixed at 768
    E, FF = D_MODEL, DIM_FF

    key = jax.random.PRNGKey(0)
    keys = jax.random.split(key, 8)
    data = jax.random.normal(keys[0], (S, B, E), dtype=jnp.float32)

    bd = 1.0 / np.sqrt(E)
    in_w = jax.random.uniform(keys[1], (3 * E, E), minval=-bd, maxval=bd,
                              dtype=jnp.float32)
    in_b = jax.random.uniform(keys[2], (3 * E,), minval=-bd, maxval=bd,
                              dtype=jnp.float32)
    out_w = jax.random.uniform(keys[3], (E, E), minval=-bd, maxval=bd,
                               dtype=jnp.float32)
    out_b = jnp.zeros((E,), jnp.float32)
    g1 = jnp.ones((E,), jnp.float32)
    b1 = jnp.zeros((E,), jnp.float32)
    w1 = jax.random.uniform(keys[4], (FF, E), minval=-bd, maxval=bd,
                            dtype=jnp.float32)
    bb1 = jax.random.uniform(keys[5], (FF,), minval=-bd, maxval=bd,
                             dtype=jnp.float32)
    bd2 = 1.0 / np.sqrt(FF)
    w2 = jax.random.uniform(keys[6], (E, FF), minval=-bd2, maxval=bd2,
                            dtype=jnp.float32)
    bb2 = jax.random.uniform(keys[7], (E,), minval=-bd2, maxval=bd2,
                             dtype=jnp.float32)
    g2 = jnp.ones((E,), jnp.float32)
    b2 = jnp.zeros((E,), jnp.float32)

    raw = (in_w, in_b, out_w, out_b, g1, b1, w1, bb1, w2, bb2, g2, b2)
    prep = prepare_params(*raw)

    out = transformer_encoder_layer_forward(data, prep)
    out = jax.block_until_ready(out)

    ref = _reference_forward(data, raw)
    assert out.shape == (S, B, E)
    err = float(jnp.max(jnp.abs(out - ref)))
    # Intentional numeric deviations vs. the f32 reference: bf16 matmul
    # operands (f32 accumulation) and the approx reciprocal in the softmax.
    # Structural bugs show up as O(0.1+) errors; bf16 rounding stays < ~1e-2.
    assert err < 3e-2, f"max abs err {err}"

    print("KERNEL_OK")
</pallas_src>

<mosaic_0001>
module attributes {stable_mosaic.version = 11 : i64} {
  func.func @_attn_ln_kernel(%arg0: i32, %arg1: memref<1x8x768xf32, #tpu.memory_space<vmem>>, %arg2: memref<768x3072xbf16, #tpu.memory_space<vmem>>, %arg3: memref<1x3072xf32, #tpu.memory_space<vmem>>, %arg4: memref<1024x768xbf16, #tpu.memory_space<vmem>>, %arg5: memref<1x768xf32, #tpu.memory_space<vmem>>, %arg6: memref<1x768xf32, #tpu.memory_space<vmem>>, %arg7: memref<1x768xf32, #tpu.memory_space<vmem>>, %arg8: memref<1x8x768xf32, #tpu.memory_space<vmem>>, %arg9: memref<8x1024xbf16, #tpu.memory_space<vmem>>) attributes {dimension_semantics = [#tpu.dimension_semantics<parallel>], iteration_bounds = array<i64: 2>, scalar_prefetch = 0 : i64, scratch_operands = 1 : i64, tpu.core_type = #tpu.core_type<tc>, window_params = [{transform_indices = @transform_0, window_bounds = array<i64: 1, 8, 768>}, {pipeline_mode = #tpu.pipeline_mode<synchronous>, transform_indices = @transform_1, window_bounds = array<i64: 768, 3072>}, {pipeline_mode = #tpu.pipeline_mode<synchronous>, transform_indices = @transform_2, window_bounds = array<i64: 1, 3072>}, {pipeline_mode = #tpu.pipeline_mode<synchronous>, transform_indices = @transform_3, window_bounds = array<i64: 1024, 768>}, {pipeline_mode = #tpu.pipeline_mode<synchronous>, transform_indices = @transform_4, window_bounds = array<i64: 1, 768>}, {pipeline_mode = #tpu.pipeline_mode<synchronous>, transform_indices = @transform_5, window_bounds = array<i64: 1, 768>}, {pipeline_mode = #tpu.pipeline_mode<synchronous>, transform_indices = @transform_6, window_bounds = array<i64: 1, 768>}, {transform_indices = @transform_7, window_bounds = array<i64: 1, 8, 768>}]} {
    %c0 = arith.constant 0 : index
    %c0_0 = arith.constant 0 : index
    %c0_1 = arith.constant 0 : index
    %0 = vector.load %arg1[%c0, %c0_0, %c0_1] : memref<1x8x768xf32, #tpu.memory_space<vmem>>, vector<1x8x768xf32>
    %1 = vector.shape_cast %0 : vector<1x8x768xf32> to vector<8x768xf32>
    %2 = arith.truncf %1 : vector<8x768xf32> to vector<8x768xbf16>
    %c0_2 = arith.constant 0 : index
    %c0_3 = arith.constant 0 : index
    %3 = vector.load %arg2[%c0_2, %c0_3] : memref<768x3072xbf16, #tpu.memory_space<vmem>>, vector<768x3072xbf16>
    %cst = arith.constant dense<0.000000e+00> : vector<8x3072xf32>
    %4 = tpu.matmul %2, %3, %cst {dimension_numbers = #tpu.dot_dimension_numbers<[1], [0], [0], [1], [0, 0, 1, 1], [], []>} : vector<8x768xbf16>, vector<768x3072xbf16>, vector<8x3072xf32> -> vector<8x3072xf32>
    %c0_4 = arith.constant 0 : index
    %c0_5 = arith.constant 0 : index
    %5 = vector.load %arg3[%c0_4, %c0_5] : memref<1x3072xf32, #tpu.memory_space<vmem>>, vector<1x3072xf32>
    %6 = vector.broadcast %5 : vector<1x3072xf32> to vector<8x3072xf32>
    %7 = arith.addf %4, %6 : vector<8x3072xf32>
    %8 = vector.extract_strided_slice %7 {offsets = [0, 0], sizes = [8, 128], strides = [1, 1]} : vector<8x3072xf32> to vector<8x128xf32>
    %cst_6 = arith.constant 0.102062076 : f32
    %9 = vector.broadcast %cst_6 : f32 to vector<8x128xf32>
    %10 = arith.mulf %8, %9 : vector<8x128xf32>
    %11 = vector.shape_cast %10 : vector<8x128xf32> to vector<1x8x128xf32>
    %12 = vector.extract_strided_slice %7 {offsets = [0, 1024], sizes = [8, 128], strides = [1, 1]} : vector<8x3072xf32> to vector<8x128xf32>
    %13 = vector.shape_cast %12 : vector<8x128xf32> to vector<1x8x128xf32>
    %14 = vector.extract_strided_slice %7 {offsets = [0, 2048], sizes = [8, 128], strides = [1, 1]} : vector<8x3072xf32> to vector<8x128xf32>
    %15 = vector.shape_cast %14 : vector<8x128xf32> to vector<1x8x128xf32>
    %16 = arith.truncf %11 : vector<1x8x128xf32> to vector<1x8x128xbf16>
    %17 = arith.truncf %13 : vector<1x8x128xf32> to vector<1x8x128xbf16>
    "tpu.trace_start"() <{level = 10 : i32, message = "bqd,bkd->bqk"}> : () -> ()
    %cst_7 = arith.constant dense<0.000000e+00> : vector<1x8x8xf32>
    %18 = tpu.matmul %16, %17, %cst_7 {dimension_numbers = #tpu.dot_dimension_numbers<[2], [2], [1], [1], [0, 0, 0, 1, 1, 1], [0], [0]>} : vector<1x8x128xbf16>, vector<1x8x128xbf16>, vector<1x8x8xf32> -> vector<1x8x8xf32>
    "tpu.trace_stop"() : () -> ()
    %cst_8 = arith.constant dense<0xFF800000> : vector<1x8xf32>
    %19 = vector.multi_reduction <maximumf>, %18, %cst_8 [2] : vector<1x8x8xf32> to vector<1x8xf32>
    %20 = vector.shape_cast %19 : vector<1x8xf32> to vector<1x8x1xf32>
    %21 = vector.broadcast %20 : vector<1x8x1xf32> to vector<1x8x8xf32>
    %22 = arith.subf %18, %21 : vector<1x8x8xf32>
    %23 = math.exp %22 : vector<1x8x8xf32>
    %cst_9 = arith.constant dense<0.000000e+00> : vector<1x8xf32>
    %24 = vector.multi_reduction <add>, %23, %cst_9 [2] : vector<1x8x8xf32> to vector<1x8xf32>
    %25 = vector.shape_cast %24 : vector<1x8xf32> to vector<1x8x1xf32>
    %26 = tpu.reciprocal %25 {approx = true} : vector<1x8x1xf32> -> vector<1x8x1xf32>
    %27 = vector.broadcast %26 : vector<1x8x1xf32> to vector<1x8x8xf32>
    %28 = arith.mulf %23, %27 : vector<1x8x8xf32>
    %29 = arith.truncf %28 : vector<1x8x8xf32> to vector<1x8x8xbf16>
    %30 = arith.truncf %15 : vector<1x8x128xf32> to vector<1x8x128xbf16>
    "tpu.trace_start"() <{level = 10 : i32, message = "bqk,bkd->bqd"}> : () -> ()
    %cst_10 = arith.constant dense<0.000000e+00> : vector<1x8x128xf32>
    %31 = tpu.matmul %29, %30, %cst_10 {dimension_numbers = #tpu.dot_dimension_numbers<[2], [1], [1], [2], [0, 0, 0, 1, 1, 2], [0], [0]>} : vector<1x8x8xbf16>, vector<1x8x128xbf16>, vector<1x8x128xf32> -> vector<1x8x128xf32>
    "tpu.trace_stop"() : () -> ()
    %32 = vector.shape_cast %31 : vector<1x8x128xf32> to vector<8x128xf32>
    %33 = arith.truncf %32 : vector<8x128xf32> to vector<8x128xbf16>
    %c0_11 = arith.constant 0 : index
    %c0_12 = arith.constant 0 : index
    %34 = vector.load %arg9[%c0_11, %c0_12] : memref<8x1024xbf16, #tpu.memory_space<vmem>>, vector<8x128xbf16>
    tpu.vector_store %arg9[%c0_11, %c0_12], %33 {strides = array<i32>} : memref<8x1024xbf16, #tpu.memory_space<vmem>>, vector<8x128xbf16>,
    %35 = vector.extract_strided_slice %7 {offsets = [0, 128], sizes = [8, 128], strides = [1, 1]} : vector<8x3072xf32> to vector<8x128xf32>
    %cst_13 = arith.constant 0.102062076 : f32
    %36 = vector.broadcast %cst_13 : f32 to vector<8x128xf32>
    %37 = arith.mulf %35, %36 : vector<8x128xf32>
    %38 = vector.shape_cast %37 : vector<8x128xf32> to vector<1x8x128xf32>
    %39 = vector.extract_strided_slice %7 {offsets = [0, 1152], sizes = [8, 128], strides = [1, 1]} : vector<8x3072xf32> to vector<8x128xf32>
    %40 = vector.shape_cast %39 : vector<8x128xf32> to vector<1x8x128xf32>
    %41 = vector.extract_strided_slice %7 {offsets = [0, 2176], sizes = [8, 128], strides = [1, 1]} : vector<8x3072xf32> to vector<8x128xf32>
    %42 = vector.shape_cast %41 : vector<8x128xf32> to vector<1x8x128xf32>
    %43 = arith.truncf %38 : vector<1x8x128xf32> to vector<1x8x128xbf16>
    %44 = arith.truncf %40 : vector<1x8x128xf32> to vector<1x8x128xbf16>
    "tpu.trace_start"() <{level = 10 : i32, message = "bqd,bkd->bqk"}> : () -> ()
    %cst_14 = arith.constant dense<0.000000e+00> : vector<1x8x8xf32>
    %45 = tpu.matmul %43, %44, %cst_14 {dimension_numbers = #tpu.dot_dimension_numbers<[2], [2], [1], [1], [0, 0, 0, 1, 1, 1], [0], [0]>} : vector<1x8x128xbf16>, vector<1x8x128xbf16>, vector<1x8x8xf32> -> vector<1x8x8xf32>
    "tpu.trace_stop"() : () -> ()
    %cst_15 = arith.constant dense<0xFF800000> : vector<1x8xf32>
    %46 = vector.multi_reduction <maximumf>, %45, %cst_15 [2] : vector<1x8x8xf32> to vector<1x8xf32>
    %47 = vector.shape_cast %46 : vector<1x8xf32> to vector<1x8x1xf32>
    %48 = vector.broadcast %47 : vector<1x8x1xf32> to vector<1x8x8xf32>
    %49 = arith.subf %45, %48 : vector<1x8x8xf32>
    %50 = math.exp %49 : vector<1x8x8xf32>
    %cst_16 = arith.constant dense<0.000000e+00> : vector<1x8xf32>
    %51 = vector.multi_reduction <add>, %50, %cst_16 [2] : vector<1x8x8xf32> to vector<1x8xf32>
    %52 = vector.shape_cast %51 : vector<1x8xf32> to vector<1x8x1xf32>
    %53 = tpu.reciprocal %52 {approx = true} : vector<1x8x1xf32> -> vector<1x8x1xf32>
    %54 = vector.broadcast %53 : vector<1x8x1xf32> to vector<1x8x8xf32>
    %55 = arith.mulf %50, %54 : vector<1x8x8xf32>
    %56 = arith.truncf %55 : vector<1x8x8xf32> to vector<1x8x8xbf16>
    %57 = arith.truncf %42 : vector<1x8x128xf32> to vector<1x8x128xbf16>
    "tpu.trace_start"() <{level = 10 : i32, message = "bqk,bkd->bqd"}> : () -> ()
    %cst_17 = arith.constant dense<0.000000e+00> : vector<1x8x128xf32>
    %58 = tpu.matmul %56, %57, %cst_17 {dimension_numbers = #tpu.dot_dimension_numbers<[2], [1], [1], [2], [0, 0, 0, 1, 1, 2], [0], [0]>} : vector<1x8x8xbf16>, vector<1x8x128xbf16>, vector<1x8x128xf32> -> vector<1x8x128xf32>
    "tpu.trace_stop"() : () -> ()
    %59 = vector.shape_cast %58 : vector<1x8x128xf32> to vector<8x128xf32>
    %60 = arith.truncf %59 : vector<8x128xf32> to vector<8x128xbf16>
    %c0_18 = arith.constant 0 : index
    %c128 = arith.constant 128 : index
    %61 = vector.load %arg9[%c0_18, %c128] : memref<8x1024xbf16, #tpu.memory_space<vmem>>, vector<8x128xbf16>
    tpu.vector_store %arg9[%c0_18, %c128], %60 {strides = array<i32>} : memref<8x1024xbf16, #tpu.memory_space<vmem>>, vector<8x128xbf16>,
    %62 = vector.extract_strided_slice %7 {offsets = [0, 256], sizes = [8, 128], strides = [1, 1]} : vector<8x3072xf32> to vector<8x128xf32>
    %cst_19 = arith.constant 0.102062076 : f32
    %63 = vector.broadcast %cst_19 : f32 to vector<8x128xf32>
    %64 = arith.mulf %62, %63 : vector<8x128xf32>
    %65 = vector.shape_cast %64 : vector<8x128xf32> to vector<1x8x128xf32>
    %66 = vector.extract_strided_slice %7 {offsets = [0, 1280], sizes = [8, 128], strides = [1, 1]} : vector<8x3072xf32> to vector<8x128xf32>
    %67 = vector.shape_cast %66 : vector<8x128xf32> to vector<1x8x128xf32>
    %68 = vector.extract_strided_slice %7 {offsets = [0, 2304], sizes = [8, 128], strides = [1, 1]} : vector<8x3072xf32> to vector<8x128xf32>
    %69 = vector.shape_cast %68 : vector<8x128xf32> to vector<1x8x128xf32>
    %70 = arith.truncf %65 : vector<1x8x128xf32> to vector<1x8x128xbf16>
    %71 = arith.truncf %67 : vector<1x8x128xf32> to vector<1x8x128xbf16>
    "tpu.trace_start"() <{level = 10 : i32, message = "bqd,bkd->bqk"}> : () -> ()
    %cst_20 = arith.constant dense<0.000000e+00> : vector<1x8x8xf32>
    %72 = tpu.matmul %70, %71, %cst_20 {dimension_numbers = #tpu.dot_dimension_numbers<[2], [2], [1], [1], [0, 0, 0, 1, 1, 1], [0], [0]>} : vector<1x8x128xbf16>, vector<1x8x128xbf16>, vector<1x8x8xf32> -> vector<1x8x8xf32>
    "tpu.trace_stop"() : () -> ()
    %cst_21 = arith.constant dense<0xFF800000> : vector<1x8xf32>
    %73 = vector.multi_reduction <maximumf>, %72, %cst_21 [2] : vector<1x8x8xf32> to vector<1x8xf32>
    %74 = vector.shape_cast %73 : vector<1x8xf32> to vector<1x8x1xf32>
    %75 = vector.broadcast %74 : vector<1x8x1xf32> to vector<1x8x8xf32>
    %76 = arith.subf %72, %75 : vector<1x8x8xf32>
    %77 = math.exp %76 : vector<1x8x8xf32>
    %cst_22 = arith.constant dense<0.000000e+00> : vector<1x8xf32>
    %78 = vector.multi_reduction <add>, %77, %cst_22 [2] : vector<1x8x8xf32> to vector<1x8xf32>
    %79 = vector.shape_cast %78 : vector<1x8xf32> to vector<1x8x1xf32>
    %80 = tpu.reciprocal %79 {approx = true} : vector<1x8x1xf32> -> vector<1x8x1xf32>
    %81 = vector.broadcast %80 : vector<1x8x1xf32> to vector<1x8x8xf32>
    %82 = arith.mulf %77, %81 : vector<1x8x8xf32>
    %83 = arith.truncf %82 : vector<1x8x8xf32> to vector<1x8x8xbf16>
    %84 = arith.truncf %69 : vector<1x8x128xf32> to vector<1x8x128xbf16>
    "tpu.trace_start"() <{level = 10 : i32, message = "bqk,bkd->bqd"}> : () -> ()
    %cst_23 = arith.constant dense<0.000000e+00> : vector<1x8x128xf32>
    %85 = tpu.matmul %83, %84, %cst_23 {dimension_numbers = #tpu.dot_dimension_numbers<[2], [1], [1], [2], [0, 0, 0, 1, 1, 2], [0], [0]>} : vector<1x8x8xbf16>, vector<1x8x128xbf16>, vector<1x8x128xf32> -> vector<1x8x128xf32>
    "tpu.trace_stop"() : () -> ()
    %86 = vector.shape_cast %85 : vector<1x8x128xf32> to vector<8x128xf32>
    %87 = arith.truncf %86 : vector<8x128xf32> to vector<8x128xbf16>
    %c0_24 = arith.constant 0 : index
    %c256 = arith.constant 256 : index
    %88 = vector.load %arg9[%c0_24, %c256] : memref<8x1024xbf16, #tpu.memory_space<vmem>>, vector<8x128xbf16>
    tpu.vector_store %arg9[%c0_24, %c256], %87 {strides = array<i32>} : memref<8x1024xbf16, #tpu.memory_space<vmem>>, vector<8x128xbf16>,
    %89 = vector.extract_strided_slice %7 {offsets = [0, 384], sizes = [8, 128], strides = [1, 1]} : vector<8x3072xf32> to vector<8x128xf32>
    %cst_25 = arith.constant 0.102062076 : f32
    %90 = vector.broadcast %cst_25 : f32 to vector<8x128xf32>
    %91 = arith.mulf %89, %90 : vector<8x128xf32>
    %92 = vector.shape_cast %91 : vector<8x128xf32> to vector<1x8x128xf32>
    %93 = vector.extract_strided_slice %7 {offsets = [0, 1408], sizes = [8, 128], strides = [1, 1]} : vector<8x3072xf32> to vector<8x128xf32>
    %94 = vector.shape_cast %93 : vector<8x128xf32> to vector<1x8x128xf32>
    %95 = vector.extract_strided_slice %7 {offsets = [0, 2432], sizes = [8, 128], strides = [1, 1]} : vector<8x3072xf32> to vector<8x128xf32>
    %96 = vector.shape_cast %95 : vector<8x128xf32> to vector<1x8x128xf32>
    %97 = arith.truncf %92 : vector<1x8x128xf32> to vector<1x8x128xbf16>
    %98 = arith.truncf %94 : vector<1x8x128xf32> to vector<1x8x128xbf16>
    "tpu.trace_start"() <{level = 10 : i32, message = "bqd,bkd->bqk"}> : () -> ()
    %cst_26 = arith.constant dense<0.000000e+00> : vector<1x8x8xf32>
    %99 = tpu.matmul %97, %98, %cst_26 {dimension_numbers = #tpu.dot_dimension_numbers<[2], [2], [1], [1], [0, 0, 0, 1, 1, 1], [0], [0]>} : vector<1x8x128xbf16>, vector<1x8x128xbf16>, vector<1x8x8xf32> -> vector<1x8x8xf32>
    "tpu.trace_stop"() : () -> ()
    %cst_27 = arith.constant dense<0xFF800000> : vector<1x8xf32>
    %100 = vector.multi_reduction <maximumf>, %99, %cst_27 [2] : vector<1x8x8xf32> to vector<1x8xf32>
    %101 = vector.shape_cast %100 : vector<1x8xf32> to vector<1x8x1xf32>
    %102 = vector.broadcast %101 : vector<1x8x1xf32> to vector<1x8x8xf32>
    %103 = arith.subf %99, %102 : vector<1x8x8xf32>
    %104 = math.exp %103 : vector<1x8x8xf32>
    %cst_28 = arith.constant dense<0.000000e+00> : vector<1x8xf32>
    %105 = vector.multi_reduction <add>, %104, %cst_28 [2] : vector<1x8x8xf32> to vector<1x8xf32>
    %106 = vector.shape_cast %105 : vector<1x8xf32> to vector<1x8x1xf32>
    %107 = tpu.reciprocal %106 {approx = true} : vector<1x8x1xf32> -> vector<1x8x1xf32>
    %108 = vector.broadcast %107 : vector<1x8x1xf32> to vector<1x8x8xf32>
    %109 = arith.mulf %104, %108 : vector<1x8x8xf32>
    %110 = arith.truncf %109 : vector<1x8x8xf32> to vector<1x8x8xbf16>
    %111 = arith.truncf %96 : vector<1x8x128xf32> to vector<1x8x128xbf16>
    "tpu.trace_start"() <{level = 10 : i32, message = "bqk,bkd->bqd"}> : () -> ()
    %cst_29 = arith.constant dense<0.000000e+00> : vector<1x8x128xf32>
    %112 = tpu.matmul %110, %111, %cst_29 {dimension_numbers = #tpu.dot_dimension_numbers<[2], [1], [1], [2], [0, 0, 0, 1, 1, 2], [0], [0]>} : vector<1x8x8xbf16>, vector<1x8x128xbf16>, vector<1x8x128xf32> -> vector<1x8x128xf32>
    "tpu.trace_stop"() : () -> ()
    %113 = vector.shape_cast %112 : vector<1x8x128xf32> to vector<8x128xf32>
    %114 = arith.truncf %113 : vector<8x128xf32> to vector<8x128xbf16>
    %c0_30 = arith.constant 0 : index
    %c384 = arith.constant 384 : index
    %115 = vector.load %arg9[%c0_30, %c384] : memref<8x1024xbf16, #tpu.memory_space<vmem>>, vector<8x128xbf16>
    tpu.vector_store %arg9[%c0_30, %c384], %114 {strides = array<i32>} : memref<8x1024xbf16, #tpu.memory_space<vmem>>, vector<8x128xbf16>,
    %116 = vector.extract_strided_slice %7 {offsets = [0, 512], sizes = [8, 128], strides = [1, 1]} : vector<8x3072xf32> to vector<8x128xf32>
    %cst_31 = arith.constant 0.102062076 : f32
    %117 = vector.broadcast %cst_31 : f32 to vector<8x128xf32>
    %118 = arith.mulf %116, %117 : vector<8x128xf32>
    %119 = vector.shape_cast %118 : vector<8x128xf32> to vector<1x8x128xf32>
    %120 = vector.extract_strided_slice %7 {offsets = [0, 1536], sizes = [8, 128], strides = [1, 1]} : vector<8x3072xf32> to vector<8x128xf32>
    %121 = vector.shape_cast %120 : vector<8x128xf32> to vector<1x8x128xf32>
    %122 = vector.extract_strided_slice %7 {offsets = [0, 2560], sizes = [8, 128], strides = [1, 1]} : vector<8x3072xf32> to vector<8x128xf32>
    %123 = vector.shape_cast %122 : vector<8x128xf32> to vector<1x8x128xf32>
    %124 = arith.truncf %119 : vector<1x8x128xf32> to vector<1x8x128xbf16>
    %125 = arith.truncf %121 : vector<1x8x128xf32> to vector<1x8x128xbf16>
    "tpu.trace_start"() <{level = 10 : i32, message = "bqd,bkd->bqk"}> : () -> ()
    %cst_32 = arith.constant dense<0.000000e+00> : vector<1x8x8xf32>
    %126 = tpu.matmul %124, %125, %cst_32 {dimension_numbers = #tpu.dot_dimension_numbers<[2], [2], [1], [1], [0, 0, 0, 1, 1, 1], [0], [0]>} : vector<1x8x128xbf16>, vector<1x8x128xbf16>, vector<1x8x8xf32> -> vector<1x8x8xf32>
    "tpu.trace_stop"() : () -> ()
    %cst_33 = arith.constant dense<0xFF800000> : vector<1x8xf32>
    %127 = vector.multi_reduction <maximumf>, %126, %cst_33 [2] : vector<1x8x8xf32> to vector<1x8xf32>
    %128 = vector.shape_cast %127 : vector<1x8xf32> to vector<1x8x1xf32>
    %129 = vector.broadcast %128 : vector<1x8x1xf32> to vector<1x8x8xf32>
    %130 = arith.subf %126, %129 : vector<1x8x8xf32>
    %131 = math.exp %130 : vector<1x8x8xf32>
    %cst_34 = arith.constant dense<0.000000e+00> : vector<1x8xf32>
    %132 = vector.multi_reduction <add>, %131, %cst_34 [2] : vector<1x8x8xf32> to vector<1x8xf32>
    %133 = vector.shape_cast %132 : vector<1x8xf32> to vector<1x8x1xf32>
    %134 = tpu.reciprocal %133 {approx = true} : vector<1x8x1xf32> -> vector<1x8x1xf32>
    %135 = vector.broadcast %134 : vector<1x8x1xf32> to vector<1x8x8xf32>
    %136 = arith.mulf %131, %135 : vector<1x8x8xf32>
    %137 = arith.truncf %136 : vector<1x8x8xf32> to vector<1x8x8xbf16>
    %138 = arith.truncf %123 : vector<1x8x128xf32> to vector<1x8x128xbf16>
    "tpu.trace_start"() <{level = 10 : i32, message = "bqk,bkd->bqd"}> : () -> ()
    %cst_35 = arith.constant dense<0.000000e+00> : vector<1x8x128xf32>
    %139 = tpu.matmul %137, %138, %cst_35 {dimension_numbers = #tpu.dot_dimension_numbers<[2], [1], [1], [2], [0, 0, 0, 1, 1, 2], [0], [0]>} : vector<1x8x8xbf16>, vector<1x8x128xbf16>, vector<1x8x128xf32> -> vector<1x8x128xf32>
    "tpu.trace_stop"() : () -> ()
    %140 = vector.shape_cast %139 : vector<1x8x128xf32> to vector<8x128xf32>
    %141 = arith.truncf %140 : vector<8x128xf32> to vector<8x128xbf16>
    %c0_36 = arith.constant 0 : index
    %c512 = arith.constant 512 : index
    %142 = vector.load %arg9[%c0_36, %c512] : memref<8x1024xbf16, #tpu.memory_space<vmem>>, vector<8x128xbf16>
    tpu.vector_store %arg9[%c0_36, %c512], %141 {strides = array<i32>} : memref<8x1024xbf16, #tpu.memory_space<vmem>>, vector<8x128xbf16>,
    %143 = vector.extract_strided_slice %7 {offsets = [0, 640], sizes = [8, 128], strides = [1, 1]} : vector<8x3072xf32> to vector<8x128xf32>
    %cst_37 = arith.constant 0.102062076 : f32
    %144 = vector.broadcast %cst_37 : f32 to vector<8x128xf32>
    %145 = arith.mulf %143, %144 : vector<8x128xf32>
    %146 = vector.shape_cast %145 : vector<8x128xf32> to vector<1x8x128xf32>
    %147 = vector.extract_strided_slice %7 {offsets = [0, 1664], sizes = [8, 128], strides = [1, 1]} : vector<8x3072xf32> to vector<8x128xf32>
    %148 = vector.shape_cast %147 : vector<8x128xf32> to vector<1x8x128xf32>
    %149 = vector.extract_strided_slice %7 {offsets = [0, 2688], sizes = [8, 128], strides = [1, 1]} : vector<8x3072xf32> to vector<8x128xf32>
    %150 = vector.shape_cast %149 : vector<8x128xf32> to vector<1x8x128xf32>
    %151 = arith.truncf %146 : vector<1x8x128xf32> to vector<1x8x128xbf16>
    %152 = arith.truncf %148 : vector<1x8x128xf32> to vector<1x8x128xbf16>
    "tpu.trace_start"() <{level = 10 : i32, message = "bqd,bkd->bqk"}> : () -> ()
    %cst_38 = arith.constant dense<0.000000e+00> : vector<1x8x8xf32>
    %153 = tpu.matmul %151, %152, %cst_38 {dimension_numbers = #tpu.dot_dimension_numbers<[2], [2], [1], [1], [0, 0, 0, 1, 1, 1], [0], [0]>} : vector<1x8x128xbf16>, vector<1x8x128xbf16>, vector<1x8x8xf32> -> vector<1x8x8xf32>
    "tpu.trace_stop"() : () -> ()
    %cst_39 = arith.constant dense<0xFF800000> : vector<1x8xf32>
    %154 = vector.multi_reduction <maximumf>, %153, %cst_39 [2] : vector<1x8x8xf32> to vector<1x8xf32>
    %155 = vector.shape_cast %154 : vector<1x8xf32> to vector<1x8x1xf32>
    %156 = vector.broadcast %155 : vector<1x8x1xf32> to vector<1x8x8xf32>
    %157 = arith.subf %153, %156 : vector<1x8x8xf32>
    %158 = math.exp %157 : vector<1x8x8xf32>
    %cst_40 = arith.constant dense<0.000000e+00> : vector<1x8xf32>
    %159 = vector.multi_reduction <add>, %158, %cst_40 [2] : vector<1x8x8xf32> to vector<1x8xf32>
    %160 = vector.shape_cast %159 : vector<1x8xf32> to vector<1x8x1xf32>
    %161 = tpu.reciprocal %160 {approx = true} : vector<1x8x1xf32> -> vector<1x8x1xf32>
    %162 = vector.broadcast %161 : vector<1x8x1xf32> to vector<1x8x8xf32>
    %163 = arith.mulf %158, %162 : vector<1x8x8xf32>
    %164 = arith.truncf %163 : vector<1x8x8xf32> to vector<1x8x8xbf16>
    %165 = arith.truncf %150 : vector<1x8x128xf32> to vector<1x8x128xbf16>
    "tpu.trace_start"() <{level = 10 : i32, message = "bqk,bkd->bqd"}> : () -> ()
    %cst_41 = arith.constant dense<0.000000e+00> : vector<1x8x128xf32>
    %166 = tpu.matmul %164, %165, %cst_41 {dimension_numbers = #tpu.dot_dimension_numbers<[2], [1], [1], [2], [0, 0, 0, 1, 1, 2], [0], [0]>} : vector<1x8x8xbf16>, vector<1x8x128xbf16>, vector<1x8x128xf32> -> vector<1x8x128xf32>
    "tpu.trace_stop"() : () -> ()
    %167 = vector.shape_cast %166 : vector<1x8x128xf32> to vector<8x128xf32>
    %168 = arith.truncf %167 : vector<8x128xf32> to vector<8x128xbf16>
    %c0_42 = arith.constant 0 : index
    %c640 = arith.constant 640 : index
    %169 = vector.load %arg9[%c0_42, %c640] : memref<8x1024xbf16, #tpu.memory_space<vmem>>, vector<8x128xbf16>
    tpu.vector_store %arg9[%c0_42, %c640], %168 {strides = array<i32>} : memref<8x1024xbf16, #tpu.memory_space<vmem>>, vector<8x128xbf16>,
    %170 = vector.extract_strided_slice %7 {offsets = [0, 768], sizes = [8, 128], strides = [1, 1]} : vector<8x3072xf32> to vector<8x128xf32>
    %cst_43 = arith.constant 0.102062076 : f32
    %171 = vector.broadcast %cst_43 : f32 to vector<8x128xf32>
    %172 = arith.mulf %170, %171 : vector<8x128xf32>
    %173 = vector.shape_cast %172 : vector<8x128xf32> to vector<1x8x128xf32>
    %174 = vector.extract_strided_slice %7 {offsets = [0, 1792], sizes = [8, 128], strides = [1, 1]} : vector<8x3072xf32> to vector<8x128xf32>
    %175 = vector.shape_cast %174 : vector<8x128xf32> to vector<1x8x128xf32>
    %176 = vector.extract_strided_slice %7 {offsets = [0, 2816], sizes = [8, 128], strides = [1, 1]} : vector<8x3072xf32> to vector<8x128xf32>
    %177 = vector.shape_cast %176 : vector<8x128xf32> to vector<1x8x128xf32>
    %178 = arith.truncf %173 : vector<1x8x128xf32> to vector<1x8x128xbf16>
    %179 = arith.truncf %175 : vector<1x8x128xf32> to vector<1x8x128xbf16>
    "tpu.trace_start"() <{level = 10 : i32, message = "bqd,bkd->bqk"}> : () -> ()
    %cst_44 = arith.constant dense<0.000000e+00> : vector<1x8x8xf32>
    %180 = tpu.matmul %178, %179, %cst_44 {dimension_numbers = #tpu.dot_dimension_numbers<[2], [2], [1], [1], [0, 0, 0, 1, 1, 1], [0], [0]>} : vector<1x8x128xbf16>, vector<1x8x128xbf16>, vector<1x8x8xf32> -> vector<1x8x8xf32>
    "tpu.trace_stop"() : () -> ()
    %cst_45 = arith.constant dense<0xFF800000> : vector<1x8xf32>
    %181 = vector.multi_reduction <maximumf>, %180, %cst_45 [2] : vector<1x8x8xf32> to vector<1x8xf32>
    %182 = vector.shape_cast %181 : vector<1x8xf32> to vector<1x8x1xf32>
    %183 = vector.broadcast %182 : vector<1x8x1xf32> to vector<1x8x8xf32>
    %184 = arith.subf %180, %183 : vector<1x8x8xf32>
    %185 = math.exp %184 : vector<1x8x8xf32>
    %cst_46 = arith.constant dense<0.000000e+00> : vector<1x8xf32>
    %186 = vector.multi_reduction <add>, %185, %cst_46 [2] : vector<1x8x8xf32> to vector<1x8xf32>
    %187 = vector.shape_cast %186 : vector<1x8xf32> to vector<1x8x1xf32>
    %188 = tpu.reciprocal %187 {approx = true} : vector<1x8x1xf32> -> vector<1x8x1xf32>
    %189 = vector.broadcast %188 : vector<1x8x1xf32> to vector<1x8x8xf32>
    %190 = arith.mulf %185, %189 : vector<1x8x8xf32>
    %191 = arith.truncf %190 : vector<1x8x8xf32> to vector<1x8x8xbf16>
    %192 = arith.truncf %177 : vector<1x8x128xf32> to vector<1x8x128xbf16>
    "tpu.trace_start"() <{level = 10 : i32, message = "bqk,bkd->bqd"}> : () -> ()
    %cst_47 = arith.constant dense<0.000000e+00> : vector<1x8x128xf32>
    %193 = tpu.matmul %191, %192, %cst_47 {dimension_numbers = #tpu.dot_dimension_numbers<[2], [1], [1], [2], [0, 0, 0, 1, 1, 2], [0], [0]>} : vector<1x8x8xbf16>, vector<1x8x128xbf16>, vector<1x8x128xf32> -> vector<1x8x128xf32>
    "tpu.trace_stop"() : () -> ()
    %194 = vector.shape_cast %193 : vector<1x8x128xf32> to vector<8x128xf32>
    %195 = arith.truncf %194 : vector<8x128xf32> to vector<8x128xbf16>
    %c0_48 = arith.constant 0 : index
    %c768 = arith.constant 768 : index
    %196 = vector.load %arg9[%c0_48, %c768] : memref<8x1024xbf16, #tpu.memory_space<vmem>>, vector<8x128xbf16>
    tpu.vector_store %arg9[%c0_48, %c768], %195 {strides = array<i32>} : memref<8x1024xbf16, #tpu.memory_space<vmem>>, vector<8x128xbf16>,
    %197 = vector.extract_strided_slice %7 {offsets = [0, 896], sizes = [8, 128], strides = [1, 1]} : vector<8x3072xf32> to vector<8x128xf32>
    %cst_49 = arith.constant 0.102062076 : f32
    %198 = vector.broadcast %cst_49 : f32 to vector<8x128xf32>
    %199 = arith.mulf %197, %198 : vector<8x128xf32>
    %200 = vector.shape_cast %199 : vector<8x128xf32> to vector<1x8x128xf32>
    %201 = vector.extract_strided_slice %7 {offsets = [0, 1920], sizes = [8, 128], strides = [1, 1]} : vector<8x3072xf32> to vector<8x128xf32>
    %202 = vector.shape_cast %201 : vector<8x128xf32> to vector<1x8x128xf32>
    %203 = vector.extract_strided_slice %7 {offsets = [0, 2944], sizes = [8, 128], strides = [1, 1]} : vector<8x3072xf32> to vector<8x128xf32>
    %204 = vector.shape_cast %203 : vector<8x128xf32> to vector<1x8x128xf32>
    %205 = arith.truncf %200 : vector<1x8x128xf32> to vector<1x8x128xbf16>
    %206 = arith.truncf %202 : vector<1x8x128xf32> to vector<1x8x128xbf16>
    "tpu.trace_start"() <{level = 10 : i32, message = "bqd,bkd->bqk"}> : () -> ()
    %cst_50 = arith.constant dense<0.000000e+00> : vector<1x8x8xf32>
    %207 = tpu.matmul %205, %206, %cst_50 {dimension_numbers = #tpu.dot_dimension_numbers<[2], [2], [1], [1], [0, 0, 0, 1, 1, 1], [0], [0]>} : vector<1x8x128xbf16>, vector<1x8x128xbf16>, vector<1x8x8xf32> -> vector<1x8x8xf32>
    "tpu.trace_stop"() : () -> ()
    %cst_51 = arith.constant dense<0xFF800000> : vector<1x8xf32>
    %208 = vector.multi_reduction <maximumf>, %207, %cst_51 [2] : vector<1x8x8xf32> to vector<1x8xf32>
    %209 = vector.shape_cast %208 : vector<1x8xf32> to vector<1x8x1xf32>
    %210 = vector.broadcast %209 : vector<1x8x1xf32> to vector<1x8x8xf32>
    %211 = arith.subf %207, %210 : vector<1x8x8xf32>
    %212 = math.exp %211 : vector<1x8x8xf32>
    %cst_52 = arith.constant dense<0.000000e+00> : vector<1x8xf32>
    %213 = vector.multi_reduction <add>, %212, %cst_52 [2] : vector<1x8x8xf32> to vector<1x8xf32>
    %214 = vector.shape_cast %213 : vector<1x8xf32> to vector<1x8x1xf32>
    %215 = tpu.reciprocal %214 {approx = true} : vector<1x8x1xf32> -> vector<1x8x1xf32>
    %216 = vector.broadcast %215 : vector<1x8x1xf32> to vector<1x8x8xf32>
    %217 = arith.mulf %212, %216 : vector<1x8x8xf32>
    %218 = arith.truncf %217 : vector<1x8x8xf32> to vector<1x8x8xbf16>
    %219 = arith.truncf %204 : vector<1x8x128xf32> to vector<1x8x128xbf16>
    "tpu.trace_start"() <{level = 10 : i32, message = "bqk,bkd->bqd"}> : () -> ()
    %cst_53 = arith.constant dense<0.000000e+00> : vector<1x8x128xf32>
    %220 = tpu.matmul %218, %219, %cst_53 {dimension_numbers = #tpu.dot_dimension_numbers<[2], [1], [1], [2], [0, 0, 0, 1, 1, 2], [0], [0]>} : vector<1x8x8xbf16>, vector<1x8x128xbf16>, vector<1x8x128xf32> -> vector<1x8x128xf32>
    "tpu.trace_stop"() : () -> ()
    %221 = vector.shape_cast %220 : vector<1x8x128xf32> to vector<8x128xf32>
    %222 = arith.truncf %221 : vector<8x128xf32> to vector<8x128xbf16>
    %c0_54 = arith.constant 0 : index
    %c896 = arith.constant 896 : index
    %223 = vector.load %arg9[%c0_54, %c896] : memref<8x1024xbf16, #tpu.memory_space<vmem>>, vector<8x128xbf16>
    tpu.vector_store %arg9[%c0_54, %c896], %222 {strides = array<i32>} : memref<8x1024xbf16, #tpu.memory_space<vmem>>, vector<8x128xbf16>,
    %c0_55 = arith.constant 0 : index
    %c0_56 = arith.constant 0 : index
    %224 = vector.load %arg9[%c0_55, %c0_56] : memref<8x1024xbf16, #tpu.memory_space<vmem>>, vector<8x1024xbf16>
    %c0_57 = arith.constant 0 : index
    %c0_58 = arith.constant 0 : index
    %225 = vector.load %arg4[%c0_57, %c0_58] : memref<1024x768xbf16, #tpu.memory_space<vmem>>, vector<1024x768xbf16>
    %cst_59 = arith.constant dense<0.000000e+00> : vector<8x768xf32>
    %226 = tpu.matmul %224, %225, %cst_59 {dimension_numbers = #tpu.dot_dimension_numbers<[1], [0], [0], [1], [0, 0, 1, 1], [], []>} : vector<8x1024xbf16>, vector<1024x768xbf16>, vector<8x768xf32> -> vector<8x768xf32>
    %c0_60 = arith.constant 0 : index
    %c0_61 = arith.constant 0 : index
    %227 = vector.load %arg5[%c0_60, %c0_61] : memref<1x768xf32, #tpu.memory_space<vmem>>, vector<1x768xf32>
    %228 = vector.broadcast %227 : vector<1x768xf32> to vector<8x768xf32>
    %229 = arith.addf %226, %228 : vector<8x768xf32>
    %230 = arith.addf %1, %229 : vector<8x768xf32>
    %cst_62 = arith.constant dense<0.000000e+00> : vector<8xf32>
    %231 = vector.multi_reduction <add>, %230, %cst_62 [1] : vector<8x768xf32> to vector<8xf32>
    %232 = vector.shape_cast %231 : vector<8xf32> to vector<8x1xf32>
    %cst_63 = arith.constant 7.680000e+02 : f32
    %233 = vector.broadcast %cst_63 : f32 to vector<8x1xf32>
    %234 = arith.divf %232, %233 : vector<8x1xf32>
    %235 = vector.broadcast %234 : vector<8x1xf32> to vector<8x768xf32>
    %236 = arith.subf %230, %235 : vector<8x768xf32>
    %237 = arith.mulf %236, %236 : vector<8x768xf32>
    %cst_64 = arith.constant dense<0.000000e+00> : vector<8xf32>
    %238 = vector.multi_reduction <add>, %237, %cst_64 [1] : vector<8x768xf32> to vector<8xf32>
    %239 = vector.shape_cast %238 : vector<8xf32> to vector<8x1xf32>
    %cst_65 = arith.constant 7.680000e+02 : f32
    %240 = vector.broadcast %cst_65 : f32 to vector<8x1xf32>
    %241 = arith.divf %239, %240 : vector<8x1xf32>
    %cst_66 = arith.constant 9.99999974E-6 : f32
    %242 = vector.broadcast %cst_66 : f32 to vector<8x1xf32>
    %243 = arith.addf %241, %242 : vector<8x1xf32>
    %244 = math.rsqrt %243 : vector<8x1xf32>
    %245 = vector.broadcast %244 : vector<8x1xf32> to vector<8x768xf32>
    %246 = arith.mulf %236, %245 : vector<8x768xf32>
    %c0_67 = arith.constant 0 : index
    %c0_68 = arith.constant 0 : index
    %247 = vector.load %arg6[%c0_67, %c0_68] : memref<1x768xf32, #tpu.memory_space<vmem>>, vector<1x768xf32>
    %248 = vector.broadcast %247 : vector<1x768xf32> to vector<8x768xf32>
    %249 = arith.mulf %246, %248 : vector<8x768xf32>
    %c0_69 = arith.constant 0 : index
    %c0_70 = arith.constant 0 : index
    %250 = vector.load %arg7[%c0_69, %c0_70] : memref<1x768xf32, #tpu.memory_space<vmem>>, vector<1x768xf32>
    %251 = vector.broadcast %250 : vector<1x768xf32> to vector<8x768xf32>
    %252 = arith.addf %249, %251 : vector<8x768xf32>
    %253 = vector.shape_cast %252 : vector<8x768xf32> to vector<1x8x768xf32>
    %c0_71 = arith.constant 0 : index
    %c0_72 = arith.constant 0 : index
    %c0_73 = arith.constant 0 : index
    %254 = vector.load %arg8[%c0_71, %c0_72, %c0_73] : memref<1x8x768xf32, #tpu.memory_space<vmem>>, vector<1x8x768xf32>
    tpu.vector_store %arg8[%c0_71, %c0_72, %c0_73], %253 {strides = array<i32>} : memref<1x8x768xf32, #tpu.memory_space<vmem>>, vector<1x8x768xf32>,
    return
  }
  func.func @transform_0(%arg0: i32) -> (i32, i32, i32) {
    %c0_i32 = arith.constant 0 : i32
    %c0_i32_0 = arith.constant 0 : i32
    %c0_i32_1 = arith.constant 0 : i32
    return %arg0, %c0_i32, %c0_i32_0 : i32, i32, i32
  }
  func.func @transform_1(%arg0: i32) -> (i32, i32) {
    %c0_i32 = arith.constant 0 : i32
    %c0_i32_0 = arith.constant 0 : i32
    %c0_i32_1 = arith.constant 0 : i32
    return %c0_i32, %c0_i32_0 : i32, i32
  }
  func.func @transform_2(%arg0: i32) -> (i32, i32) {
    %c0_i32 = arith.constant 0 : i32
    %c0_i32_0 = arith.constant 0 : i32
    %c0_i32_1 = arith.constant 0 : i32
    return %c0_i32, %c0_i32_0 : i32, i32
  }
  func.func @transform_3(%arg0: i32) -> (i32, i32) {
    %c0_i32 = arith.constant 0 : i32
    %c0_i32_0 = arith.constant 0 : i32
    %c0_i32_1 = arith.constant 0 : i32
    return %c0_i32, %c0_i32_0 : i32, i32
  }
  func.func @transform_4(%arg0: i32) -> (i32, i32) {
    %c0_i32 = arith.constant 0 : i32
    %c0_i32_0 = arith.constant 0 : i32
    %c0_i32_1 = arith.constant 0 : i32
    return %c0_i32, %c0_i32_0 : i32, i32
  }
  func.func @transform_5(%arg0: i32) -> (i32, i32) {
    %c0_i32 = arith.constant 0 : i32
    %c0_i32_0 = arith.constant 0 : i32
    %c0_i32_1 = arith.constant 0 : i32
    return %c0_i32, %c0_i32_0 : i32, i32
  }
  func.func @transform_6(%arg0: i32) -> (i32, i32) {
    %c0_i32 = arith.constant 0 : i32
    %c0_i32_0 = arith.constant 0 : i32
    %c0_i32_1 = arith.constant 0 : i32
    return %c0_i32, %c0_i32_0 : i32, i32
  }
  func.func @transform_7(%arg0: i32) -> (i32, i32, i32) {
    %c0_i32 = arith.constant 0 : i32
    %c0_i32_0 = arith.constant 0 : i32
    %c0_i32_1 = arith.constant 0 : i32
    return %arg0, %c0_i32, %c0_i32_0 : i32, i32, i32
  }
}

</mosaic_0001>

<bundles_post_ra>
// kernel: tpu_custom_call.1
= control target key start
LH: loop header
LB: loop body
LE: loop exit
PB: predicated region body
PF: predicated region fallthrough
CT: control target
= control target key end

     0   :  { %s16378_s0 = inlined_call_operand.hbm [shape: f32[2,8,768], index: 0, kind: input, shape index: {}]   ;;  %s16379_s1 = inlined_call_operand.hbm [shape: bf16[768,3072], index: 1, kind: input, shape index: {}]   ;;  %s16380_s2 = inlined_call_operand.hbm [shape: f32[1,3072], index: 2, kind: input, shape index: {}]   ;;  %s16381_s3 = inlined_call_operand.hbm [shape: bf16[1024,768], index: 3, kind: input, shape index: {}]   ;;  %s16382_s4 = inlined_call_operand.hbm [shape: f32[1,768], index: 4, kind: input, shape index: {}]   ;;  %s16383_s5 = inlined_call_operand.hbm [shape: f32[1,768], index: 5, kind: input, shape index: {}]   ;;  %s16384_s6 = inlined_call_operand.hbm [shape: f32[1,768], index: 6, kind: input, shape index: {}]   ;;  %s16385_s7 = inlined_call_operand.hbm [shape: f32[2,8,768], index: 7, kind: output, shape index: {}]  }
   0x1   :  { %16390 = sst [smem:[#allocation21_spill]] %s16379_s1 }
   0x2   :  { %16391 = sst [smem:[#allocation22_spill]] %s16380_s2 }
   0x3   :  { %12 = vsyncpa [#allocation4], 0 }
   0x4   :  { %14 = vsyncpa [#allocation4 + $0x1], 0 }
   0x5   :  { %15 = vsyncpa [#allocation7], 0 }
   0x6   :  { %16 = vsyncpa [#allocation10], 0 }
   0x7   :  { %17 = vsyncpa [#allocation13], 0 }
   0x8   :  { %18 = vsyncpa [#allocation5], 0 }
   0x9   :  { %20 = vsyncpa [#allocation5 + $0x1], 0  ;;  %s15622_s24 = smov 0   ;;  %s15624_s25 = smov 0  }
   0xa   :  { %s15626_s26 = smov 0   ;;  %s15628_s27 = smov 0  }
   0xb LB: > { %s15568_s28 = smov [#allocation6]   ;;  %s15643_s30 = sadd.s32 4294967295, %s15566_s27   ;;  %s15566_s27 = sphi %s15628_s27, %s16416_s27   ;;  %s15562_s26 = sphi %s15626_s26, %s16415_s26   ;;  %s15558_s25 = sphi %s15624_s25, %s16414_s25   ;;  %s15554_s24 = sphi %s15622_s24, %s16413_s24  }
   0xc   : > { %s221_s29 = sshll.u32 %s15568_s28, 4  ;;  %p12863_p0 = scmp.ge.s32.totalorder %s15566_s27, 1  ;;  %s222_s29 = int_to_ptr.vmem [resolvable:$true] %s221_s29 }
   0xd   : > { %p16386_p1 = scmp.eq.s32.totalorder %s15643_s30, 0  ;;  %p209_p2 = scmp.lt.s32.totalorder %s15566_s27, 3 }
   0xe   : > { %s15569_s9 = smov [#allocation9]   ;;  %s15570_s12 = smov [#allocation12]  }
   0xf   : > { %p15648_p3 = pnand %p12863_p0, %p209_p2  ;;  %s245_s10 = sshll.u32 %s15569_s9, 4  ;;  %s15661_s10 = int_to_ptr.vmem [resolvable:$true] %s245_s10 }
  0x10   : > { %s15663_s13 = sshll.u32 %s15570_s12, 4  ;;  %s15317_s15 = scalar_lea.vmem %s222_s29, 147456  ;;  %s271_s13 = int_to_ptr.vmem [resolvable:$true] %s15663_s13 }
  0x11   : > { %s16392_s8 = scalar_select %p15648_p3, 1, 0 }
  0x12   : > { %p14594_p5 = pneg %p15648_p3  ;;  %p15318_p8 = scmp.ne.s32.totalorder %s222_s29, %s15317_s15 }
  0x13   : > { %p15325_p11 = scmp.lt.s32.totalorder %s222_s29, %s222_s29  ;;  %p15326_p12 = scmp.lt.s32.totalorder %s15317_s15, %s15317_s15 }
  0x14   : > { %p15657_p6 = pnand %p14594_p5, %p16386_p1 }
  0x15   : > { %p15327_p13 = por %p15326_p12, %p15325_p11 }
  0x16   : > { %p15667_p7 = pneg %p15657_p6 }
  0x18   : > { %p15320_p9 = pnand %p15318_p8, %p15667_p7 }
  0x1a   : > { %p15321_p10 = pneg %p15320_p9 }
  0x1c   : > { %p15328_p0 = pnand %p15327_p13, %p15321_p10 }
  0x1e   : > { %15331 = shalt.err (!%p15328_p0)
}
  0x1f   : > { %s15571_s16 = smov 1536   ;;  %s15572_s17 = smov 96  }
  0x20   : > { %s16395_s1 = sld [smem:[#allocation21_spill]]  ;;  %s15343_s20 = scalar_lea.vmem %s15661_s10, 49152 }
  0x21   : > { %p15344_p2 = scmp.ne.s32.totalorder %s15661_s10, %s15343_s20  ;;  %p15351_p9 = scmp.lt.s32.totalorder %s15661_s10, %s15661_s10 }
  0x22   : > { %p15352_p10 = scmp.lt.s32.totalorder %s15343_s20, %s15343_s20 }
  0x23   : > { %p15346_p5 = pnand %p15344_p2, %p15667_p7 }
  0x24   : > { %p15353_p11 = por %p15352_p10, %p15351_p9 }
  0x25   : > { %p15347_p8 = pneg %p15346_p5 }
  0x26   : > { %14597 = dma.hbm_to_vmem [thread:$0]  (!%p15657_p6), %s16395_s1, 147456, %s222_s29, [#allocation7], %s15571_s16, %s15571_s16, %s15572_s17  }
  0x27   : > { %p15354_p12 = pnand %p15353_p11, %p15347_p8 }
  0x29   : > { %15357 = shalt.err (!%p15354_p12)
}
  0x2a   : > { %s15573_s21 = smov 384   ;;  %s15574_s22 = smov 24  }
  0x2b   : > { %14603 = dma.hbm_to_vmem [thread:$0]  (!%p15657_p6), %s16381_s3, 49152, %s15661_s10, [#allocation10], %s15573_s21, %s15573_s21, %s15574_s22  }
  0x2c   : > { %s15369_s29 = scalar_lea.vmem %s271_s13, 96  ;;  %p15377_p5 = scmp.lt.s32.totalorder %s271_s13, %s271_s13 }
  0x2d   : > { %p15370_p13 = scmp.ne.s32.totalorder %s271_s13, %s15369_s29  ;;  %p15378_p8 = scmp.lt.s32.totalorder %s15369_s29, %s15369_s29 }
  0x2f   : > { %p15372_p0 = pnand %p15370_p13, %p15667_p7  ;;  %p15379_p9 = por %p15378_p8, %p15377_p5 }
  0x31   : > { %p15373_p2 = pneg %p15372_p0 }
  0x33   : > { %p15380_p10 = pnand %p15379_p9, %p15373_p2 }
  0x35   : > { %15383 = shalt.err (!%p15380_p10)
}
  0x36   : > { %14609 = dma.hbm_to_vmem [thread:$0]  (!%p15657_p6), %s16383_s5, 96, %s271_s13, [#allocation13]  }
  0x37   : > { %s15575_s15 = smov [#allocation8]   ;;  %s15576_s16 = smov [#allocation11]  }
  0x38   : > { %s235_s10 = sshll.u32 %s15575_s15, 4  ;;  %s259_s17 = sshll.u32 %s15576_s16, 4  ;;  %s236_s10 = int_to_ptr.vmem [resolvable:$true] %s235_s10  ;;  %s260_s17 = int_to_ptr.vmem [resolvable:$true] %s259_s17 }
  0x39   : > { %s15395_s18 = scalar_lea.vmem %s236_s10, 384  ;;  %p15403_p0 = scmp.lt.s32.totalorder %s236_s10, %s236_s10 }
  0x3a   : > { %p15396_p11 = scmp.ne.s32.totalorder %s236_s10, %s15395_s18  ;;  %p15404_p2 = scmp.lt.s32.totalorder %s15395_s18, %s15395_s18 }
  0x3c   : > { %p15398_p12 = pnand %p15396_p11, %p15667_p7  ;;  %p15405_p5 = por %p15404_p2, %p15403_p0 }
  0x3e   : > { %p15399_p13 = pneg %p15398_p12 }
  0x40   : > { %p15406_p8 = pnand %p15405_p5, %p15399_p13 }
  0x42   : > { %15409 = shalt.err (!%p15406_p8)
}
  0x43   : > { %s16396_s2 = sld [smem:[#allocation22_spill]]  ;;  %s15421_s13 = scalar_lea.vmem %s260_s17, 96 }
  0x44   : > { %p15422_p9 = scmp.ne.s32.totalorder %s260_s17, %s15421_s13  ;;  %p15429_p11 = scmp.lt.s32.totalorder %s260_s17, %s260_s17 }
  0x45   : > { %p15430_p12 = scmp.lt.s32.totalorder %s15421_s13, %s15421_s13 }
  0x46   : > { %p15424_p10 = pnand %p15422_p9, %p15667_p7 }
  0x47   : > { %p15431_p1 = por %p15430_p12, %p15429_p11 }
  0x48   : > { %p15425_p4 = pneg %p15424_p10 }
  0x49   : > { %14600 = dma.hbm_to_vmem [thread:$0]  (!%p15657_p6), %s16396_s2, 384, %s236_s10, [#allocation7]  }
  0x4a   : > { %p15432_p3 = pnand %p15431_p1, %p15425_p4 }
  0x4c   : > { %15435 = shalt.err (!%p15432_p3)
}
  0x4d   : > { %14606 = dma.hbm_to_vmem [thread:$0]  (!%p15657_p6), %s16382_s4, 96, %s260_s17, [#allocation10]  }
  0x4e   : > { %s15577_s23 = smov [#allocation14]  }
  0x4f   : > { %s281_s28 = sshll.u32 %s15577_s23, 4  ;;  %s282_s28 = int_to_ptr.vmem [resolvable:$true] %s281_s28 }
  0x50   : > { %s15447_s29 = scalar_lea.vmem %s282_s28, 96  ;;  %p15455_p5 = scmp.lt.s32.totalorder %s282_s28, %s282_s28 }
  0x51   : > { %p15448_p13 = scmp.ne.s32.totalorder %s282_s28, %s15447_s29  ;;  %p15456_p8 = scmp.lt.s32.totalorder %s15447_s29, %s15447_s29 }
  0x53   : > { %p15450_p0 = pnand %p15448_p13, %p15667_p7  ;;  %p15457_p9 = por %p15456_p8, %p15455_p5 }
  0x55   : > { %p15451_p2 = pneg %p15450_p0 }
  0x57   : > { %p15458_p1 = pnand %p15457_p9, %p15451_p2 }
  0x59   : > { %15461 = shalt.err (!%p15458_p1)
}
  0x5a   : > { %14612 = dma.hbm_to_vmem [thread:$0]  (!%p15657_p6), %s16384_s6, 96, %s282_s28, [#allocation13]  }
  0x5b   : > { %s12862_s14 = sadd.s32 4294967294, %s15566_s27   ;;  %s15721_s11 = sadd.s32 1, %s15566_s27  }
  0x5c   : > { %s30_s15 = ssub.s32 %s15566_s27, %s15721_s11  ;;  %s33_s10 = sadd.s32 1, %s15562_s26 }
  0x5d   : > { %p31_p3 = scmp.eq.s32.totalorder %s30_s15, 0  ;;  %p40_p4 = scmp.ne.s32.totalorder %s15562_s26, %s15558_s25 }
  0x5e   : > { %p41_p7 = scmp.eq.s32.totalorder %s15566_s27, 0  ;;  %p46_p10 = scmp.ne.s32.totalorder %s15558_s25, %s15554_s24 }
  0x5f   : > { %s15732_s16 = scalar_select %p31_p3, %s15562_s26, %s33_s10  }
  0x60   : > { %p42_p11 = por %p41_p7, %p40_p4  ;;  %p16397_p12 = scmp.eq.s32.totalorder %s15643_s30, 0 }
  0x61   : > { %p196_p6 = scmp.eq.s32.totalorder %s15643_s30, 1  ;;  %p202_p0 = scmp.eq.s32.totalorder %s12862_s14, 1 }
  0x62   : > { %p15736_p13 = por %p16397_p12, %p46_p10  ;;  %p14627_p2 = scmp.lt.s32.totalorder %s15566_s27, 2 }
  0x63   : > { %s292_s18 = sand.u32 1, %s15562_s26   ;;  %p15743_p5 = por %p196_p6, %p40_p4 }
  0x64   : > { %s16398_s17 = scalar_select %p15736_p13, 1, 0 }
  0x65   : > { %s16399_s19 = scalar_select %p15743_p5, 1, 0 }
  0x66   : > { %p15747_p8 = por %p202_p0, %p46_p10  ;;  %s14562_s13 = smul.u32 48, %s292_s18 }
  0x67   : > { %s14563_s21 = smul.u32 768, %s15566_s27  ;;  %p15752_p9 = pnand %p14627_p2, %p42_p11 }
  0x68   : > { %s16400_s20 = scalar_select %p15747_p8, 1, 0 }
  0x69   : > { %s15759_s29 = scalar_lea.hbm %s16378_s0, %s14563_s21  ;;  %s296_s9 = scalar_lea.vmem [#allocation3], %s14562_s13 }
  0x6a   : > { %s304_s12 = sshll.u32 %s296_s9, 4  ;;  %s293_s14 = scalar_lea.sflag [#allocation4], %s292_s18  ;;  %s305_s12 = int_to_ptr.vmem [resolvable:$true] %s304_s12 }
  0x6b   : > { %s15462_s15 = scalar_lea.hbm %s15759_s29, 768  ;;  %p15464_p3 = pneg %p15752_p9 }
  0x6c   : > { %p15463_p1 = scmp.ne.s32.totalorder %s15759_s29, %s15462_s15  ;;  %s15467_s23 = scalar_lea.hbm %s16378_s0, 1536 }
  0x6d   : > { %p15468_p10 = scmp.lt.s32.totalorder %s15759_s29, %s16378_s0  ;;  %p15469_p11 = scmp.lt.s32.totalorder %s15467_s23, %s15462_s15 }
  0x6e   : > { %p15465_p4 = pnand %p15464_p3, %p15463_p1 }
  0x6f   : > { %p15470_p12 = por %p15469_p11, %p15468_p10 }
  0x70   : > { %p15466_p7 = pneg %p15465_p4 }
  0x72   : > { %p15471_p6 = pnand %p15470_p12, %p15466_p7 }
  0x74   : > { %15474 = shalt.err (!%p15471_p6)
}
  0x75   : > { %s15475_s13 = scalar_lea.vmem %s305_s12, 768  ;;  %s15578_s18 = smov [#allocation3]  }
  0x76   : > { %p15476_p0 = scmp.ne.s32.totalorder %s305_s12, %s15475_s13  ;;  %s15480_s9 = sshll.u32 %s15578_s18, 4  ;;  %s15481_s9 = int_to_ptr.vmem [resolvable:$false] %s15480_s9 }
  0x77   : > { %s15482_s2 = scalar_lea.vmem %s15481_s9, 1536  ;;  %p15483_p1 = scmp.lt.s32.totalorder %s305_s12, %s15481_s9 }
  0x78   : > { %p15478_p2 = pnand %p15476_p0, %p15464_p3  ;;  %p15484_p4 = scmp.lt.s32.totalorder %s15482_s2, %s15475_s13 }
  0x7a   : > { %p15479_p8 = pneg %p15478_p2  ;;  %p15485_p5 = por %p15484_p4, %p15483_p1 }
  0x7c   : > { %p15486_p13 = pnand %p15485_p5, %p15479_p8 }
  0x7e   : > { %15489 = shalt.err (!%p15486_p13)
}
  0x7f   : > { %14616 = dma.hbm_to_vmem [thread:$0]  (!%p15752_p9), %s15759_s29, 768, %s305_s12, %s293_s14  }
  0x80   : > { %p16402_p7 = scmp.ne.s32.totalorder %s16392_s8, 0 }
  0x81   : > { %s15778_s1 = sand.u32 (!%p16402_p7), 1, %s15558_s25   ;;  %p16403_p13 = scmp.ne.s32.totalorder (!%p16402_p7), %s16398_s17, 0 }
  0x82   : > { %313 = sbr.rel (%p16402_p7) target bundleno = 2900 (0xb54), region = 48  ;;  %s316_s10 = scalar_lea.sflag (!%p16402_p7), [#allocation4], %s15778_s1 }
  0x83   : > { %s14564_s15 = smul.u32 (!%p16402_p7), 48, %s15778_s1 }
  0x85   : > { %s15784_s2 = scalar_lea.vmem (!%p16402_p7), [#allocation3], %s14564_s15 }
  0x87   : > { %15533 = dma.done.wait (%p16403_p13), %s316_s10, 768  }
  0x88   : > { %15535 = vsyncadd (%p16403_p13), %s316_s10, 4294966528  ;;  %p16404_p5 = scmp.eq.s32.totalorder %s15643_s30, 0 }
  0x8a   : > { %15537 = dma.done.wait (%p16404_p5), [#allocation7], 147840   ;;  %p16405_p8 = pmov %p16404_p5 }
  0x8b   : > { %p16406_p9 = pmov %p16404_p5 }
  0x8c   : > { %15539 = vsyncadd (%p16405_p8), [#allocation7], 4294819456 }
  0x8d   : > { %15541 = dma.done.wait (%p16406_p9), [#allocation10], 49248   ;;  %p16407_p3 = pmov %p16404_p5 }
  0x8f   : > { %15543 = vsyncadd (%p16407_p3), [#allocation10], 4294918048  ;;  %p16408_p10 = pmov %p16407_p3 }
  0x90   : > { %p16409_p11 = pmov %p16407_p3 }
  0x91   : > { %15545 = dma.done.wait (%p16408_p10), [#allocation13], 192  }
  0x92   : > { %15547 = vsyncadd (%p16409_p11), [#allocation13], 4294967104  ;;  %v555_v0 = vld [vmem:[#allocation6 + $0x540] sm:$0xff]  ;;  %v376_v53 = vld [vmem:[%s15784_s2 + $0x8] sm:$0xff]  ;;  %vm8961_vm0 = vcmask 1043456   ;;  %vm15580_vm1 = vmmov 0  }
  0x93   : > { %v567_v1 = vld [vmem:[#allocation6 + $0x5a0] sm:$0xff]  ;;  %v15803_v57 = vpack.c.bf16 %v376_v53, %v376_v53  ;;  %v378_v58 = vld [vmem:[%s15784_s2 + $0x18] sm:$0xff]  ;;  %vm8944_vm2 = vcmask 64512   ;;  %s14565_s8 = smul.u32 768, %s15643_s30  ;;  %s373_s17 = scalar_lea.vmem [#allocation15], %s14564_s15 }
  0x94   : > { %v939_v2 = vld [vmem:[#allocation6 + $0x1140] sm:$0xff]  ;;  %v13048_v3 = vcombine.high %v555_v0, %v567_v1  ;;  %v13047_v5 = vcombine.low %v555_v0, %v567_v1  ;;  %v15806_v61 = vpack.c.bf16 %v378_v58, %v378_v58  ;;  %s12735_s22 = sshll.u32 %s373_s17, 4  ;;  %s12721_s14 = scalar_lea.sflag [#allocation5], %s15778_s1  ;;  %s16337_s22 = int_to_ptr.vmem [resolvable:$true] %s12735_s22 }
  0x95   : > { %v951_v4 = vld [vmem:[#allocation6 + $0x11a0] sm:$0xff]  ;;  %7457 = vmatprep.mubr.bf16.mxu0 %v15803_v57  ;;  %s16335_s30 = scalar_lea.hbm %s16385_s7, %s14565_s8  ;;  %s15490_s23 = scalar_lea.vmem %s16337_s22, 768 }
  0x96   : > { %v531_v6 = vld [vmem:[#allocation6 + $0x480] sm:$0xff]  ;;  %v13432_v8 = vcombine.high %v939_v2, %v951_v4  ;;  %v13431_v9 = vcombine.low %v939_v2, %v951_v4  ;;  %7425 = vmatprep.subr.bf16.mxu0 %v13048_v3  ;;  %7498 = vmatprep.mubr.bf16.mxu1 %v15806_v61  ;;  %p15491_p12 = scmp.ne.s32.totalorder %s16337_s22, %s15490_s23  ;;  %p16410_p6 = scmp.ne.s32.totalorder %s16399_s19, 0 }
  0x97   : > { %v543_v7 = vld [vmem:[#allocation6 + $0x4e0] sm:$0xff]  ;;  %7426 = vmatpush1.bf16.msra.mxu0 %v13047_v5  ;;  %s15581_s28 = smov [#allocation15]  }
  0x98   : > { %v13024_v10 = vcombine.high %v531_v6, %v543_v7  ;;  %v915_v11 = vld [vmem:[#allocation6 + $0x1080] sm:$0xff]  ;;  %7466 = vmatprep.subr.bf16.mxu1 %v13432_v8  ;;  %v13023_v18 = vcombine.low %v531_v6, %v543_v7  ;;  %p15492_p0 = pnand %p15491_p12, %p16410_p6  ;;  %s15494_s21 = sshll.u32 %s15581_s28, 4  ;;  %s15495_s21 = int_to_ptr.vmem [resolvable:$false] %s15494_s21 }
  0x99   : > { %v927_v12 = vld [vmem:[#allocation6 + $0x10e0] sm:$0xff]  ;;  %7467 = vmatpush1.bf16.msra.mxu1 %v13431_v9  ;;  %s15496_s13 = scalar_lea.vmem %s15495_s21, 1536  ;;  %p15497_p1 = scmp.lt.s32.totalorder %s16337_s22, %s15495_s21 }
  0x9a   : > { %v507_v13 = vld [vmem:[#allocation6 + $0x3c0] sm:$0xff]  ;;  %v13408_v14 = vcombine.high %v915_v11, %v927_v12  ;;  %7427 = vmatprep.subr.bf16.mxu0 %v13024_v10  ;;  %v13407_v19 = vcombine.low %v915_v11, %v927_v12  ;;  %p15493_p2 = pneg %p15492_p0  ;;  %p15498_p4 = scmp.lt.s32.totalorder %s15496_s13, %s15490_s23 }
  0x9b   : > { %v519_v15 = vld [vmem:[#allocation6 + $0x420] sm:$0xff]  ;;  %7428 = vmatpush1.bf16.msra.mxu0 %v13023_v18 }
  0x9c   : > { %v891_v16 = vld [vmem:[#allocation6 + $0xfc0] sm:$0xff]  ;;  %v13000_v20 = vcombine.high %v507_v13, %v519_v15  ;;  %7468 = vmatprep.subr.bf16.mxu1 %v13408_v14  ;;  %v12999_v26 = vcombine.low %v507_v13, %v519_v15  ;;  %p15499_p7 = por %p15498_p4, %p15497_p1 }
  0x9d   : > { %v903_v17 = vld [vmem:[#allocation6 + $0x1020] sm:$0xff]  ;;  %7469 = vmatpush1.bf16.msra.mxu1 %v13407_v19 }
  0x9e   : > { %v13384_v21 = vcombine.high %v891_v16, %v903_v17  ;;  %v483_v22 = vld [vmem:[#allocation6 + $0x300] sm:$0xff]  ;;  %7429 = vmatprep.subr.bf16.mxu0 %v13000_v20  ;;  %v13383_v27 = vcombine.low %v891_v16, %v903_v17  ;;  %p15500_p13 = pnand %p15499_p7, %p15493_p2 }
  0x9f   : > { %v495_v23 = vld [vmem:[#allocation6 + $0x360] sm:$0xff]  ;;  %7430 = vmatpush1.bf16.msra.mxu0 %v12999_v26 }
  0xa0   : > { %v867_v24 = vld [vmem:[#allocation6 + $0xf00] sm:$0xff]  ;;  %v12976_v28 = vcombine.high %v483_v22, %v495_v23  ;;  %7470 = vmatprep.subr.bf16.mxu1 %v13384_v21  ;;  %v12975_v34 = vcombine.low %v483_v22, %v495_v23 }
  0xa1   : > { %v879_v25 = vld [vmem:[#allocation6 + $0xf60] sm:$0xff]  ;;  %7471 = vmatpush1.bf16.msra.mxu1 %v13383_v27 }
  0xa2   : > { %v13360_v29 = vcombine.high %v867_v24, %v879_v25  ;;  %v459_v30 = vld [vmem:[#allocation6 + $0x240] sm:$0xff]  ;;  %7431 = vmatprep.subr.bf16.mxu0 %v12976_v28  ;;  %v13359_v35 = vcombine.low %v867_v24, %v879_v25 }
  0xa3   : > { %v471_v31 = vld [vmem:[#allocation6 + $0x2a0] sm:$0xff]  ;;  %7432 = vmatpush1.bf16.msra.mxu0 %v12975_v34 }
  0xa4   : > { %v843_v32 = vld [vmem:[#allocation6 + $0xe40] sm:$0xff]  ;;  %v12952_v36 = vcombine.high %v459_v30, %v471_v31  ;;  %7472 = vmatprep.subr.bf16.mxu1 %v13360_v29  ;;  %v12951_v42 = vcombine.low %v459_v30, %v471_v31 }
  0xa5   : > { %v855_v33 = vld [vmem:[#allocation6 + $0xea0] sm:$0xff]  ;;  %7473 = vmatpush1.bf16.msra.mxu1 %v13359_v35 }
  0xa6   : > { %v13336_v37 = vcombine.high %v843_v32, %v855_v33  ;;  %v435_v38 = vld [vmem:[#allocation6 + $0x180] sm:$0xff]  ;;  %7433 = vmatprep.subr.bf16.mxu0 %v12952_v36  ;;  %v13335_v43 = vcombine.low %v843_v32, %v855_v33 }
  0xa7   : > { %v447_v39 = vld [vmem:[#allocation6 + $0x1e0] sm:$0xff]  ;;  %7434 = vmatpush1.bf16.msra.mxu0 %v12951_v42 }
  0xa8   : > { %v819_v40 = vld [vmem:[#allocation6 + $0xd80] sm:$0xff]  ;;  %v12928_v44 = vcombine.high %v435_v38, %v447_v39  ;;  %7474 = vmatprep.subr.bf16.mxu1 %v13336_v37  ;;  %v12927_v50 = vcombine.low %v435_v38, %v447_v39 }
  0xa9   : > { %v831_v41 = vld [vmem:[#allocation6 + $0xde0] sm:$0xff]  ;;  %7475 = vmatpush1.bf16.msra.mxu1 %v13335_v43 }
  0xaa   : > { %v13312_v45 = vcombine.high %v819_v40, %v831_v41  ;;  %v411_v46 = vld [vmem:[#allocation6 + $0xc0] sm:$0xff]  ;;  %7435 = vmatprep.subr.bf16.mxu0 %v12928_v44  ;;  %v13311_v51 = vcombine.low %v819_v40, %v831_v41 }
  0xab   : > { %v423_v47 = vld [vmem:[#allocation6 + $0x120] sm:$0xff]  ;;  %7436 = vmatpush1.bf16.msra.mxu0 %v12927_v50 }
  0xac   : > { %v795_v48 = vld [vmem:[#allocation6 + $0xcc0] sm:$0xff]  ;;  %v12904_v52 = vcombine.high %v411_v46, %v423_v47  ;;  %7476 = vmatprep.subr.bf16.mxu1 %v13312_v45  ;;  %v12903_v62 = vcombine.low %v411_v46, %v423_v47 }
  0xad   : > { %v807_v49 = vld [vmem:[#allocation6 + $0xd20] sm:$0xff]  ;;  %7477 = vmatpush1.bf16.msra.mxu1 %v13311_v51 }
  0xae   : > { %v13288_v54 = vcombine.high %v795_v48, %v807_v49  ;;  %v387_v55 = vld [vmem:[#allocation6] sm:$0xff]  ;;  %7437 = vmatprep.subr.bf16.mxu0 %v12904_v52  ;;  %v13287_v63 = vcombine.low %v795_v48, %v807_v49 }
  0xaf   : > { %v399_v56 = vld [vmem:[#allocation6 + $0x60] sm:$0xff]  ;;  %7438 = vmatpush1.bf16.msra.mxu0 %v12903_v62 }
  0xb0   : > { %v771_v59 = vld [vmem:[#allocation6 + $0xc00] sm:$0xff]  ;;  %v12880_v0 = vcombine.high %v387_v55, %v399_v56  ;;  %7478 = vmatprep.subr.bf16.mxu1 %v13288_v54  ;;  %v12879_v6 = vcombine.low %v387_v55, %v399_v56 }
  0xb1   : > { %v783_v60 = vld [vmem:[#allocation6 + $0xc60] sm:$0xff]  ;;  %7479 = vmatpush1.bf16.msra.mxu1 %v13287_v63 }
  0xb2   : > { %v13264_v1 = vcombine.high %v771_v59, %v783_v60  ;;  %v747_v2 = vld [vmem:[#allocation6 + $0xb40] sm:$0xff]  ;;  %7439 = vmatprep.subr.bf16.mxu0 %v12880_v0  ;;  %v13263_v7 = vcombine.low %v771_v59, %v783_v60 }
  0xb3   : > { %v759_v3 = vld [vmem:[#allocation6 + $0xba0] sm:$0xff]  ;;  %7440 = vmatpush1.bf16.msra.mxu0 %v12879_v6  ;;  %v556_v6 = vld [vmem:[#allocation6 + $0x548] sm:$0xff] }
  0xb4   : > { %v1131_v4 = vld [vmem:[#allocation6 + $0x1740] sm:$0xff]  ;;  %v13240_v8 = vcombine.high %v747_v2, %v759_v3  ;;  %7480 = vmatprep.subr.bf16.mxu1 %v13264_v1  ;;  %v13239_v14 = vcombine.low %v747_v2, %v759_v3 }
  0xb5   : > { %v1143_v5 = vld [vmem:[#allocation6 + $0x17a0] sm:$0xff]  ;;  %7481 = vmatpush1.bf16.msra.mxu1 %v13263_v7  ;;  %v568_v7 = vld [vmem:[#allocation6 + $0x5a8] sm:$0xff] }
  0xb6   : > { %v13624_v9 = vcombine.high %v1131_v4, %v1143_v5  ;;  %v723_v10 = vld [vmem:[#allocation6 + $0xa80] sm:$0xff]  ;;  %7441 = vmatprep.subr.bf16.mxu0 %v13240_v8  ;;  %v13623_v15 = vcombine.low %v1131_v4, %v1143_v5 }
  0xb7   : > { %v735_v11 = vld [vmem:[#allocation6 + $0xae0] sm:$0xff]  ;;  %7442 = vmatpush2.bf16.msra.mxu0 %v13239_v14 }
  0xb8   : > { %v1107_v12 = vld [vmem:[#allocation6 + $0x1680] sm:$0xff]  ;;  %v13216_v16 = vcombine.high %v723_v10, %v735_v11  ;;  %7482 = vmatprep.subr.bf16.mxu1 %v13624_v9  ;;  %v13215_v22 = vcombine.low %v723_v10, %v735_v11 }
  0xb9   : > { %v1119_v13 = vld [vmem:[#allocation6 + $0x16e0] sm:$0xff]  ;;  %7483 = vmatpush2.bf16.msra.mxu1 %v13623_v15 }
  0xba   : > { %v13600_v17 = vcombine.high %v1107_v12, %v1119_v13  ;;  %v699_v18 = vld [vmem:[#allocation6 + $0x9c0] sm:$0xff]  ;;  %7443 = vmatprep.subr.bf16.mxu0 %v13216_v16  ;;  %v13599_v23 = vcombine.low %v1107_v12, %v1119_v13  ;;  %v13050_v13 = vcombine.high %v556_v6, %v568_v7 }
  0xbb   : > { %v711_v19 = vld [vmem:[#allocation6 + $0xa20] sm:$0xff]  ;;  %7444 = vmatpush2.bf16.msra.mxu0 %v13215_v22  ;;  %v13049_v22 = vcombine.low %v556_v6, %v568_v7  ;;  %v400_v7 = vld [vmem:[#allocation6 + $0x68] sm:$0xff] }
  0xbc   : > { %v1083_v20 = vld [vmem:[#allocation6 + $0x15c0] sm:$0xff]  ;;  %v13192_v24 = vcombine.high %v699_v18, %v711_v19  ;;  %7484 = vmatprep.subr.bf16.mxu1 %v13600_v17  ;;  %v13191_v30 = vcombine.low %v699_v18, %v711_v19  ;;  %v532_v17 = vld [vmem:[#allocation6 + $0x488] sm:$0xff] }
  0xbd   : > { %v1095_v21 = vld [vmem:[#allocation6 + $0x1620] sm:$0xff]  ;;  %7485 = vmatpush2.bf16.msra.mxu1 %v13599_v23  ;;  %v544_v18 = vld [vmem:[#allocation6 + $0x4e8] sm:$0xff] }
  0xbe   : > { %v13576_v25 = vcombine.high %v1083_v20, %v1095_v21  ;;  %v675_v26 = vld [vmem:[#allocation6 + $0x900] sm:$0xff]  ;;  %7445 = vmatprep.subr.bf16.mxu0 %v13192_v24  ;;  %v13575_v31 = vcombine.low %v1083_v20, %v1095_v21  ;;  %v380_v19 = vld [vmem:[%s15784_s2 + $0x28] sm:$0xff]  ;;  %v13026_v24 = vcombine.high %v532_v17, %v544_v18 }
  0xbf   : > { %v687_v27 = vld [vmem:[#allocation6 + $0x960] sm:$0xff]  ;;  %7446 = vmatpush2.bf16.msra.mxu0 %v13191_v30 }
  0xc0   : > { %v1059_v28 = vld [vmem:[#allocation6 + $0x1500] sm:$0xff]  ;;  %v13168_v32 = vcombine.high %v675_v26, %v687_v27  ;;  %7486 = vmatprep.subr.bf16.mxu1 %v13576_v25  ;;  %v13167_v38 = vcombine.low %v675_v26, %v687_v27  ;;  %v508_v27 = vld [vmem:[#allocation6 + $0x3c8] sm:$0xff] }
  0xc1   : > { %v1071_v29 = vld [vmem:[#allocation6 + $0x1560] sm:$0xff]  ;;  %7487 = vmatpush2.bf16.msra.mxu1 %v13575_v31  ;;  %v13025_v31 = vcombine.low %v532_v17, %v544_v18 }
  0xc2   : > { %v13552_v33 = vcombine.high %v1059_v28, %v1071_v29  ;;  %v651_v34 = vld [vmem:[#allocation6 + $0x840] sm:$0xff]  ;;  %7447 = vmatprep.subr.bf16.mxu0 %v13168_v32  ;;  %v13551_v39 = vcombine.low %v1059_v28, %v1071_v29  ;;  %v15817_v28 = vpack.c.bf16 %v380_v19, %v380_v19  ;;  %v520_v29 = vld [vmem:[#allocation6 + $0x428] sm:$0xff] }
  0xc3   : > { %v663_v35 = vld [vmem:[#allocation6 + $0x8a0] sm:$0xff]  ;;  %7448 = vmatpush2.bf16.msra.mxu0 %v13167_v38 }
  0xc4   : > { %v1035_v36 = vld [vmem:[#allocation6 + $0x1440] sm:$0xff]  ;;  %v13144_v40 = vcombine.high %v651_v34, %v663_v35  ;;  %7488 = vmatprep.subr.bf16.mxu1 %v13552_v33  ;;  %v13143_v46 = vcombine.low %v651_v34, %v663_v35  ;;  %v484_v35 = vld [vmem:[#allocation6 + $0x308] sm:$0xff] }
  0xc5   : > { %v1047_v37 = vld [vmem:[#allocation6 + $0x14a0] sm:$0xff]  ;;  %7489 = vmatpush2.bf16.msra.mxu1 %v13551_v39  ;;  %v13001_v39 = vcombine.low %v508_v27, %v520_v29 }
  0xc6   : > { %v13528_v41 = vcombine.high %v1035_v36, %v1047_v37  ;;  %v627_v42 = vld [vmem:[#allocation6 + $0x780] sm:$0xff]  ;;  %7449 = vmatprep.subr.bf16.mxu0 %v13144_v40  ;;  %v13527_v47 = vcombine.low %v1035_v36, %v1047_v37  ;;  %v13002_v36 = vcombine.high %v508_v27, %v520_v29  ;;  %v496_v37 = vld [vmem:[#allocation6 + $0x368] sm:$0xff] }
  0xc7   : > { %v639_v43 = vld [vmem:[#allocation6 + $0x7e0] sm:$0xff]  ;;  %7450 = vmatpush2.bf16.msra.mxu0 %v13143_v46 }
  0xc8   : > { %v1011_v44 = vld [vmem:[#allocation6 + $0x1380] sm:$0xff]  ;;  %v13120_v48 = vcombine.high %v627_v42, %v639_v43  ;;  %7490 = vmatprep.subr.bf16.mxu1 %v13528_v41  ;;  %v13119_v54 = vcombine.low %v627_v42, %v639_v43  ;;  %v460_v43 = vld [vmem:[#allocation6 + $0x248] sm:$0xff] }
  0xc9   : > { %v1023_v45 = vld [vmem:[#allocation6 + $0x13e0] sm:$0xff]  ;;  %7491 = vmatpush2.bf16.msra.mxu1 %v13527_v47  ;;  %v12977_v47 = vcombine.low %v484_v35, %v496_v37 }
  0xca   : > { %v13504_v49 = vcombine.high %v1011_v44, %v1023_v45  ;;  %v603_v50 = vld [vmem:[#allocation6 + $0x6c0] sm:$0xff]  ;;  %7451 = vmatprep.subr.bf16.mxu0 %v13120_v48  ;;  %v13503_v55 = vcombine.low %v1011_v44, %v1023_v45  ;;  %v12978_v44 = vcombine.high %v484_v35, %v496_v37  ;;  %v472_v45 = vld [vmem:[#allocation6 + $0x2a8] sm:$0xff] }
  0xcb   : > { %v615_v51 = vld [vmem:[#allocation6 + $0x720] sm:$0xff]  ;;  %7452 = vmatpush2.bf16.msra.mxu0 %v13119_v54 }
  0xcc   : > { %v987_v52 = vld [vmem:[#allocation6 + $0x12c0] sm:$0xff]  ;;  %v13096_v56 = vcombine.high %v603_v50, %v615_v51  ;;  %7492 = vmatprep.subr.bf16.mxu1 %v13504_v49  ;;  %v13095_v0 = vcombine.low %v603_v50, %v615_v51  ;;  %v436_v51 = vld [vmem:[#allocation6 + $0x188] sm:$0xff] }
  0xcd   : > { %v999_v53 = vld [vmem:[#allocation6 + $0x1320] sm:$0xff]  ;;  %7493 = vmatpush2.bf16.msra.mxu1 %v13503_v55  ;;  %v12953_v55 = vcombine.low %v460_v43, %v472_v45 }
  0xce   : > { %v13480_v58 = vcombine.high %v987_v52, %v999_v53  ;;  %v579_v59 = vld [vmem:[#allocation6 + $0x600] sm:$0xff]  ;;  %7453 = vmatprep.subr.bf16.mxu0 %v13096_v56  ;;  %v13479_v1 = vcombine.low %v987_v52, %v999_v53  ;;  %v12954_v52 = vcombine.high %v460_v43, %v472_v45  ;;  %v448_v53 = vld [vmem:[#allocation6 + $0x1e8] sm:$0xff] }
  0xcf   : > { %v591_v60 = vld [vmem:[#allocation6 + $0x660] sm:$0xff]  ;;  %7454 = vmatpush2.bf16.msra.mxu0 %v13095_v0 }
  0xd0   : > { %v963_v62 = vld [vmem:[#allocation6 + $0x1200] sm:$0xff]  ;;  %v13072_v2 = vcombine.high %v579_v59, %v591_v60  ;;  %7494 = vmatprep.subr.bf16.mxu1 %v13480_v58  ;;  %v13071_v8 = vcombine.low %v579_v59, %v591_v60  ;;  %v412_v60 = vld [vmem:[#allocation6 + $0xc8] sm:$0xff] }
  0xd1   : > { %v975_v63 = vld [vmem:[#allocation6 + $0x1260] sm:$0xff]  ;;  %7495 = vmatpush2.bf16.msra.mxu1 %v13479_v1  ;;  %v12929_v1 = vcombine.low %v436_v51, %v448_v53 }
  0xd2   : > { %v13456_v3 = vcombine.high %v963_v62, %v975_v63  ;;  %v1323_v4 = vld [vmem:[#allocation6 + $0x1d40] sm:$0xff]  ;;  %7455 = vmatprep.subr.bf16.mxu0 %v13072_v2  ;;  %v13455_v10 = vcombine.low %v963_v62, %v975_v63  ;;  %v12930_v62 = vcombine.high %v436_v51, %v448_v53  ;;  %v424_v63 = vld [vmem:[#allocation6 + $0x128] sm:$0xff] }
  0xd3   : > { %v1335_v5 = vld [vmem:[#allocation6 + $0x1da0] sm:$0xff]  ;;  %7456 = vmatpush2.bf16.msra.mxu0 %v13071_v8  ;;  %v12906_v6 = vcombine.high %v412_v60, %v424_v63 }
  0xd4   : > { %v375_v9 = vld [vmem:[%s15784_s2] sm:$0xff]  ;;  %v13816_v11 = vcombine.high %v1323_v4, %v1335_v5  ;;  %v377_v12 = vld [vmem:[%s15784_s2 + $0x10] sm:$0xff]  ;;  %7496 = vmatprep.subr.bf16.mxu1 %v13456_v3  ;;  %v13815_v20 = vcombine.low %v1323_v4, %v1335_v5  ;;  %v388_v5 = vld [vmem:[#allocation6 + $0x8] sm:$0xff] }
  0xd5   : > { %v1299_v14 = vld [vmem:[#allocation6 + $0x1c80] sm:$0xff]  ;;  %v15812_v16 = vpack.c.bf16 %v375_v9, %v375_v9  ;;  %v15815_v21 = vpack.c.bf16 %v377_v12, %v377_v12  ;;  %7497 = vmatpush2.bf16.msra.mxu1 %v13455_v10  ;;  %v12905_v9 = vcombine.low %v412_v60, %v424_v63  ;;  %v12881_v18 = vcombine.low %v388_v5, %v400_v7 }
  0xd6   : > { %v1311_v15 = vld [vmem:[#allocation6 + $0x1ce0] sm:$0xff]  ;;  %7507 = vmatprep.subr.bf16.mxu0 %v13816_v11  ;;  %7548 = vmatprep.subr.bf16.mxu1 %v13050_v13  ;;  %v748_v13 = vld [vmem:[#allocation6 + $0xb48] sm:$0xff] }
  0xd7   : > { %v13792_v23 = vcombine.high %v1299_v14, %v1311_v15  ;;  %v1275_v25 = vld [vmem:[#allocation6 + $0x1bc0] sm:$0xff]  ;;  %7458 = vmatmul.mubr.bf16.vlgmr.msra.gmra.mxu0 %v15812_v16  ;;  %v13791_v30 = vcombine.low %v1299_v14, %v1311_v15  ;;  %v12882_v14 = vcombine.high %v388_v5, %v400_v7  ;;  %v760_v15 = vld [vmem:[#allocation6 + $0xba8] sm:$0xff] }
  0xd8   : > { %v1287_v26 = vld [vmem:[#allocation6 + $0x1c20] sm:$0xff]  ;;  %7499 = vmatmul.mubr.bf16.vlgmr.msra.gmra.mxu1 %v15815_v21  ;;  %7508 = vmatpush1.bf16.msra.mxu0 %v13815_v20  ;;  %v13241_v27 = vcombine.low %v748_v13, %v760_v15 }
  0xd9   : > { %7549 = vmatpush1.bf16.msra.mxu1 %v13049_v22  ;;  %7509 = vmatprep.subr.bf16.mxu0 %v13792_v23  ;;  %v13768_v32 = vcombine.high %v1275_v25, %v1287_v26  ;;  %v1251_v33 = vld [vmem:[#allocation6 + $0x1b00] sm:$0xff]  ;;  %v13767_v38 = vcombine.low %v1275_v25, %v1287_v26  ;;  %v724_v23 = vld [vmem:[#allocation6 + $0xa88] sm:$0xff] }
  0xda   : > { %v1263_v34 = vld [vmem:[#allocation6 + $0x1b60] sm:$0xff]  ;;  %7550 = vmatprep.subr.bf16.mxu1 %v13026_v24  ;;  %7539 = vmatprep.mubr.bf16.mxu0 %v15817_v28  ;;  %v13242_v24 = vcombine.high %v748_v13, %v760_v15  ;;  %v736_v25 = vld [vmem:[#allocation6 + $0xae8] sm:$0xff] }
  0xdb   : > { %7580 = vmatprep.mubr.bf16.mxu1 %v15803_v57  ;;  %v13744_v40 = vcombine.high %v1251_v33, %v1263_v34  ;;  %v1227_v41 = vld [vmem:[#allocation6 + $0x1a40] sm:$0xff]  ;;  %v13743_v46 = vcombine.low %v1251_v33, %v1263_v34  ;;  %v13218_v33 = vcombine.high %v724_v23, %v736_v25  ;;  %v712_v34 = vld [vmem:[#allocation6 + $0xa28] sm:$0xff] }
  0xdc   : > { %7510 = vmatpush1.bf16.msra.mxu0 %v13791_v30  ;;  %v1239_v42 = vld [vmem:[#allocation6 + $0x1aa0] sm:$0xff] }
  0xdd   : > { %7551 = vmatpush1.bf16.msra.mxu1 %v13025_v31  ;;  %7511 = vmatprep.subr.bf16.mxu0 %v13768_v32  ;;  %v13720_v48 = vcombine.high %v1227_v41, %v1239_v42  ;;  %v1203_v49 = vld [vmem:[#allocation6 + $0x1980] sm:$0xff]  ;;  %v13719_v54 = vcombine.low %v1227_v41, %v1239_v42  ;;  %v700_v32 = vld [vmem:[#allocation6 + $0x9c8] sm:$0xff] }
  0xde   : > { %7552 = vmatprep.subr.bf16.mxu1 %v13002_v36  ;;  %v1215_v50 = vld [vmem:[#allocation6 + $0x19e0] sm:$0xff]  ;;  %v13217_v36 = vcombine.low %v724_v23, %v736_v25  ;;  %v13194_v41 = vcombine.high %v700_v32, %v712_v34  ;;  %v688_v42 = vld [vmem:[#allocation6 + $0x968] sm:$0xff] }
  0xdf   : > { %v13696_v56 = vcombine.high %v1203_v49, %v1215_v50  ;;  %v1179_v58 = vld [vmem:[#allocation6 + $0x18c0] sm:$0xff]  ;;  %v13695_v0 = vcombine.low %v1203_v49, %v1215_v50  ;;  %v664_v50 = vld [vmem:[#allocation6 + $0x8a8] sm:$0xff] }
  0xe0   : > { %7512 = vmatpush1.bf16.msra.mxu0 %v13767_v38  ;;  %v1191_v59 = vld [vmem:[#allocation6 + $0x1920] sm:$0xff]  ;;  %v1336_v23 = vld [vmem:[#allocation6 + $0x1da8] sm:$0xff] }
  0xe1   : > { %7553 = vmatpush1.bf16.msra.mxu1 %v13001_v39  ;;  %7513 = vmatprep.subr.bf16.mxu0 %v13744_v40  ;;  %v13672_v2 = vcombine.high %v1179_v58, %v1191_v59  ;;  %v1155_v3 = vld [vmem:[#allocation6 + $0x1800] sm:$0xff]  ;;  %v13671_v8 = vcombine.low %v1179_v58, %v1191_v59  ;;  %v676_v40 = vld [vmem:[#allocation6 + $0x908] sm:$0xff] }
  0xe2   : > { %7554 = vmatprep.subr.bf16.mxu1 %v12978_v44  ;;  %v1167_v4 = vld [vmem:[#allocation6 + $0x1860] sm:$0xff]  ;;  %v13193_v44 = vcombine.low %v700_v32, %v712_v34  ;;  %v13170_v49 = vcombine.high %v676_v40, %v688_v42  ;;  %v640_v59 = vld [vmem:[#allocation6 + $0x7e8] sm:$0xff] }
  0xe3   : > { %v13648_v10 = vcombine.high %v1155_v3, %v1167_v4  ;;  %v1515_v11 = vld [vmem:[#allocation6 + $0x2340] sm:$0xff]  ;;  %v13647_v17 = vcombine.low %v1155_v3, %v1167_v4  ;;  %v616_v4 = vld [vmem:[#allocation6 + $0x728] sm:$0xff] }
  0xe4   : > { %7514 = vmatpush1.bf16.msra.mxu0 %v13743_v46  ;;  %v1527_v12 = vld [vmem:[#allocation6 + $0x23a0] sm:$0xff]  ;;  %v1312_v32 = vld [vmem:[#allocation6 + $0x1ce8] sm:$0xff] }
  0xe5   : > { %7555 = vmatpush1.bf16.msra.mxu1 %v12977_v47  ;;  %7515 = vmatprep.subr.bf16.mxu0 %v13720_v48  ;;  %v14008_v19 = vcombine.high %v1515_v11, %v1527_v12  ;;  %v1491_v20 = vld [vmem:[#allocation6 + $0x2280] sm:$0xff]  ;;  %v14007_v26 = vcombine.low %v1515_v11, %v1527_v12  ;;  %v652_v48 = vld [vmem:[#allocation6 + $0x848] sm:$0xff] }
  0xe6   : > { %7556 = vmatprep.subr.bf16.mxu1 %v12954_v52  ;;  %v1503_v22 = vld [vmem:[#allocation6 + $0x22e0] sm:$0xff]  ;;  %v13169_v52 = vcombine.low %v676_v40, %v688_v42  ;;  %v13146_v58 = vcombine.high %v652_v48, %v664_v50  ;;  %v592_v12 = vld [vmem:[#allocation6 + $0x668] sm:$0xff] }
  0xe7   : > { %v13984_v29 = vcombine.high %v1491_v20, %v1503_v22  ;;  %v1467_v30 = vld [vmem:[#allocation6 + $0x21c0] sm:$0xff]  ;;  %v13983_v35 = vcombine.low %v1491_v20, %v1503_v22  ;;  %v1276_v40 = vld [vmem:[#allocation6 + $0x1bc8] sm:$0xff] }
  0xe8   : > { %7516 = vmatpush1.bf16.msra.mxu0 %v13719_v54  ;;  %v1479_v31 = vld [vmem:[#allocation6 + $0x2220] sm:$0xff] }
  0xe9   : > { %7557 = vmatpush1.bf16.msra.mxu1 %v12953_v55  ;;  %7517 = vmatprep.subr.bf16.mxu0 %v13696_v56  ;;  %v13960_v37 = vcombine.high %v1467_v30, %v1479_v31  ;;  %v1443_v38 = vld [vmem:[#allocation6 + $0x2100] sm:$0xff]  ;;  %v13959_v43 = vcombine.low %v1467_v30, %v1479_v31  ;;  %v628_v56 = vld [vmem:[#allocation6 + $0x788] sm:$0xff] }
  0xea   : > { %7558 = vmatprep.subr.bf16.mxu1 %v12930_v62  ;;  %v1455_v39 = vld [vmem:[#allocation6 + $0x2160] sm:$0xff]  ;;  %v13145_v62 = vcombine.low %v652_v48, %v664_v50  ;;  %v13122_v3 = vcombine.high %v628_v56, %v640_v59  ;;  %v1300_v30 = vld [vmem:[#allocation6 + $0x1c88] sm:$0xff] }
  0xeb   : > { %v13936_v45 = vcombine.high %v1443_v38, %v1455_v39  ;;  %v1419_v46 = vld [vmem:[#allocation6 + $0x2040] sm:$0xff]  ;;  %v13935_v51 = vcombine.low %v1443_v38, %v1455_v39  ;;  %v904_v38 = vld [vmem:[#allocation6 + $0x1028] sm:$0xff]  ;;  %v13794_v39 = vcombine.high %v1300_v30, %v1312_v32 }
  0xec   : > { %7518 = vmatpush1.bf16.msra.mxu0 %v13695_v0  ;;  %v1431_v47 = vld [vmem:[#allocation6 + $0x20a0] sm:$0xff] }
  0xed   : > { %7559 = vmatpush1.bf16.msra.mxu1 %v12929_v1  ;;  %7519 = vmatprep.subr.bf16.mxu0 %v13672_v2  ;;  %v13912_v53 = vcombine.high %v1419_v46, %v1431_v47  ;;  %v1395_v54 = vld [vmem:[#allocation6 + $0x1f80] sm:$0xff]  ;;  %v13911_v60 = vcombine.low %v1419_v46, %v1431_v47  ;;  %v604_v2 = vld [vmem:[#allocation6 + $0x6c8] sm:$0xff] }
  0xee   : > { %7560 = vmatprep.subr.bf16.mxu1 %v12906_v6  ;;  %v1407_v55 = vld [vmem:[#allocation6 + $0x1fe0] sm:$0xff]  ;;  %v13121_v6 = vcombine.low %v628_v56, %v640_v59  ;;  %v13098_v11 = vcombine.high %v604_v2, %v616_v4  ;;  %v880_v46 = vld [vmem:[#allocation6 + $0xf68] sm:$0xff] }
  0xef   : > { %v13888_v63 = vcombine.high %v1395_v54, %v1407_v55  ;;  %v1371_v0 = vld [vmem:[#allocation6 + $0x1ec0] sm:$0xff]  ;;  %v13887_v5 = vcombine.low %v1395_v54, %v1407_v55  ;;  %v1252_v47 = vld [vmem:[#allocation6 + $0x1b08] sm:$0xff] }
  0xf0   : > { %7520 = vmatpush1.bf16.msra.mxu0 %v13671_v8  ;;  %v1383_v1 = vld [vmem:[#allocation6 + $0x1f20] sm:$0xff]  ;;  %v856_v54 = vld [vmem:[#allocation6 + $0xea8] sm:$0xff] }
  0xf1   : > { %7561 = vmatpush1.bf16.msra.mxu1 %v12905_v9  ;;  %7521 = vmatprep.subr.bf16.mxu0 %v13648_v10  ;;  %v13864_v7 = vcombine.high %v1371_v0, %v1383_v1  ;;  %v1347_v8 = vld [vmem:[#allocation6 + $0x1e00] sm:$0xff]  ;;  %v580_v10 = vld [vmem:[#allocation6 + $0x608] sm:$0xff]  ;;  %v13863_v13 = vcombine.low %v1371_v0, %v1383_v1 }
  0xf2   : > { %7562 = vmatprep.subr.bf16.mxu1 %v12882_v14  ;;  %v1359_v9 = vld [vmem:[#allocation6 + $0x1e60] sm:$0xff]  ;;  %v13097_v14 = vcombine.low %v604_v2, %v616_v4  ;;  %v13074_v20 = vcombine.high %v580_v10, %v592_v12  ;;  %v13073_v25 = vcombine.low %v580_v10, %v592_v12  ;;  %v1228_v55 = vld [vmem:[#allocation6 + $0x1a48] sm:$0xff] }
  0xf3   : > { %v13840_v15 = vcombine.high %v1347_v8, %v1359_v9  ;;  %v379_v22 = vld [vmem:[%s15784_s2 + $0x20] sm:$0xff]  ;;  %v832_v0 = vld [vmem:[#allocation6 + $0xde8] sm:$0xff] }
  0xf4   : > { %7522 = vmatpush1.bf16.msra.mxu0 %v13647_v17  ;;  %v940_v17 = vld [vmem:[#allocation6 + $0x1148] sm:$0xff] }
  0xf5   : > { %7563 = vmatpush1.bf16.msra.mxu1 %v12881_v18  ;;  %7523 = vmatprep.subr.bf16.mxu0 %v14008_v19  ;;  %v952_v18 = vld [vmem:[#allocation6 + $0x11a8] sm:$0xff] }
  0xf6   : > { %7564 = vmatprep.subr.bf16.mxu1 %v13242_v24  ;;  %v1324_v19 = vld [vmem:[#allocation6 + $0x1d48] sm:$0xff]  ;;  %v13839_v24 = vcombine.low %v1347_v8, %v1359_v9  ;;  %v13433_v34 = vcombine.low %v940_v17, %v952_v18 }
  0xf7   : > { %v13818_v31 = vcombine.high %v1324_v19, %v1336_v23  ;;  %v1204_v1 = vld [vmem:[#allocation6 + $0x1988] sm:$0xff] }
  0xf8   : > { %7524 = vmatpush2.bf16.msra.mxu0 %v14007_v26  ;;  %v13434_v26 = vcombine.high %v940_v17, %v952_v18  ;;  %v808_v8 = vld [vmem:[#allocation6 + $0xd28] sm:$0xff] }
  0xf9   : > { %7565 = vmatpush2.bf16.msra.mxu1 %v13241_v27  ;;  %7525 = vmatprep.subr.bf16.mxu0 %v13984_v29  ;;  %v916_v27 = vld [vmem:[#allocation6 + $0x1088] sm:$0xff] }
  0xfa   : > { %7566 = vmatprep.subr.bf16.mxu1 %v13218_v33  ;;  %v928_v29 = vld [vmem:[#allocation6 + $0x10e8] sm:$0xff]  ;;  %v15824_v33 = vpack.c.bf16 %v379_v22, %v379_v22 }
  0xfb   : > { %v13409_v42 = vcombine.low %v916_v27, %v928_v29  ;;  %v1180_v9 = vld [vmem:[#allocation6 + $0x18c8] sm:$0xff] }
  0xfc   : > { %7526 = vmatpush2.bf16.msra.mxu0 %v13983_v35  ;;  %v13817_v35 = vcombine.low %v1324_v19, %v1336_v23  ;;  %v784_v17 = vld [vmem:[#allocation6 + $0xc68] sm:$0xff] }
  0xfd   : > { %7567 = vmatpush2.bf16.msra.mxu1 %v13217_v36  ;;  %7527 = vmatprep.subr.bf16.mxu0 %v13960_v37  ;;  %v13410_v36 = vcombine.high %v916_v27, %v928_v29  ;;  %v892_v37 = vld [vmem:[#allocation6 + $0xfc8] sm:$0xff] }
  0xfe   : > { %7568 = vmatprep.subr.bf16.mxu1 %v13194_v41  ;;  %v1288_v41 = vld [vmem:[#allocation6 + $0x1c28] sm:$0xff]  ;;  %v13385_v50 = vcombine.low %v892_v37, %v904_v38 }
  0xff   : > { %v13770_v48 = vcombine.high %v1276_v40, %v1288_v41  ;;  %v1156_v18 = vld [vmem:[#allocation6 + $0x1808] sm:$0xff] }
 0x100   : > { %7528 = vmatpush2.bf16.msra.mxu0 %v13959_v43  ;;  %v13793_v43 = vcombine.low %v1300_v30, %v1312_v32  ;;  %v1516_v27 = vld [vmem:[#allocation6 + $0x2348] sm:$0xff] }
 0x101   : > { %7569 = vmatpush2.bf16.msra.mxu1 %v13193_v44  ;;  %7529 = vmatprep.subr.bf16.mxu0 %v13936_v45  ;;  %v13386_v44 = vcombine.high %v892_v37, %v904_v38  ;;  %v868_v45 = vld [vmem:[#allocation6 + $0xf08] sm:$0xff] }
 0x102   : > { %7570 = vmatprep.subr.bf16.mxu1 %v13170_v49  ;;  %v1264_v49 = vld [vmem:[#allocation6 + $0x1b68] sm:$0xff]  ;;  %v13361_v59 = vcombine.low %v868_v45, %v880_v46 }
 0x103   : > { %v13746_v56 = vcombine.high %v1252_v47, %v1264_v49  ;;  %v1528_v30 = vld [vmem:[#allocation6 + $0x23a8] sm:$0xff] }
 0x104   : > { %7530 = vmatpush2.bf16.msra.mxu0 %v13935_v51  ;;  %v13769_v51 = vcombine.low %v1276_v40, %v1288_v41  ;;  %v1492_v37 = vld [vmem:[#allocation6 + $0x2288] sm:$0xff]  ;;  %v14010_v38 = vcombine.high %v1516_v27, %v1528_v30  ;;  %v14009_v41 = vcombine.low %v1516_v27, %v1528_v30 }
 0x105   : > { %7571 = vmatpush2.bf16.msra.mxu1 %v13169_v52  ;;  %7531 = vmatprep.subr.bf16.mxu0 %v13912_v53  ;;  %v13362_v52 = vcombine.high %v868_v45, %v880_v46  ;;  %v844_v53 = vld [vmem:[#allocation6 + $0xe48] sm:$0xff] }
 0x106   : > { %7572 = vmatprep.subr.bf16.mxu1 %v13146_v58  ;;  %v1240_v58 = vld [vmem:[#allocation6 + $0x1aa8] sm:$0xff]  ;;  %v13337_v4 = vcombine.low %v844_v53, %v856_v54 }
 0x107   : > { %v13722_v2 = vcombine.high %v1228_v55, %v1240_v58  ;;  %v1468_v45 = vld [vmem:[#allocation6 + $0x21c8] sm:$0xff] }
 0x108   : > { %7532 = vmatpush2.bf16.msra.mxu0 %v13911_v60  ;;  %v13745_v60 = vcombine.low %v1252_v47, %v1264_v49  ;;  %v1480_v47 = vld [vmem:[#allocation6 + $0x2228] sm:$0xff] }
 0x109   : > { %7573 = vmatpush2.bf16.msra.mxu1 %v13145_v62  ;;  %7533 = vmatprep.subr.bf16.mxu0 %v13888_v63  ;;  %v13338_v62 = vcombine.high %v844_v53, %v856_v54  ;;  %v820_v63 = vld [vmem:[#allocation6 + $0xd88] sm:$0xff]  ;;  %v13962_v54 = vcombine.high %v1468_v45, %v1480_v47 }
 0x10a   : > { %7574 = vmatprep.subr.bf16.mxu1 %v13122_v3  ;;  %v1216_v3 = vld [vmem:[#allocation6 + $0x19e8] sm:$0xff]  ;;  %v13313_v12 = vcombine.low %v820_v63, %v832_v0 }
 0x10b   : > { %v13698_v10 = vcombine.high %v1204_v1, %v1216_v3  ;;  %v1444_v53 = vld [vmem:[#allocation6 + $0x2108] sm:$0xff] }
 0x10c   : > { %7534 = vmatpush2.bf16.msra.mxu0 %v13887_v5  ;;  %v13721_v5 = vcombine.low %v1228_v55, %v1240_v58  ;;  %v1456_v55 = vld [vmem:[#allocation6 + $0x2168] sm:$0xff]  ;;  %v13961_v58 = vcombine.low %v1468_v45, %v1480_v47  ;;  %v929_v45 = vld [vmem:[#allocation6 + $0x10f0] sm:$0xff] }
 0x10d   : > { %7575 = vmatpush2.bf16.msra.mxu1 %v13121_v6  ;;  %7535 = vmatprep.subr.bf16.mxu0 %v13864_v7  ;;  %v13314_v6 = vcombine.high %v820_v63, %v832_v0  ;;  %v796_v7 = vld [vmem:[#allocation6 + $0xcc8] sm:$0xff]  ;;  %v13938_v0 = vcombine.high %v1444_v53, %v1456_v55 }
 0x10e   : > { %7576 = vmatprep.subr.bf16.mxu1 %v13098_v11  ;;  %v1192_v11 = vld [vmem:[#allocation6 + $0x1928] sm:$0xff]  ;;  %v13289_v22 = vcombine.low %v796_v7, %v808_v8 }
 0x10f   : > { %v13674_v19 = vcombine.high %v1180_v9, %v1192_v11  ;;  %v13673_v23 = vcombine.low %v1180_v9, %v1192_v11  ;;  %v1420_v63 = vld [vmem:[#allocation6 + $0x2048] sm:$0xff] }
 0x110   : > { %7536 = vmatpush2.bf16.msra.mxu0 %v13863_v13  ;;  %v13697_v13 = vcombine.low %v1204_v1, %v1216_v3  ;;  %v1432_v1 = vld [vmem:[#allocation6 + $0x20a8] sm:$0xff]  ;;  %v13937_v3 = vcombine.low %v1444_v53, %v1456_v55  ;;  %v905_v53 = vld [vmem:[#allocation6 + $0x1030] sm:$0xff] }
 0x111   : > { %7577 = vmatpush2.bf16.msra.mxu1 %v13097_v14  ;;  %7537 = vmatprep.subr.bf16.mxu0 %v13840_v15  ;;  %v13290_v14 = vcombine.high %v796_v7, %v808_v8  ;;  %v772_v15 = vld [vmem:[#allocation6 + $0xc08] sm:$0xff]  ;;  %v13914_v8 = vcombine.high %v1420_v63, %v1432_v1  ;;  %v13913_v11 = vcombine.low %v1420_v63, %v1432_v1  ;;  %v881_v63 = vld [vmem:[#allocation6 + $0xf70] sm:$0xff] }
 0x112   : > { %7578 = vmatprep.subr.bf16.mxu1 %v13074_v20  ;;  %v1168_v20 = vld [vmem:[#allocation6 + $0x1868] sm:$0xff] }
 0x113   : > { %v13650_v29 = vcombine.high %v1156_v18, %v1168_v20  ;;  %v13649_v32 = vcombine.low %v1156_v18, %v1168_v20  ;;  %v1396_v7 = vld [vmem:[#allocation6 + $0x1f88] sm:$0xff] }
 0x114   : > { %7538 = vmatpush2.bf16.msra.mxu0 %v13839_v24  ;;  %v13266_v24 = vcombine.high %v772_v15, %v784_v17  ;;  %v1408_v9 = vld [vmem:[#allocation6 + $0x1fe8] sm:$0xff] }
 0x115   : > { %7579 = vmatpush2.bf16.msra.mxu1 %v13073_v25  ;;  %7589 = vmatprep.subr.bf16.mxu0 %v13434_v26  ;;  %v1132_v25 = vld [vmem:[#allocation6 + $0x1748] sm:$0xff]  ;;  %v13889_v20 = vcombine.low %v1396_v7, %v1408_v9 }
 0x116   : > { %7630 = vmatprep.subr.bf16.mxu1 %v13818_v31  ;;  %v1144_v26 = vld [vmem:[#allocation6 + $0x17a8] sm:$0xff]  ;;  %v13265_v31 = vcombine.low %v772_v15, %v784_v17  ;;  %v13890_v17 = vcombine.high %v1396_v7, %v1408_v9  ;;  %v857_v7 = vld [vmem:[#allocation6 + $0xeb0] sm:$0xff] }
 0x117   : > { %7540 = vmatmul.mubr.bf16.vlgmr.msra.gmra.mxu0 %v15824_v33  ;;  %v13625_v40 = vcombine.low %v1132_v25, %v1144_v26  ;;  %v1372_v15 = vld [vmem:[#allocation6 + $0x1ec8] sm:$0xff] }
 0x118   : > { %7581 = vmatmul.mubr.bf16.vlgmr.msra.gmra.mxu1 %v15812_v16  ;;  %7590 = vmatpush1.bf16.msra.mxu0 %v13433_v34  ;;  %v13626_v34 = vcombine.high %v1132_v25, %v1144_v26  ;;  %v1384_v18 = vld [vmem:[#allocation6 + $0x1f28] sm:$0xff] }
 0x119   : > { %7631 = vmatpush1.bf16.msra.mxu1 %v13817_v35  ;;  %7591 = vmatprep.subr.bf16.mxu0 %v13410_v36  ;;  %v1108_v35 = vld [vmem:[#allocation6 + $0x1688] sm:$0xff]  ;;  %v13866_v26 = vcombine.high %v1372_v15, %v1384_v18  ;;  %v13865_v30 = vcombine.low %v1372_v15, %v1384_v18  ;;  %v833_v15 = vld [vmem:[#allocation6 + $0xdf0] sm:$0xff] }
 0x11a   : > { %7632 = vmatprep.subr.bf16.mxu1 %v13794_v39  ;;  %7621 = vmatprep.mubr.bf16.mxu0 %v15806_v61  ;;  %v1120_v36 = vld [vmem:[#allocation6 + $0x16e8] sm:$0xff] }
 0x11b   : > { %7662 = vmatprep.mubr.bf16.mxu1 %v15817_v28  ;;  %v1504_v39 = vld [vmem:[#allocation6 + $0x22e8] sm:$0xff] }
 0x11c   : > { %7592 = vmatpush1.bf16.msra.mxu0 %v13409_v42  ;;  %v13602_v42 = vcombine.high %v1108_v35, %v1120_v36  ;;  %v13986_v46 = vcombine.high %v1492_v37, %v1504_v39  ;;  %v13985_v49 = vcombine.low %v1492_v37, %v1504_v39  ;;  %v1348_v25 = vld [vmem:[#allocation6 + $0x1e08] sm:$0xff]  ;;  %v953_v37 = vld [vmem:[#allocation6 + $0x11b0] sm:$0xff] }
 0x11d   : > { %7633 = vmatpush1.bf16.msra.mxu1 %v13793_v43  ;;  %7593 = vmatprep.subr.bf16.mxu0 %v13386_v44  ;;  %v1084_v43 = vld [vmem:[#allocation6 + $0x15c8] sm:$0xff] }
 0x11e   : > { %7634 = vmatprep.subr.bf16.mxu1 %v13770_v48  ;;  %v1096_v44 = vld [vmem:[#allocation6 + $0x1628] sm:$0xff]  ;;  %v13601_v48 = vcombine.low %v1108_v35, %v1120_v36  ;;  %v941_v35 = vld [vmem:[#allocation6 + $0x1150] sm:$0xff] }
 0x11f   : > { %v1360_v27 = vld [vmem:[#allocation6 + $0x1e68] sm:$0xff]  ;;  %v13435_v47 = vcombine.low %v941_v35, %v953_v37 }
 0x120   : > { %7594 = vmatpush1.bf16.msra.mxu0 %v13385_v50  ;;  %v13578_v50 = vcombine.high %v1084_v43, %v1096_v44  ;;  %v13842_v36 = vcombine.high %v1348_v25, %v1360_v27  ;;  %v13841_v39 = vcombine.low %v1348_v25, %v1360_v27  ;;  %v809_v25 = vld [vmem:[#allocation6 + $0xd30] sm:$0xff] }
 0x121   : > { %7635 = vmatpush1.bf16.msra.mxu1 %v13769_v51  ;;  %7595 = vmatprep.subr.bf16.mxu0 %v13362_v52  ;;  %v1060_v51 = vld [vmem:[#allocation6 + $0x1508] sm:$0xff] }
 0x122   : > { %7636 = vmatprep.subr.bf16.mxu1 %v13746_v56  ;;  %v1072_v52 = vld [vmem:[#allocation6 + $0x1568] sm:$0xff]  ;;  %v13577_v56 = vcombine.low %v1084_v43, %v1096_v44  ;;  %v917_v43 = vld [vmem:[#allocation6 + $0x1090] sm:$0xff]  ;;  %v13436_v44 = vcombine.high %v941_v35, %v953_v37 }
 0x123   : > { %v13411_v55 = vcombine.low %v917_v43, %v929_v45  ;;  %v785_v35 = vld [vmem:[#allocation6 + $0xc70] sm:$0xff] }
 0x124   : > { %7596 = vmatpush1.bf16.msra.mxu0 %v13361_v59  ;;  %v13554_v59 = vcombine.high %v1060_v51, %v1072_v52 }
 0x125   : > { %7637 = vmatpush1.bf16.msra.mxu1 %v13745_v60  ;;  %7597 = vmatprep.subr.bf16.mxu0 %v13338_v62  ;;  %v1036_v60 = vld [vmem:[#allocation6 + $0x1448] sm:$0xff] }
 0x126   : > { %7638 = vmatprep.subr.bf16.mxu1 %v13722_v2  ;;  %v1048_v62 = vld [vmem:[#allocation6 + $0x14a8] sm:$0xff]  ;;  %v13553_v2 = vcombine.low %v1060_v51, %v1072_v52  ;;  %v893_v51 = vld [vmem:[#allocation6 + $0xfd0] sm:$0xff]  ;;  %v13412_v52 = vcombine.high %v917_v43, %v929_v45 }
 0x127   : > { %v13387_v1 = vcombine.low %v893_v51, %v905_v53  ;;  %v1145_v43 = vld [vmem:[#allocation6 + $0x17b0] sm:$0xff] }
 0x128   : > { %7598 = vmatpush1.bf16.msra.mxu0 %v13337_v4  ;;  %v13530_v4 = vcombine.high %v1036_v60, %v1048_v62 }
 0x129   : > { %7639 = vmatpush1.bf16.msra.mxu1 %v13721_v5  ;;  %7599 = vmatprep.subr.bf16.mxu0 %v13314_v6  ;;  %v1012_v5 = vld [vmem:[#allocation6 + $0x1388] sm:$0xff] }
 0x12a   : > { %7640 = vmatprep.subr.bf16.mxu1 %v13698_v10  ;;  %v1024_v6 = vld [vmem:[#allocation6 + $0x13e8] sm:$0xff]  ;;  %v13529_v10 = vcombine.low %v1036_v60, %v1048_v62  ;;  %v869_v60 = vld [vmem:[#allocation6 + $0xf10] sm:$0xff]  ;;  %v13388_v62 = vcombine.high %v893_v51, %v905_v53 }
 0x12b   : > { %v13363_v9 = vcombine.low %v869_v60, %v881_v63  ;;  %v1121_v51 = vld [vmem:[#allocation6 + $0x16f0] sm:$0xff] }
 0x12c   : > { %7600 = vmatpush1.bf16.msra.mxu0 %v13313_v12  ;;  %v13506_v12 = vcombine.high %v1012_v5, %v1024_v6 }
 0x12d   : > { %7641 = vmatpush1.bf16.msra.mxu1 %v13697_v13  ;;  %7601 = vmatprep.subr.bf16.mxu0 %v13290_v14  ;;  %v988_v13 = vld [vmem:[#allocation6 + $0x12c8] sm:$0xff] }
 0x12e   : > { %7642 = vmatprep.subr.bf16.mxu1 %v13674_v19  ;;  %v1000_v14 = vld [vmem:[#allocation6 + $0x1328] sm:$0xff]  ;;  %v13505_v19 = vcombine.low %v1012_v5, %v1024_v6  ;;  %v845_v5 = vld [vmem:[#allocation6 + $0xe50] sm:$0xff]  ;;  %v13364_v6 = vcombine.high %v869_v60, %v881_v63 }
 0x12f   : > { %v13339_v18 = vcombine.low %v845_v5, %v857_v7  ;;  %v1097_v60 = vld [vmem:[#allocation6 + $0x1630] sm:$0xff] }
 0x130   : > { %7602 = vmatpush1.bf16.msra.mxu0 %v13289_v22  ;;  %v13482_v22 = vcombine.high %v988_v13, %v1000_v14 }
 0x131   : > { %7643 = vmatpush1.bf16.msra.mxu1 %v13673_v23  ;;  %7603 = vmatprep.subr.bf16.mxu0 %v13266_v24  ;;  %v964_v23 = vld [vmem:[#allocation6 + $0x1208] sm:$0xff] }
 0x132   : > { %7644 = vmatprep.subr.bf16.mxu1 %v13650_v29  ;;  %v976_v24 = vld [vmem:[#allocation6 + $0x1268] sm:$0xff]  ;;  %v13481_v29 = vcombine.low %v988_v13, %v1000_v14  ;;  %v821_v13 = vld [vmem:[#allocation6 + $0xd90] sm:$0xff]  ;;  %v13340_v14 = vcombine.high %v845_v5, %v857_v7 }
 0x133   : > { %v13315_v27 = vcombine.low %v821_v13, %v833_v15  ;;  %v1073_v5 = vld [vmem:[#allocation6 + $0x1570] sm:$0xff] }
 0x134   : > { %7604 = vmatpush1.bf16.msra.mxu0 %v13265_v31  ;;  %v13458_v31 = vcombine.high %v964_v23, %v976_v24 }
 0x135   : > { %7645 = vmatpush1.bf16.msra.mxu1 %v13649_v32  ;;  %7605 = vmatprep.subr.bf16.mxu0 %v13626_v34  ;;  %v557_v32 = vld [vmem:[#allocation6 + $0x550] sm:$0xff] }
 0x136   : > { %7646 = vmatprep.subr.bf16.mxu1 %v14010_v38  ;;  %v569_v34 = vld [vmem:[#allocation6 + $0x5b0] sm:$0xff]  ;;  %v13457_v38 = vcombine.low %v964_v23, %v976_v24  ;;  %v13316_v24 = vcombine.high %v821_v13, %v833_v15 }
 0x137   : > { %v797_v23 = vld [vmem:[#allocation6 + $0xcd0] sm:$0xff] }
 0x138   : > { %7606 = vmatpush2.bf16.msra.mxu0 %v13625_v40  ;;  %v13052_v40 = vcombine.high %v557_v32, %v569_v34  ;;  %v13291_v37 = vcombine.low %v797_v23, %v809_v25  ;;  %v1049_v13 = vld [vmem:[#allocation6 + $0x14b0] sm:$0xff] }
 0x139   : > { %7647 = vmatpush2.bf16.msra.mxu1 %v14009_v41  ;;  %7607 = vmatprep.subr.bf16.mxu0 %v13602_v42  ;;  %v533_v41 = vld [vmem:[#allocation6 + $0x490] sm:$0xff] }
 0x13a   : > { %7648 = vmatprep.subr.bf16.mxu1 %v13986_v46  ;;  %v545_v42 = vld [vmem:[#allocation6 + $0x4f0] sm:$0xff]  ;;  %v13051_v46 = vcombine.low %v557_v32, %v569_v34  ;;  %v13292_v34 = vcombine.high %v797_v23, %v809_v25 }
 0x13b   : > { %v773_v32 = vld [vmem:[#allocation6 + $0xc10] sm:$0xff] }
 0x13c   : > { %7608 = vmatpush2.bf16.msra.mxu0 %v13601_v48  ;;  %v13028_v48 = vcombine.high %v533_v41, %v545_v42  ;;  %v13267_v45 = vcombine.low %v773_v32, %v785_v35  ;;  %v1025_v23 = vld [vmem:[#allocation6 + $0x13f0] sm:$0xff] }
 0x13d   : > { %7649 = vmatpush2.bf16.msra.mxu1 %v13985_v49  ;;  %7609 = vmatprep.subr.bf16.mxu0 %v13578_v50  ;;  %v509_v49 = vld [vmem:[#allocation6 + $0x3d0] sm:$0xff] }
 0x13e   : > { %7650 = vmatprep.subr.bf16.mxu1 %v13962_v54  ;;  %v521_v50 = vld [vmem:[#allocation6 + $0x430] sm:$0xff]  ;;  %v13027_v54 = vcombine.low %v533_v41, %v545_v42  ;;  %v13268_v42 = vcombine.high %v773_v32, %v785_v35  ;;  %v1545_v35 = vlaneseq }
 0x13f   : > { %v1133_v41 = vld [vmem:[#allocation6 + $0x1750] sm:$0xff] }
 0x140   : > { %7610 = vmatpush2.bf16.msra.mxu0 %v13577_v56  ;;  %v13004_v56 = vcombine.high %v509_v49, %v521_v50  ;;  %v13627_v53 = vcombine.low %v1133_v41, %v1145_v43  ;;  %v1001_v32 = vld [vmem:[#allocation6 + $0x1330] sm:$0xff] }
 0x141   : > { %7651 = vmatpush2.bf16.msra.mxu1 %v13961_v58  ;;  %7611 = vmatprep.subr.bf16.mxu0 %v13554_v59  ;;  %v485_v58 = vld [vmem:[#allocation6 + $0x310] sm:$0xff] }
 0x142   : > { %7652 = vmatprep.subr.bf16.mxu1 %v13938_v0  ;;  %v497_v59 = vld [vmem:[#allocation6 + $0x370] sm:$0xff]  ;;  %v13003_v0 = vcombine.low %v509_v49, %v521_v50  ;;  %v13628_v50 = vcombine.high %v1133_v41, %v1145_v43 }
 0x143   : > { %v1109_v49 = vld [vmem:[#allocation6 + $0x1690] sm:$0xff] }
 0x144   : > { %7612 = vmatpush2.bf16.msra.mxu0 %v13553_v2  ;;  %v12980_v2 = vcombine.high %v485_v58, %v497_v59  ;;  %v13603_v63 = vcombine.low %v1109_v49, %v1121_v51 }
 0x145   : > { %7653 = vmatpush2.bf16.msra.mxu1 %v13937_v3  ;;  %7613 = vmatprep.subr.bf16.mxu0 %v13530_v4  ;;  %v461_v3 = vld [vmem:[#allocation6 + $0x250] sm:$0xff] }
 0x146   : > { %7654 = vmatprep.subr.bf16.mxu1 %v13914_v8  ;;  %v473_v4 = vld [vmem:[#allocation6 + $0x2b0] sm:$0xff]  ;;  %v12979_v8 = vcombine.low %v485_v58, %v497_v59  ;;  %v13604_v59 = vcombine.high %v1109_v49, %v1121_v51  ;;  %v558_v49 = vld [vmem:[#allocation6 + $0x558] sm:$0xff] }
 0x147   : > { %v1085_v58 = vld [vmem:[#allocation6 + $0x15d0] sm:$0xff]  ;;  %v570_v51 = vld [vmem:[#allocation6 + $0x5b8] sm:$0xff] }
 0x148   : > { %7614 = vmatpush2.bf16.msra.mxu0 %v13529_v10  ;;  %v12956_v10 = vcombine.high %v461_v3, %v473_v4  ;;  %v13579_v7 = vcombine.low %v1085_v58, %v1097_v60 }
 0x149   : > { %7655 = vmatpush2.bf16.msra.mxu1 %v13913_v11  ;;  %7615 = vmatprep.subr.bf16.mxu0 %v13506_v12  ;;  %v437_v11 = vld [vmem:[#allocation6 + $0x190] sm:$0xff] }
 0x14a   : > { %7656 = vmatprep.subr.bf16.mxu1 %v13890_v17  ;;  %v449_v12 = vld [vmem:[#allocation6 + $0x1f0] sm:$0xff]  ;;  %v12955_v17 = vcombine.low %v461_v3, %v473_v4  ;;  %v13580_v4 = vcombine.high %v1085_v58, %v1097_v60  ;;  %v534_v60 = vld [vmem:[#allocation6 + $0x498] sm:$0xff] }
 0x14b   : > { %v1061_v3 = vld [vmem:[#allocation6 + $0x1510] sm:$0xff] }
 0x14c   : > { %7616 = vmatpush2.bf16.msra.mxu0 %v13505_v19  ;;  %v12932_v19 = vcombine.high %v437_v11, %v449_v12  ;;  %v13555_v15 = vcombine.low %v1061_v3, %v1073_v5  ;;  %v1301_v58 = vld [vmem:[#allocation6 + $0x1c90] sm:$0xff] }
 0x14d   : > { %7657 = vmatpush2.bf16.msra.mxu1 %v13889_v20  ;;  %7617 = vmatprep.subr.bf16.mxu0 %v13482_v22  ;;  %v413_v20 = vld [vmem:[#allocation6 + $0xd0] sm:$0xff] }
 0x14e   : > { %7658 = vmatprep.subr.bf16.mxu1 %v13866_v26  ;;  %v425_v22 = vld [vmem:[#allocation6 + $0x130] sm:$0xff]  ;;  %v12931_v26 = vcombine.low %v437_v11, %v449_v12  ;;  %v13556_v12 = vcombine.high %v1061_v3, %v1073_v5  ;;  %v13053_v3 = vcombine.low %v558_v49, %v570_v51 }
 0x14f   : > { %v1037_v11 = vld [vmem:[#allocation6 + $0x1450] sm:$0xff] }
 0x150   : > { %7618 = vmatpush2.bf16.msra.mxu0 %v13481_v29  ;;  %v12908_v29 = vcombine.high %v413_v20, %v425_v22  ;;  %v13531_v25 = vcombine.low %v1037_v11, %v1049_v13  ;;  %v1277_v5 = vld [vmem:[#allocation6 + $0x1bd0] sm:$0xff] }
 0x151   : > { %7659 = vmatpush2.bf16.msra.mxu1 %v13865_v30  ;;  %7619 = vmatprep.subr.bf16.mxu0 %v13458_v31  ;;  %v389_v30 = vld [vmem:[#allocation6 + $0x10] sm:$0xff] }
 0x152   : > { %7660 = vmatprep.subr.bf16.mxu1 %v13842_v36  ;;  %v401_v31 = vld [vmem:[#allocation6 + $0x70] sm:$0xff]  ;;  %v12907_v36 = vcombine.low %v413_v20, %v425_v22  ;;  %v13532_v22 = vcombine.high %v1037_v11, %v1049_v13  ;;  %v522_v11 = vld [vmem:[#allocation6 + $0x438] sm:$0xff] }
 0x153   : > { %v1013_v20 = vld [vmem:[#allocation6 + $0x1390] sm:$0xff] }
 0x154   : > { %7620 = vmatpush2.bf16.msra.mxu0 %v13457_v38  ;;  %v12884_v38 = vcombine.high %v389_v30, %v401_v31 }
 0x155   : > { %7661 = vmatpush2.bf16.msra.mxu1 %v13841_v39  ;;  %7671 = vmatprep.subr.bf16.mxu0 %v13052_v40  ;;  %v749_v39 = vld [vmem:[#allocation6 + $0xb50] sm:$0xff] }
 0x156   : > { %7712 = vmatprep.subr.bf16.mxu1 %v13436_v44  ;;  %v761_v40 = vld [vmem:[#allocation6 + $0xbb0] sm:$0xff]  ;;  %v12883_v44 = vcombine.low %v389_v30, %v401_v31  ;;  %v13508_v31 = vcombine.high %v1013_v20, %v1025_v23 }
 0x157   : > { %7622 = vmatmul.mubr.bf16.vlgmr.msra.gmra.mxu0 %v15815_v21  ;;  %v989_v30 = vld [vmem:[#allocation6 + $0x12d0] sm:$0xff] }
 0x158   : > { %7663 = vmatmul.mubr.bf16.vlgmr.msra.gmra.mxu1 %v15824_v33  ;;  %7672 = vmatpush1.bf16.msra.mxu0 %v13051_v46  ;;  %v13244_v46 = vcombine.high %v749_v39, %v761_v40  ;;  %v13484_v41 = vcombine.high %v989_v30, %v1001_v32 }
 0x159   : > { %7713 = vmatpush1.bf16.msra.mxu1 %v13435_v47  ;;  %7673 = vmatprep.subr.bf16.mxu0 %v13028_v48  ;;  %v725_v47 = vld [vmem:[#allocation6 + $0xa90] sm:$0xff] }
 0x15a   : > { %7714 = vmatprep.subr.bf16.mxu1 %v13412_v52  ;;  %7703 = vmatprep.mubr.bf16.mxu0 %v15803_v57  ;;  %v737_v48 = vld [vmem:[#allocation6 + $0xaf0] sm:$0xff]  ;;  %v13243_v52 = vcombine.low %v749_v39, %v761_v40 }
 0x15b   : > { %7744 = vmatprep.mubr.bf16.mxu1 %v15806_v61  ;;  %v593_v39 = vld [vmem:[#allocation6 + $0x670] sm:$0xff] }
 0x15c   : > { %7674 = vmatpush1.bf16.msra.mxu0 %v13027_v54  ;;  %v13220_v54 = vcombine.high %v725_v47, %v737_v48  ;;  %v965_v40 = vld [vmem:[#allocation6 + $0x1210] sm:$0xff] }
 0x15d   : > { %7715 = vmatpush1.bf16.msra.mxu1 %v13411_v55  ;;  %7675 = vmatprep.subr.bf16.mxu0 %v13004_v56  ;;  %v701_v55 = vld [vmem:[#allocation6 + $0x9d0] sm:$0xff] }
 0x15e   : > { %7716 = vmatprep.subr.bf16.mxu1 %v13388_v62  ;;  %v713_v56 = vld [vmem:[#allocation6 + $0xa30] sm:$0xff]  ;;  %v13219_v62 = vcombine.low %v725_v47, %v737_v48 }
 0x15f   : > { %v1325_v47 = vld [vmem:[#allocation6 + $0x1d50] sm:$0xff] }
 0x160   : > { %7676 = vmatpush1.bf16.msra.mxu0 %v13003_v0  ;;  %v13196_v0 = vcombine.high %v701_v55, %v713_v56  ;;  %v1337_v48 = vld [vmem:[#allocation6 + $0x1db0] sm:$0xff] }
 0x161   : > { %7717 = vmatpush1.bf16.msra.mxu1 %v13387_v1  ;;  %7677 = vmatprep.subr.bf16.mxu0 %v12980_v2  ;;  %v677_v1 = vld [vmem:[#allocation6 + $0x910] sm:$0xff] }
 0x162   : > { %7718 = vmatprep.subr.bf16.mxu1 %v13364_v6  ;;  %v689_v2 = vld [vmem:[#allocation6 + $0x970] sm:$0xff]  ;;  %v13195_v6 = vcombine.low %v701_v55, %v713_v56  ;;  %v13820_v56 = vcombine.high %v1325_v47, %v1337_v48 }
 0x164   : > { %7678 = vmatpush1.bf16.msra.mxu0 %v12979_v8  ;;  %v13172_v8 = vcombine.high %v677_v1, %v689_v2 }
 0x165   : > { %7719 = vmatpush1.bf16.msra.mxu1 %v13363_v9  ;;  %7679 = vmatprep.subr.bf16.mxu0 %v12956_v10  ;;  %v653_v9 = vld [vmem:[#allocation6 + $0x850] sm:$0xff] }
 0x166   : > { %7720 = vmatprep.subr.bf16.mxu1 %v13340_v14  ;;  %v665_v10 = vld [vmem:[#allocation6 + $0x8b0] sm:$0xff]  ;;  %v13171_v14 = vcombine.low %v677_v1, %v689_v2  ;;  %v13819_v2 = vcombine.low %v1325_v47, %v1337_v48 }
 0x167   : > { %v1205_v48 = vld [vmem:[#allocation6 + $0x1990] sm:$0xff] }
 0x168   : > { %7680 = vmatpush1.bf16.msra.mxu0 %v12955_v17  ;;  %v13148_v17 = vcombine.high %v653_v9, %v665_v10 }
 0x169   : > { %7721 = vmatpush1.bf16.msra.mxu1 %v13339_v18  ;;  %7681 = vmatprep.subr.bf16.mxu0 %v12932_v19  ;;  %v629_v18 = vld [vmem:[#allocation6 + $0x790] sm:$0xff] }
 0x16a   : > { %7722 = vmatprep.subr.bf16.mxu1 %v13316_v24  ;;  %v641_v19 = vld [vmem:[#allocation6 + $0x7f0] sm:$0xff]  ;;  %v13147_v24 = vcombine.low %v653_v9, %v665_v10  ;;  %v510_v9 = vld [vmem:[#allocation6 + $0x3d8] sm:$0xff] }
 0x16c   : > { %7682 = vmatpush1.bf16.msra.mxu0 %v12931_v26  ;;  %v13124_v26 = vcombine.high %v629_v18, %v641_v19 }
 0x16d   : > { %7723 = vmatpush1.bf16.msra.mxu1 %v13315_v27  ;;  %7683 = vmatprep.subr.bf16.mxu0 %v12908_v29  ;;  %v605_v27 = vld [vmem:[#allocation6 + $0x6d0] sm:$0xff] }
 0x16e   : > { %7724 = vmatprep.subr.bf16.mxu1 %v13292_v34  ;;  %v617_v29 = vld [vmem:[#allocation6 + $0x730] sm:$0xff]  ;;  %v13123_v34 = vcombine.low %v629_v18, %v641_v19 }
 0x16f   : > { %v13099_v43 = vcombine.low %v605_v27, %v617_v29 }
 0x170   : > { %7684 = vmatpush1.bf16.msra.mxu0 %v12907_v36  ;;  %v13507_v36 = vcombine.low %v1013_v20, %v1025_v23  ;;  %v13006_v23 = vcombine.high %v510_v9, %v522_v11 }
 0x171   : > { %7725 = vmatpush1.bf16.msra.mxu1 %v13291_v37  ;;  %7685 = vmatprep.subr.bf16.mxu0 %v12884_v38  ;;  %v13100_v37 = vcombine.high %v605_v27, %v617_v29  ;;  %v581_v38 = vld [vmem:[#allocation6 + $0x610] sm:$0xff]  ;;  %v486_v27 = vld [vmem:[#allocation6 + $0x318] sm:$0xff] }
 0x172   : > { %7726 = vmatprep.subr.bf16.mxu1 %v13268_v42  ;;  %v977_v42 = vld [vmem:[#allocation6 + $0x1270] sm:$0xff]  ;;  %v498_v29 = vld [vmem:[#allocation6 + $0x378] sm:$0xff] }
 0x173   : > { %v13459_v55 = vcombine.low %v965_v40, %v977_v42 }
 0x174   : > { %7686 = vmatpush1.bf16.msra.mxu0 %v12883_v44  ;;  %v15834_v44 = vshrl.u32 %v1545_v35, 7  ;;  %v13005_v35 = vcombine.low %v510_v9, %v522_v11 }
 0x175   : > { %7727 = vmatpush1.bf16.msra.mxu1 %v13267_v45  ;;  %7687 = vmatprep.subr.bf16.mxu0 %v13244_v46  ;;  %v13483_v45 = vcombine.low %v989_v30, %v1001_v32  ;;  %v13076_v46 = vcombine.high %v581_v38, %v593_v39 }
 0x176   : > { %7728 = vmatprep.subr.bf16.mxu1 %v13628_v50  ;;  %v13460_v50 = vcombine.high %v965_v40, %v977_v42  ;;  %v474_v42 = vld [vmem:[#allocation6 + $0x2b8] sm:$0xff] }
 0x178   : > { %7688 = vmatpush2.bf16.msra.mxu0 %v13243_v52  ;;  %v15836_v52 = vld [vmem:[#allocation8] sm:$0xff] }
 0x179   : > { %7729 = vmatpush2.bf16.msra.mxu1 %v13627_v53  ;;  %7689 = vmatprep.subr.bf16.mxu0 %v13220_v54  ;;  %v13075_v53 = vcombine.low %v581_v38, %v593_v39  ;;  %v15839_v54 = vsub.s32 0, %v15834_v44  ;;  %v1229_v38 = vld [vmem:[#allocation6 + $0x1a50] sm:$0xff] }
 0x17a   : > { %7730 = vmatprep.subr.bf16.mxu1 %v13604_v59  ;;  %v1313_v59 = vld [vmem:[#allocation6 + $0x1cf0] sm:$0xff] }
 0x17b   : > { %v1548_v1 = vrot.slane %v15836_v52, %v15839_v54  ;;  %v1241_v39 = vld [vmem:[#allocation6 + $0x1ab0] sm:$0xff] }
 0x17c   : > { %7690 = vmatpush2.bf16.msra.mxu0 %v13219_v62  ;;  %v13054_v62 = vcombine.high %v558_v49, %v570_v51  ;;  %v1217_v49 = vld [vmem:[#allocation6 + $0x19f0] sm:$0xff]  ;;  %v450_v51 = vld [vmem:[#allocation6 + $0x1f8] sm:$0xff] }
 0x17d   : > { %7731 = vmatpush2.bf16.msra.mxu1 %v13603_v63  ;;  %7691 = vmatprep.subr.bf16.mxu0 %v13196_v0  ;;  %v15842_v63 = vsub.s32 1, %v15834_v44  ;;  %v546_v0 = vld [vmem:[#allocation6 + $0x4f8] sm:$0xff] }
 0x17e   : > { %7732 = vmatprep.subr.bf16.mxu1 %v13580_v4  ;;  %v13796_v4 = vcombine.high %v1301_v58, %v1313_v59 }
 0x180   : > { %7692 = vmatpush2.bf16.msra.mxu0 %v13195_v6  ;;  %v1289_v6 = vld [vmem:[#allocation6 + $0x1c30] sm:$0xff] }
 0x181   : > { %7733 = vmatpush2.bf16.msra.mxu1 %v13579_v7  ;;  %7693 = vmatprep.subr.bf16.mxu0 %v13172_v8  ;;  %v1552_v7 = vrot.slane %v15836_v52, %v15842_v63  ;;  %v13030_v8 = vcombine.high %v534_v60, %v546_v0  ;;  %v13772_v18 = vcombine.high %v1277_v5, %v1289_v6 }
 0x182   : > { %7734 = vmatprep.subr.bf16.mxu1 %v13556_v12 }
 0x184   : > { %7694 = vmatpush2.bf16.msra.mxu0 %v13171_v14  ;;  %v13795_v14 = vcombine.low %v1301_v58, %v1313_v59  ;;  %v1181_v59 = vld [vmem:[#allocation6 + $0x18d0] sm:$0xff] }
 0x185   : > { %7735 = vmatpush2.bf16.msra.mxu1 %v13555_v15  ;;  %7695 = vmatprep.subr.bf16.mxu0 %v13148_v17  ;;  %v13029_v17 = vcombine.low %v534_v60, %v546_v0  ;;  %v1193_v60 = vld [vmem:[#allocation6 + $0x1930] sm:$0xff]  ;;  %v426_v0 = vld [vmem:[#allocation6 + $0x138] sm:$0xff] }
 0x186   : > { %7736 = vmatprep.subr.bf16.mxu1 %v13532_v22  ;;  %v13675_v9 = vcombine.low %v1181_v59, %v1193_v60 }
 0x188   : > { %7696 = vmatpush2.bf16.msra.mxu0 %v13147_v24  ;;  %v1253_v24 = vld [vmem:[#allocation6 + $0x1b10] sm:$0xff] }
 0x189   : > { %7737 = vmatpush2.bf16.msra.mxu1 %v13531_v25  ;;  %7697 = vmatprep.subr.bf16.mxu0 %v13124_v26  ;;  %v1265_v25 = vld [vmem:[#allocation6 + $0x1b70] sm:$0xff] }
 0x18a   : > { %7738 = vmatprep.subr.bf16.mxu1 %v13508_v31  ;;  %v13771_v31 = vcombine.low %v1277_v5, %v1289_v6  ;;  %v1157_v5 = vld [vmem:[#allocation6 + $0x1810] sm:$0xff] }
 0x18b   : > { %v1169_v6 = vld [vmem:[#allocation6 + $0x1870] sm:$0xff] }
 0x18c   : > { %7698 = vmatpush2.bf16.msra.mxu0 %v13123_v34  ;;  %v13652_v11 = vcombine.high %v1157_v5, %v1169_v6 }
 0x18d   : > { %7739 = vmatpush2.bf16.msra.mxu1 %v13507_v36  ;;  %7699 = vmatprep.subr.bf16.mxu0 %v13100_v37  ;;  %v13748_v36 = vcombine.high %v1253_v24, %v1265_v25  ;;  %v12982_v37 = vcombine.high %v486_v27, %v498_v29 }
 0x18e   : > { %7740 = vmatprep.subr.bf16.mxu1 %v13484_v41  ;;  %v462_v41 = vld [vmem:[#allocation6 + $0x258] sm:$0xff] }
 0x18f   : > { %v12958_v47 = vcombine.high %v462_v41, %v474_v42 }
 0x190   : > { %7700 = vmatpush2.bf16.msra.mxu0 %v13099_v43  ;;  %v13747_v43 = vcombine.low %v1253_v24, %v1265_v25  ;;  %v1493_v24 = vld [vmem:[#allocation6 + $0x2290] sm:$0xff] }
 0x191   : > { %7741 = vmatpush2.bf16.msra.mxu1 %v13483_v45  ;;  %7701 = vmatprep.subr.bf16.mxu0 %v13076_v46  ;;  %v12981_v45 = vcombine.low %v486_v27, %v498_v29  ;;  %v13724_v46 = vcombine.high %v1229_v38, %v1241_v39  ;;  %v1505_v25 = vld [vmem:[#allocation6 + $0x22f0] sm:$0xff]  ;;  %v738_v27 = vld [vmem:[#allocation6 + $0xaf8] sm:$0xff] }
 0x192   : > { %7742 = vmatprep.subr.bf16.mxu1 %v13460_v50  ;;  %v438_v50 = vld [vmem:[#allocation6 + $0x198] sm:$0xff] }
 0x193   : > { %v12934_v58 = vcombine.high %v438_v50, %v450_v51 }
 0x194   : > { %7702 = vmatpush2.bf16.msra.mxu0 %v13075_v53  ;;  %v13723_v53 = vcombine.low %v1229_v38, %v1241_v39  ;;  %v714_v38 = vld [vmem:[#allocation6 + $0xa38] sm:$0xff]  ;;  %v13987_v39 = vcombine.low %v1493_v24, %v1505_v25 }
 0x195   : > { %7743 = vmatpush2.bf16.msra.mxu1 %v13459_v55  ;;  %7753 = vmatprep.subr.bf16.mxu0 %v13820_v56  ;;  %v12957_v55 = vcombine.low %v462_v41, %v474_v42  ;;  %v13700_v56 = vcombine.high %v1205_v48, %v1217_v49 }
 0x196   : > { %7794 = vmatprep.subr.bf16.mxu1 %v13054_v62  ;;  %v414_v62 = vld [vmem:[#allocation6 + $0xd8] sm:$0xff] }
 0x197   : > { %v7459_v10 = vpop.f32.mrf.mxu0  ;;  %7704 = vmatmul.mubr.bf16.vlgmr.msra.gmra.mxu0 %v15812_v16 }
 0x198   : > { %v7460_v12 = vadd.f32 %v7459_v10, %v1548_v1  ;;  %7745 = vmatmul.mubr.bf16.vlgmr.msra.gmra.mxu1 %v15815_v21  ;;  %7754 = vmatpush1.bf16.msra.mxu0 %v13819_v2  ;;  %v7500_v13 = vpop.f32.mrf.mxu1  ;;  %v13699_v1 = vcombine.low %v1205_v48, %v1217_v49  ;;  %v12933_v2 = vcombine.low %v438_v50, %v450_v51 }
 0x199   : > { %7795 = vmatpush1.bf16.msra.mxu1 %v13053_v3  ;;  %v7461_v15 = vpop.f32.mrf.mxu0  ;;  %7755 = vmatprep.subr.bf16.mxu0 %v13796_v4  ;;  %v13676_v3 = vcombine.high %v1181_v59, %v1193_v60  ;;  %v12910_v4 = vcombine.high %v414_v62, %v426_v0  ;;  %v12909_v10 = vcombine.low %v414_v62, %v426_v0 }
 0x19a   : > { %v7462_v19 = vadd.f32 %v7461_v15, %v1552_v7  ;;  %v15850_v20 = vadd.f32 %v7500_v13, %v7460_v12  ;;  %v7502_v22 = vpop.f32.mrf.mxu1  ;;  %7796 = vmatprep.subr.bf16.mxu1 %v13030_v8  ;;  %7785 = vmatprep.mubr.bf16.mxu0 %v15817_v28  ;;  %v390_v7 = vld [vmem:[#allocation6 + $0x18] sm:$0xff]  ;;  %v1517_v13 = vld [vmem:[#allocation6 + $0x2350] sm:$0xff] }
 0x19b   : > { %v7463_v26 = vpop.f32.mrf.mxu0  ;;  %7826 = vmatprep.mubr.bf16.mxu1 %v15803_v57  ;;  %v402_v8 = vld [vmem:[#allocation6 + $0x78] sm:$0xff] }
 0x19c   : > { %v15854_v30 = vadd.f32 %v7502_v22, %v7462_v19  ;;  %7756 = vmatpush1.bf16.msra.mxu0 %v13795_v14  ;;  %v7504_v32 = vpop.f32.mrf.mxu1  ;;  %v12886_v12 = vcombine.high %v390_v7, %v402_v8  ;;  %v1529_v14 = vld [vmem:[#allocation6 + $0x23b0] sm:$0xff]  ;;  %v750_v15 = vld [vmem:[#allocation6 + $0xb58] sm:$0xff]  ;;  %v12885_v19 = vcombine.low %v390_v7, %v402_v8 }
 0x19d   : > { %7797 = vmatpush1.bf16.msra.mxu1 %v13029_v17  ;;  %v7464_v34 = vpop.f32.mrf.mxu0  ;;  %7757 = vmatprep.subr.bf16.mxu0 %v13772_v18  ;;  %v762_v17 = vld [vmem:[#allocation6 + $0xbb8] sm:$0xff]  ;;  %v13651_v18 = vcombine.low %v1157_v5, %v1169_v6  ;;  %v14012_v22 = vcombine.high %v1517_v13, %v1529_v14  ;;  %v14011_v29 = vcombine.low %v1517_v13, %v1529_v14 }
 0x19e   : > { %7798 = vmatprep.subr.bf16.mxu1 %v13006_v23  ;;  %v7505_v40 = vpop.f32.mrf.mxu1  ;;  %v13246_v23 = vcombine.high %v750_v15, %v762_v17  ;;  %v726_v26 = vld [vmem:[#allocation6 + $0xa98] sm:$0xff]  ;;  %v13988_v32 = vcombine.high %v1493_v24, %v1505_v25 }
 0x19f   : > { %v13222_v34 = vcombine.high %v726_v26, %v738_v27  ;;  %v13221_v40 = vcombine.low %v726_v26, %v738_v27 }
 0x1a0   : > { %7758 = vmatpush1.bf16.msra.mxu0 %v13771_v31  ;;  %v13245_v31 = vcombine.low %v750_v15, %v762_v17 }
 0x1a1   : > { %7799 = vmatpush1.bf16.msra.mxu1 %v13005_v35  ;;  %7759 = vmatprep.subr.bf16.mxu0 %v13748_v36  ;;  %v1469_v35 = vld [vmem:[#allocation6 + $0x21d0] sm:$0xff] }
 0x1a2   : > { %7800 = vmatprep.subr.bf16.mxu1 %v12982_v37  ;;  %v1481_v36 = vld [vmem:[#allocation6 + $0x2230] sm:$0xff]  ;;  %v702_v37 = vld [vmem:[#allocation6 + $0x9d8] sm:$0xff] }
 0x1a3   : > { %v13964_v41 = vcombine.high %v1469_v35, %v1481_v36  ;;  %v13198_v42 = vcombine.high %v702_v37, %v714_v38  ;;  %v13963_v48 = vcombine.low %v1469_v35, %v1481_v36  ;;  %v13197_v49 = vcombine.low %v702_v37, %v714_v38 }
 0x1a4   : > { %7760 = vmatpush1.bf16.msra.mxu0 %v13747_v43  ;;  %v1445_v43 = vld [vmem:[#allocation6 + $0x2110] sm:$0xff] }
 0x1a5   : > { %7801 = vmatpush1.bf16.msra.mxu1 %v12981_v45  ;;  %7761 = vmatprep.subr.bf16.mxu0 %v13724_v46  ;;  %v1457_v45 = vld [vmem:[#allocation6 + $0x2170] sm:$0xff]  ;;  %v678_v46 = vld [vmem:[#allocation6 + $0x918] sm:$0xff] }
 0x1a6   : > { %7802 = vmatprep.subr.bf16.mxu1 %v12958_v47  ;;  %v690_v47 = vld [vmem:[#allocation6 + $0x978] sm:$0xff]  ;;  %v13940_v50 = vcombine.high %v1445_v43, %v1457_v45  ;;  %v13939_v59 = vcombine.low %v1445_v43, %v1457_v45 }
 0x1a7   : > { %v13174_v51 = vcombine.high %v678_v46, %v690_v47  ;;  %v13173_v60 = vcombine.low %v678_v46, %v690_v47 }
 0x1a8   : > { %7762 = vmatpush1.bf16.msra.mxu0 %v13723_v53  ;;  %v1421_v53 = vld [vmem:[#allocation6 + $0x2050] sm:$0xff] }
 0x1a9   : > { %7803 = vmatpush1.bf16.msra.mxu1 %v12957_v55  ;;  %7763 = vmatprep.subr.bf16.mxu0 %v13700_v56  ;;  %v1433_v55 = vld [vmem:[#allocation6 + $0x20b0] sm:$0xff]  ;;  %v654_v56 = vld [vmem:[#allocation6 + $0x858] sm:$0xff] }
 0x1aa   : > { %7804 = vmatprep.subr.bf16.mxu1 %v12934_v58  ;;  %v666_v58 = vld [vmem:[#allocation6 + $0x8b8] sm:$0xff]  ;;  %v13916_v62 = vcombine.high %v1421_v53, %v1433_v55  ;;  %v13915_v5 = vcombine.low %v1421_v53, %v1433_v55 }
 0x1ab   : > { %v13150_v0 = vcombine.high %v654_v56, %v666_v58  ;;  %v13149_v6 = vcombine.low %v654_v56, %v666_v58  ;;  %v1290_v53 = vld [vmem:[#allocation6 + $0x1c38] sm:$0xff] }
 0x1ac   : > { %7764 = vmatpush1.bf16.msra.mxu0 %v13699_v1  ;;  %v1397_v1 = vld [vmem:[#allocation6 + $0x1f90] sm:$0xff] }
 0x1ad   : > { %7805 = vmatpush1.bf16.msra.mxu1 %v12933_v2  ;;  %7765 = vmatprep.subr.bf16.mxu0 %v13676_v3  ;;  %v1409_v2 = vld [vmem:[#allocation6 + $0x1ff0] sm:$0xff]  ;;  %v630_v3 = vld [vmem:[#allocation6 + $0x798] sm:$0xff] }
 0x1ae   : > { %7806 = vmatprep.subr.bf16.mxu1 %v12910_v4  ;;  %v642_v4 = vld [vmem:[#allocation6 + $0x7f8] sm:$0xff]  ;;  %v13892_v7 = vcombine.high %v1397_v1, %v1409_v2  ;;  %v13891_v13 = vcombine.low %v1397_v1, %v1409_v2 }
 0x1af   : > { %v13126_v8 = vcombine.high %v630_v3, %v642_v4  ;;  %v13125_v14 = vcombine.low %v630_v3, %v642_v4  ;;  %v870_v2 = vld [vmem:[#allocation6 + $0xf18] sm:$0xff] }
 0x1b0   : > { %7766 = vmatpush1.bf16.msra.mxu0 %v13675_v9  ;;  %v1373_v9 = vld [vmem:[#allocation6 + $0x1ed0] sm:$0xff]  ;;  %v882_v3 = vld [vmem:[#allocation6 + $0xf78] sm:$0xff] }
 0x1b1   : > { %7807 = vmatpush1.bf16.msra.mxu1 %v12909_v10  ;;  %7767 = vmatprep.subr.bf16.mxu0 %v13652_v11  ;;  %v1385_v10 = vld [vmem:[#allocation6 + $0x1f30] sm:$0xff]  ;;  %v606_v11 = vld [vmem:[#allocation6 + $0x6d8] sm:$0xff] }
 0x1b2   : > { %7808 = vmatprep.subr.bf16.mxu1 %v12886_v12  ;;  %v618_v12 = vld [vmem:[#allocation6 + $0x738] sm:$0xff]  ;;  %v13868_v15 = vcombine.high %v1373_v9, %v1385_v10  ;;  %v13867_v24 = vcombine.low %v1373_v9, %v1385_v10  ;;  %v13366_v10 = vcombine.high %v870_v2, %v882_v3 }
 0x1b3   : > { %v13102_v17 = vcombine.high %v606_v11, %v618_v12  ;;  %v13101_v25 = vcombine.low %v606_v11, %v618_v12  ;;  %v846_v12 = vld [vmem:[#allocation6 + $0xe58] sm:$0xff] }
 0x1b4   : > { %7768 = vmatpush1.bf16.msra.mxu0 %v13651_v18  ;;  %v1349_v18 = vld [vmem:[#allocation6 + $0x1e10] sm:$0xff] }
 0x1b5   : > { %7809 = vmatpush1.bf16.msra.mxu1 %v12885_v19  ;;  %7769 = vmatprep.subr.bf16.mxu0 %v14012_v22  ;;  %v1361_v19 = vld [vmem:[#allocation6 + $0x1e70] sm:$0xff]  ;;  %v582_v22 = vld [vmem:[#allocation6 + $0x618] sm:$0xff] }
 0x1b6   : > { %7810 = vmatprep.subr.bf16.mxu1 %v13246_v23  ;;  %v594_v23 = vld [vmem:[#allocation6 + $0x678] sm:$0xff]  ;;  %v13844_v26 = vcombine.high %v1349_v18, %v1361_v19  ;;  %v13843_v35 = vcombine.low %v1349_v18, %v1361_v19  ;;  %v13365_v18 = vcombine.low %v870_v2, %v882_v3 }
 0x1b7   : > { %v13078_v27 = vcombine.high %v582_v22, %v594_v23  ;;  %v13077_v36 = vcombine.low %v582_v22, %v594_v23 }
 0x1b8   : > { %7770 = vmatpush2.bf16.msra.mxu0 %v14011_v29  ;;  %v942_v29 = vld [vmem:[#allocation6 + $0x1158] sm:$0xff] }
 0x1b9   : > { %7811 = vmatpush2.bf16.msra.mxu1 %v13245_v31  ;;  %7771 = vmatprep.subr.bf16.mxu0 %v13988_v32  ;;  %v954_v31 = vld [vmem:[#allocation6 + $0x11b8] sm:$0xff] }
 0x1ba   : > { %7812 = vmatprep.subr.bf16.mxu1 %v13222_v34  ;;  %v1326_v32 = vld [vmem:[#allocation6 + $0x1d58] sm:$0xff]  ;;  %v13438_v37 = vcombine.high %v942_v29, %v954_v31  ;;  %v13437_v43 = vcombine.low %v942_v29, %v954_v31 }
 0x1bb   : > { %v1338_v34 = vld [vmem:[#allocation6 + $0x1db8] sm:$0xff] }
 0x1bc   : > { %7772 = vmatpush2.bf16.msra.mxu0 %v13987_v39  ;;  %v13822_v38 = vcombine.high %v1326_v32, %v1338_v34  ;;  %v918_v39 = vld [vmem:[#allocation6 + $0x1098] sm:$0xff]  ;;  %v13821_v45 = vcombine.low %v1326_v32, %v1338_v34 }
 0x1bd   : > { %7813 = vmatpush2.bf16.msra.mxu1 %v13221_v40  ;;  %7773 = vmatprep.subr.bf16.mxu0 %v13964_v41  ;;  %v930_v40 = vld [vmem:[#allocation6 + $0x10f8] sm:$0xff] }
 0x1be   : > { %7814 = vmatprep.subr.bf16.mxu1 %v13198_v42  ;;  %v1302_v41 = vld [vmem:[#allocation6 + $0x1c98] sm:$0xff]  ;;  %v13414_v46 = vcombine.high %v918_v39, %v930_v40  ;;  %v13413_v56 = vcombine.low %v918_v39, %v930_v40 }
 0x1bf   : > { %v1314_v42 = vld [vmem:[#allocation6 + $0x1cf8] sm:$0xff] }
 0x1c0   : > { %7774 = vmatpush2.bf16.msra.mxu0 %v13963_v48  ;;  %v13798_v47 = vcombine.high %v1302_v41, %v1314_v42  ;;  %v894_v48 = vld [vmem:[#allocation6 + $0xfd8] sm:$0xff] }
 0x1c1   : > { %7815 = vmatpush2.bf16.msra.mxu1 %v13197_v49  ;;  %7775 = vmatprep.subr.bf16.mxu0 %v13940_v50  ;;  %v906_v49 = vld [vmem:[#allocation6 + $0x1038] sm:$0xff] }
 0x1c2   : > { %7816 = vmatprep.subr.bf16.mxu1 %v13174_v51  ;;  %v1278_v51 = vld [vmem:[#allocation6 + $0x1bd8] sm:$0xff] }
 0x1c3   : > { %v13774_v1 = vcombine.high %v1278_v51, %v1290_v53 }
 0x1c4   : > { %7776 = vmatpush2.bf16.msra.mxu0 %v13939_v59 }
 0x1c5   : > { %7817 = vmatpush2.bf16.msra.mxu1 %v13173_v60  ;;  %7777 = vmatprep.subr.bf16.mxu0 %v13916_v62  ;;  %v13797_v60 = vcombine.low %v1302_v41, %v1314_v42  ;;  %v13390_v62 = vcombine.high %v894_v48, %v906_v49 }
 0x1c6   : > { %7818 = vmatprep.subr.bf16.mxu1 %v13150_v0 }
 0x1c8   : > { %7778 = vmatpush2.bf16.msra.mxu0 %v13915_v5  ;;  %v1254_v5 = vld [vmem:[#allocation6 + $0x1b18] sm:$0xff] }
 0x1c9   : > { %7819 = vmatpush2.bf16.msra.mxu1 %v13149_v6  ;;  %7779 = vmatprep.subr.bf16.mxu0 %v13892_v7  ;;  %v1266_v6 = vld [vmem:[#allocation6 + $0x1b78] sm:$0xff]  ;;  %v13389_v7 = vcombine.low %v894_v48, %v906_v49 }
 0x1ca   : > { %7820 = vmatprep.subr.bf16.mxu1 %v13126_v8  ;;  %v13750_v11 = vcombine.high %v1254_v5, %v1266_v6  ;;  %v13749_v19 = vcombine.low %v1254_v5, %v1266_v6  ;;  %v1122_v5 = vld [vmem:[#allocation6 + $0x16f8] sm:$0xff] }
 0x1cb   : > { %v1494_v6 = vld [vmem:[#allocation6 + $0x2298] sm:$0xff] }
 0x1cc   : > { %7780 = vmatpush2.bf16.msra.mxu0 %v13891_v13  ;;  %v858_v13 = vld [vmem:[#allocation6 + $0xeb8] sm:$0xff] }
 0x1cd   : > { %7821 = vmatpush2.bf16.msra.mxu1 %v13125_v14  ;;  %7781 = vmatprep.subr.bf16.mxu0 %v13868_v15  ;;  %v1230_v15 = vld [vmem:[#allocation6 + $0x1a58] sm:$0xff]  ;;  %v13342_v22 = vcombine.high %v846_v12, %v858_v13  ;;  %v13341_v29 = vcombine.low %v846_v12, %v858_v13 }
 0x1ce   : > { %7822 = vmatprep.subr.bf16.mxu1 %v13102_v17  ;;  %v1242_v17 = vld [vmem:[#allocation6 + $0x1ab8] sm:$0xff] }
 0x1cf   : > { %v13726_v23 = vcombine.high %v1230_v15, %v1242_v17  ;;  %v13725_v31 = vcombine.low %v1230_v15, %v1242_v17  ;;  %v1098_v12 = vld [vmem:[#allocation6 + $0x1638] sm:$0xff] }
 0x1d0   : > { %7782 = vmatpush2.bf16.msra.mxu0 %v13867_v24  ;;  %v822_v24 = vld [vmem:[#allocation6 + $0xd98] sm:$0xff] }
 0x1d1   : > { %7823 = vmatpush2.bf16.msra.mxu1 %v13101_v25  ;;  %7783 = vmatprep.subr.bf16.mxu0 %v13844_v26  ;;  %v834_v25 = vld [vmem:[#allocation6 + $0xdf8] sm:$0xff] }
 0x1d2   : > { %7824 = vmatprep.subr.bf16.mxu1 %v13078_v27  ;;  %v1206_v26 = vld [vmem:[#allocation6 + $0x1998] sm:$0xff]  ;;  %v13318_v32 = vcombine.high %v822_v24, %v834_v25  ;;  %v13317_v39 = vcombine.low %v822_v24, %v834_v25 }
 0x1d3   : > { %v1218_v27 = vld [vmem:[#allocation6 + $0x19f8] sm:$0xff] }
 0x1d4   : > { %7784 = vmatpush2.bf16.msra.mxu0 %v13843_v35  ;;  %v13702_v34 = vcombine.high %v1206_v26, %v1218_v27  ;;  %v798_v35 = vld [vmem:[#allocation6 + $0xcd8] sm:$0xff]  ;;  %v13701_v40 = vcombine.low %v1206_v26, %v1218_v27 }
 0x1d5   : > { %7825 = vmatpush2.bf16.msra.mxu1 %v13077_v36  ;;  %7835 = vmatprep.subr.bf16.mxu0 %v13438_v37  ;;  %v810_v36 = vld [vmem:[#allocation6 + $0xd38] sm:$0xff] }
 0x1d6   : > { %7876 = vmatprep.subr.bf16.mxu1 %v13822_v38  ;;  %v1182_v37 = vld [vmem:[#allocation6 + $0x18d8] sm:$0xff]  ;;  %v13294_v41 = vcombine.high %v798_v35, %v810_v36  ;;  %v13293_v48 = vcombine.low %v798_v35, %v810_v36 }
 0x1d7   : > { %v7541_v50 = vpop.f32.mrf.mxu0  ;;  %7786 = vmatmul.mubr.bf16.vlgmr.msra.gmra.mxu0 %v15824_v33  ;;  %v1194_v38 = vld [vmem:[#allocation6 + $0x1938] sm:$0xff] }
 0x1d8   : > { %v15858_v55 = vadd.f32 %v7541_v50, %v15850_v20  ;;  %7827 = vmatmul.mubr.bf16.vlgmr.msra.gmra.mxu1 %v15812_v16  ;;  %7836 = vmatpush1.bf16.msra.mxu0 %v13437_v43  ;;  %v15861_v58 = vpop.f32.mrf.mxu1  ;;  %v13678_v42 = vcombine.high %v1182_v37, %v1194_v38  ;;  %v774_v43 = vld [vmem:[#allocation6 + $0xc18] sm:$0xff]  ;;  %v13677_v49 = vcombine.low %v1182_v37, %v1194_v38 }
 0x1d9   : > { %7877 = vmatpush1.bf16.msra.mxu1 %v13821_v45  ;;  %v7543_v59 = vpop.f32.mrf.mxu0  ;;  %7837 = vmatprep.subr.bf16.mxu0 %v13414_v46  ;;  %v786_v45 = vld [vmem:[#allocation6 + $0xc78] sm:$0xff] }
 0x1da   : > { %v15864_v0 = vadd.f32 %v7543_v59, %v15854_v30  ;;  %7878 = vmatprep.subr.bf16.mxu1 %v13798_v47  ;;  %v15866_v20 = vpop.f32.mrf.mxu1  ;;  %7867 = vmatprep.mubr.bf16.mxu0 %v15806_v61  ;;  %v13773_v30 = vcombine.low %v1278_v51, %v1290_v53  ;;  %v1158_v46 = vld [vmem:[#allocation6 + $0x1818] sm:$0xff]  ;;  %v13270_v50 = vcombine.high %v774_v43, %v786_v45 }
 0x1db   : > { %v7545_v4 = vpop.f32.mrf.mxu0  ;;  %7908 = vmatprep.mubr.bf16.mxu1 %v15817_v28  ;;  %v1170_v47 = vld [vmem:[#allocation6 + $0x1878] sm:$0xff] }
 0x1dc   : > { %7838 = vmatpush1.bf16.msra.mxu0 %v13413_v56  ;;  %v7586_v8 = vpop.f32.mrf.mxu1  ;;  %v13654_v51 = vcombine.high %v1158_v46, %v1170_v47  ;;  %v1134_v53 = vld [vmem:[#allocation6 + $0x1758] sm:$0xff] }
 0x1dd   : > { %7879 = vmatpush1.bf16.msra.mxu1 %v13797_v60  ;;  %v7546_v9 = vpop.f32.mrf.mxu0  ;;  %7839 = vmatprep.subr.bf16.mxu0 %v13390_v62  ;;  %v1146_v56 = vld [vmem:[#allocation6 + $0x17b8] sm:$0xff]  ;;  %v13269_v62 = vcombine.low %v774_v43, %v786_v45 }
 0x1de   : > { %7880 = vmatprep.subr.bf16.mxu1 %v13774_v1  ;;  %v7587_v14 = vpop.f32.mrf.mxu1  ;;  %v1518_v59 = vld [vmem:[#allocation6 + $0x2358] sm:$0xff]  ;;  %v13653_v1 = vcombine.low %v1158_v46, %v1170_v47  ;;  %v13630_v2 = vcombine.high %v1134_v53, %v1146_v56  ;;  %v13629_v8 = vcombine.low %v1134_v53, %v1146_v56 }
 0x1df   : > { %v1530_v60 = vld [vmem:[#allocation6 + $0x23b8] sm:$0xff] }
 0x1e0   : > { %7840 = vmatpush1.bf16.msra.mxu0 %v13389_v7  ;;  %v14014_v3 = vcombine.high %v1518_v59, %v1530_v60  ;;  %v1110_v4 = vld [vmem:[#allocation6 + $0x1698] sm:$0xff]  ;;  %v14013_v9 = vcombine.low %v1518_v59, %v1530_v60 }
 0x1e1   : > { %7881 = vmatpush1.bf16.msra.mxu1 %v13773_v30  ;;  %7841 = vmatprep.subr.bf16.mxu0 %v13366_v10  ;;  %v1506_v7 = vld [vmem:[#allocation6 + $0x22f8] sm:$0xff]  ;;  %v13606_v30 = vcombine.high %v1110_v4, %v1122_v5  ;;  %v13605_v15 = vcombine.low %v1110_v4, %v1122_v5 }
 0x1e2   : > { %7882 = vmatprep.subr.bf16.mxu1 %v13750_v11  ;;  %v13990_v10 = vcombine.high %v1494_v6, %v1506_v7  ;;  %v1086_v11 = vld [vmem:[#allocation6 + $0x15d8] sm:$0xff]  ;;  %v13989_v17 = vcombine.low %v1494_v6, %v1506_v7  ;;  %v15871_v7 = vsub.s32 2, %v15834_v44 }
 0x1e3   : > { %v1470_v13 = vld [vmem:[#allocation6 + $0x21d8] sm:$0xff]  ;;  %v13581_v26 = vcombine.low %v1086_v11, %v1098_v12 }
 0x1e4   : > { %7842 = vmatpush1.bf16.msra.mxu0 %v13365_v18  ;;  %v1482_v14 = vld [vmem:[#allocation6 + $0x2238] sm:$0xff]  ;;  %v13582_v18 = vcombine.high %v1086_v11, %v1098_v12  ;;  %v559_v11 = vld [vmem:[#allocation6 + $0x560] sm:$0xff] }
 0x1e5   : > { %7883 = vmatpush1.bf16.msra.mxu1 %v13749_v19  ;;  %7843 = vmatprep.subr.bf16.mxu0 %v13342_v22  ;;  %v13966_v19 = vcombine.high %v1470_v13, %v1482_v14  ;;  %v1062_v22 = vld [vmem:[#allocation6 + $0x1518] sm:$0xff]  ;;  %v13965_v27 = vcombine.low %v1470_v13, %v1482_v14  ;;  %v571_v12 = vld [vmem:[#allocation6 + $0x5c0] sm:$0xff] }
 0x1e6   : > { %7884 = vmatprep.subr.bf16.mxu1 %v13726_v23  ;;  %v1074_v23 = vld [vmem:[#allocation6 + $0x1578] sm:$0xff]  ;;  %v943_v13 = vld [vmem:[#allocation6 + $0x1160] sm:$0xff] }
 0x1e7   : > { %v1446_v24 = vld [vmem:[#allocation6 + $0x2118] sm:$0xff]  ;;  %v13557_v37 = vcombine.low %v1062_v22, %v1074_v23  ;;  %v955_v14 = vld [vmem:[#allocation6 + $0x11c0] sm:$0xff] }
 0x1e8   : > { %7844 = vmatpush1.bf16.msra.mxu0 %v13341_v29  ;;  %v1458_v25 = vld [vmem:[#allocation6 + $0x2178] sm:$0xff]  ;;  %v13558_v29 = vcombine.high %v1062_v22, %v1074_v23  ;;  %v13440_v23 = vcombine.high %v943_v13, %v955_v14 }
 0x1e9   : > { %7885 = vmatpush1.bf16.msra.mxu1 %v13725_v31  ;;  %7845 = vmatprep.subr.bf16.mxu0 %v13318_v32  ;;  %v13942_v31 = vcombine.high %v1446_v24, %v1458_v25  ;;  %v1038_v32 = vld [vmem:[#allocation6 + $0x1458] sm:$0xff]  ;;  %v13941_v38 = vcombine.low %v1446_v24, %v1458_v25  ;;  %v535_v24 = vld [vmem:[#allocation6 + $0x4a0] sm:$0xff] }
 0x1ea   : > { %7886 = vmatprep.subr.bf16.mxu1 %v13702_v34  ;;  %v1050_v34 = vld [vmem:[#allocation6 + $0x14b8] sm:$0xff]  ;;  %v547_v25 = vld [vmem:[#allocation6 + $0x500] sm:$0xff] }
 0x1eb   : > { %v1422_v35 = vld [vmem:[#allocation6 + $0x2058] sm:$0xff]  ;;  %v13533_v46 = vcombine.low %v1038_v32, %v1050_v34 }
 0x1ec   : > { %7846 = vmatpush1.bf16.msra.mxu0 %v13317_v39  ;;  %v1434_v36 = vld [vmem:[#allocation6 + $0x20b8] sm:$0xff]  ;;  %v13534_v39 = vcombine.high %v1038_v32, %v1050_v34  ;;  %v13439_v32 = vcombine.low %v943_v13, %v955_v14  ;;  %v13032_v34 = vcombine.high %v535_v24, %v547_v25 }
 0x1ed   : > { %7887 = vmatpush1.bf16.msra.mxu1 %v13701_v40  ;;  %7847 = vmatprep.subr.bf16.mxu0 %v13294_v41  ;;  %v13918_v40 = vcombine.high %v1422_v35, %v1434_v36  ;;  %v1014_v41 = vld [vmem:[#allocation6 + $0x1398] sm:$0xff]  ;;  %v13917_v47 = vcombine.low %v1422_v35, %v1434_v36 }
 0x1ee   : > { %7888 = vmatprep.subr.bf16.mxu1 %v13678_v42  ;;  %v1026_v42 = vld [vmem:[#allocation6 + $0x13f8] sm:$0xff] }
 0x1ef   : > { %v1398_v43 = vld [vmem:[#allocation6 + $0x1f98] sm:$0xff]  ;;  %v13509_v59 = vcombine.low %v1014_v41, %v1026_v42 }
 0x1f0   : > { %7848 = vmatpush1.bf16.msra.mxu0 %v13293_v48  ;;  %v1410_v45 = vld [vmem:[#allocation6 + $0x1ff8] sm:$0xff]  ;;  %v13510_v48 = vcombine.high %v1014_v41, %v1026_v42  ;;  %v13031_v42 = vcombine.low %v535_v24, %v547_v25 }
 0x1f1   : > { %7889 = vmatpush1.bf16.msra.mxu1 %v13677_v49  ;;  %7849 = vmatprep.subr.bf16.mxu0 %v13270_v50  ;;  %v13894_v49 = vcombine.high %v1398_v43, %v1410_v45  ;;  %v990_v50 = vld [vmem:[#allocation6 + $0x12d8] sm:$0xff]  ;;  %v13893_v60 = vcombine.low %v1398_v43, %v1410_v45 }
 0x1f2   : > { %7890 = vmatprep.subr.bf16.mxu1 %v13654_v51  ;;  %v1002_v51 = vld [vmem:[#allocation6 + $0x1338] sm:$0xff] }
 0x1f3   : > { %v1374_v53 = vld [vmem:[#allocation6 + $0x1ed8] sm:$0xff]  ;;  %v13485_v6 = vcombine.low %v990_v50, %v1002_v51 }
 0x1f4   : > { %7850 = vmatpush1.bf16.msra.mxu0 %v13269_v62  ;;  %v1386_v56 = vld [vmem:[#allocation6 + $0x1f38] sm:$0xff]  ;;  %v13486_v62 = vcombine.high %v990_v50, %v1002_v51  ;;  %v487_v50 = vld [vmem:[#allocation6 + $0x320] sm:$0xff] }
 0x1f5   : > { %7891 = vmatpush1.bf16.msra.mxu1 %v13653_v1  ;;  %7851 = vmatprep.subr.bf16.mxu0 %v13630_v2  ;;  %v13870_v1 = vcombine.high %v1374_v53, %v1386_v56  ;;  %v966_v2 = vld [vmem:[#allocation6 + $0x1218] sm:$0xff]  ;;  %v499_v51 = vld [vmem:[#allocation6 + $0x380] sm:$0xff] }
 0x1f6   : > { %7892 = vmatprep.subr.bf16.mxu1 %v14014_v3  ;;  %v978_v3 = vld [vmem:[#allocation6 + $0x1278] sm:$0xff] }
 0x1f7   : > { %v1350_v4 = vld [vmem:[#allocation6 + $0x1e18] sm:$0xff] }
 0x1f8   : > { %7852 = vmatpush2.bf16.msra.mxu0 %v13629_v8  ;;  %v1362_v5 = vld [vmem:[#allocation6 + $0x1e78] sm:$0xff]  ;;  %v13869_v8 = vcombine.low %v1374_v53, %v1386_v56  ;;  %v871_v56 = vld [vmem:[#allocation6 + $0xf20] sm:$0xff] }
 0x1f9   : > { %7893 = vmatpush2.bf16.msra.mxu1 %v14013_v9  ;;  %7853 = vmatprep.subr.bf16.mxu0 %v13606_v30  ;;  %v13462_v9 = vcombine.high %v966_v2, %v978_v3  ;;  %v15874_v30 = vsub.s32 3, %v15834_v44 }
 0x1fa   : > { %7894 = vmatprep.subr.bf16.mxu1 %v13990_v10  ;;  %v13846_v10 = vcombine.high %v1350_v4, %v1362_v5 }
 0x1fb   : > { %v1560_v22 = vrot.slane %v15836_v52, %v15874_v30 }
 0x1fc   : > { %7854 = vmatpush2.bf16.msra.mxu0 %v13605_v15  ;;  %v1556_v15 = vrot.slane %v15836_v52, %v15871_v7  ;;  %v523_v52 = vld [vmem:[#allocation6 + $0x440] sm:$0xff] }
 0x1fd   : > { %7895 = vmatpush2.bf16.msra.mxu1 %v13989_v17  ;;  %7855 = vmatprep.subr.bf16.mxu0 %v13582_v18  ;;  %v13461_v17 = vcombine.low %v966_v2, %v978_v3  ;;  %v13845_v18 = vcombine.low %v1350_v4, %v1362_v5  ;;  %v7585_v35 = vadd.f32 %v15866_v20, %v1560_v22  ;;  %v835_v22 = vld [vmem:[#allocation6 + $0xe00] sm:$0xff] }
 0x1fe   : > { %7896 = vmatprep.subr.bf16.mxu1 %v13966_v19  ;;  %v13056_v19 = vcombine.high %v559_v11, %v571_v12  ;;  %v12984_v4 = vcombine.high %v487_v50, %v499_v51 }
 0x200   : > { %7856 = vmatpush2.bf16.msra.mxu0 %v13581_v26  ;;  %v919_v26 = vld [vmem:[#allocation6 + $0x10a0] sm:$0xff] }
 0x201   : > { %7897 = vmatpush2.bf16.msra.mxu1 %v13965_v27  ;;  %7857 = vmatprep.subr.bf16.mxu0 %v13558_v29  ;;  %v931_v27 = vld [vmem:[#allocation6 + $0x1100] sm:$0xff]  ;;  %v7583_v29 = vadd.f32 %v15861_v58, %v1556_v15 }
 0x202   : > { %7898 = vmatprep.subr.bf16.mxu1 %v13942_v31  ;;  %v13055_v31 = vcombine.low %v559_v11, %v571_v12  ;;  %v13416_v36 = vcombine.high %v919_v26, %v931_v27  ;;  %v13415_v45 = vcombine.low %v919_v26, %v931_v27  ;;  %v859_v11 = vld [vmem:[#allocation6 + $0xec0] sm:$0xff]  ;;  %v12983_v12 = vcombine.low %v487_v50, %v499_v51 }
 0x203   : > { %v415_v27 = vld [vmem:[#allocation6 + $0xe0] sm:$0xff] }
 0x204   : > { %7858 = vmatpush2.bf16.msra.mxu0 %v13557_v37  ;;  %v511_v37 = vld [vmem:[#allocation6 + $0x3e0] sm:$0xff] }
 0x205   : > { %7899 = vmatpush2.bf16.msra.mxu1 %v13941_v38  ;;  %7859 = vmatprep.subr.bf16.mxu0 %v13534_v39  ;;  %v895_v39 = vld [vmem:[#allocation6 + $0xfe0] sm:$0xff]  ;;  %v13008_v20 = vcombine.high %v511_v37, %v523_v52 }
 0x206   : > { %7900 = vmatprep.subr.bf16.mxu1 %v13918_v40  ;;  %v907_v40 = vld [vmem:[#allocation6 + $0x1040] sm:$0xff] }
 0x207   : > { %v13391_v3 = vcombine.low %v895_v39, %v907_v40 }
 0x208   : > { %7860 = vmatpush2.bf16.msra.mxu0 %v13533_v46 }
 0x209   : > { %7901 = vmatpush2.bf16.msra.mxu1 %v13917_v47  ;;  %7861 = vmatprep.subr.bf16.mxu0 %v13510_v48 }
 0x20a   : > { %7902 = vmatprep.subr.bf16.mxu1 %v13894_v49  ;;  %v13392_v49 = vcombine.high %v895_v39, %v907_v40  ;;  %v775_v39 = vld [vmem:[#allocation6 + $0xc20] sm:$0xff] }
 0x20b   : > { %v787_v40 = vld [vmem:[#allocation6 + $0xc80] sm:$0xff] }
 0x20c   : > { %7862 = vmatpush2.bf16.msra.mxu0 %v13509_v59  ;;  %v883_v59 = vld [vmem:[#allocation6 + $0xf80] sm:$0xff]  ;;  %v13271_v50 = vcombine.low %v775_v39, %v787_v40 }
 0x20d   : > { %7903 = vmatpush2.bf16.msra.mxu1 %v13893_v60  ;;  %7863 = vmatprep.subr.bf16.mxu0 %v13486_v62  ;;  %v13007_v62 = vcombine.low %v511_v37, %v523_v52  ;;  %v13368_v5 = vcombine.high %v871_v56, %v883_v59  ;;  %v13367_v13 = vcombine.low %v871_v56, %v883_v59  ;;  %v391_v52 = vld [vmem:[#allocation6 + $0x20] sm:$0xff] }
 0x20e   : > { %7904 = vmatprep.subr.bf16.mxu1 %v13870_v1  ;;  %v727_v56 = vld [vmem:[#allocation6 + $0xaa0] sm:$0xff] }
 0x20f   : > { %v739_v59 = vld [vmem:[#allocation6 + $0xb00] sm:$0xff] }
 0x210   : > { %7864 = vmatpush2.bf16.msra.mxu0 %v13485_v6  ;;  %v463_v6 = vld [vmem:[#allocation6 + $0x260] sm:$0xff] }
 0x211   : > { %7905 = vmatpush2.bf16.msra.mxu1 %v13869_v8  ;;  %7865 = vmatprep.subr.bf16.mxu0 %v13462_v9  ;;  %v475_v8 = vld [vmem:[#allocation6 + $0x2c0] sm:$0xff] }
 0x212   : > { %7906 = vmatprep.subr.bf16.mxu1 %v13846_v10  ;;  %v847_v10 = vld [vmem:[#allocation6 + $0xe60] sm:$0xff]  ;;  %v12960_v14 = vcombine.high %v463_v6, %v475_v8 }
 0x213   : > { %v13344_v15 = vcombine.high %v847_v10, %v859_v11  ;;  %v13343_v24 = vcombine.low %v847_v10, %v859_v11  ;;  %v1099_v10 = vld [vmem:[#allocation6 + $0x1640] sm:$0xff]  ;;  %v13223_v11 = vcombine.low %v727_v56, %v739_v59 }
 0x214   : > { %7866 = vmatpush2.bf16.msra.mxu0 %v13461_v17  ;;  %v439_v17 = vld [vmem:[#allocation6 + $0x1a0] sm:$0xff] }
 0x215   : > { %7907 = vmatpush2.bf16.msra.mxu1 %v13845_v18  ;;  %7917 = vmatprep.subr.bf16.mxu0 %v13056_v19  ;;  %v451_v18 = vld [vmem:[#allocation6 + $0x200] sm:$0xff] }
 0x216   : > { %7958 = vmatprep.subr.bf16.mxu1 %v13440_v23  ;;  %v823_v19 = vld [vmem:[#allocation6 + $0xda0] sm:$0xff]  ;;  %v12959_v23 = vcombine.low %v463_v6, %v475_v8  ;;  %v12936_v25 = vcombine.high %v439_v17, %v451_v18 }
 0x217   : > { %v7623_v38 = vpop.f32.mrf.mxu0  ;;  %7868 = vmatmul.mubr.bf16.vlgmr.msra.gmra.mxu0 %v15815_v21  ;;  %v13320_v26 = vcombine.high %v823_v19, %v835_v22  ;;  %v703_v6 = vld [vmem:[#allocation6 + $0x9e0] sm:$0xff] }
 0x218   : > { %v7624_v41 = vadd.f32 %v7623_v38, %v7583_v29  ;;  %7909 = vmatmul.mubr.bf16.vlgmr.msra.gmra.mxu1 %v15824_v33  ;;  %7918 = vmatpush1.bf16.msra.mxu0 %v13055_v31  ;;  %v7664_v58 = vpop.f32.mrf.mxu1  ;;  %v427_v29 = vld [vmem:[#allocation6 + $0x140] sm:$0xff] }
 0x219   : > { %7959 = vmatpush1.bf16.msra.mxu1 %v13439_v32  ;;  %v7625_v43 = vpop.f32.mrf.mxu0  ;;  %7919 = vmatprep.subr.bf16.mxu0 %v13032_v34  ;;  %v799_v31 = vld [vmem:[#allocation6 + $0xce0] sm:$0xff]  ;;  %v12935_v34 = vcombine.low %v439_v17, %v451_v18 }
 0x21a   : > { %v7626_v46 = vadd.f32 %v7625_v43, %v7585_v35  ;;  %v15884_v47 = vadd.f32 %v7664_v58, %v7624_v41  ;;  %v7666_v48 = vpop.f32.mrf.mxu1  ;;  %7960 = vmatprep.subr.bf16.mxu1 %v13416_v36  ;;  %7949 = vmatprep.mubr.bf16.mxu0 %v15803_v57  ;;  %v811_v32 = vld [vmem:[#allocation6 + $0xd40] sm:$0xff]  ;;  %v13319_v35 = vcombine.low %v823_v19, %v835_v22 }
 0x21b   : > { %v7627_v53 = vpop.f32.mrf.mxu0  ;;  %7990 = vmatprep.mubr.bf16.mxu1 %v15806_v61  ;;  %v12912_v36 = vcombine.high %v415_v27, %v427_v29  ;;  %v13296_v37 = vcombine.high %v799_v31, %v811_v32  ;;  %v403_v38 = vld [vmem:[#allocation6 + $0x80] sm:$0xff]  ;;  %v12911_v41 = vcombine.low %v415_v27, %v427_v29  ;;  %v13295_v58 = vcombine.low %v799_v31, %v811_v32 }
 0x21c   : > { %v15888_v60 = vadd.f32 %v7666_v48, %v7626_v46  ;;  %7920 = vmatpush1.bf16.msra.mxu0 %v13031_v42  ;;  %v7668_v1 = vpop.f32.mrf.mxu1  ;;  %v12888_v42 = vcombine.high %v391_v52, %v403_v38  ;;  %v13272_v43 = vcombine.high %v775_v39, %v787_v40  ;;  %v1135_v46 = vld [vmem:[#allocation6 + $0x1760] sm:$0xff] }
 0x21d   : > { %7961 = vmatpush1.bf16.msra.mxu1 %v13415_v45  ;;  %v7628_v2 = vpop.f32.mrf.mxu0  ;;  %7921 = vmatprep.subr.bf16.mxu0 %v13008_v20  ;;  %v751_v45 = vld [vmem:[#allocation6 + $0xb60] sm:$0xff] }
 0x21e   : > { %7962 = vmatprep.subr.bf16.mxu1 %v13392_v49  ;;  %v7669_v9 = vpop.f32.mrf.mxu1  ;;  %v763_v20 = vld [vmem:[#allocation6 + $0xbc0] sm:$0xff]  ;;  %v12887_v49 = vcombine.low %v391_v52, %v403_v38 }
 0x21f   : > { %v1147_v48 = vld [vmem:[#allocation6 + $0x17c0] sm:$0xff]  ;;  %v13248_v51 = vcombine.high %v751_v45, %v763_v20  ;;  %v13247_v2 = vcombine.low %v751_v45, %v763_v20 }
 0x220   : > { %7922 = vmatpush1.bf16.msra.mxu0 %v13007_v62  ;;  %v13632_v53 = vcombine.high %v1135_v46, %v1147_v48  ;;  %v1111_v62 = vld [vmem:[#allocation6 + $0x16a0] sm:$0xff] }
 0x221   : > { %7963 = vmatpush1.bf16.msra.mxu1 %v13391_v3  ;;  %7923 = vmatprep.subr.bf16.mxu0 %v12984_v4  ;;  %v1123_v1 = vld [vmem:[#allocation6 + $0x1700] sm:$0xff]  ;;  %v13631_v3 = vcombine.low %v1135_v46, %v1147_v48  ;;  %v13224_v4 = vcombine.high %v727_v56, %v739_v59 }
 0x222   : > { %7964 = vmatprep.subr.bf16.mxu1 %v13368_v5  ;;  %v13608_v5 = vcombine.high %v1111_v62, %v1123_v1  ;;  %v715_v8 = vld [vmem:[#allocation6 + $0xa40] sm:$0xff] }
 0x223   : > { %v1087_v9 = vld [vmem:[#allocation6 + $0x15e0] sm:$0xff]  ;;  %v13199_v22 = vcombine.low %v703_v6, %v715_v8 }
 0x224   : > { %7924 = vmatpush1.bf16.msra.mxu0 %v12983_v12  ;;  %v13607_v12 = vcombine.low %v1111_v62, %v1123_v1  ;;  %v691_v17 = vld [vmem:[#allocation6 + $0x980] sm:$0xff] }
 0x225   : > { %7965 = vmatpush1.bf16.msra.mxu1 %v13367_v13  ;;  %7925 = vmatprep.subr.bf16.mxu0 %v12960_v14  ;;  %v13200_v13 = vcombine.high %v703_v6, %v715_v8  ;;  %v13584_v14 = vcombine.high %v1087_v9, %v1099_v10  ;;  %v1063_v18 = vld [vmem:[#allocation6 + $0x1520] sm:$0xff]  ;;  %v560_v8 = vld [vmem:[#allocation6 + $0x568] sm:$0xff] }
 0x226   : > { %7966 = vmatprep.subr.bf16.mxu1 %v13344_v15  ;;  %v679_v15 = vld [vmem:[#allocation6 + $0x920] sm:$0xff] }
 0x227   : > { %v1075_v19 = vld [vmem:[#allocation6 + $0x1580] sm:$0xff]  ;;  %v13175_v32 = vcombine.low %v679_v15, %v691_v17 }
 0x228   : > { %7926 = vmatpush1.bf16.msra.mxu0 %v12959_v23  ;;  %v13583_v23 = vcombine.low %v1087_v9, %v1099_v10  ;;  %v667_v27 = vld [vmem:[#allocation6 + $0x8c0] sm:$0xff]  ;;  %v572_v9 = vld [vmem:[#allocation6 + $0x5c8] sm:$0xff] }
 0x229   : > { %7967 = vmatpush1.bf16.msra.mxu1 %v13343_v24  ;;  %7927 = vmatprep.subr.bf16.mxu0 %v12936_v25  ;;  %v13176_v24 = vcombine.high %v679_v15, %v691_v17  ;;  %v13560_v25 = vcombine.high %v1063_v18, %v1075_v19  ;;  %v1039_v29 = vld [vmem:[#allocation6 + $0x1460] sm:$0xff]  ;;  %v15894_v15 = vsub.s32 5, %v15834_v44 }
 0x22a   : > { %7968 = vmatprep.subr.bf16.mxu1 %v13320_v26  ;;  %v655_v26 = vld [vmem:[#allocation6 + $0x860] sm:$0xff] }
 0x22b   : > { %v1051_v31 = vld [vmem:[#allocation6 + $0x14c0] sm:$0xff]  ;;  %v13151_v40 = vcombine.low %v655_v26, %v667_v27 }
 0x22c   : > { %7928 = vmatpush1.bf16.msra.mxu0 %v12935_v34  ;;  %v13559_v34 = vcombine.low %v1063_v18, %v1075_v19  ;;  %v643_v52 = vld [vmem:[#allocation6 + $0x800] sm:$0xff]  ;;  %v536_v19 = vld [vmem:[#allocation6 + $0x4a8] sm:$0xff] }
 0x22d   : > { %7969 = vmatpush1.bf16.msra.mxu1 %v13319_v35  ;;  %7929 = vmatprep.subr.bf16.mxu0 %v12912_v36  ;;  %v13152_v35 = vcombine.high %v655_v26, %v667_v27  ;;  %v13536_v36 = vcombine.high %v1039_v29, %v1051_v31  ;;  %v1015_v38 = vld [vmem:[#allocation6 + $0x13a0] sm:$0xff]  ;;  %v13057_v26 = vcombine.low %v560_v8, %v572_v9 }
 0x22e   : > { %7970 = vmatprep.subr.bf16.mxu1 %v13296_v37  ;;  %v631_v37 = vld [vmem:[#allocation6 + $0x7a0] sm:$0xff] }
 0x22f   : > { %v1027_v39 = vld [vmem:[#allocation6 + $0x1400] sm:$0xff]  ;;  %v13127_v48 = vcombine.low %v631_v37, %v643_v52 }
 0x230   : > { %7930 = vmatpush1.bf16.msra.mxu0 %v12911_v41  ;;  %v13535_v41 = vcombine.low %v1039_v29, %v1051_v31  ;;  %v619_v45 = vld [vmem:[#allocation6 + $0x740] sm:$0xff] }
 0x231   : > { %7971 = vmatpush1.bf16.msra.mxu1 %v13295_v58  ;;  %7931 = vmatprep.subr.bf16.mxu0 %v12888_v42  ;;  %v13128_v58 = vcombine.high %v631_v37, %v643_v52  ;;  %v13512_v42 = vcombine.high %v1015_v38, %v1027_v39  ;;  %v991_v20 = vld [vmem:[#allocation6 + $0x12e0] sm:$0xff]  ;;  %v524_v37 = vld [vmem:[#allocation6 + $0x448] sm:$0xff] }
 0x232   : > { %7972 = vmatprep.subr.bf16.mxu1 %v13272_v43  ;;  %v607_v43 = vld [vmem:[#allocation6 + $0x6e0] sm:$0xff] }
 0x233   : > { %v1003_v46 = vld [vmem:[#allocation6 + $0x1340] sm:$0xff]  ;;  %v13103_v1 = vcombine.low %v607_v43, %v619_v45 }
 0x234   : > { %7932 = vmatpush1.bf16.msra.mxu0 %v12887_v49  ;;  %v13511_v49 = vcombine.low %v1015_v38, %v1027_v39  ;;  %v595_v56 = vld [vmem:[#allocation6 + $0x680] sm:$0xff] }
 0x235   : > { %7973 = vmatpush1.bf16.msra.mxu1 %v13271_v50  ;;  %7933 = vmatprep.subr.bf16.mxu0 %v13248_v51  ;;  %v13104_v50 = vcombine.high %v607_v43, %v619_v45  ;;  %v13488_v51 = vcombine.high %v991_v20, %v1003_v46  ;;  %v967_v59 = vld [vmem:[#allocation6 + $0x1220] sm:$0xff] }
 0x236   : > { %7974 = vmatprep.subr.bf16.mxu1 %v13632_v53  ;;  %v583_v53 = vld [vmem:[#allocation6 + $0x620] sm:$0xff] }
 0x237   : > { %v979_v62 = vld [vmem:[#allocation6 + $0x1280] sm:$0xff]  ;;  %v13079_v10 = vcombine.low %v583_v53, %v595_v56 }
 0x238   : > { %7934 = vmatpush2.bf16.msra.mxu0 %v13247_v2  ;;  %v13487_v2 = vcombine.low %v991_v20, %v1003_v46  ;;  %v1339_v6 = vld [vmem:[#allocation6 + $0x1dc0] sm:$0xff] }
 0x239   : > { %7975 = vmatpush2.bf16.msra.mxu1 %v13631_v3  ;;  %7935 = vmatprep.subr.bf16.mxu0 %v13224_v4  ;;  %v13080_v3 = vcombine.high %v583_v53, %v595_v56  ;;  %v13464_v4 = vcombine.high %v967_v59, %v979_v62  ;;  %v1303_v17 = vld [vmem:[#allocation6 + $0x1ca0] sm:$0xff] }
 0x23a   : > { %7976 = vmatprep.subr.bf16.mxu1 %v13608_v5  ;;  %v1327_v5 = vld [vmem:[#allocation6 + $0x1d60] sm:$0xff] }
 0x23b   : > { %v1315_v18 = vld [vmem:[#allocation6 + $0x1d00] sm:$0xff] }
 0x23c   : > { %7936 = vmatpush2.bf16.msra.mxu0 %v13223_v11  ;;  %v15891_v11 = vsub.s32 4, %v15834_v44  ;;  %v13800_v27 = vcombine.high %v1303_v17, %v1315_v18  ;;  %v13799_v39 = vcombine.low %v1303_v17, %v1315_v18  ;;  %v1255_v46 = vld [vmem:[#allocation6 + $0x1b20] sm:$0xff] }
 0x23d   : > { %7977 = vmatpush2.bf16.msra.mxu1 %v13607_v12  ;;  %7937 = vmatprep.subr.bf16.mxu0 %v13200_v13  ;;  %v13463_v12 = vcombine.low %v967_v59, %v979_v62  ;;  %v13824_v13 = vcombine.high %v1327_v5, %v1339_v6  ;;  %v1207_v17 = vld [vmem:[#allocation6 + $0x19a0] sm:$0xff] }
 0x23e   : > { %7978 = vmatprep.subr.bf16.mxu1 %v13584_v14  ;;  %v13058_v14 = vcombine.high %v560_v8, %v572_v9  ;;  %v464_v8 = vld [vmem:[#allocation6 + $0x268] sm:$0xff]  ;;  %v1219_v18 = vld [vmem:[#allocation6 + $0x1a00] sm:$0xff] }
 0x23f   : > { %v476_v9 = vld [vmem:[#allocation6 + $0x2c8] sm:$0xff] }
 0x240   : > { %7938 = vmatpush2.bf16.msra.mxu0 %v13199_v22  ;;  %v548_v22 = vld [vmem:[#allocation6 + $0x508] sm:$0xff] }
 0x241   : > { %7979 = vmatpush2.bf16.msra.mxu1 %v13583_v23  ;;  %7939 = vmatprep.subr.bf16.mxu0 %v13176_v24  ;;  %v15896_v23 = vld [vmem:[#allocation8] sm:$0xff]  ;;  %v13034_v31 = vcombine.high %v536_v19, %v548_v22 }
 0x242   : > { %7980 = vmatprep.subr.bf16.mxu1 %v13560_v25  ;;  %v1564_v24 = vrot.slane %v15896_v23, %v15891_v11  ;;  %v13823_v25 = vcombine.low %v1327_v5, %v1339_v6  ;;  %v1568_v29 = vrot.slane %v15896_v23, %v15894_v15  ;;  %v1243_v5 = vld [vmem:[#allocation6 + $0x1ac0] sm:$0xff] }
 0x244   : > { %7940 = vmatpush2.bf16.msra.mxu0 %v13175_v32  ;;  %v1279_v32 = vld [vmem:[#allocation6 + $0x1be0] sm:$0xff] }
 0x245   : > { %7981 = vmatpush2.bf16.msra.mxu1 %v13559_v34  ;;  %7941 = vmatprep.subr.bf16.mxu0 %v13152_v35  ;;  %v1291_v34 = vld [vmem:[#allocation6 + $0x1c40] sm:$0xff] }
 0x246   : > { %7982 = vmatprep.subr.bf16.mxu1 %v13536_v36  ;;  %v512_v36 = vld [vmem:[#allocation6 + $0x3e8] sm:$0xff]  ;;  %v13775_v56 = vcombine.low %v1279_v32, %v1291_v34 }
 0x247   : > { %v13010_v20 = vcombine.high %v512_v36, %v524_v37 }
 0x248   : > { %7942 = vmatpush2.bf16.msra.mxu0 %v13151_v40 }
 0x249   : > { %7983 = vmatpush2.bf16.msra.mxu1 %v13535_v41  ;;  %7943 = vmatprep.subr.bf16.mxu0 %v13128_v58  ;;  %v13033_v41 = vcombine.low %v536_v19, %v548_v22  ;;  %v13776_v58 = vcombine.high %v1279_v32, %v1291_v34  ;;  %v440_v19 = vld [vmem:[#allocation6 + $0x1a8] sm:$0xff] }
 0x24a   : > { %7984 = vmatprep.subr.bf16.mxu1 %v13512_v42  ;;  %v452_v22 = vld [vmem:[#allocation6 + $0x208] sm:$0xff] }
 0x24b   : > { %v416_v32 = vld [vmem:[#allocation6 + $0xe8] sm:$0xff] }
 0x24c   : > { %7944 = vmatpush2.bf16.msra.mxu0 %v13127_v48  ;;  %v1267_v48 = vld [vmem:[#allocation6 + $0x1b80] sm:$0xff]  ;;  %v428_v34 = vld [vmem:[#allocation6 + $0x148] sm:$0xff] }
 0x24d   : > { %7985 = vmatpush2.bf16.msra.mxu1 %v13511_v49  ;;  %7945 = vmatprep.subr.bf16.mxu0 %v13104_v50  ;;  %v488_v50 = vld [vmem:[#allocation6 + $0x328] sm:$0xff] }
 0x24e   : > { %7986 = vmatprep.subr.bf16.mxu1 %v13488_v51  ;;  %v500_v51 = vld [vmem:[#allocation6 + $0x388] sm:$0xff] }
 0x250   : > { %7946 = vmatpush2.bf16.msra.mxu0 %v13103_v1  ;;  %v13009_v1 = vcombine.low %v512_v36, %v524_v37  ;;  %v12937_v36 = vcombine.low %v440_v19, %v452_v22 }
 0x251   : > { %7987 = vmatpush2.bf16.msra.mxu1 %v13487_v2  ;;  %7947 = vmatprep.subr.bf16.mxu0 %v13080_v3  ;;  %v13752_v2 = vcombine.high %v1255_v46, %v1267_v48  ;;  %v12986_v3 = vcombine.high %v488_v50, %v500_v51 }
 0x252   : > { %7988 = vmatprep.subr.bf16.mxu1 %v13464_v4  ;;  %v1231_v4 = vld [vmem:[#allocation6 + $0x1a60] sm:$0xff] }
 0x254   : > { %7948 = vmatpush2.bf16.msra.mxu0 %v13079_v10  ;;  %v13751_v10 = vcombine.low %v1255_v46, %v1267_v48  ;;  %v1519_v46 = vld [vmem:[#allocation6 + $0x2360] sm:$0xff] }
 0x255   : > { %7989 = vmatpush2.bf16.msra.mxu1 %v13463_v12  ;;  %7999 = vmatprep.subr.bf16.mxu0 %v13824_v13  ;;  %v12985_v12 = vcombine.low %v488_v50, %v500_v51  ;;  %v13728_v13 = vcombine.high %v1231_v4, %v1243_v5  ;;  %v1531_v48 = vld [vmem:[#allocation6 + $0x23c0] sm:$0xff]  ;;  %v764_v50 = vld [vmem:[#allocation6 + $0xbc8] sm:$0xff] }
 0x256   : > { %8040 = vmatprep.subr.bf16.mxu1 %v13058_v14  ;;  %v12962_v14 = vcombine.high %v464_v8, %v476_v9 }
 0x257   : > { %v7705_v35 = vpop.f32.mrf.mxu0  ;;  %7950 = vmatmul.mubr.bf16.vlgmr.msra.gmra.mxu0 %v15812_v16 }
 0x258   : > { %v7706_v52 = vadd.f32 %v7705_v35, %v1564_v24  ;;  %7991 = vmatmul.mubr.bf16.vlgmr.msra.gmra.mxu1 %v15815_v21  ;;  %8000 = vmatpush1.bf16.msra.mxu0 %v13823_v25  ;;  %v7746_v38 = vpop.f32.mrf.mxu1  ;;  %v13727_v24 = vcombine.low %v1231_v4, %v1243_v5  ;;  %v12961_v25 = vcombine.low %v464_v8, %v476_v9  ;;  %v740_v4 = vld [vmem:[#allocation6 + $0xb08] sm:$0xff] }
 0x259   : > { %8041 = vmatpush1.bf16.msra.mxu1 %v13057_v26  ;;  %v7707_v40 = vpop.f32.mrf.mxu0  ;;  %8001 = vmatprep.subr.bf16.mxu0 %v13800_v27  ;;  %v13704_v26 = vcombine.high %v1207_v17, %v1219_v18  ;;  %v12938_v27 = vcombine.high %v440_v19, %v452_v22  ;;  %v13703_v35 = vcombine.low %v1207_v17, %v1219_v18 }
 0x25a   : > { %v7708_v42 = vadd.f32 %v7707_v40, %v1568_v29  ;;  %v15904_v43 = vadd.f32 %v7746_v38, %v7706_v52  ;;  %v7748_v45 = vpop.f32.mrf.mxu1  ;;  %8042 = vmatprep.subr.bf16.mxu1 %v13034_v31  ;;  %8031 = vmatprep.mubr.bf16.mxu0 %v15817_v28  ;;  %v1183_v29 = vld [vmem:[#allocation6 + $0x18e0] sm:$0xff]  ;;  %v12914_v52 = vcombine.high %v416_v32, %v428_v34  ;;  %v392_v40 = vld [vmem:[#allocation6 + $0x28] sm:$0xff] }
 0x25b   : > { %v7709_v49 = vpop.f32.mrf.mxu0  ;;  %8072 = vmatprep.mubr.bf16.mxu1 %v15803_v57  ;;  %v1195_v31 = vld [vmem:[#allocation6 + $0x1940] sm:$0xff]  ;;  %v14015_v5 = vcombine.low %v1519_v46, %v1531_v48 }
 0x25c   : > { %v15908_v53 = vadd.f32 %v7748_v45, %v7708_v42  ;;  %8002 = vmatpush1.bf16.msra.mxu0 %v13799_v39  ;;  %v7750_v59 = vpop.f32.mrf.mxu1  ;;  %v13680_v37 = vcombine.high %v1183_v29, %v1195_v31  ;;  %v1159_v38 = vld [vmem:[#allocation6 + $0x1820] sm:$0xff]  ;;  %v12913_v42 = vcombine.low %v416_v32, %v428_v34  ;;  %v752_v49 = vld [vmem:[#allocation6 + $0xb68] sm:$0xff] }
 0x25d   : > { %8043 = vmatpush1.bf16.msra.mxu1 %v13033_v41  ;;  %v7710_v62 = vpop.f32.mrf.mxu0  ;;  %8003 = vmatprep.subr.bf16.mxu0 %v13776_v58  ;;  %v1171_v39 = vld [vmem:[#allocation6 + $0x1880] sm:$0xff]  ;;  %v404_v41 = vld [vmem:[#allocation6 + $0x88] sm:$0xff]  ;;  %v13679_v58 = vcombine.low %v1183_v29, %v1195_v31  ;;  %v14016_v59 = vcombine.high %v1519_v46, %v1531_v48 }
 0x25e   : > { %8044 = vmatprep.subr.bf16.mxu1 %v13010_v20  ;;  %v7751_v6 = vpop.f32.mrf.mxu1  ;;  %v13656_v45 = vcombine.high %v1159_v38, %v1171_v39  ;;  %v12890_v20 = vcombine.high %v392_v40, %v404_v41  ;;  %v13655_v51 = vcombine.low %v1159_v38, %v1171_v39  ;;  %v13250_v62 = vcombine.high %v752_v49, %v764_v50 }
 0x25f   : > { %v13249_v6 = vcombine.low %v752_v49, %v764_v50 }
 0x260   : > { %8004 = vmatpush1.bf16.msra.mxu0 %v13775_v56  ;;  %v12889_v56 = vcombine.low %v392_v40, %v404_v41 }
 0x261   : > { %8045 = vmatpush1.bf16.msra.mxu1 %v13009_v1  ;;  %8005 = vmatprep.subr.bf16.mxu0 %v13752_v2  ;;  %v1495_v1 = vld [vmem:[#allocation6 + $0x22a0] sm:$0xff] }
 0x262   : > { %8046 = vmatprep.subr.bf16.mxu1 %v12986_v3  ;;  %v1507_v2 = vld [vmem:[#allocation6 + $0x2300] sm:$0xff]  ;;  %v728_v3 = vld [vmem:[#allocation6 + $0xaa8] sm:$0xff] }
 0x263   : > { %v13992_v8 = vcombine.high %v1495_v1, %v1507_v2  ;;  %v13226_v9 = vcombine.high %v728_v3, %v740_v4  ;;  %v13991_v17 = vcombine.low %v1495_v1, %v1507_v2  ;;  %v13225_v18 = vcombine.low %v728_v3, %v740_v4 }
 0x264   : > { %8006 = vmatpush1.bf16.msra.mxu0 %v13751_v10  ;;  %v1471_v10 = vld [vmem:[#allocation6 + $0x21e0] sm:$0xff] }
 0x265   : > { %8047 = vmatpush1.bf16.msra.mxu1 %v12985_v12  ;;  %8007 = vmatprep.subr.bf16.mxu0 %v13728_v13  ;;  %v1483_v12 = vld [vmem:[#allocation6 + $0x2240] sm:$0xff]  ;;  %v704_v13 = vld [vmem:[#allocation6 + $0x9e8] sm:$0xff] }
 0x266   : > { %8048 = vmatprep.subr.bf16.mxu1 %v12962_v14  ;;  %v716_v14 = vld [vmem:[#allocation6 + $0xa48] sm:$0xff]  ;;  %v13968_v19 = vcombine.high %v1471_v10, %v1483_v12  ;;  %v13967_v29 = vcombine.low %v1471_v10, %v1483_v12 }
 0x267   : > { %v13202_v22 = vcombine.high %v704_v13, %v716_v14  ;;  %v13201_v31 = vcombine.low %v704_v13, %v716_v14 }
 0x268   : > { %8008 = vmatpush1.bf16.msra.mxu0 %v13727_v24  ;;  %v1447_v24 = vld [vmem:[#allocation6 + $0x2120] sm:$0xff] }
 0x269   : > { %8049 = vmatpush1.bf16.msra.mxu1 %v12961_v25  ;;  %8009 = vmatprep.subr.bf16.mxu0 %v13704_v26  ;;  %v1459_v25 = vld [vmem:[#allocation6 + $0x2180] sm:$0xff]  ;;  %v680_v26 = vld [vmem:[#allocation6 + $0x928] sm:$0xff] }
 0x26a   : > { %8050 = vmatprep.subr.bf16.mxu1 %v12938_v27  ;;  %v692_v27 = vld [vmem:[#allocation6 + $0x988] sm:$0xff]  ;;  %v13944_v32 = vcombine.high %v1447_v24, %v1459_v25  ;;  %v13943_v38 = vcombine.low %v1447_v24, %v1459_v25 }
 0x26b   : > { %v13178_v34 = vcombine.high %v680_v26, %v692_v27  ;;  %v13177_v39 = vcombine.low %v680_v26, %v692_v27 }
 0x26c   : > { %8010 = vmatpush1.bf16.msra.mxu0 %v13703_v35  ;;  %v1423_v35 = vld [vmem:[#allocation6 + $0x2060] sm:$0xff] }
 0x26d   : > { %8051 = vmatpush1.bf16.msra.mxu1 %v12937_v36  ;;  %8011 = vmatprep.subr.bf16.mxu0 %v13680_v37  ;;  %v1435_v36 = vld [vmem:[#allocation6 + $0x20c0] sm:$0xff]  ;;  %v656_v37 = vld [vmem:[#allocation6 + $0x868] sm:$0xff] }
 0x26e   : > { %8052 = vmatprep.subr.bf16.mxu1 %v12914_v52  ;;  %v668_v52 = vld [vmem:[#allocation6 + $0x8c8] sm:$0xff]  ;;  %v13920_v40 = vcombine.high %v1423_v35, %v1435_v36  ;;  %v13919_v46 = vcombine.low %v1423_v35, %v1435_v36 }
 0x26f   : > { %v13154_v41 = vcombine.high %v656_v37, %v668_v52  ;;  %v13153_v48 = vcombine.low %v656_v37, %v668_v52 }
 0x270   : > { %8012 = vmatpush1.bf16.msra.mxu0 %v13679_v58  ;;  %v1399_v58 = vld [vmem:[#allocation6 + $0x1fa0] sm:$0xff] }
 0x271   : > { %8053 = vmatpush1.bf16.msra.mxu1 %v12913_v42  ;;  %8013 = vmatprep.subr.bf16.mxu0 %v13656_v45  ;;  %v1411_v42 = vld [vmem:[#allocation6 + $0x2000] sm:$0xff]  ;;  %v632_v45 = vld [vmem:[#allocation6 + $0x7a8] sm:$0xff] }
 0x272   : > { %8054 = vmatprep.subr.bf16.mxu1 %v12890_v20  ;;  %v644_v20 = vld [vmem:[#allocation6 + $0x808] sm:$0xff]  ;;  %v13896_v49 = vcombine.high %v1399_v58, %v1411_v42  ;;  %v13895_v1 = vcombine.low %v1399_v58, %v1411_v42 }
 0x273   : > { %v13130_v50 = vcombine.high %v632_v45, %v644_v20  ;;  %v13129_v2 = vcombine.low %v632_v45, %v644_v20  ;;  %v1292_v58 = vld [vmem:[#allocation6 + $0x1c48] sm:$0xff] }
 0x274   : > { %8014 = vmatpush1.bf16.msra.mxu0 %v13655_v51  ;;  %v1375_v51 = vld [vmem:[#allocation6 + $0x1ee0] sm:$0xff] }
 0x275   : > { %8055 = vmatpush1.bf16.msra.mxu1 %v12889_v56  ;;  %8015 = vmatprep.subr.bf16.mxu0 %v14016_v59  ;;  %v1387_v56 = vld [vmem:[#allocation6 + $0x1f40] sm:$0xff]  ;;  %v608_v59 = vld [vmem:[#allocation6 + $0x6e8] sm:$0xff] }
 0x276   : > { %8056 = vmatprep.subr.bf16.mxu1 %v13250_v62  ;;  %v620_v62 = vld [vmem:[#allocation6 + $0x748] sm:$0xff]  ;;  %v13872_v3 = vcombine.high %v1375_v51, %v1387_v56  ;;  %v13871_v10 = vcombine.low %v1375_v51, %v1387_v56 }
 0x277   : > { %v13106_v4 = vcombine.high %v608_v59, %v620_v62  ;;  %v13105_v12 = vcombine.low %v608_v59, %v620_v62  ;;  %v872_v56 = vld [vmem:[#allocation6 + $0xf28] sm:$0xff] }
 0x278   : > { %8016 = vmatpush2.bf16.msra.mxu0 %v14015_v5  ;;  %v1351_v5 = vld [vmem:[#allocation6 + $0x1e20] sm:$0xff]  ;;  %v884_v59 = vld [vmem:[#allocation6 + $0xf88] sm:$0xff] }
 0x279   : > { %8057 = vmatpush2.bf16.msra.mxu1 %v13249_v6  ;;  %8017 = vmatprep.subr.bf16.mxu0 %v13992_v8  ;;  %v1363_v6 = vld [vmem:[#allocation6 + $0x1e80] sm:$0xff]  ;;  %v584_v8 = vld [vmem:[#allocation6 + $0x628] sm:$0xff] }
 0x27a   : > { %8058 = vmatprep.subr.bf16.mxu1 %v13226_v9  ;;  %v596_v9 = vld [vmem:[#allocation6 + $0x688] sm:$0xff]  ;;  %v13848_v13 = vcombine.high %v1351_v5, %v1363_v6  ;;  %v13847_v24 = vcombine.low %v1351_v5, %v1363_v6  ;;  %v13370_v6 = vcombine.high %v872_v56, %v884_v59 }
 0x27b   : > { %v13082_v14 = vcombine.high %v584_v8, %v596_v9  ;;  %v13081_v25 = vcombine.low %v584_v8, %v596_v9  ;;  %v848_v9 = vld [vmem:[#allocation6 + $0xe68] sm:$0xff] }
 0x27c   : > { %8018 = vmatpush2.bf16.msra.mxu0 %v13991_v17  ;;  %v944_v17 = vld [vmem:[#allocation6 + $0x1168] sm:$0xff] }
 0x27d   : > { %8059 = vmatpush2.bf16.msra.mxu1 %v13225_v18  ;;  %8019 = vmatprep.subr.bf16.mxu0 %v13968_v19  ;;  %v956_v18 = vld [vmem:[#allocation6 + $0x11c8] sm:$0xff] }
 0x27e   : > { %8060 = vmatprep.subr.bf16.mxu1 %v13202_v22  ;;  %v1328_v19 = vld [vmem:[#allocation6 + $0x1d68] sm:$0xff]  ;;  %v13442_v26 = vcombine.high %v944_v17, %v956_v18  ;;  %v13441_v35 = vcombine.low %v944_v17, %v956_v18  ;;  %v13369_v17 = vcombine.low %v872_v56, %v884_v59 }
 0x27f   : > { %v1340_v22 = vld [vmem:[#allocation6 + $0x1dc8] sm:$0xff] }
 0x280   : > { %8020 = vmatpush2.bf16.msra.mxu0 %v13967_v29  ;;  %v13826_v27 = vcombine.high %v1328_v19, %v1340_v22  ;;  %v920_v29 = vld [vmem:[#allocation6 + $0x10a8] sm:$0xff]  ;;  %v13825_v36 = vcombine.low %v1328_v19, %v1340_v22 }
 0x281   : > { %8061 = vmatpush2.bf16.msra.mxu1 %v13201_v31  ;;  %8021 = vmatprep.subr.bf16.mxu0 %v13944_v32  ;;  %v932_v31 = vld [vmem:[#allocation6 + $0x1108] sm:$0xff] }
 0x282   : > { %8062 = vmatprep.subr.bf16.mxu1 %v13178_v34  ;;  %v1304_v32 = vld [vmem:[#allocation6 + $0x1ca8] sm:$0xff]  ;;  %v13418_v37 = vcombine.high %v920_v29, %v932_v31  ;;  %v13417_v45 = vcombine.low %v920_v29, %v932_v31 }
 0x283   : > { %v1316_v34 = vld [vmem:[#allocation6 + $0x1d08] sm:$0xff] }
 0x284   : > { %8022 = vmatpush2.bf16.msra.mxu0 %v13943_v38  ;;  %v13802_v52 = vcombine.high %v1304_v32, %v1316_v34  ;;  %v896_v38 = vld [vmem:[#allocation6 + $0xfe8] sm:$0xff] }
 0x285   : > { %8063 = vmatpush2.bf16.msra.mxu1 %v13177_v39  ;;  %8023 = vmatprep.subr.bf16.mxu0 %v13920_v40  ;;  %v908_v39 = vld [vmem:[#allocation6 + $0x1048] sm:$0xff] }
 0x286   : > { %8064 = vmatprep.subr.bf16.mxu1 %v13154_v41  ;;  %v1280_v41 = vld [vmem:[#allocation6 + $0x1be8] sm:$0xff] }
 0x287   : > { %v13778_v51 = vcombine.high %v1280_v41, %v1292_v58 }
 0x288   : > { %8024 = vmatpush2.bf16.msra.mxu0 %v13919_v46 }
 0x289   : > { %8065 = vmatpush2.bf16.msra.mxu1 %v13153_v48  ;;  %8025 = vmatprep.subr.bf16.mxu0 %v13896_v49  ;;  %v13801_v48 = vcombine.low %v1304_v32, %v1316_v34  ;;  %v13394_v49 = vcombine.high %v896_v38, %v908_v39 }
 0x28a   : > { %8066 = vmatprep.subr.bf16.mxu1 %v13130_v50 }
 0x28c   : > { %8026 = vmatpush2.bf16.msra.mxu0 %v13895_v1  ;;  %v1256_v1 = vld [vmem:[#allocation6 + $0x1b28] sm:$0xff] }
 0x28d   : > { %8067 = vmatpush2.bf16.msra.mxu1 %v13129_v2  ;;  %8027 = vmatprep.subr.bf16.mxu0 %v13872_v3  ;;  %v1268_v2 = vld [vmem:[#allocation6 + $0x1b88] sm:$0xff]  ;;  %v13393_v3 = vcombine.low %v896_v38, %v908_v39 }
 0x28e   : > { %8068 = vmatprep.subr.bf16.mxu1 %v13106_v4  ;;  %v13754_v8 = vcombine.high %v1256_v1, %v1268_v2  ;;  %v13753_v18 = vcombine.low %v1256_v1, %v1268_v2  ;;  %v1148_v1 = vld [vmem:[#allocation6 + $0x17c8] sm:$0xff] }
 0x28f   : > { %v1520_v2 = vld [vmem:[#allocation6 + $0x2368] sm:$0xff] }
 0x290   : > { %8028 = vmatpush2.bf16.msra.mxu0 %v13871_v10  ;;  %v860_v10 = vld [vmem:[#allocation6 + $0xec8] sm:$0xff] }
 0x291   : > { %8069 = vmatpush2.bf16.msra.mxu1 %v13105_v12  ;;  %8029 = vmatprep.subr.bf16.mxu0 %v13848_v13  ;;  %v1232_v13 = vld [vmem:[#allocation6 + $0x1a68] sm:$0xff]  ;;  %v13346_v19 = vcombine.high %v848_v9, %v860_v10  ;;  %v13345_v29 = vcombine.low %v848_v9, %v860_v10 }
 0x292   : > { %8070 = vmatprep.subr.bf16.mxu1 %v13082_v14  ;;  %v1244_v14 = vld [vmem:[#allocation6 + $0x1ac8] sm:$0xff] }
 0x293   : > { %v13730_v22 = vcombine.high %v1232_v13, %v1244_v14  ;;  %v13729_v31 = vcombine.low %v1232_v13, %v1244_v14  ;;  %v1124_v9 = vld [vmem:[#allocation6 + $0x1708] sm:$0xff] }
 0x294   : > { %8030 = vmatpush2.bf16.msra.mxu0 %v13847_v24  ;;  %v824_v24 = vld [vmem:[#allocation6 + $0xda8] sm:$0xff] }
 0x295   : > { %8071 = vmatpush2.bf16.msra.mxu1 %v13081_v25  ;;  %8081 = vmatprep.subr.bf16.mxu0 %v13442_v26  ;;  %v836_v25 = vld [vmem:[#allocation6 + $0xe08] sm:$0xff] }
 0x296   : > { %8122 = vmatprep.subr.bf16.mxu1 %v13826_v27  ;;  %v1208_v26 = vld [vmem:[#allocation6 + $0x19a8] sm:$0xff]  ;;  %v13322_v32 = vcombine.high %v824_v24, %v836_v25  ;;  %v13321_v38 = vcombine.low %v824_v24, %v836_v25 }
 0x297   : > { %v7787_v40 = vpop.f32.mrf.mxu0  ;;  %8032 = vmatmul.mubr.bf16.vlgmr.msra.gmra.mxu0 %v15824_v33  ;;  %v1220_v27 = vld [vmem:[#allocation6 + $0x1a08] sm:$0xff] }
 0x298   : > { %v15912_v42 = vadd.f32 %v7787_v40, %v15904_v43  ;;  %8073 = vmatmul.mubr.bf16.vlgmr.msra.gmra.mxu1 %v15812_v16  ;;  %8082 = vmatpush1.bf16.msra.mxu0 %v13441_v35  ;;  %v15915_v20 = vpop.f32.mrf.mxu1  ;;  %v13706_v34 = vcombine.high %v1208_v26, %v1220_v27  ;;  %v800_v35 = vld [vmem:[#allocation6 + $0xce8] sm:$0xff]  ;;  %v13705_v39 = vcombine.low %v1208_v26, %v1220_v27 }
 0x299   : > { %8123 = vmatpush1.bf16.msra.mxu1 %v13825_v36  ;;  %v7789_v46 = vpop.f32.mrf.mxu0  ;;  %8083 = vmatprep.subr.bf16.mxu0 %v13418_v37  ;;  %v812_v36 = vld [vmem:[#allocation6 + $0xd48] sm:$0xff] }
 0x29a   : > { %v15918_v50 = vadd.f32 %v7789_v46, %v15908_v53  ;;  %8124 = vmatprep.subr.bf16.mxu1 %v13802_v52  ;;  %v15920_v43 = vpop.f32.mrf.mxu1  ;;  %8113 = vmatprep.mubr.bf16.mxu0 %v15806_v61  ;;  %v13777_v53 = vcombine.low %v1280_v41, %v1292_v58  ;;  %v1184_v37 = vld [vmem:[#allocation6 + $0x18e8] sm:$0xff]  ;;  %v13298_v40 = vcombine.high %v800_v35, %v812_v36 }
 0x29b   : > { %v7791_v62 = vpop.f32.mrf.mxu0  ;;  %8154 = vmatprep.mubr.bf16.mxu1 %v15817_v28  ;;  %v1196_v52 = vld [vmem:[#allocation6 + $0x1948] sm:$0xff] }
 0x29c   : > { %8084 = vmatpush1.bf16.msra.mxu0 %v13417_v45  ;;  %v7832_v4 = vpop.f32.mrf.mxu1  ;;  %v13682_v41 = vcombine.high %v1184_v37, %v1196_v52  ;;  %v776_v58 = vld [vmem:[#allocation6 + $0xc28] sm:$0xff] }
 0x29d   : > { %8125 = vmatpush1.bf16.msra.mxu1 %v13801_v48  ;;  %v7792_v5 = vpop.f32.mrf.mxu0  ;;  %8085 = vmatprep.subr.bf16.mxu0 %v13394_v49  ;;  %v788_v45 = vld [vmem:[#allocation6 + $0xc88] sm:$0xff]  ;;  %v13297_v49 = vcombine.low %v800_v35, %v812_v36 }
 0x29e   : > { %8126 = vmatprep.subr.bf16.mxu1 %v13778_v51  ;;  %v7833_v12 = vpop.f32.mrf.mxu1  ;;  %v1160_v46 = vld [vmem:[#allocation6 + $0x1828] sm:$0xff]  ;;  %v13681_v51 = vcombine.low %v1184_v37, %v1196_v52  ;;  %v13274_v56 = vcombine.high %v776_v58, %v788_v45  ;;  %v13273_v4 = vcombine.low %v776_v58, %v788_v45 }
 0x29f   : > { %v1172_v48 = vld [vmem:[#allocation6 + $0x1888] sm:$0xff] }
 0x2a0   : > { %8086 = vmatpush1.bf16.msra.mxu0 %v13393_v3  ;;  %v13658_v59 = vcombine.high %v1160_v46, %v1172_v48  ;;  %v1136_v62 = vld [vmem:[#allocation6 + $0x1768] sm:$0xff]  ;;  %v13657_v5 = vcombine.low %v1160_v46, %v1172_v48 }
 0x2a1   : > { %8127 = vmatpush1.bf16.msra.mxu1 %v13777_v53  ;;  %8087 = vmatprep.subr.bf16.mxu0 %v13370_v6  ;;  %v1532_v3 = vld [vmem:[#allocation6 + $0x23c8] sm:$0xff]  ;;  %v13634_v53 = vcombine.high %v1136_v62, %v1148_v1  ;;  %v13633_v13 = vcombine.low %v1136_v62, %v1148_v1 }
 0x2a2   : > { %8128 = vmatprep.subr.bf16.mxu1 %v13754_v8  ;;  %v14018_v6 = vcombine.high %v1520_v2, %v1532_v3  ;;  %v1112_v8 = vld [vmem:[#allocation6 + $0x16a8] sm:$0xff]  ;;  %v14017_v14 = vcombine.low %v1520_v2, %v1532_v3 }
 0x2a3   : > { %v1496_v10 = vld [vmem:[#allocation6 + $0x22a8] sm:$0xff]  ;;  %v13609_v26 = vcombine.low %v1112_v8, %v1124_v9 }
 0x2a4   : > { %8088 = vmatpush1.bf16.msra.mxu0 %v13369_v17  ;;  %v1508_v12 = vld [vmem:[#allocation6 + $0x2308] sm:$0xff]  ;;  %v13610_v17 = vcombine.high %v1112_v8, %v1124_v9 }
 0x2a5   : > { %8129 = vmatpush1.bf16.msra.mxu1 %v13753_v18  ;;  %8089 = vmatprep.subr.bf16.mxu0 %v13346_v19  ;;  %v13994_v18 = vcombine.high %v1496_v10, %v1508_v12  ;;  %v1088_v19 = vld [vmem:[#allocation6 + $0x15e8] sm:$0xff]  ;;  %v13993_v27 = vcombine.low %v1496_v10, %v1508_v12 }
 0x2a6   : > { %8130 = vmatprep.subr.bf16.mxu1 %v13730_v22  ;;  %v1100_v22 = vld [vmem:[#allocation6 + $0x1648] sm:$0xff] }
 0x2a7   : > { %v1472_v24 = vld [vmem:[#allocation6 + $0x21e8] sm:$0xff]  ;;  %v13585_v37 = vcombine.low %v1088_v19, %v1100_v22 }
 0x2a8   : > { %8090 = vmatpush1.bf16.msra.mxu0 %v13345_v29  ;;  %v1484_v25 = vld [vmem:[#allocation6 + $0x2248] sm:$0xff]  ;;  %v13586_v29 = vcombine.high %v1088_v19, %v1100_v22 }
 0x2a9   : > { %8131 = vmatpush1.bf16.msra.mxu1 %v13729_v31  ;;  %8091 = vmatprep.subr.bf16.mxu0 %v13322_v32  ;;  %v13970_v31 = vcombine.high %v1472_v24, %v1484_v25  ;;  %v1064_v32 = vld [vmem:[#allocation6 + $0x1528] sm:$0xff]  ;;  %v13969_v52 = vcombine.low %v1472_v24, %v1484_v25  ;;  %v15925_v25 = vsub.s32 6, %v15834_v44 }
 0x2aa   : > { %8132 = vmatprep.subr.bf16.mxu1 %v13706_v34  ;;  %v1076_v34 = vld [vmem:[#allocation6 + $0x1588] sm:$0xff] }
 0x2ab   : > { %v1448_v35 = vld [vmem:[#allocation6 + $0x2128] sm:$0xff]  ;;  %v13561_v46 = vcombine.low %v1064_v32, %v1076_v34 }
 0x2ac   : > { %8092 = vmatpush1.bf16.msra.mxu0 %v13321_v38  ;;  %v1460_v36 = vld [vmem:[#allocation6 + $0x2188] sm:$0xff]  ;;  %v13562_v38 = vcombine.high %v1064_v32, %v1076_v34  ;;  %v561_v32 = vld [vmem:[#allocation6 + $0x570] sm:$0xff] }
 0x2ad   : > { %8133 = vmatpush1.bf16.msra.mxu1 %v13705_v39  ;;  %8093 = vmatprep.subr.bf16.mxu0 %v13298_v40  ;;  %v13946_v39 = vcombine.high %v1448_v35, %v1460_v36  ;;  %v1040_v40 = vld [vmem:[#allocation6 + $0x1468] sm:$0xff]  ;;  %v13945_v48 = vcombine.low %v1448_v35, %v1460_v36  ;;  %v573_v34 = vld [vmem:[#allocation6 + $0x5d0] sm:$0xff] }
 0x2ae   : > { %8134 = vmatprep.subr.bf16.mxu1 %v13682_v41  ;;  %v1052_v41 = vld [vmem:[#allocation6 + $0x14c8] sm:$0xff]  ;;  %v945_v35 = vld [vmem:[#allocation6 + $0x1170] sm:$0xff] }
 0x2af   : > { %v1424_v58 = vld [vmem:[#allocation6 + $0x2068] sm:$0xff]  ;;  %v13537_v2 = vcombine.low %v1040_v40, %v1052_v41  ;;  %v957_v36 = vld [vmem:[#allocation6 + $0x11d0] sm:$0xff] }
 0x2b0   : > { %8094 = vmatpush1.bf16.msra.mxu0 %v13297_v49  ;;  %v1436_v45 = vld [vmem:[#allocation6 + $0x20c8] sm:$0xff]  ;;  %v13538_v49 = vcombine.high %v1040_v40, %v1052_v41  ;;  %v537_v41 = vld [vmem:[#allocation6 + $0x4b0] sm:$0xff] }
 0x2b1   : > { %8135 = vmatpush1.bf16.msra.mxu1 %v13681_v51  ;;  %8095 = vmatprep.subr.bf16.mxu0 %v13274_v56  ;;  %v13922_v51 = vcombine.high %v1424_v58, %v1436_v45  ;;  %v1016_v56 = vld [vmem:[#allocation6 + $0x13a8] sm:$0xff]  ;;  %v13921_v3 = vcombine.low %v1424_v58, %v1436_v45  ;;  %v549_v58 = vld [vmem:[#allocation6 + $0x510] sm:$0xff] }
 0x2b2   : > { %8136 = vmatprep.subr.bf16.mxu1 %v13658_v59  ;;  %v1028_v59 = vld [vmem:[#allocation6 + $0x1408] sm:$0xff]  ;;  %v921_v45 = vld [vmem:[#allocation6 + $0x10b0] sm:$0xff] }
 0x2b3   : > { %v1400_v62 = vld [vmem:[#allocation6 + $0x1fa8] sm:$0xff]  ;;  %v13513_v10 = vcombine.low %v1016_v56, %v1028_v59 }
 0x2b4   : > { %8096 = vmatpush1.bf16.msra.mxu0 %v13273_v4  ;;  %v1412_v1 = vld [vmem:[#allocation6 + $0x2008] sm:$0xff]  ;;  %v13514_v4 = vcombine.high %v1016_v56, %v1028_v59  ;;  %v13036_v56 = vcombine.high %v537_v41, %v549_v58 }
 0x2b5   : > { %8137 = vmatpush1.bf16.msra.mxu1 %v13657_v5  ;;  %8097 = vmatprep.subr.bf16.mxu0 %v13634_v53  ;;  %v13898_v5 = vcombine.high %v1400_v62, %v1412_v1  ;;  %v992_v53 = vld [vmem:[#allocation6 + $0x12e8] sm:$0xff]  ;;  %v13897_v12 = vcombine.low %v1400_v62, %v1412_v1  ;;  %v513_v1 = vld [vmem:[#allocation6 + $0x3f0] sm:$0xff] }
 0x2b6   : > { %8138 = vmatprep.subr.bf16.mxu1 %v14018_v6  ;;  %v1004_v6 = vld [vmem:[#allocation6 + $0x1348] sm:$0xff] }
 0x2b7   : > { %v1376_v8 = vld [vmem:[#allocation6 + $0x1ee8] sm:$0xff]  ;;  %v13489_v24 = vcombine.low %v992_v53, %v1004_v6 }
 0x2b8   : > { %8098 = vmatpush2.bf16.msra.mxu0 %v13633_v13  ;;  %v1388_v9 = vld [vmem:[#allocation6 + $0x1f48] sm:$0xff]  ;;  %v13490_v13 = vcombine.high %v992_v53, %v1004_v6  ;;  %v13035_v53 = vcombine.low %v537_v41, %v549_v58 }
 0x2b9   : > { %8139 = vmatpush2.bf16.msra.mxu1 %v14017_v14  ;;  %8099 = vmatprep.subr.bf16.mxu0 %v13610_v17  ;;  %v13874_v14 = vcombine.high %v1376_v8, %v1388_v9  ;;  %v968_v17 = vld [vmem:[#allocation6 + $0x1228] sm:$0xff] }
 0x2ba   : > { %8140 = vmatprep.subr.bf16.mxu1 %v13994_v18  ;;  %v980_v18 = vld [vmem:[#allocation6 + $0x1288] sm:$0xff] }
 0x2bb   : > { %v1352_v19 = vld [vmem:[#allocation6 + $0x1e28] sm:$0xff] }
 0x2bc   : > { %8100 = vmatpush2.bf16.msra.mxu0 %v13609_v26  ;;  %v1364_v22 = vld [vmem:[#allocation6 + $0x1e88] sm:$0xff]  ;;  %v13873_v26 = vcombine.low %v1376_v8, %v1388_v9 }
 0x2bd   : > { %8141 = vmatpush2.bf16.msra.mxu1 %v13993_v27  ;;  %8101 = vmatprep.subr.bf16.mxu0 %v13586_v29  ;;  %v13466_v27 = vcombine.high %v968_v17, %v980_v18  ;;  %v15928_v29 = vsub.s32 7, %v15834_v44  ;;  %v13444_v44 = vcombine.high %v945_v35, %v957_v36 }
 0x2be   : > { %8142 = vmatprep.subr.bf16.mxu1 %v13970_v31  ;;  %v13850_v31 = vcombine.high %v1352_v19, %v1364_v22 }
 0x2bf   : > { %v1576_v40 = vrot.slane %v15896_v23, %v15928_v29 }
 0x2c0   : > { %8102 = vmatpush2.bf16.msra.mxu0 %v13585_v37  ;;  %v1572_v37 = vrot.slane %v15896_v23, %v15925_v25  ;;  %v525_v23 = vld [vmem:[#allocation6 + $0x450] sm:$0xff] }
 0x2c1   : > { %8143 = vmatpush2.bf16.msra.mxu1 %v13969_v52  ;;  %8103 = vmatprep.subr.bf16.mxu0 %v13562_v38  ;;  %v13465_v52 = vcombine.low %v968_v17, %v980_v18  ;;  %v13849_v38 = vcombine.low %v1352_v19, %v1364_v22  ;;  %v7831_v59 = vadd.f32 %v15920_v43, %v1576_v40  ;;  %v501_v17 = vld [vmem:[#allocation6 + $0x390] sm:$0xff] }
 0x2c2   : > { %8144 = vmatprep.subr.bf16.mxu1 %v13946_v39  ;;  %v13060_v39 = vcombine.high %v561_v32, %v573_v34  ;;  %v13012_v43 = vcombine.high %v513_v1, %v525_v23  ;;  %v873_v19 = vld [vmem:[#allocation6 + $0xf30] sm:$0xff] }
 0x2c3   : > { %v885_v22 = vld [vmem:[#allocation6 + $0xf90] sm:$0xff] }
 0x2c4   : > { %8104 = vmatpush2.bf16.msra.mxu0 %v13561_v46  ;;  %v933_v46 = vld [vmem:[#allocation6 + $0x1110] sm:$0xff] }
 0x2c5   : > { %8145 = vmatpush2.bf16.msra.mxu1 %v13945_v48  ;;  %8105 = vmatprep.subr.bf16.mxu0 %v13538_v49  ;;  %v7829_v48 = vadd.f32 %v15915_v20, %v1572_v37  ;;  %v13059_v49 = vcombine.low %v561_v32, %v573_v34  ;;  %v13420_v62 = vcombine.high %v921_v45, %v933_v46  ;;  %v477_v37 = vld [vmem:[#allocation6 + $0x2d0] sm:$0xff] }
 0x2c6   : > { %8146 = vmatprep.subr.bf16.mxu1 %v13922_v51  ;;  %v13443_v51 = vcombine.low %v945_v35, %v957_v36  ;;  %v13419_v8 = vcombine.low %v921_v45, %v933_v46  ;;  %v13372_v35 = vcombine.high %v873_v19, %v885_v22  ;;  %v465_v36 = vld [vmem:[#allocation6 + $0x270] sm:$0xff] }
 0x2c7   : > { %v12964_v41 = vcombine.high %v465_v36, %v477_v37  ;;  %v441_v45 = vld [vmem:[#allocation6 + $0x1b0] sm:$0xff] }
 0x2c8   : > { %8106 = vmatpush2.bf16.msra.mxu0 %v13537_v2  ;;  %v453_v46 = vld [vmem:[#allocation6 + $0x210] sm:$0xff] }
 0x2c9   : > { %8147 = vmatpush2.bf16.msra.mxu1 %v13921_v3  ;;  %8107 = vmatprep.subr.bf16.mxu0 %v13514_v4  ;;  %v897_v3 = vld [vmem:[#allocation6 + $0xff0] sm:$0xff] }
 0x2ca   : > { %8148 = vmatprep.subr.bf16.mxu1 %v13898_v5  ;;  %v909_v4 = vld [vmem:[#allocation6 + $0x1050] sm:$0xff] }
 0x2cb   : > { %v13395_v32 = vcombine.low %v897_v3, %v909_v4 }
 0x2cc   : > { %8108 = vmatpush2.bf16.msra.mxu0 %v13513_v10 }
 0x2cd   : > { %8149 = vmatpush2.bf16.msra.mxu1 %v13897_v12  ;;  %8109 = vmatprep.subr.bf16.mxu0 %v13490_v13  ;;  %v13396_v13 = vcombine.high %v897_v3, %v909_v4  ;;  %v813_v3 = vld [vmem:[#allocation6 + $0xd50] sm:$0xff]  ;;  %v12939_v4 = vcombine.low %v441_v45, %v453_v46 }
 0x2ce   : > { %8150 = vmatprep.subr.bf16.mxu1 %v13874_v14  ;;  %v489_v14 = vld [vmem:[#allocation6 + $0x330] sm:$0xff] }
 0x2cf   : > { %v12988_v34 = vcombine.high %v489_v14, %v501_v17  ;;  %v12987_v40 = vcombine.low %v489_v14, %v501_v17 }
 0x2d0   : > { %8110 = vmatpush2.bf16.msra.mxu0 %v13489_v24 }
 0x2d1   : > { %8151 = vmatpush2.bf16.msra.mxu1 %v13873_v26  ;;  %8111 = vmatprep.subr.bf16.mxu0 %v13466_v27  ;;  %v13011_v26 = vcombine.low %v513_v1, %v525_v23  ;;  %v417_v1 = vld [vmem:[#allocation6 + $0xf0] sm:$0xff] }
 0x2d2   : > { %8152 = vmatprep.subr.bf16.mxu1 %v13850_v31  ;;  %v429_v23 = vld [vmem:[#allocation6 + $0x150] sm:$0xff] }
 0x2d4   : > { %8112 = vmatpush2.bf16.msra.mxu0 %v13465_v52 }
 0x2d5   : > { %8153 = vmatpush2.bf16.msra.mxu1 %v13849_v38  ;;  %8163 = vmatprep.subr.bf16.mxu0 %v13060_v39  ;;  %v849_v38 = vld [vmem:[#allocation6 + $0xe70] sm:$0xff] }
 0x2d6   : > { %8204 = vmatprep.subr.bf16.mxu1 %v13444_v44  ;;  %v861_v39 = vld [vmem:[#allocation6 + $0xed0] sm:$0xff]  ;;  %v13371_v44 = vcombine.low %v873_v19, %v885_v22 }
 0x2d7   : > { %v7869_v2 = vpop.f32.mrf.mxu0  ;;  %8114 = vmatmul.mubr.bf16.vlgmr.msra.gmra.mxu0 %v15815_v21  ;;  %v13348_v58 = vcombine.high %v849_v38, %v861_v39  ;;  %v765_v19 = vld [vmem:[#allocation6 + $0xbd0] sm:$0xff] }
 0x2d8   : > { %v7870_v5 = vadd.f32 %v7869_v2, %v7829_v48  ;;  %8155 = vmatmul.mubr.bf16.vlgmr.msra.gmra.mxu1 %v15824_v33  ;;  %8164 = vmatpush1.bf16.msra.mxu0 %v13059_v49  ;;  %v7910_v20 = vpop.f32.mrf.mxu1  ;;  %v825_v48 = vld [vmem:[#allocation6 + $0xdb0] sm:$0xff] }
 0x2d9   : > { %8205 = vmatpush1.bf16.msra.mxu1 %v13443_v51  ;;  %v7871_v6 = vpop.f32.mrf.mxu0  ;;  %8165 = vmatprep.subr.bf16.mxu0 %v13036_v56  ;;  %v837_v49 = vld [vmem:[#allocation6 + $0xe10] sm:$0xff]  ;;  %v12963_v51 = vcombine.low %v465_v36, %v477_v37  ;;  %v13347_v56 = vcombine.low %v849_v38, %v861_v39 }
 0x2da   : > { %v7872_v9 = vadd.f32 %v7871_v6, %v7831_v59  ;;  %v15938_v10 = vadd.f32 %v7910_v20, %v7870_v5  ;;  %v7912_v12 = vpop.f32.mrf.mxu1  ;;  %8206 = vmatprep.subr.bf16.mxu1 %v13420_v62  ;;  %8195 = vmatprep.mubr.bf16.mxu0 %v15803_v57  ;;  %v12940_v59 = vcombine.high %v441_v45, %v453_v46  ;;  %v801_v2 = vld [vmem:[#allocation6 + $0xcf0] sm:$0xff] }
 0x2db   : > { %v7873_v18 = vpop.f32.mrf.mxu0  ;;  %8236 = vmatprep.mubr.bf16.mxu1 %v15806_v61  ;;  %v13324_v62 = vcombine.high %v825_v48, %v837_v49  ;;  %v13323_v5 = vcombine.low %v825_v48, %v837_v49  ;;  %v12916_v20 = vcombine.high %v417_v1, %v429_v23  ;;  %v393_v6 = vld [vmem:[#allocation6 + $0x30] sm:$0xff] }
 0x2dc   : > { %v15942_v24 = vadd.f32 %v7912_v12, %v7872_v9  ;;  %8166 = vmatpush1.bf16.msra.mxu0 %v13035_v53  ;;  %v7914_v27 = vpop.f32.mrf.mxu1  ;;  %v13300_v53 = vcombine.high %v801_v2, %v813_v3  ;;  %v789_v9 = vld [vmem:[#allocation6 + $0xc90] sm:$0xff]  ;;  %v12915_v12 = vcombine.low %v417_v1, %v429_v23 }
 0x2dd   : > { %8207 = vmatpush1.bf16.msra.mxu1 %v13419_v8  ;;  %v7874_v31 = vpop.f32.mrf.mxu0  ;;  %8167 = vmatprep.subr.bf16.mxu0 %v13012_v43  ;;  %v405_v8 = vld [vmem:[#allocation6 + $0x90] sm:$0xff] }
 0x2de   : > { %8208 = vmatprep.subr.bf16.mxu1 %v13396_v13  ;;  %v7915_v52 = vpop.f32.mrf.mxu1  ;;  %v777_v43 = vld [vmem:[#allocation6 + $0xc30] sm:$0xff]  ;;  %v13299_v13 = vcombine.low %v801_v2, %v813_v3  ;;  %v12892_v14 = vcombine.high %v393_v6, %v405_v8  ;;  %v12891_v27 = vcombine.low %v393_v6, %v405_v8 }
 0x2df   : > { %v13276_v17 = vcombine.high %v777_v43, %v789_v9  ;;  %v753_v18 = vld [vmem:[#allocation6 + $0xb70] sm:$0xff]  ;;  %v13275_v31 = vcombine.low %v777_v43, %v789_v9 }
 0x2e0   : > { %8168 = vmatpush1.bf16.msra.mxu0 %v13011_v26  ;;  %v1137_v22 = vld [vmem:[#allocation6 + $0x1770] sm:$0xff]  ;;  %v13251_v38 = vcombine.low %v753_v18, %v765_v19 }
 0x2e1   : > { %8209 = vmatpush1.bf16.msra.mxu1 %v13395_v32  ;;  %8169 = vmatprep.subr.bf16.mxu0 %v12988_v34  ;;  %v1149_v26 = vld [vmem:[#allocation6 + $0x17d0] sm:$0xff]  ;;  %v13252_v32 = vcombine.high %v753_v18, %v765_v19 }
 0x2e2   : > { %8210 = vmatprep.subr.bf16.mxu1 %v13372_v35  ;;  %v13636_v34 = vcombine.high %v1137_v22, %v1149_v26  ;;  %v729_v35 = vld [vmem:[#allocation6 + $0xab0] sm:$0xff]  ;;  %v13635_v39 = vcombine.low %v1137_v22, %v1149_v26 }
 0x2e3   : > { %v741_v36 = vld [vmem:[#allocation6 + $0xb10] sm:$0xff] }
 0x2e4   : > { %8170 = vmatpush1.bf16.msra.mxu0 %v12987_v40  ;;  %v1113_v37 = vld [vmem:[#allocation6 + $0x16b0] sm:$0xff]  ;;  %v13228_v40 = vcombine.high %v729_v35, %v741_v36  ;;  %v13227_v48 = vcombine.low %v729_v35, %v741_v36 }
 0x2e5   : > { %8211 = vmatpush1.bf16.msra.mxu1 %v13371_v44  ;;  %8171 = vmatprep.subr.bf16.mxu0 %v12964_v41  ;;  %v1125_v52 = vld [vmem:[#allocation6 + $0x1710] sm:$0xff] }
 0x2e6   : > { %8212 = vmatprep.subr.bf16.mxu1 %v13348_v58  ;;  %v13612_v44 = vcombine.high %v1113_v37, %v1125_v52  ;;  %v705_v41 = vld [vmem:[#allocation6 + $0x9f0] sm:$0xff]  ;;  %v13611_v49 = vcombine.low %v1113_v37, %v1125_v52 }
 0x2e7   : > { %v717_v58 = vld [vmem:[#allocation6 + $0xa50] sm:$0xff] }
 0x2e8   : > { %8172 = vmatpush1.bf16.msra.mxu0 %v12963_v51  ;;  %v1089_v45 = vld [vmem:[#allocation6 + $0x15f0] sm:$0xff]  ;;  %v13204_v51 = vcombine.high %v705_v41, %v717_v58  ;;  %v13203_v2 = vcombine.low %v705_v41, %v717_v58 }
 0x2e9   : > { %8213 = vmatpush1.bf16.msra.mxu1 %v13347_v56  ;;  %8173 = vmatprep.subr.bf16.mxu0 %v12940_v59  ;;  %v1101_v46 = vld [vmem:[#allocation6 + $0x1650] sm:$0xff] }
 0x2ea   : > { %8214 = vmatprep.subr.bf16.mxu1 %v13324_v62  ;;  %v13588_v56 = vcombine.high %v1089_v45, %v1101_v46  ;;  %v681_v59 = vld [vmem:[#allocation6 + $0x930] sm:$0xff]  ;;  %v13587_v3 = vcombine.low %v1089_v45, %v1101_v46 }
 0x2eb   : > { %v693_v62 = vld [vmem:[#allocation6 + $0x990] sm:$0xff] }
 0x2ec   : > { %8174 = vmatpush1.bf16.msra.mxu0 %v12939_v4  ;;  %v1065_v1 = vld [vmem:[#allocation6 + $0x1530] sm:$0xff]  ;;  %v13180_v4 = vcombine.high %v681_v59, %v693_v62  ;;  %v13179_v43 = vcombine.low %v681_v59, %v693_v62  ;;  %v562_v59 = vld [vmem:[#allocation6 + $0x578] sm:$0xff] }
 0x2ed   : > { %8215 = vmatpush1.bf16.msra.mxu1 %v13323_v5  ;;  %8175 = vmatprep.subr.bf16.mxu0 %v12916_v20  ;;  %v1077_v23 = vld [vmem:[#allocation6 + $0x1590] sm:$0xff]  ;;  %v574_v62 = vld [vmem:[#allocation6 + $0x5d8] sm:$0xff] }
 0x2ee   : > { %8216 = vmatprep.subr.bf16.mxu1 %v13300_v53  ;;  %v13564_v5 = vcombine.high %v1065_v1, %v1077_v23  ;;  %v657_v20 = vld [vmem:[#allocation6 + $0x870] sm:$0xff]  ;;  %v13563_v9 = vcombine.low %v1065_v1, %v1077_v23 }
 0x2ef   : > { %v669_v53 = vld [vmem:[#allocation6 + $0x8d0] sm:$0xff] }
 0x2f0   : > { %8176 = vmatpush1.bf16.msra.mxu0 %v12915_v12  ;;  %v1041_v6 = vld [vmem:[#allocation6 + $0x1470] sm:$0xff]  ;;  %v13156_v12 = vcombine.high %v657_v20, %v669_v53  ;;  %v13155_v22 = vcombine.low %v657_v20, %v669_v53  ;;  %v538_v53 = vld [vmem:[#allocation6 + $0x4b8] sm:$0xff] }
 0x2f1   : > { %8217 = vmatpush1.bf16.msra.mxu1 %v13299_v13  ;;  %8177 = vmatprep.subr.bf16.mxu0 %v12892_v14  ;;  %v1053_v8 = vld [vmem:[#allocation6 + $0x14d0] sm:$0xff] }
 0x2f2   : > { %8218 = vmatprep.subr.bf16.mxu1 %v13276_v17  ;;  %v13540_v13 = vcombine.high %v1041_v6, %v1053_v8  ;;  %v633_v14 = vld [vmem:[#allocation6 + $0x7b0] sm:$0xff]  ;;  %v13539_v26 = vcombine.low %v1041_v6, %v1053_v8  ;;  %v550_v6 = vld [vmem:[#allocation6 + $0x518] sm:$0xff] }
 0x2f3   : > { %v645_v17 = vld [vmem:[#allocation6 + $0x810] sm:$0xff] }
 0x2f4   : > { %8178 = vmatpush1.bf16.msra.mxu0 %v12891_v27  ;;  %v1017_v18 = vld [vmem:[#allocation6 + $0x13b0] sm:$0xff]  ;;  %v13132_v27 = vcombine.high %v633_v14, %v645_v17  ;;  %v13131_v37 = vcombine.low %v633_v14, %v645_v17  ;;  %v13038_v14 = vcombine.high %v538_v53, %v550_v6 }
 0x2f5   : > { %8219 = vmatpush1.bf16.msra.mxu1 %v13275_v31  ;;  %8179 = vmatprep.subr.bf16.mxu0 %v13252_v32  ;;  %v1029_v19 = vld [vmem:[#allocation6 + $0x1410] sm:$0xff] }
 0x2f6   : > { %8220 = vmatprep.subr.bf16.mxu1 %v13636_v34  ;;  %v13516_v31 = vcombine.high %v1017_v18, %v1029_v19  ;;  %v609_v32 = vld [vmem:[#allocation6 + $0x6f0] sm:$0xff]  ;;  %v13515_v52 = vcombine.low %v1017_v18, %v1029_v19 }
 0x2f7   : > { %v621_v34 = vld [vmem:[#allocation6 + $0x750] sm:$0xff] }
 0x2f8   : > { %8180 = vmatpush2.bf16.msra.mxu0 %v13251_v38  ;;  %v993_v35 = vld [vmem:[#allocation6 + $0x12f0] sm:$0xff]  ;;  %v13108_v38 = vcombine.high %v609_v32, %v621_v34  ;;  %v13107_v45 = vcombine.low %v609_v32, %v621_v34 }
 0x2f9   : > { %8221 = vmatpush2.bf16.msra.mxu1 %v13635_v39  ;;  %8181 = vmatprep.subr.bf16.mxu0 %v13228_v40  ;;  %v1005_v36 = vld [vmem:[#allocation6 + $0x1350] sm:$0xff] }
 0x2fa   : > { %8222 = vmatprep.subr.bf16.mxu1 %v13612_v44  ;;  %v13492_v39 = vcombine.high %v993_v35, %v1005_v36  ;;  %v585_v40 = vld [vmem:[#allocation6 + $0x630] sm:$0xff]  ;;  %v13491_v46 = vcombine.low %v993_v35, %v1005_v36  ;;  %v13037_v35 = vcombine.low %v538_v53, %v550_v6 }
 0x2fb   : > { %v597_v44 = vld [vmem:[#allocation6 + $0x690] sm:$0xff] }
 0x2fc   : > { %8182 = vmatpush2.bf16.msra.mxu0 %v13227_v48  ;;  %v969_v41 = vld [vmem:[#allocation6 + $0x1230] sm:$0xff]  ;;  %v13084_v48 = vcombine.high %v585_v40, %v597_v44  ;;  %v13083_v1 = vcombine.low %v585_v40, %v597_v44 }
 0x2fd   : > { %8223 = vmatpush2.bf16.msra.mxu1 %v13611_v49  ;;  %8183 = vmatprep.subr.bf16.mxu0 %v13204_v51  ;;  %v981_v58 = vld [vmem:[#allocation6 + $0x1290] sm:$0xff] }
 0x2fe   : > { %8224 = vmatprep.subr.bf16.mxu1 %v13588_v56  ;;  %v13468_v49 = vcombine.high %v969_v41, %v981_v58  ;;  %v1329_v51 = vld [vmem:[#allocation6 + $0x1d70] sm:$0xff]  ;;  %v13467_v23 = vcombine.low %v969_v41, %v981_v58  ;;  %v490_v58 = vld [vmem:[#allocation6 + $0x338] sm:$0xff] }
 0x2ff   : > { %v1341_v56 = vld [vmem:[#allocation6 + $0x1dd0] sm:$0xff] }
 0x300   : > { %8184 = vmatpush2.bf16.msra.mxu0 %v13203_v2  ;;  %v15944_v2 = vld [vmem:[#allocation8 + $0x8] sm:$0xff]  ;;  %v1317_v20 = vld [vmem:[#allocation6 + $0x1d10] sm:$0xff] }
 0x301   : > { %8225 = vmatpush2.bf16.msra.mxu1 %v13587_v3  ;;  %8185 = vmatprep.subr.bf16.mxu0 %v13180_v4  ;;  %v13828_v3 = vcombine.high %v1329_v51, %v1341_v56  ;;  %v13062_v4 = vcombine.high %v562_v59, %v574_v62  ;;  %v1580_v8 = vrot.slane %v15944_v2, %v15839_v54  ;;  %v1281_v17 = vld [vmem:[#allocation6 + $0x1bf0] sm:$0xff] }
 0x302   : > { %8226 = vmatprep.subr.bf16.mxu1 %v13564_v5  ;;  %v1305_v5 = vld [vmem:[#allocation6 + $0x1cb0] sm:$0xff] }
 0x303   : > { %v1293_v18 = vld [vmem:[#allocation6 + $0x1c50] sm:$0xff]  ;;  %v13803_v32 = vcombine.low %v1305_v5, %v1317_v20 }
 0x304   : > { %8186 = vmatpush2.bf16.msra.mxu0 %v13179_v43  ;;  %v13827_v43 = vcombine.low %v1329_v51, %v1341_v56  ;;  %v13780_v36 = vcombine.high %v1281_v17, %v1293_v18  ;;  %v1257_v40 = vld [vmem:[#allocation6 + $0x1b30] sm:$0xff] }
 0x305   : > { %8227 = vmatpush2.bf16.msra.mxu1 %v13563_v9  ;;  %8187 = vmatprep.subr.bf16.mxu0 %v13156_v12  ;;  %v13061_v9 = vcombine.low %v562_v59, %v574_v62  ;;  %v13804_v12 = vcombine.high %v1305_v5, %v1317_v20  ;;  %v1269_v44 = vld [vmem:[#allocation6 + $0x1b90] sm:$0xff]  ;;  %v478_v5 = vld [vmem:[#allocation6 + $0x2d8] sm:$0xff] }
 0x306   : > { %8228 = vmatprep.subr.bf16.mxu1 %v13540_v13  ;;  %v1584_v13 = vrot.slane %v15944_v2, %v15842_v63  ;;  %v13756_v59 = vcombine.high %v1257_v40, %v1269_v44  ;;  %v13755_v20 = vcombine.low %v1257_v40, %v1269_v44  ;;  %v406_v40 = vld [vmem:[#allocation6 + $0x98] sm:$0xff] }
 0x308   : > { %8188 = vmatpush2.bf16.msra.mxu0 %v13155_v22  ;;  %v514_v22 = vld [vmem:[#allocation6 + $0x3f8] sm:$0xff] }
 0x309   : > { %8229 = vmatpush2.bf16.msra.mxu1 %v13539_v26  ;;  %8189 = vmatprep.subr.bf16.mxu0 %v13132_v27  ;;  %v526_v26 = vld [vmem:[#allocation6 + $0x458] sm:$0xff] }
 0x30a   : > { %8230 = vmatprep.subr.bf16.mxu1 %v13516_v31  ;;  %v13013_v56 = vcombine.low %v514_v22, %v526_v26 }
 0x30c   : > { %8190 = vmatpush2.bf16.msra.mxu0 %v13131_v37 }
 0x30d   : > { %8231 = vmatpush2.bf16.msra.mxu1 %v13515_v52  ;;  %8191 = vmatprep.subr.bf16.mxu0 %v13108_v38 }
 0x30e   : > { %8232 = vmatprep.subr.bf16.mxu1 %v13492_v39  ;;  %v13014_v39 = vcombine.high %v514_v22, %v526_v26  ;;  %v1185_v22 = vld [vmem:[#allocation6 + $0x18f0] sm:$0xff] }
 0x30f   : > { %v1197_v26 = vld [vmem:[#allocation6 + $0x1950] sm:$0xff] }
 0x310   : > { %8192 = vmatpush2.bf16.msra.mxu0 %v13107_v45  ;;  %v502_v45 = vld [vmem:[#allocation6 + $0x398] sm:$0xff]  ;;  %v13683_v44 = vcombine.low %v1185_v22, %v1197_v26 }
 0x311   : > { %8233 = vmatpush2.bf16.msra.mxu1 %v13491_v46  ;;  %8193 = vmatprep.subr.bf16.mxu0 %v13084_v48  ;;  %v13779_v48 = vcombine.low %v1281_v17, %v1293_v18  ;;  %v12990_v62 = vcombine.high %v490_v58, %v502_v45  ;;  %v12989_v53 = vcombine.low %v490_v58, %v502_v45 }
 0x312   : > { %8234 = vmatprep.subr.bf16.mxu1 %v13468_v49 }
 0x314   : > { %8194 = vmatpush2.bf16.msra.mxu0 %v13083_v1  ;;  %v1233_v1 = vld [vmem:[#allocation6 + $0x1a70] sm:$0xff] }
 0x315   : > { %8235 = vmatpush2.bf16.msra.mxu1 %v13467_v23  ;;  %8245 = vmatprep.subr.bf16.mxu0 %v13828_v3  ;;  %v1245_v23 = vld [vmem:[#allocation6 + $0x1ad0] sm:$0xff] }
 0x316   : > { %8286 = vmatprep.subr.bf16.mxu1 %v13062_v4  ;;  %v466_v4 = vld [vmem:[#allocation6 + $0x278] sm:$0xff]  ;;  %v13732_v6 = vcombine.high %v1233_v1, %v1245_v23 }
 0x317   : > { %v7951_v19 = vpop.f32.mrf.mxu0  ;;  %8196 = vmatmul.mubr.bf16.vlgmr.msra.gmra.mxu0 %v15812_v16  ;;  %v12965_v17 = vcombine.low %v466_v4, %v478_v5 }
 0x318   : > { %v7952_v27 = vadd.f32 %v7951_v19, %v1580_v8  ;;  %8237 = vmatmul.mubr.bf16.vlgmr.msra.gmra.mxu1 %v15815_v21  ;;  %8246 = vmatpush1.bf16.msra.mxu0 %v13827_v43  ;;  %v7992_v31 = vpop.f32.mrf.mxu1  ;;  %v12966_v8 = vcombine.high %v466_v4, %v478_v5  ;;  %v1209_v43 = vld [vmem:[#allocation6 + $0x19b0] sm:$0xff]  ;;  %v730_v5 = vld [vmem:[#allocation6 + $0xab8] sm:$0xff] }
 0x319   : > { %8287 = vmatpush1.bf16.msra.mxu1 %v13061_v9  ;;  %v7953_v34 = vpop.f32.mrf.mxu0  ;;  %8247 = vmatprep.subr.bf16.mxu0 %v13804_v12  ;;  %v1221_v9 = vld [vmem:[#allocation6 + $0x1a10] sm:$0xff]  ;;  %v442_v12 = vld [vmem:[#allocation6 + $0x1b8] sm:$0xff] }
 0x31a   : > { %v7954_v37 = vadd.f32 %v7953_v34, %v1584_v13  ;;  %v15952_v52 = vadd.f32 %v7992_v31, %v7952_v27  ;;  %v7994_v38 = vpop.f32.mrf.mxu1  ;;  %8288 = vmatprep.subr.bf16.mxu1 %v13038_v14  ;;  %8277 = vmatprep.mubr.bf16.mxu0 %v15817_v28  ;;  %v454_v13 = vld [vmem:[#allocation6 + $0x218] sm:$0xff]  ;;  %v13731_v14 = vcombine.low %v1233_v1, %v1245_v23  ;;  %v1509_v4 = vld [vmem:[#allocation6 + $0x2310] sm:$0xff] }
 0x31b   : > { %v7955_v41 = vpop.f32.mrf.mxu0  ;;  %8318 = vmatprep.mubr.bf16.mxu1 %v15803_v57  ;;  %v13708_v18 = vcombine.high %v1209_v43, %v1221_v9  ;;  %v12942_v19 = vcombine.high %v442_v12, %v454_v13  ;;  %v418_v27 = vld [vmem:[#allocation6 + $0xf8] sm:$0xff]  ;;  %v12941_v34 = vcombine.low %v442_v12, %v454_v13  ;;  %v1485_v12 = vld [vmem:[#allocation6 + $0x2250] sm:$0xff] }
 0x31c   : > { %v15956_v46 = vadd.f32 %v7994_v38, %v7954_v37  ;;  %8248 = vmatpush1.bf16.msra.mxu0 %v13803_v32  ;;  %v7996_v49 = vpop.f32.mrf.mxu1  ;;  %v430_v31 = vld [vmem:[#allocation6 + $0x158] sm:$0xff]  ;;  %v13707_v32 = vcombine.low %v1209_v43, %v1221_v9  ;;  %v1161_v37 = vld [vmem:[#allocation6 + $0x1830] sm:$0xff] }
 0x31d   : > { %8289 = vmatpush1.bf16.msra.mxu1 %v13037_v35  ;;  %v7956_v51 = vpop.f32.mrf.mxu0  ;;  %8249 = vmatprep.subr.bf16.mxu0 %v13780_v36  ;;  %v13684_v35 = vcombine.high %v1185_v22, %v1197_v26  ;;  %v12918_v36 = vcombine.high %v418_v27, %v430_v31  ;;  %v1173_v38 = vld [vmem:[#allocation6 + $0x1890] sm:$0xff]  ;;  %v12917_v41 = vcombine.low %v418_v27, %v430_v31  ;;  %v706_v13 = vld [vmem:[#allocation6 + $0x9f8] sm:$0xff] }
 0x31e   : > { %8290 = vmatprep.subr.bf16.mxu1 %v13014_v39  ;;  %v7997_v3 = vpop.f32.mrf.mxu1  ;;  %v394_v39 = vld [vmem:[#allocation6 + $0x38] sm:$0xff]  ;;  %v13660_v58 = vcombine.high %v1161_v37, %v1173_v38  ;;  %v1533_v49 = vld [vmem:[#allocation6 + $0x23d0] sm:$0xff] }
 0x31f   : > { %v12894_v45 = vcombine.high %v394_v39, %v406_v40  ;;  %v754_v51 = vld [vmem:[#allocation6 + $0xb78] sm:$0xff]  ;;  %v1497_v3 = vld [vmem:[#allocation6 + $0x22b0] sm:$0xff] }
 0x320   : > { %8250 = vmatpush1.bf16.msra.mxu0 %v13779_v48  ;;  %v1521_v48 = vld [vmem:[#allocation6 + $0x2370] sm:$0xff]  ;;  %v682_v31 = vld [vmem:[#allocation6 + $0x938] sm:$0xff] }
 0x321   : > { %8291 = vmatpush1.bf16.msra.mxu1 %v13013_v56  ;;  %8251 = vmatprep.subr.bf16.mxu0 %v13756_v59  ;;  %v766_v56 = vld [vmem:[#allocation6 + $0xbd8] sm:$0xff]  ;;  %v13659_v59 = vcombine.low %v1161_v37, %v1173_v38  ;;  %v14020_v1 = vcombine.high %v1521_v48, %v1533_v49  ;;  %v1473_v9 = vld [vmem:[#allocation6 + $0x21f0] sm:$0xff] }
 0x322   : > { %8292 = vmatprep.subr.bf16.mxu1 %v12990_v62  ;;  %v12893_v62 = vcombine.low %v394_v39, %v406_v40  ;;  %v13254_v23 = vcombine.high %v754_v51, %v766_v56  ;;  %v1449_v26 = vld [vmem:[#allocation6 + $0x2130] sm:$0xff]  ;;  %v658_v40 = vld [vmem:[#allocation6 + $0x878] sm:$0xff] }
 0x323   : > { %v1461_v27 = vld [vmem:[#allocation6 + $0x2190] sm:$0xff] }
 0x324   : > { %8252 = vmatpush1.bf16.msra.mxu0 %v13755_v20  ;;  %v742_v20 = vld [vmem:[#allocation6 + $0xb18] sm:$0xff]  ;;  %v1425_v38 = vld [vmem:[#allocation6 + $0x2070] sm:$0xff] }
 0x325   : > { %8293 = vmatpush1.bf16.msra.mxu1 %v12989_v53  ;;  %8253 = vmatprep.subr.bf16.mxu0 %v13732_v6  ;;  %v14019_v53 = vcombine.low %v1521_v48, %v1533_v49  ;;  %v13253_v6 = vcombine.low %v754_v51, %v766_v56  ;;  %v13230_v43 = vcombine.high %v730_v5, %v742_v20  ;;  %v1437_v39 = vld [vmem:[#allocation6 + $0x20d0] sm:$0xff]  ;;  %v634_v56 = vld [vmem:[#allocation6 + $0x7b8] sm:$0xff] }
 0x326   : > { %8294 = vmatprep.subr.bf16.mxu1 %v12966_v8  ;;  %v13996_v8 = vcombine.high %v1497_v3, %v1509_v4  ;;  %v1401_v49 = vld [vmem:[#allocation6 + $0x1fb0] sm:$0xff] }
 0x327   : > { %v1413_v51 = vld [vmem:[#allocation6 + $0x2010] sm:$0xff] }
 0x328   : > { %8254 = vmatpush1.bf16.msra.mxu0 %v13731_v14  ;;  %v718_v14 = vld [vmem:[#allocation6 + $0xa58] sm:$0xff] }
 0x329   : > { %8295 = vmatpush1.bf16.msra.mxu1 %v12965_v17  ;;  %8255 = vmatprep.subr.bf16.mxu0 %v13708_v18  ;;  %v13995_v17 = vcombine.low %v1497_v3, %v1509_v4  ;;  %v13229_v18 = vcombine.low %v730_v5, %v742_v20  ;;  %v13206_v22 = vcombine.high %v706_v13, %v718_v14  ;;  %v1377_v4 = vld [vmem:[#allocation6 + $0x1ef0] sm:$0xff]  ;;  %v610_v20 = vld [vmem:[#allocation6 + $0x6f8] sm:$0xff] }
 0x32a   : > { %8296 = vmatprep.subr.bf16.mxu1 %v12942_v19  ;;  %v13972_v19 = vcombine.high %v1473_v9, %v1485_v12  ;;  %v1389_v5 = vld [vmem:[#allocation6 + $0x1f50] sm:$0xff] }
 0x32c   : > { %8256 = vmatpush1.bf16.msra.mxu0 %v13707_v32  ;;  %v694_v32 = vld [vmem:[#allocation6 + $0x998] sm:$0xff] }
 0x32d   : > { %8297 = vmatpush1.bf16.msra.mxu1 %v12941_v34  ;;  %8257 = vmatprep.subr.bf16.mxu0 %v13684_v35  ;;  %v13971_v34 = vcombine.low %v1473_v9, %v1485_v12  ;;  %v13205_v35 = vcombine.low %v706_v13, %v718_v14  ;;  %v13182_v37 = vcombine.high %v682_v31, %v694_v32  ;;  %v1353_v12 = vld [vmem:[#allocation6 + $0x1e30] sm:$0xff]  ;;  %v586_v14 = vld [vmem:[#allocation6 + $0x638] sm:$0xff] }
 0x32e   : > { %8298 = vmatprep.subr.bf16.mxu1 %v12918_v36  ;;  %v13948_v36 = vcombine.high %v1449_v26, %v1461_v27  ;;  %v1365_v13 = vld [vmem:[#allocation6 + $0x1e90] sm:$0xff] }
 0x330   : > { %8258 = vmatpush1.bf16.msra.mxu0 %v13683_v44  ;;  %v670_v44 = vld [vmem:[#allocation6 + $0x8d8] sm:$0xff] }
 0x331   : > { %8299 = vmatpush1.bf16.msra.mxu1 %v12917_v41  ;;  %8259 = vmatprep.subr.bf16.mxu0 %v13660_v58  ;;  %v13947_v41 = vcombine.low %v1449_v26, %v1461_v27  ;;  %v13181_v58 = vcombine.low %v682_v31, %v694_v32  ;;  %v13158_v48 = vcombine.high %v658_v40, %v670_v44  ;;  %v946_v27 = vld [vmem:[#allocation6 + $0x1178] sm:$0xff] }
 0x332   : > { %8300 = vmatprep.subr.bf16.mxu1 %v12894_v45  ;;  %v13924_v45 = vcombine.high %v1425_v38, %v1437_v39  ;;  %v958_v31 = vld [vmem:[#allocation6 + $0x11d8] sm:$0xff] }
 0x333   : > { %v1330_v32 = vld [vmem:[#allocation6 + $0x1d78] sm:$0xff] }
 0x334   : > { %8260 = vmatpush1.bf16.msra.mxu0 %v13659_v59  ;;  %v646_v59 = vld [vmem:[#allocation6 + $0x818] sm:$0xff] }
 0x335   : > { %8301 = vmatpush1.bf16.msra.mxu1 %v12893_v62  ;;  %8261 = vmatprep.subr.bf16.mxu0 %v14020_v1  ;;  %v13923_v62 = vcombine.low %v1425_v38, %v1437_v39  ;;  %v13157_v1 = vcombine.low %v658_v40, %v670_v44  ;;  %v13134_v3 = vcombine.high %v634_v56, %v646_v59  ;;  %v922_v39 = vld [vmem:[#allocation6 + $0x10b8] sm:$0xff] }
 0x336   : > { %8302 = vmatprep.subr.bf16.mxu1 %v13254_v23  ;;  %v13900_v23 = vcombine.high %v1401_v49, %v1413_v51  ;;  %v934_v40 = vld [vmem:[#allocation6 + $0x1118] sm:$0xff] }
 0x337   : > { %v1306_v44 = vld [vmem:[#allocation6 + $0x1cb8] sm:$0xff] }
 0x338   : > { %8262 = vmatpush2.bf16.msra.mxu0 %v14019_v53  ;;  %v622_v53 = vld [vmem:[#allocation6 + $0x758] sm:$0xff] }
 0x339   : > { %8303 = vmatpush2.bf16.msra.mxu1 %v13253_v6  ;;  %8263 = vmatprep.subr.bf16.mxu0 %v13996_v8  ;;  %v13899_v6 = vcombine.low %v1401_v49, %v1413_v51  ;;  %v13133_v8 = vcombine.low %v634_v56, %v646_v59  ;;  %v13110_v9 = vcombine.high %v610_v20, %v622_v53  ;;  %v898_v51 = vld [vmem:[#allocation6 + $0xff8] sm:$0xff] }
 0x33a   : > { %8304 = vmatprep.subr.bf16.mxu1 %v13230_v43  ;;  %v13876_v43 = vcombine.high %v1377_v4, %v1389_v5  ;;  %v910_v56 = vld [vmem:[#allocation6 + $0x1058] sm:$0xff] }
 0x33c   : > { %8264 = vmatpush2.bf16.msra.mxu0 %v13995_v17  ;;  %v598_v17 = vld [vmem:[#allocation6 + $0x698] sm:$0xff] }
 0x33d   : > { %8305 = vmatpush2.bf16.msra.mxu1 %v13229_v18  ;;  %8265 = vmatprep.subr.bf16.mxu0 %v13972_v19  ;;  %v13875_v18 = vcombine.low %v1377_v4, %v1389_v5  ;;  %v13109_v19 = vcombine.low %v610_v20, %v622_v53  ;;  %v13086_v26 = vcombine.high %v586_v14, %v598_v17 }
 0x33e   : > { %8306 = vmatprep.subr.bf16.mxu1 %v13206_v22  ;;  %v13852_v22 = vcombine.high %v1353_v12, %v1365_v13  ;;  %v13398_v53 = vcombine.high %v898_v51, %v910_v56 }
 0x340   : > { %8266 = vmatpush2.bf16.msra.mxu0 %v13971_v34  ;;  %v1342_v34 = vld [vmem:[#allocation6 + $0x1dd8] sm:$0xff] }
 0x341   : > { %8307 = vmatpush2.bf16.msra.mxu1 %v13205_v35  ;;  %8267 = vmatprep.subr.bf16.mxu0 %v13948_v36  ;;  %v13851_v35 = vcombine.low %v1353_v12, %v1365_v13  ;;  %v13085_v36 = vcombine.low %v586_v14, %v598_v17  ;;  %v13830_v38 = vcombine.high %v1330_v32, %v1342_v34  ;;  %v1258_v13 = vld [vmem:[#allocation6 + $0x1b38] sm:$0xff] }
 0x342   : > { %8308 = vmatprep.subr.bf16.mxu1 %v13182_v37  ;;  %v13446_v37 = vcombine.high %v946_v27, %v958_v31  ;;  %v1270_v14 = vld [vmem:[#allocation6 + $0x1b98] sm:$0xff]  ;;  %v13397_v17 = vcombine.low %v898_v51, %v910_v56 }
 0x343   : > { %v802_v56 = vld [vmem:[#allocation6 + $0xcf8] sm:$0xff] }
 0x344   : > { %8268 = vmatpush2.bf16.msra.mxu0 %v13947_v41  ;;  %v1318_v41 = vld [vmem:[#allocation6 + $0x1d18] sm:$0xff] }
 0x345   : > { %8309 = vmatpush2.bf16.msra.mxu1 %v13181_v58  ;;  %8269 = vmatprep.subr.bf16.mxu0 %v13924_v45  ;;  %v13445_v58 = vcombine.low %v946_v27, %v958_v31  ;;  %v13829_v45 = vcombine.low %v1330_v32, %v1342_v34  ;;  %v13806_v49 = vcombine.high %v1306_v44, %v1318_v41  ;;  %v850_v27 = vld [vmem:[#allocation6 + $0xe78] sm:$0xff] }
 0x346   : > { %8310 = vmatprep.subr.bf16.mxu1 %v13158_v48  ;;  %v13422_v48 = vcombine.high %v922_v39, %v934_v40  ;;  %v13805_v20 = vcombine.low %v1306_v44, %v1318_v41  ;;  %v862_v31 = vld [vmem:[#allocation6 + $0xed8] sm:$0xff] }
 0x347   : > { %v1234_v34 = vld [vmem:[#allocation6 + $0x1a78] sm:$0xff] }
 0x348   : > { %8270 = vmatpush2.bf16.msra.mxu0 %v13923_v62  ;;  %v1282_v62 = vld [vmem:[#allocation6 + $0x1bf8] sm:$0xff] }
 0x349   : > { %8311 = vmatpush2.bf16.msra.mxu1 %v13157_v1  ;;  %8271 = vmatprep.subr.bf16.mxu0 %v13900_v23  ;;  %v1294_v1 = vld [vmem:[#allocation6 + $0x1c58] sm:$0xff] }
 0x34a   : > { %8312 = vmatprep.subr.bf16.mxu1 %v13134_v3  ;;  %v13421_v3 = vcombine.low %v922_v39, %v934_v40  ;;  %v826_v40 = vld [vmem:[#allocation6 + $0xdb8] sm:$0xff] }
 0x34b   : > { %v838_v44 = vld [vmem:[#allocation6 + $0xe18] sm:$0xff] }
 0x34c   : > { %8272 = vmatpush2.bf16.msra.mxu0 %v13899_v6  ;;  %v1210_v41 = vld [vmem:[#allocation6 + $0x19b8] sm:$0xff] }
 0x34d   : > { %8313 = vmatpush2.bf16.msra.mxu1 %v13133_v8  ;;  %8273 = vmatprep.subr.bf16.mxu0 %v13876_v43  ;;  %v13782_v8 = vcombine.high %v1282_v62, %v1294_v1  ;;  %v874_v43 = vld [vmem:[#allocation6 + $0xf38] sm:$0xff] }
 0x34e   : > { %8314 = vmatprep.subr.bf16.mxu1 %v13110_v9  ;;  %v886_v9 = vld [vmem:[#allocation6 + $0xf98] sm:$0xff] }
 0x350   : > { %8274 = vmatpush2.bf16.msra.mxu0 %v13875_v18 }
 0x351   : > { %8315 = vmatpush2.bf16.msra.mxu1 %v13109_v19  ;;  %8275 = vmatprep.subr.bf16.mxu0 %v13852_v22  ;;  %v13374_v22 = vcombine.high %v874_v43, %v886_v9 }
 0x352   : > { %8316 = vmatprep.subr.bf16.mxu1 %v13086_v26  ;;  %v13758_v26 = vcombine.high %v1258_v13, %v1270_v14 }
 0x354   : > { %8276 = vmatpush2.bf16.msra.mxu0 %v13851_v35  ;;  %v1246_v35 = vld [vmem:[#allocation6 + $0x1ad8] sm:$0xff] }
 0x355   : > { %8317 = vmatpush2.bf16.msra.mxu1 %v13085_v36  ;;  %8327 = vmatprep.subr.bf16.mxu0 %v13446_v37  ;;  %v13373_v36 = vcombine.low %v874_v43, %v886_v9  ;;  %v13757_v37 = vcombine.low %v1258_v13, %v1270_v14  ;;  %v13734_v39 = vcombine.high %v1234_v34, %v1246_v35  ;;  %v790_v43 = vld [vmem:[#allocation6 + $0xc98] sm:$0xff] }
 0x356   : > { %8368 = vmatprep.subr.bf16.mxu1 %v13830_v38  ;;  %v13350_v38 = vcombine.high %v850_v27, %v862_v31  ;;  %v1162_v9 = vld [vmem:[#allocation6 + $0x1838] sm:$0xff] }
 0x357   : > { %v8033_v59 = vpop.f32.mrf.mxu0  ;;  %8278 = vmatmul.mubr.bf16.vlgmr.msra.gmra.mxu0 %v15824_v33 }
 0x358   : > { %v15960_v23 = vadd.f32 %v8033_v59, %v15952_v52  ;;  %8319 = vmatmul.mubr.bf16.vlgmr.msra.gmra.mxu1 %v15812_v16  ;;  %8328 = vmatpush1.bf16.msra.mxu0 %v13445_v58  ;;  %v15963_v4 = vpop.f32.mrf.mxu1  ;;  %v1222_v58 = vld [vmem:[#allocation6 + $0x1a18] sm:$0xff] }
 0x359   : > { %8369 = vmatpush1.bf16.msra.mxu1 %v13829_v45  ;;  %v8035_v5 = vpop.f32.mrf.mxu0  ;;  %8329 = vmatprep.subr.bf16.mxu0 %v13422_v48  ;;  %v13349_v45 = vcombine.low %v850_v27, %v862_v31  ;;  %v13733_v48 = vcombine.low %v1234_v34, %v1246_v35  ;;  %v13710_v51 = vcombine.high %v1210_v41, %v1222_v58  ;;  %v814_v59 = vld [vmem:[#allocation6 + $0xd58] sm:$0xff] }
 0x35a   : > { %v15966_v6 = vadd.f32 %v8035_v5, %v15956_v46  ;;  %8370 = vmatprep.subr.bf16.mxu1 %v13806_v49  ;;  %v15968_v52 = vpop.f32.mrf.mxu1  ;;  %8359 = vmatprep.mubr.bf16.mxu0 %v15806_v61  ;;  %v13781_v46 = vcombine.low %v1282_v62, %v1294_v1  ;;  %v13326_v49 = vcombine.high %v826_v40, %v838_v44  ;;  %v1186_v62 = vld [vmem:[#allocation6 + $0x18f8] sm:$0xff] }
 0x35b   : > { %v8037_v12 = vpop.f32.mrf.mxu0  ;;  %8400 = vmatprep.mubr.bf16.mxu1 %v15817_v28  ;;  %v1198_v1 = vld [vmem:[#allocation6 + $0x1958] sm:$0xff]  ;;  %v13709_v5 = vcombine.low %v1210_v41, %v1222_v58  ;;  %v13301_v13 = vcombine.low %v802_v56, %v814_v59 }
 0x35c   : > { %8330 = vmatpush1.bf16.msra.mxu0 %v13421_v3  ;;  %v8078_v18 = vpop.f32.mrf.mxu1  ;;  %v13325_v3 = vcombine.low %v826_v40, %v838_v44  ;;  %v1174_v12 = vld [vmem:[#allocation6 + $0x1898] sm:$0xff]  ;;  %v13685_v14 = vcombine.low %v1186_v62, %v1198_v1 }
 0x35d   : > { %8371 = vmatpush1.bf16.msra.mxu1 %v13805_v20  ;;  %v8038_v19 = vpop.f32.mrf.mxu0  ;;  %8331 = vmatprep.subr.bf16.mxu0 %v13398_v53  ;;  %v13302_v20 = vcombine.high %v802_v56, %v814_v59  ;;  %v13686_v53 = vcombine.high %v1186_v62, %v1198_v1  ;;  %v13662_v18 = vcombine.high %v1162_v9, %v1174_v12  ;;  %v1114_v35 = vld [vmem:[#allocation6 + $0x16b8] sm:$0xff] }
 0x35e   : > { %8372 = vmatprep.subr.bf16.mxu1 %v13782_v8  ;;  %v8079_v32 = vpop.f32.mrf.mxu1  ;;  %v778_v8 = vld [vmem:[#allocation6 + $0xc38] sm:$0xff]  ;;  %v13661_v31 = vcombine.low %v1162_v9, %v1174_v12 }
 0x35f   : > { %v1138_v19 = vld [vmem:[#allocation6 + $0x1778] sm:$0xff]  ;;  %v13277_v27 = vcombine.low %v778_v8, %v790_v43 }
 0x360   : > { %8332 = vmatpush1.bf16.msra.mxu0 %v13397_v17  ;;  %v13278_v17 = vcombine.high %v778_v8, %v790_v43  ;;  %v1090_v58 = vld [vmem:[#allocation6 + $0x15f8] sm:$0xff] }
 0x361   : > { %8373 = vmatpush1.bf16.msra.mxu1 %v13781_v46  ;;  %8333 = vmatprep.subr.bf16.mxu0 %v13374_v22  ;;  %v1150_v46 = vld [vmem:[#allocation6 + $0x17d8] sm:$0xff] }
 0x362   : > { %8374 = vmatprep.subr.bf16.mxu1 %v13758_v26  ;;  %v1522_v22 = vld [vmem:[#allocation6 + $0x2378] sm:$0xff]  ;;  %v13638_v32 = vcombine.high %v1138_v19, %v1150_v46 }
 0x363   : > { %v1534_v26 = vld [vmem:[#allocation6 + $0x23d8] sm:$0xff] }
 0x364   : > { %8334 = vmatpush1.bf16.msra.mxu0 %v13373_v36  ;;  %v14022_v34 = vcombine.high %v1522_v22, %v1534_v26  ;;  %v1126_v36 = vld [vmem:[#allocation6 + $0x1718] sm:$0xff]  ;;  %v14021_v40 = vcombine.low %v1522_v22, %v1534_v26 }
 0x365   : > { %8375 = vmatpush1.bf16.msra.mxu1 %v13757_v37  ;;  %8335 = vmatprep.subr.bf16.mxu0 %v13350_v38  ;;  %v1498_v37 = vld [vmem:[#allocation6 + $0x22b8] sm:$0xff]  ;;  %v13614_v44 = vcombine.high %v1114_v35, %v1126_v36 }
 0x366   : > { %8376 = vmatprep.subr.bf16.mxu1 %v13734_v39  ;;  %v1510_v38 = vld [vmem:[#allocation6 + $0x2318] sm:$0xff]  ;;  %v13637_v39 = vcombine.low %v1138_v19, %v1150_v46 }
 0x367   : > { %v13998_v41 = vcombine.high %v1498_v37, %v1510_v38  ;;  %v13997_v56 = vcombine.low %v1498_v37, %v1510_v38  ;;  %v1066_v1 = vld [vmem:[#allocation6 + $0x1538] sm:$0xff] }
 0x368   : > { %8336 = vmatpush1.bf16.msra.mxu0 %v13349_v45  ;;  %v1102_v45 = vld [vmem:[#allocation6 + $0x1658] sm:$0xff] }
 0x369   : > { %8377 = vmatpush1.bf16.msra.mxu1 %v13733_v48  ;;  %8337 = vmatprep.subr.bf16.mxu0 %v13326_v49  ;;  %v1474_v48 = vld [vmem:[#allocation6 + $0x21f8] sm:$0xff]  ;;  %v13590_v59 = vcombine.high %v1090_v58, %v1102_v45 }
 0x36a   : > { %8378 = vmatprep.subr.bf16.mxu1 %v13710_v51  ;;  %v1486_v49 = vld [vmem:[#allocation6 + $0x2258] sm:$0xff]  ;;  %v13613_v51 = vcombine.low %v1114_v35, %v1126_v36 }
 0x36b   : > { %v13974_v62 = vcombine.high %v1474_v48, %v1486_v49  ;;  %v13973_v8 = vcombine.low %v1474_v48, %v1486_v49  ;;  %v1042_v12 = vld [vmem:[#allocation6 + $0x1478] sm:$0xff] }
 0x36c   : > { %8338 = vmatpush1.bf16.msra.mxu0 %v13325_v3  ;;  %v1078_v3 = vld [vmem:[#allocation6 + $0x1598] sm:$0xff] }
 0x36d   : > { %8379 = vmatpush1.bf16.msra.mxu1 %v13709_v5  ;;  %8339 = vmatprep.subr.bf16.mxu0 %v13302_v20  ;;  %v1450_v5 = vld [vmem:[#allocation6 + $0x2138] sm:$0xff]  ;;  %v13566_v43 = vcombine.high %v1066_v1, %v1078_v3 }
 0x36e   : > { %8380 = vmatprep.subr.bf16.mxu1 %v13686_v53  ;;  %v1462_v20 = vld [vmem:[#allocation6 + $0x2198] sm:$0xff]  ;;  %v13589_v53 = vcombine.low %v1090_v58, %v1102_v45 }
 0x36f   : > { %v13950_v9 = vcombine.high %v1450_v5, %v1462_v20  ;;  %v13949_v19 = vcombine.low %v1450_v5, %v1462_v20  ;;  %v1018_v26 = vld [vmem:[#allocation6 + $0x13b8] sm:$0xff]  ;;  %v563_v20 = vld [vmem:[#allocation6 + $0x580] sm:$0xff] }
 0x370   : > { %8340 = vmatpush1.bf16.msra.mxu0 %v13301_v13  ;;  %v1054_v13 = vld [vmem:[#allocation6 + $0x14d8] sm:$0xff] }
 0x371   : > { %8381 = vmatpush1.bf16.msra.mxu1 %v13685_v14  ;;  %8341 = vmatprep.subr.bf16.mxu0 %v13278_v17  ;;  %v1426_v14 = vld [vmem:[#allocation6 + $0x2078] sm:$0xff]  ;;  %v13542_v46 = vcombine.high %v1042_v12, %v1054_v13 }
 0x372   : > { %8382 = vmatprep.subr.bf16.mxu1 %v13662_v18  ;;  %v1438_v17 = vld [vmem:[#allocation6 + $0x20d8] sm:$0xff]  ;;  %v13565_v18 = vcombine.low %v1066_v1, %v1078_v3 }
 0x373   : > { %v13926_v22 = vcombine.high %v1426_v14, %v1438_v17  ;;  %v13925_v35 = vcombine.low %v1426_v14, %v1438_v17  ;;  %v994_v38 = vld [vmem:[#allocation6 + $0x12f8] sm:$0xff]  ;;  %v1592_v17 = vrot.slane %v15944_v2, %v15874_v30 }
 0x374   : > { %8342 = vmatpush1.bf16.msra.mxu0 %v13277_v27  ;;  %v1030_v27 = vld [vmem:[#allocation6 + $0x1418] sm:$0xff] }
 0x375   : > { %8383 = vmatpush1.bf16.msra.mxu1 %v13661_v31  ;;  %8343 = vmatprep.subr.bf16.mxu0 %v13638_v32  ;;  %v1402_v31 = vld [vmem:[#allocation6 + $0x1fb8] sm:$0xff]  ;;  %v13518_v36 = vcombine.high %v1018_v26, %v1030_v27 }
 0x376   : > { %8384 = vmatprep.subr.bf16.mxu1 %v14022_v34  ;;  %v1414_v32 = vld [vmem:[#allocation6 + $0x2018] sm:$0xff]  ;;  %v13541_v34 = vcombine.low %v1042_v12, %v1054_v13 }
 0x377   : > { %v13902_v37 = vcombine.high %v1402_v31, %v1414_v32  ;;  %v13901_v58 = vcombine.low %v1402_v31, %v1414_v32  ;;  %v970_v49 = vld [vmem:[#allocation6 + $0x1238] sm:$0xff] }
 0x378   : > { %8344 = vmatpush2.bf16.msra.mxu0 %v13637_v39  ;;  %v1006_v39 = vld [vmem:[#allocation6 + $0x1358] sm:$0xff] }
 0x379   : > { %8385 = vmatpush2.bf16.msra.mxu1 %v14021_v40  ;;  %8345 = vmatprep.subr.bf16.mxu0 %v13614_v44  ;;  %v1378_v40 = vld [vmem:[#allocation6 + $0x1ef8] sm:$0xff]  ;;  %v13494_v45 = vcombine.high %v994_v38, %v1006_v39 }
 0x37a   : > { %8386 = vmatprep.subr.bf16.mxu1 %v13998_v41  ;;  %v1390_v44 = vld [vmem:[#allocation6 + $0x1f58] sm:$0xff]  ;;  %v13517_v41 = vcombine.low %v1018_v26, %v1030_v27  ;;  %v935_v26 = vld [vmem:[#allocation6 + $0x1120] sm:$0xff] }
 0x37b   : > { %v13878_v48 = vcombine.high %v1378_v40, %v1390_v44  ;;  %v13877_v1 = vcombine.low %v1378_v40, %v1390_v44  ;;  %v911_v40 = vld [vmem:[#allocation6 + $0x1060] sm:$0xff] }
 0x37c   : > { %8346 = vmatpush2.bf16.msra.mxu0 %v13613_v51  ;;  %v982_v51 = vld [vmem:[#allocation6 + $0x1298] sm:$0xff] }
 0x37d   : > { %8387 = vmatpush2.bf16.msra.mxu1 %v13997_v56  ;;  %8347 = vmatprep.subr.bf16.mxu0 %v13590_v59  ;;  %v1354_v56 = vld [vmem:[#allocation6 + $0x1e38] sm:$0xff]  ;;  %v13470_v3 = vcombine.high %v970_v49, %v982_v51  ;;  %v13469_v12 = vcombine.low %v970_v49, %v982_v51 }
 0x37e   : > { %8388 = vmatprep.subr.bf16.mxu1 %v13974_v62  ;;  %v1366_v59 = vld [vmem:[#allocation6 + $0x1e98] sm:$0xff]  ;;  %v13493_v62 = vcombine.low %v994_v38, %v1006_v39  ;;  %v899_v39 = vld [vmem:[#allocation6 + $0x1000] sm:$0xff] }
 0x37f   : > { %v13854_v5 = vcombine.high %v1354_v56, %v1366_v59  ;;  %v13853_v13 = vcombine.low %v1354_v56, %v1366_v59  ;;  %v13400_v56 = vcombine.high %v899_v39, %v911_v40  ;;  %v491_v59 = vld [vmem:[#allocation6 + $0x340] sm:$0xff] }
 0x380   : > { %8348 = vmatpush2.bf16.msra.mxu0 %v13589_v53  ;;  %v575_v53 = vld [vmem:[#allocation6 + $0x5e0] sm:$0xff] }
 0x381   : > { %8389 = vmatpush2.bf16.msra.mxu1 %v13973_v8  ;;  %8349 = vmatprep.subr.bf16.mxu0 %v13566_v43  ;;  %v947_v8 = vld [vmem:[#allocation6 + $0x1180] sm:$0xff]  ;;  %v13064_v14 = vcombine.high %v563_v20, %v575_v53  ;;  %v13063_v31 = vcombine.low %v563_v20, %v575_v53 }
 0x382   : > { %8390 = vmatprep.subr.bf16.mxu1 %v13950_v9  ;;  %v959_v43 = vld [vmem:[#allocation6 + $0x11e0] sm:$0xff]  ;;  %v1588_v9 = vrot.slane %v15944_v2, %v15871_v7 }
 0x383   : > { %v13447_v32 = vcombine.low %v947_v8, %v959_v43  ;;  %v527_v2 = vld [vmem:[#allocation6 + $0x460] sm:$0xff] }
 0x384   : > { %8350 = vmatpush2.bf16.msra.mxu0 %v13565_v18  ;;  %v13448_v18 = vcombine.high %v947_v8, %v959_v43  ;;  %v8075_v27 = vadd.f32 %v15963_v4, %v1588_v9  ;;  %v13399_v9 = vcombine.low %v899_v39, %v911_v40  ;;  %v419_v40 = vld [vmem:[#allocation6 + $0x100] sm:$0xff] }
 0x385   : > { %8391 = vmatpush2.bf16.msra.mxu1 %v13949_v19  ;;  %8351 = vmatprep.subr.bf16.mxu0 %v13542_v46  ;;  %v539_v19 = vld [vmem:[#allocation6 + $0x4c0] sm:$0xff] }
 0x386   : > { %8392 = vmatprep.subr.bf16.mxu1 %v13926_v22  ;;  %v551_v46 = vld [vmem:[#allocation6 + $0x520] sm:$0xff] }
 0x387   : > { %v923_v22 = vld [vmem:[#allocation6 + $0x10c0] sm:$0xff] }
 0x388   : > { %8352 = vmatpush2.bf16.msra.mxu0 %v13541_v34  ;;  %v13040_v34 = vcombine.high %v539_v19, %v551_v46 }
 0x389   : > { %8393 = vmatpush2.bf16.msra.mxu1 %v13925_v35  ;;  %8353 = vmatprep.subr.bf16.mxu0 %v13518_v36  ;;  %v8077_v35 = vadd.f32 %v15968_v52, %v1592_v17  ;;  %v13424_v36 = vcombine.high %v923_v22, %v935_v26  ;;  %v479_v17 = vld [vmem:[#allocation6 + $0x2e0] sm:$0xff] }
 0x38a   : > { %8394 = vmatprep.subr.bf16.mxu1 %v13902_v37  ;;  %v515_v37 = vld [vmem:[#allocation6 + $0x400] sm:$0xff] }
 0x38b   : > { %v13016_v52 = vcombine.high %v515_v37, %v527_v2  ;;  %v13015_v53 = vcombine.low %v515_v37, %v527_v2 }
 0x38c   : > { %8354 = vmatpush2.bf16.msra.mxu0 %v13517_v41  ;;  %v13039_v41 = vcombine.low %v539_v19, %v551_v46  ;;  %v851_v19 = vld [vmem:[#allocation6 + $0xe80] sm:$0xff] }
 0x38d   : > { %8395 = vmatpush2.bf16.msra.mxu1 %v13901_v58  ;;  %8355 = vmatprep.subr.bf16.mxu0 %v13494_v45  ;;  %v13423_v45 = vcombine.low %v923_v22, %v935_v26  ;;  %v863_v46 = vld [vmem:[#allocation6 + $0xee0] sm:$0xff] }
 0x38e   : > { %8396 = vmatprep.subr.bf16.mxu1 %v13878_v48  ;;  %v13351_v2 = vcombine.low %v851_v19, %v863_v46 }
 0x390   : > { %8356 = vmatpush2.bf16.msra.mxu0 %v13493_v62  ;;  %v503_v62 = vld [vmem:[#allocation6 + $0x3a0] sm:$0xff] }
 0x391   : > { %8397 = vmatpush2.bf16.msra.mxu1 %v13877_v1  ;;  %8357 = vmatprep.subr.bf16.mxu0 %v13470_v3  ;;  %v875_v3 = vld [vmem:[#allocation6 + $0xf40] sm:$0xff]  ;;  %v12991_v22 = vcombine.low %v491_v59, %v503_v62 }
 0x392   : > { %8398 = vmatprep.subr.bf16.mxu1 %v13854_v5  ;;  %v887_v5 = vld [vmem:[#allocation6 + $0xfa0] sm:$0xff] }
 0x393   : > { %v13375_v26 = vcombine.low %v875_v3, %v887_v5 }
 0x394   : > { %8358 = vmatpush2.bf16.msra.mxu0 %v13469_v12  ;;  %v12992_v12 = vcombine.high %v491_v59, %v503_v62  ;;  %v779_v59 = vld [vmem:[#allocation6 + $0xc40] sm:$0xff] }
 0x395   : > { %8399 = vmatpush2.bf16.msra.mxu1 %v13853_v13  ;;  %8409 = vmatprep.subr.bf16.mxu0 %v13064_v14  ;;  %v13376_v13 = vcombine.high %v875_v3, %v887_v5  ;;  %v467_v14 = vld [vmem:[#allocation6 + $0x280] sm:$0xff] }
 0x396   : > { %8450 = vmatprep.subr.bf16.mxu1 %v13448_v18  ;;  %v12967_v37 = vcombine.low %v467_v14, %v479_v17  ;;  %v791_v62 = vld [vmem:[#allocation6 + $0xca0] sm:$0xff] }
 0x397   : > { %v8115_v38 = vpop.f32.mrf.mxu0  ;;  %8360 = vmatmul.mubr.bf16.vlgmr.msra.gmra.mxu0 %v15815_v21 }
 0x398   : > { %v8116_v44 = vadd.f32 %v8115_v38, %v8075_v27  ;;  %8401 = vmatmul.mubr.bf16.vlgmr.msra.gmra.mxu1 %v15824_v33  ;;  %8410 = vmatpush1.bf16.msra.mxu0 %v13063_v31  ;;  %v8156_v4 = vpop.f32.mrf.mxu1  ;;  %v12968_v27 = vcombine.high %v467_v14, %v479_v17  ;;  %v13352_v31 = vcombine.high %v851_v19, %v863_v46  ;;  %v731_v19 = vld [vmem:[#allocation6 + $0xac0] sm:$0xff] }
 0x399   : > { %8451 = vmatpush1.bf16.msra.mxu1 %v13447_v32  ;;  %v8117_v58 = vpop.f32.mrf.mxu0  ;;  %8411 = vmatprep.subr.bf16.mxu0 %v13040_v34  ;;  %v443_v32 = vld [vmem:[#allocation6 + $0x1c0] sm:$0xff]  ;;  %v13279_v14 = vcombine.low %v779_v59, %v791_v62 }
 0x39a   : > { %v8118_v48 = vadd.f32 %v8117_v58, %v8077_v35  ;;  %v15980_v49 = vadd.f32 %v8156_v4, %v8116_v44  ;;  %v8158_v51 = vpop.f32.mrf.mxu1  ;;  %8452 = vmatprep.subr.bf16.mxu1 %v13424_v36  ;;  %8441 = vmatprep.mubr.bf16.mxu0 %v15803_v57  ;;  %v455_v34 = vld [vmem:[#allocation6 + $0x220] sm:$0xff] }
 0x39b   : > { %v8119_v1 = vpop.f32.mrf.mxu0  ;;  %8482 = vmatprep.mubr.bf16.mxu1 %v15806_v61  ;;  %v827_v35 = vld [vmem:[#allocation6 + $0xdc0] sm:$0xff]  ;;  %v12944_v38 = vcombine.high %v443_v32, %v455_v34  ;;  %v12943_v58 = vcombine.low %v443_v32, %v455_v34 }
 0x39c   : > { %v15984_v20 = vadd.f32 %v8158_v51, %v8118_v48  ;;  %8412 = vmatpush1.bf16.msra.mxu0 %v13039_v41  ;;  %v8160_v8 = vpop.f32.mrf.mxu1  ;;  %v839_v36 = vld [vmem:[#allocation6 + $0xe20] sm:$0xff] }
 0x39d   : > { %8453 = vmatpush1.bf16.msra.mxu1 %v13423_v45  ;;  %v8120_v43 = vpop.f32.mrf.mxu0  ;;  %8413 = vmatprep.subr.bf16.mxu0 %v13016_v52  ;;  %v13328_v39 = vcombine.high %v827_v35, %v839_v36  ;;  %v431_v44 = vld [vmem:[#allocation6 + $0x160] sm:$0xff]  ;;  %v13327_v45 = vcombine.low %v827_v35, %v839_v36 }
 0x39e   : > { %8454 = vmatprep.subr.bf16.mxu1 %v13400_v56  ;;  %v8161_v18 = vpop.f32.mrf.mxu1  ;;  %v803_v4 = vld [vmem:[#allocation6 + $0xd00] sm:$0xff]  ;;  %v12920_v52 = vcombine.high %v419_v40, %v431_v44  ;;  %v12919_v1 = vcombine.low %v419_v40, %v431_v44 }
 0x39f   : > { %v815_v41 = vld [vmem:[#allocation6 + $0xd60] sm:$0xff] }
 0x3a0   : > { %8414 = vmatpush1.bf16.msra.mxu0 %v13015_v53  ;;  %v13304_v48 = vcombine.high %v803_v4, %v815_v41  ;;  %v395_v51 = vld [vmem:[#allocation6 + $0x40] sm:$0xff]  ;;  %v13303_v3 = vcombine.low %v803_v4, %v815_v41  ;;  %v13280_v53 = vcombine.high %v779_v59, %v791_v62 }
 0x3a1   : > { %8455 = vmatpush1.bf16.msra.mxu1 %v13399_v9  ;;  %8415 = vmatprep.subr.bf16.mxu0 %v12992_v12  ;;  %v407_v56 = vld [vmem:[#allocation6 + $0xa0] sm:$0xff] }
 0x3a2   : > { %8456 = vmatprep.subr.bf16.mxu1 %v13376_v13  ;;  %v12896_v5 = vcombine.high %v395_v51, %v407_v56  ;;  %v755_v8 = vld [vmem:[#allocation6 + $0xb80] sm:$0xff]  ;;  %v12895_v13 = vcombine.low %v395_v51, %v407_v56 }
 0x3a3   : > { %v767_v43 = vld [vmem:[#allocation6 + $0xbe0] sm:$0xff] }
 0x3a4   : > { %8416 = vmatpush1.bf16.msra.mxu0 %v12991_v22  ;;  %v1139_v9 = vld [vmem:[#allocation6 + $0x1780] sm:$0xff]  ;;  %v13256_v17 = vcombine.high %v755_v8, %v767_v43 }
 0x3a5   : > { %8457 = vmatpush1.bf16.msra.mxu1 %v13375_v26  ;;  %8417 = vmatprep.subr.bf16.mxu0 %v12968_v27  ;;  %v1151_v12 = vld [vmem:[#allocation6 + $0x17e0] sm:$0xff]  ;;  %v13255_v27 = vcombine.low %v755_v8, %v767_v43 }
 0x3a6   : > { %8458 = vmatprep.subr.bf16.mxu1 %v13352_v31  ;;  %v13640_v18 = vcombine.high %v1139_v9, %v1151_v12  ;;  %v743_v46 = vld [vmem:[#allocation6 + $0xb20] sm:$0xff]  ;;  %v13639_v31 = vcombine.low %v1139_v9, %v1151_v12 }
 0x3a7   : > { %v1115_v22 = vld [vmem:[#allocation6 + $0x16c0] sm:$0xff]  ;;  %v13232_v32 = vcombine.high %v731_v19, %v743_v46 }
 0x3a8   : > { %8418 = vmatpush1.bf16.msra.mxu0 %v12967_v37  ;;  %v1127_v26 = vld [vmem:[#allocation6 + $0x1720] sm:$0xff] }
 0x3a9   : > { %8459 = vmatpush1.bf16.msra.mxu1 %v13351_v2  ;;  %8419 = vmatprep.subr.bf16.mxu0 %v12944_v38  ;;  %v13616_v34 = vcombine.high %v1115_v22, %v1127_v26  ;;  %v707_v35 = vld [vmem:[#allocation6 + $0xa00] sm:$0xff]  ;;  %v13231_v38 = vcombine.low %v731_v19, %v743_v46 }
 0x3aa   : > { %8460 = vmatprep.subr.bf16.mxu1 %v13328_v39  ;;  %v719_v36 = vld [vmem:[#allocation6 + $0xa60] sm:$0xff]  ;;  %v13615_v39 = vcombine.low %v1115_v22, %v1127_v26 }
 0x3ab   : > { %v1091_v37 = vld [vmem:[#allocation6 + $0x1600] sm:$0xff]  ;;  %v13208_v40 = vcombine.high %v707_v35, %v719_v36 }
 0x3ac   : > { %8420 = vmatpush1.bf16.msra.mxu0 %v12943_v58  ;;  %v1103_v2 = vld [vmem:[#allocation6 + $0x1660] sm:$0xff] }
 0x3ad   : > { %8461 = vmatpush1.bf16.msra.mxu1 %v13327_v45  ;;  %8421 = vmatprep.subr.bf16.mxu0 %v12920_v52  ;;  %v13592_v44 = vcombine.high %v1091_v37, %v1103_v2  ;;  %v683_v4 = vld [vmem:[#allocation6 + $0x940] sm:$0xff]  ;;  %v13207_v52 = vcombine.low %v707_v35, %v719_v36 }
 0x3ae   : > { %8462 = vmatprep.subr.bf16.mxu1 %v13304_v48  ;;  %v695_v41 = vld [vmem:[#allocation6 + $0x9a0] sm:$0xff]  ;;  %v13591_v48 = vcombine.low %v1091_v37, %v1103_v2 }
 0x3af   : > { %v1067_v58 = vld [vmem:[#allocation6 + $0x1540] sm:$0xff]  ;;  %v13184_v51 = vcombine.high %v683_v4, %v695_v41 }
 0x3b0   : > { %8422 = vmatpush1.bf16.msra.mxu0 %v12919_v1  ;;  %v1079_v45 = vld [vmem:[#allocation6 + $0x15a0] sm:$0xff] }
 0x3b1   : > { %8463 = vmatpush1.bf16.msra.mxu1 %v13303_v3  ;;  %8423 = vmatprep.subr.bf16.mxu0 %v12896_v5  ;;  %v13568_v56 = vcombine.high %v1067_v58, %v1079_v45  ;;  %v659_v59 = vld [vmem:[#allocation6 + $0x880] sm:$0xff]  ;;  %v13183_v5 = vcombine.low %v683_v4, %v695_v41 }
 0x3b2   : > { %8464 = vmatprep.subr.bf16.mxu1 %v13280_v53  ;;  %v671_v62 = vld [vmem:[#allocation6 + $0x8e0] sm:$0xff]  ;;  %v13567_v53 = vcombine.low %v1067_v58, %v1079_v45 }
 0x3b3   : > { %v1043_v1 = vld [vmem:[#allocation6 + $0x1480] sm:$0xff]  ;;  %v13160_v8 = vcombine.high %v659_v59, %v671_v62 }
 0x3b4   : > { %8424 = vmatpush1.bf16.msra.mxu0 %v12895_v13  ;;  %v1055_v3 = vld [vmem:[#allocation6 + $0x14e0] sm:$0xff] }
 0x3b5   : > { %8465 = vmatpush1.bf16.msra.mxu1 %v13279_v14  ;;  %8425 = vmatprep.subr.bf16.mxu0 %v13256_v17  ;;  %v13544_v43 = vcombine.high %v1043_v1, %v1055_v3  ;;  %v635_v9 = vld [vmem:[#allocation6 + $0x7c0] sm:$0xff]  ;;  %v13159_v17 = vcombine.low %v659_v59, %v671_v62 }
 0x3b6   : > { %8466 = vmatprep.subr.bf16.mxu1 %v13640_v18  ;;  %v647_v12 = vld [vmem:[#allocation6 + $0x820] sm:$0xff]  ;;  %v13543_v18 = vcombine.low %v1043_v1, %v1055_v3 }
 0x3b7   : > { %v1019_v13 = vld [vmem:[#allocation6 + $0x13c0] sm:$0xff]  ;;  %v13136_v19 = vcombine.high %v635_v9, %v647_v12 }
 0x3b8   : > { %8426 = vmatpush2.bf16.msra.mxu0 %v13255_v27  ;;  %v1031_v14 = vld [vmem:[#allocation6 + $0x1420] sm:$0xff] }
 0x3b9   : > { %8467 = vmatpush2.bf16.msra.mxu1 %v13639_v31  ;;  %8427 = vmatprep.subr.bf16.mxu0 %v13232_v32  ;;  %v13520_v46 = vcombine.high %v1019_v13, %v1031_v14  ;;  %v611_v22 = vld [vmem:[#allocation6 + $0x700] sm:$0xff]  ;;  %v13135_v32 = vcombine.low %v635_v9, %v647_v12 }
 0x3ba   : > { %8468 = vmatprep.subr.bf16.mxu1 %v13616_v34  ;;  %v623_v26 = vld [vmem:[#allocation6 + $0x760] sm:$0xff]  ;;  %v13519_v34 = vcombine.low %v1019_v13, %v1031_v14 }
 0x3bb   : > { %v995_v27 = vld [vmem:[#allocation6 + $0x1300] sm:$0xff]  ;;  %v13112_v35 = vcombine.high %v611_v22, %v623_v26 }
 0x3bc   : > { %8428 = vmatpush2.bf16.msra.mxu0 %v13231_v38  ;;  %v1007_v31 = vld [vmem:[#allocation6 + $0x1360] sm:$0xff] }
 0x3bd   : > { %8469 = vmatpush2.bf16.msra.mxu1 %v13615_v39  ;;  %8429 = vmatprep.subr.bf16.mxu0 %v13208_v40  ;;  %v13496_v36 = vcombine.high %v995_v27, %v1007_v31  ;;  %v587_v37 = vld [vmem:[#allocation6 + $0x640] sm:$0xff]  ;;  %v13111_v40 = vcombine.low %v611_v22, %v623_v26  ;;  %v516_v22 = vld [vmem:[#allocation6 + $0x408] sm:$0xff] }
 0x3be   : > { %8470 = vmatprep.subr.bf16.mxu1 %v13592_v44  ;;  %v599_v2 = vld [vmem:[#allocation6 + $0x6a0] sm:$0xff]  ;;  %v13495_v44 = vcombine.low %v995_v27, %v1007_v31  ;;  %v528_v26 = vld [vmem:[#allocation6 + $0x468] sm:$0xff] }
 0x3bf   : > { %v971_v38 = vld [vmem:[#allocation6 + $0x1240] sm:$0xff]  ;;  %v13088_v4 = vcombine.high %v587_v37, %v599_v2 }
 0x3c0   : > { %8430 = vmatpush2.bf16.msra.mxu0 %v13207_v52  ;;  %v983_v39 = vld [vmem:[#allocation6 + $0x12a0] sm:$0xff]  ;;  %v564_v52 = vld [vmem:[#allocation6 + $0x588] sm:$0xff] }
 0x3c1   : > { %8471 = vmatpush2.bf16.msra.mxu1 %v13591_v48  ;;  %8431 = vmatprep.subr.bf16.mxu0 %v13184_v51  ;;  %v13472_v41 = vcombine.high %v971_v38, %v983_v39  ;;  %v1331_v58 = vld [vmem:[#allocation6 + $0x1d80] sm:$0xff]  ;;  %v576_v48 = vld [vmem:[#allocation6 + $0x5e8] sm:$0xff]  ;;  %v13087_v51 = vcombine.low %v587_v37, %v599_v2 }
 0x3c2   : > { %8472 = vmatprep.subr.bf16.mxu1 %v13568_v56  ;;  %v1343_v45 = vld [vmem:[#allocation6 + $0x1de0] sm:$0xff]  ;;  %v13471_v56 = vcombine.low %v971_v38, %v983_v39  ;;  %v13066_v62 = vcombine.high %v564_v52, %v576_v48  ;;  %v13065_v12 = vcombine.low %v564_v52, %v576_v48  ;;  %v13018_v39 = vcombine.high %v516_v22, %v528_v26 }
 0x3c3   : > { %v13832_v59 = vcombine.high %v1331_v58, %v1343_v45  ;;  %v1307_v1 = vld [vmem:[#allocation6 + $0x1cc0] sm:$0xff]  ;;  %v13831_v9 = vcombine.low %v1331_v58, %v1343_v45  ;;  %v504_v58 = vld [vmem:[#allocation6 + $0x3a8] sm:$0xff] }
 0x3c4   : > { %8432 = vmatpush2.bf16.msra.mxu0 %v13183_v5  ;;  %v1319_v3 = vld [vmem:[#allocation6 + $0x1d20] sm:$0xff]  ;;  %v540_v5 = vld [vmem:[#allocation6 + $0x4c8] sm:$0xff] }
 0x3c5   : > { %8473 = vmatpush2.bf16.msra.mxu1 %v13567_v53  ;;  %8433 = vmatprep.subr.bf16.mxu0 %v13160_v8  ;;  %v552_v53 = vld [vmem:[#allocation6 + $0x528] sm:$0xff]  ;;  %v13808_v13 = vcombine.high %v1307_v1, %v1319_v3 }
 0x3c6   : > { %8474 = vmatprep.subr.bf16.mxu1 %v13544_v43  ;;  %v15986_v8 = vld [vmem:[#allocation8 + $0x8] sm:$0xff] }
 0x3c7   : > { %v1596_v43 = vrot.slane %v15986_v8, %v15891_v11  ;;  %v1600_v14 = vrot.slane %v15986_v8, %v15894_v15 }
 0x3c8   : > { %8434 = vmatpush2.bf16.msra.mxu0 %v13159_v17  ;;  %v13042_v17 = vcombine.high %v540_v5, %v552_v53 }
 0x3c9   : > { %8475 = vmatpush2.bf16.msra.mxu1 %v13543_v18  ;;  %8435 = vmatprep.subr.bf16.mxu0 %v13136_v19  ;;  %v1283_v18 = vld [vmem:[#allocation6 + $0x1c00] sm:$0xff] }
 0x3ca   : > { %8476 = vmatprep.subr.bf16.mxu1 %v13520_v46  ;;  %v1295_v19 = vld [vmem:[#allocation6 + $0x1c60] sm:$0xff] }
 0x3cb   : > { %v13783_v52 = vcombine.low %v1283_v18, %v1295_v19 }
 0x3cc   : > { %8436 = vmatpush2.bf16.msra.mxu0 %v13135_v32  ;;  %v13807_v32 = vcombine.low %v1307_v1, %v1319_v3  ;;  %v1235_v1 = vld [vmem:[#allocation6 + $0x1a80] sm:$0xff] }
 0x3cd   : > { %8477 = vmatpush2.bf16.msra.mxu1 %v13519_v34  ;;  %8437 = vmatprep.subr.bf16.mxu0 %v13112_v35  ;;  %v13041_v35 = vcombine.low %v540_v5, %v552_v53  ;;  %v1247_v3 = vld [vmem:[#allocation6 + $0x1ae0] sm:$0xff]  ;;  %v468_v53 = vld [vmem:[#allocation6 + $0x288] sm:$0xff] }
 0x3ce   : > { %8478 = vmatprep.subr.bf16.mxu1 %v13496_v36  ;;  %v13784_v36 = vcombine.high %v1283_v18, %v1295_v19  ;;  %v1223_v18 = vld [vmem:[#allocation6 + $0x1a20] sm:$0xff]  ;;  %v444_v19 = vld [vmem:[#allocation6 + $0x1c8] sm:$0xff] }
 0x3d0   : > { %8438 = vmatpush2.bf16.msra.mxu0 %v13111_v40  ;;  %v1259_v40 = vld [vmem:[#allocation6 + $0x1b40] sm:$0xff] }
 0x3d1   : > { %8479 = vmatpush2.bf16.msra.mxu1 %v13495_v44  ;;  %8439 = vmatprep.subr.bf16.mxu0 %v13088_v4  ;;  %v1271_v44 = vld [vmem:[#allocation6 + $0x1ba0] sm:$0xff] }
 0x3d2   : > { %8480 = vmatprep.subr.bf16.mxu1 %v13472_v41  ;;  %v492_v41 = vld [vmem:[#allocation6 + $0x348] sm:$0xff] }
 0x3d4   : > { %8440 = vmatpush2.bf16.msra.mxu0 %v13087_v51 }
 0x3d5   : > { %8481 = vmatpush2.bf16.msra.mxu1 %v13471_v56  ;;  %8491 = vmatprep.subr.bf16.mxu0 %v13832_v59  ;;  %v13017_v56 = vcombine.low %v516_v22, %v528_v26  ;;  %v13760_v59 = vcombine.high %v1259_v40, %v1271_v44  ;;  %v13735_v22 = vcombine.low %v1235_v1, %v1247_v3 }
 0x3d6   : > { %8532 = vmatprep.subr.bf16.mxu1 %v13066_v62  ;;  %v12994_v62 = vcombine.high %v492_v41, %v504_v58 }
 0x3d7   : > { %v8197_v46 = vpop.f32.mrf.mxu0  ;;  %8442 = vmatmul.mubr.bf16.vlgmr.msra.gmra.mxu0 %v15812_v16 }
 0x3d8   : > { %v8198_v27 = vadd.f32 %v8197_v46, %v1596_v43  ;;  %8483 = vmatmul.mubr.bf16.vlgmr.msra.gmra.mxu1 %v15815_v21  ;;  %8492 = vmatpush1.bf16.msra.mxu0 %v13831_v9  ;;  %v8238_v31 = vpop.f32.mrf.mxu1  ;;  %v480_v43 = vld [vmem:[#allocation6 + $0x2e8] sm:$0xff]  ;;  %v13759_v9 = vcombine.low %v1259_v40, %v1271_v44  ;;  %v1163_v44 = vld [vmem:[#allocation6 + $0x1840] sm:$0xff] }
 0x3d9   : > { %8533 = vmatpush1.bf16.msra.mxu1 %v13065_v12  ;;  %v8199_v34 = vpop.f32.mrf.mxu0  ;;  %8493 = vmatprep.subr.bf16.mxu0 %v13808_v13  ;;  %v12993_v12 = vcombine.low %v492_v41, %v504_v58  ;;  %v13736_v13 = vcombine.high %v1235_v1, %v1247_v3  ;;  %v456_v46 = vld [vmem:[#allocation6 + $0x228] sm:$0xff]  ;;  %v12969_v26 = vcombine.low %v468_v53, %v480_v43 }
 0x3da   : > { %v8200_v37 = vadd.f32 %v8199_v34, %v1600_v14  ;;  %v15994_v2 = vadd.f32 %v8238_v31, %v8198_v27  ;;  %v8240_v38 = vpop.f32.mrf.mxu1  ;;  %8534 = vmatprep.subr.bf16.mxu1 %v13042_v17  ;;  %8523 = vmatprep.mubr.bf16.mxu0 %v15817_v28  ;;  %v12970_v14 = vcombine.high %v468_v53, %v480_v43  ;;  %v1211_v17 = vld [vmem:[#allocation6 + $0x19c0] sm:$0xff]  ;;  %v396_v41 = vld [vmem:[#allocation6 + $0x48] sm:$0xff] }
 0x3db   : > { %v8201_v4 = vpop.f32.mrf.mxu0  ;;  %8564 = vmatprep.mubr.bf16.mxu1 %v15803_v57  ;;  %v13712_v27 = vcombine.high %v1211_v17, %v1223_v18  ;;  %v12946_v31 = vcombine.high %v444_v19, %v456_v46  ;;  %v1199_v34 = vld [vmem:[#allocation6 + $0x1960] sm:$0xff]  ;;  %v408_v58 = vld [vmem:[#allocation6 + $0xa8] sm:$0xff] }
 0x3dc   : > { %v15998_v45 = vadd.f32 %v8240_v38, %v8200_v37  ;;  %8494 = vmatpush1.bf16.msra.mxu0 %v13807_v32  ;;  %v8242_v48 = vpop.f32.mrf.mxu1  ;;  %v1187_v32 = vld [vmem:[#allocation6 + $0x1900] sm:$0xff]  ;;  %v13711_v37 = vcombine.low %v1211_v17, %v1223_v18  ;;  %v12945_v38 = vcombine.low %v444_v19, %v456_v46  ;;  %v756_v1 = vld [vmem:[#allocation6 + $0xb88] sm:$0xff]  ;;  %v12897_v53 = vcombine.low %v396_v41, %v408_v58 }
 0x3dd   : > { %8535 = vmatpush1.bf16.msra.mxu1 %v13041_v35  ;;  %v8202_v51 = vpop.f32.mrf.mxu0  ;;  %8495 = vmatprep.subr.bf16.mxu0 %v13784_v36  ;;  %v420_v35 = vld [vmem:[#allocation6 + $0x108] sm:$0xff]  ;;  %v1175_v4 = vld [vmem:[#allocation6 + $0x18a0] sm:$0xff] }
 0x3de   : > { %8536 = vmatprep.subr.bf16.mxu1 %v13018_v39  ;;  %v8243_v5 = vpop.f32.mrf.mxu1  ;;  %v432_v36 = vld [vmem:[#allocation6 + $0x168] sm:$0xff]  ;;  %v13688_v39 = vcombine.high %v1187_v32, %v1199_v34  ;;  %v13664_v51 = vcombine.high %v1163_v44, %v1175_v4 }
 0x3df   : > { %v12922_v40 = vcombine.high %v420_v35, %v432_v36  ;;  %v12921_v48 = vcombine.low %v420_v35, %v432_v36  ;;  %v768_v3 = vld [vmem:[#allocation6 + $0xbe8] sm:$0xff]  ;;  %v13663_v5 = vcombine.low %v1163_v44, %v1175_v4 }
 0x3e0   : > { %8496 = vmatpush1.bf16.msra.mxu0 %v13783_v52  ;;  %v13687_v52 = vcombine.low %v1187_v32, %v1199_v34  ;;  %v744_v17 = vld [vmem:[#allocation6 + $0xb28] sm:$0xff]  ;;  %v13257_v19 = vcombine.low %v756_v1, %v768_v3 }
 0x3e1   : > { %8537 = vmatpush1.bf16.msra.mxu1 %v13017_v56  ;;  %8497 = vmatprep.subr.bf16.mxu0 %v13760_v59  ;;  %v12898_v56 = vcombine.high %v396_v41, %v408_v58  ;;  %v1523_v59 = vld [vmem:[#allocation6 + $0x2380] sm:$0xff]  ;;  %v720_v32 = vld [vmem:[#allocation6 + $0xa68] sm:$0xff] }
 0x3e2   : > { %8538 = vmatprep.subr.bf16.mxu1 %v12994_v62  ;;  %v1535_v62 = vld [vmem:[#allocation6 + $0x23e0] sm:$0xff]  ;;  %v696_v44 = vld [vmem:[#allocation6 + $0x9a8] sm:$0xff] }
 0x3e3   : > { %v14024_v43 = vcombine.high %v1523_v59, %v1535_v62  ;;  %v14023_v18 = vcombine.low %v1523_v59, %v1535_v62  ;;  %v672_v59 = vld [vmem:[#allocation6 + $0x8e8] sm:$0xff] }
 0x3e4   : > { %8498 = vmatpush1.bf16.msra.mxu0 %v13759_v9  ;;  %v13258_v9 = vcombine.high %v756_v1, %v768_v3 }
 0x3e5   : > { %8539 = vmatpush1.bf16.msra.mxu1 %v12993_v12  ;;  %8499 = vmatprep.subr.bf16.mxu0 %v13736_v13  ;;  %v1499_v12 = vld [vmem:[#allocation6 + $0x22c0] sm:$0xff] }
 0x3e6   : > { %8540 = vmatprep.subr.bf16.mxu1 %v12970_v14  ;;  %v1511_v13 = vld [vmem:[#allocation6 + $0x2320] sm:$0xff]  ;;  %v732_v14 = vld [vmem:[#allocation6 + $0xac8] sm:$0xff] }
 0x3e7   : > { %v14000_v46 = vcombine.high %v1499_v12, %v1511_v13  ;;  %v13999_v34 = vcombine.low %v1499_v12, %v1511_v13  ;;  %v13233_v35 = vcombine.low %v732_v14, %v744_v17  ;;  %v648_v12 = vld [vmem:[#allocation6 + $0x828] sm:$0xff] }
 0x3e8   : > { %8500 = vmatpush1.bf16.msra.mxu0 %v13735_v22  ;;  %v13234_v22 = vcombine.high %v732_v14, %v744_v17 }
 0x3e9   : > { %8541 = vmatpush1.bf16.msra.mxu1 %v12969_v26  ;;  %8501 = vmatprep.subr.bf16.mxu0 %v13712_v27  ;;  %v1475_v26 = vld [vmem:[#allocation6 + $0x2200] sm:$0xff] }
 0x3ea   : > { %8542 = vmatprep.subr.bf16.mxu1 %v12946_v31  ;;  %v1487_v27 = vld [vmem:[#allocation6 + $0x2260] sm:$0xff]  ;;  %v708_v31 = vld [vmem:[#allocation6 + $0xa08] sm:$0xff] }
 0x3eb   : > { %v13976_v36 = vcombine.high %v1475_v26, %v1487_v27  ;;  %v13975_v4 = vcombine.low %v1475_v26, %v1487_v27  ;;  %v13209_v41 = vcombine.low %v708_v31, %v720_v32  ;;  %v624_v26 = vld [vmem:[#allocation6 + $0x768] sm:$0xff] }
 0x3ec   : > { %8502 = vmatpush1.bf16.msra.mxu0 %v13711_v37  ;;  %v13210_v37 = vcombine.high %v708_v31, %v720_v32 }
 0x3ed   : > { %8543 = vmatpush1.bf16.msra.mxu1 %v12945_v38  ;;  %8503 = vmatprep.subr.bf16.mxu0 %v13688_v39  ;;  %v1451_v38 = vld [vmem:[#allocation6 + $0x2140] sm:$0xff] }
 0x3ee   : > { %8544 = vmatprep.subr.bf16.mxu1 %v12922_v40  ;;  %v1463_v39 = vld [vmem:[#allocation6 + $0x21a0] sm:$0xff]  ;;  %v684_v40 = vld [vmem:[#allocation6 + $0x948] sm:$0xff] }
 0x3ef   : > { %v13952_v58 = vcombine.high %v1451_v38, %v1463_v39  ;;  %v13951_v62 = vcombine.low %v1451_v38, %v1463_v39  ;;  %v13185_v1 = vcombine.low %v684_v40, %v696_v44  ;;  %v600_v38 = vld [vmem:[#allocation6 + $0x6a8] sm:$0xff] }
 0x3f0   : > { %8504 = vmatpush1.bf16.msra.mxu0 %v13687_v52  ;;  %v13186_v52 = vcombine.high %v684_v40, %v696_v44 }
 0x3f1   : > { %8545 = vmatpush1.bf16.msra.mxu1 %v12921_v48  ;;  %8505 = vmatprep.subr.bf16.mxu0 %v13664_v51  ;;  %v1427_v48 = vld [vmem:[#allocation6 + $0x2080] sm:$0xff] }
 0x3f2   : > { %8546 = vmatprep.subr.bf16.mxu1 %v12898_v56  ;;  %v1439_v51 = vld [vmem:[#allocation6 + $0x20e0] sm:$0xff]  ;;  %v660_v56 = vld [vmem:[#allocation6 + $0x888] sm:$0xff] }
 0x3f3   : > { %v13928_v3 = vcombine.high %v1427_v48, %v1439_v51  ;;  %v13927_v13 = vcombine.low %v1427_v48, %v1439_v51  ;;  %v13161_v14 = vcombine.low %v660_v56, %v672_v59  ;;  %v1344_v48 = vld [vmem:[#allocation6 + $0x1de8] sm:$0xff] }
 0x3f4   : > { %8506 = vmatpush1.bf16.msra.mxu0 %v13663_v5  ;;  %v13162_v5 = vcombine.high %v660_v56, %v672_v59 }
 0x3f5   : > { %8547 = vmatpush1.bf16.msra.mxu1 %v12897_v53  ;;  %8507 = vmatprep.subr.bf16.mxu0 %v14024_v43  ;;  %v1403_v53 = vld [vmem:[#allocation6 + $0x1fc0] sm:$0xff] }
 0x3f6   : > { %8548 = vmatprep.subr.bf16.mxu1 %v13258_v9  ;;  %v1415_v43 = vld [vmem:[#allocation6 + $0x2020] sm:$0xff]  ;;  %v636_v9 = vld [vmem:[#allocation6 + $0x7c8] sm:$0xff] }
 0x3f7   : > { %v13904_v17 = vcombine.high %v1403_v53, %v1415_v43  ;;  %v13903_v27 = vcombine.low %v1403_v53, %v1415_v43  ;;  %v13137_v31 = vcombine.low %v636_v9, %v648_v12  ;;  %v1320_v53 = vld [vmem:[#allocation6 + $0x1d28] sm:$0xff] }
 0x3f8   : > { %8508 = vmatpush2.bf16.msra.mxu0 %v14023_v18  ;;  %v13138_v18 = vcombine.high %v636_v9, %v648_v12 }
 0x3f9   : > { %8549 = vmatpush2.bf16.msra.mxu1 %v13257_v19  ;;  %8509 = vmatprep.subr.bf16.mxu0 %v14000_v46  ;;  %v1379_v19 = vld [vmem:[#allocation6 + $0x1f00] sm:$0xff] }
 0x3fa   : > { %8550 = vmatprep.subr.bf16.mxu1 %v13234_v22  ;;  %v1391_v46 = vld [vmem:[#allocation6 + $0x1f60] sm:$0xff]  ;;  %v612_v22 = vld [vmem:[#allocation6 + $0x708] sm:$0xff] }
 0x3fb   : > { %v13880_v32 = vcombine.high %v1379_v19, %v1391_v46  ;;  %v13879_v39 = vcombine.low %v1379_v19, %v1391_v46  ;;  %v13113_v40 = vcombine.low %v612_v22, %v624_v26  ;;  %v1284_v19 = vld [vmem:[#allocation6 + $0x1c08] sm:$0xff] }
 0x3fc   : > { %8510 = vmatpush2.bf16.msra.mxu0 %v13999_v34  ;;  %v13114_v34 = vcombine.high %v612_v22, %v624_v26  ;;  %v1296_v46 = vld [vmem:[#allocation6 + $0x1c68] sm:$0xff] }
 0x3fd   : > { %8551 = vmatpush2.bf16.msra.mxu1 %v13233_v35  ;;  %8511 = vmatprep.subr.bf16.mxu0 %v13976_v36  ;;  %v1355_v35 = vld [vmem:[#allocation6 + $0x1e40] sm:$0xff] }
 0x3fe   : > { %8552 = vmatprep.subr.bf16.mxu1 %v13210_v37  ;;  %v1367_v36 = vld [vmem:[#allocation6 + $0x1ea0] sm:$0xff]  ;;  %v588_v37 = vld [vmem:[#allocation6 + $0x648] sm:$0xff] }
 0x3ff   : > { %v13856_v44 = vcombine.high %v1355_v35, %v1367_v36  ;;  %v13855_v51 = vcombine.low %v1355_v35, %v1367_v36  ;;  %v13089_v56 = vcombine.low %v588_v37, %v600_v38  ;;  %v13786_v36 = vcombine.high %v1284_v19, %v1296_v46 }
 0x400   : > { %8512 = vmatpush2.bf16.msra.mxu0 %v13975_v4  ;;  %v13090_v4 = vcombine.high %v588_v37, %v600_v38  ;;  %v876_v37 = vld [vmem:[#allocation6 + $0xf48] sm:$0xff] }
 0x401   : > { %8553 = vmatpush2.bf16.msra.mxu1 %v13209_v41  ;;  %8513 = vmatprep.subr.bf16.mxu0 %v13952_v58  ;;  %v948_v41 = vld [vmem:[#allocation6 + $0x1188] sm:$0xff] }
 0x402   : > { %8554 = vmatprep.subr.bf16.mxu1 %v13186_v52  ;;  %v960_v58 = vld [vmem:[#allocation6 + $0x11e8] sm:$0xff] }
 0x403   : > { %v1332_v52 = vld [vmem:[#allocation6 + $0x1d88] sm:$0xff]  ;;  %v13450_v59 = vcombine.high %v948_v41, %v960_v58  ;;  %v13449_v43 = vcombine.low %v948_v41, %v960_v58 }
 0x404   : > { %8514 = vmatpush2.bf16.msra.mxu0 %v13951_v62  ;;  %v13834_v62 = vcombine.high %v1332_v52, %v1344_v48  ;;  %v13833_v9 = vcombine.low %v1332_v52, %v1344_v48  ;;  %v888_v38 = vld [vmem:[#allocation6 + $0xfa8] sm:$0xff] }
 0x405   : > { %8555 = vmatpush2.bf16.msra.mxu1 %v13185_v1  ;;  %8515 = vmatprep.subr.bf16.mxu0 %v13928_v3  ;;  %v924_v1 = vld [vmem:[#allocation6 + $0x10c8] sm:$0xff]  ;;  %v13378_v52 = vcombine.high %v876_v37, %v888_v38 }
 0x406   : > { %8556 = vmatprep.subr.bf16.mxu1 %v13162_v5  ;;  %v936_v3 = vld [vmem:[#allocation6 + $0x1128] sm:$0xff] }
 0x407   : > { %v1308_v5 = vld [vmem:[#allocation6 + $0x1cc8] sm:$0xff]  ;;  %v13426_v12 = vcombine.high %v924_v1, %v936_v3  ;;  %v13425_v26 = vcombine.low %v924_v1, %v936_v3  ;;  %v13377_v3 = vcombine.low %v876_v37, %v888_v38 }
 0x408   : > { %8516 = vmatpush2.bf16.msra.mxu0 %v13927_v13  ;;  %v13810_v13 = vcombine.high %v1308_v5, %v1320_v53  ;;  %v1248_v1 = vld [vmem:[#allocation6 + $0x1ae8] sm:$0xff] }
 0x409   : > { %8557 = vmatpush2.bf16.msra.mxu1 %v13161_v14  ;;  %8517 = vmatprep.subr.bf16.mxu0 %v13904_v17  ;;  %v900_v14 = vld [vmem:[#allocation6 + $0x1008] sm:$0xff] }
 0x40a   : > { %8558 = vmatprep.subr.bf16.mxu1 %v13138_v18  ;;  %v912_v17 = vld [vmem:[#allocation6 + $0x1068] sm:$0xff] }
 0x40c   : > { %8518 = vmatpush2.bf16.msra.mxu0 %v13903_v27 }
 0x40d   : > { %8559 = vmatpush2.bf16.msra.mxu1 %v13137_v31  ;;  %8519 = vmatprep.subr.bf16.mxu0 %v13880_v32  ;;  %v13809_v32 = vcombine.low %v1308_v5, %v1320_v53 }
 0x40e   : > { %8560 = vmatprep.subr.bf16.mxu1 %v13114_v34  ;;  %v13402_v34 = vcombine.high %v900_v14, %v912_v17 }
 0x410   : > { %8520 = vmatpush2.bf16.msra.mxu0 %v13879_v39 }
 0x411   : > { %8561 = vmatpush2.bf16.msra.mxu1 %v13113_v40  ;;  %8521 = vmatprep.subr.bf16.mxu0 %v13856_v44  ;;  %v1260_v40 = vld [vmem:[#allocation6 + $0x1b48] sm:$0xff] }
 0x412   : > { %8562 = vmatprep.subr.bf16.mxu1 %v13090_v4  ;;  %v1272_v44 = vld [vmem:[#allocation6 + $0x1ba8] sm:$0xff]  ;;  %v13401_v4 = vcombine.low %v900_v14, %v912_v17 }
 0x413   : > { %v13762_v48 = vcombine.high %v1260_v40, %v1272_v44  ;;  %v13761_v5 = vcombine.low %v1260_v40, %v1272_v44  ;;  %v1224_v14 = vld [vmem:[#allocation6 + $0x1a28] sm:$0xff] }
 0x414   : > { %8522 = vmatpush2.bf16.msra.mxu0 %v13855_v51  ;;  %v852_v51 = vld [vmem:[#allocation6 + $0xe88] sm:$0xff] }
 0x415   : > { %8563 = vmatpush2.bf16.msra.mxu1 %v13089_v56  ;;  %8573 = vmatprep.subr.bf16.mxu0 %v13450_v59  ;;  %v864_v56 = vld [vmem:[#allocation6 + $0xee8] sm:$0xff] }
 0x416   : > { %8614 = vmatprep.subr.bf16.mxu1 %v13834_v62  ;;  %v1236_v62 = vld [vmem:[#allocation6 + $0x1a88] sm:$0xff]  ;;  %v13354_v53 = vcombine.high %v852_v51, %v864_v56  ;;  %v13353_v17 = vcombine.low %v852_v51, %v864_v56 }
 0x417   : > { %v8279_v18 = vpop.f32.mrf.mxu0  ;;  %8524 = vmatmul.mubr.bf16.vlgmr.msra.gmra.mxu0 %v15824_v33  ;;  %v780_v40 = vld [vmem:[#allocation6 + $0xc48] sm:$0xff] }
 0x418   : > { %v16002_v22 = vadd.f32 %v8279_v18, %v15994_v2  ;;  %8565 = vmatmul.mubr.bf16.vlgmr.msra.gmra.mxu1 %v15812_v16  ;;  %8574 = vmatpush1.bf16.msra.mxu0 %v13449_v43  ;;  %v16005_v27 = vpop.f32.mrf.mxu1  ;;  %v13738_v43 = vcombine.high %v1236_v62, %v1248_v1  ;;  %v13737_v18 = vcombine.low %v1236_v62, %v1248_v1  ;;  %v792_v44 = vld [vmem:[#allocation6 + $0xca8] sm:$0xff] }
 0x419   : > { %8615 = vmatpush1.bf16.msra.mxu1 %v13833_v9  ;;  %v8281_v31 = vpop.f32.mrf.mxu0  ;;  %8575 = vmatprep.subr.bf16.mxu0 %v13426_v12  ;;  %v828_v9 = vld [vmem:[#allocation6 + $0xdc8] sm:$0xff]  ;;  %v13281_v1 = vcombine.low %v780_v40, %v792_v44 }
 0x41a   : > { %v16008_v35 = vadd.f32 %v8281_v31, %v15998_v45  ;;  %8616 = vmatprep.subr.bf16.mxu1 %v13810_v13  ;;  %v16010_v2 = vpop.f32.mrf.mxu1  ;;  %8605 = vmatprep.mubr.bf16.mxu0 %v15806_v61  ;;  %v13785_v45 = vcombine.low %v1284_v19, %v1296_v46  ;;  %v840_v12 = vld [vmem:[#allocation6 + $0xe28] sm:$0xff] }
 0x41b   : > { %v8283_v39 = vpop.f32.mrf.mxu0  ;;  %8646 = vmatprep.mubr.bf16.mxu1 %v15817_v28  ;;  %v1212_v13 = vld [vmem:[#allocation6 + $0x19c8] sm:$0xff]  ;;  %v13330_v19 = vcombine.high %v828_v9, %v840_v12 }
 0x41c   : > { %8576 = vmatpush1.bf16.msra.mxu0 %v13425_v26  ;;  %v8324_v41 = vpop.f32.mrf.mxu1  ;;  %v13714_v46 = vcombine.high %v1212_v13, %v1224_v14  ;;  %v804_v26 = vld [vmem:[#allocation6 + $0xd08] sm:$0xff]  ;;  %v13713_v37 = vcombine.low %v1212_v13, %v1224_v14 }
 0x41d   : > { %8617 = vmatpush1.bf16.msra.mxu1 %v13809_v32  ;;  %v8284_v58 = vpop.f32.mrf.mxu0  ;;  %8577 = vmatprep.subr.bf16.mxu0 %v13402_v34  ;;  %v816_v31 = vld [vmem:[#allocation6 + $0xd68] sm:$0xff] }
 0x41e   : > { %8618 = vmatprep.subr.bf16.mxu1 %v13786_v36  ;;  %v8325_v59 = vpop.f32.mrf.mxu1  ;;  %v1188_v32 = vld [vmem:[#allocation6 + $0x1908] sm:$0xff]  ;;  %v13329_v36 = vcombine.low %v828_v9, %v840_v12  ;;  %v13306_v38 = vcombine.high %v804_v26, %v816_v31  ;;  %v13305_v58 = vcombine.low %v804_v26, %v816_v31 }
 0x41f   : > { %v1200_v34 = vld [vmem:[#allocation6 + $0x1968] sm:$0xff] }
 0x420   : > { %8578 = vmatpush1.bf16.msra.mxu0 %v13401_v4  ;;  %v13690_v39 = vcombine.high %v1188_v32, %v1200_v34  ;;  %v1164_v4 = vld [vmem:[#allocation6 + $0x1848] sm:$0xff] }
 0x421   : > { %8619 = vmatpush1.bf16.msra.mxu1 %v13785_v45  ;;  %8579 = vmatprep.subr.bf16.mxu0 %v13378_v52  ;;  %v1176_v41 = vld [vmem:[#allocation6 + $0x18a8] sm:$0xff]  ;;  %v13689_v45 = vcombine.low %v1188_v32, %v1200_v34  ;;  %v13282_v52 = vcombine.high %v780_v40, %v792_v44 }
 0x422   : > { %8620 = vmatprep.subr.bf16.mxu1 %v13762_v48  ;;  %v13666_v48 = vcombine.high %v1164_v4, %v1176_v41  ;;  %v1140_v51 = vld [vmem:[#allocation6 + $0x1788] sm:$0xff] }
 0x423   : > { %v1152_v56 = vld [vmem:[#allocation6 + $0x17e8] sm:$0xff] }
 0x424   : > { %8580 = vmatpush1.bf16.msra.mxu0 %v13377_v3  ;;  %v1524_v59 = vld [vmem:[#allocation6 + $0x2388] sm:$0xff]  ;;  %v13665_v3 = vcombine.low %v1164_v4, %v1176_v41  ;;  %v13641_v14 = vcombine.low %v1140_v51, %v1152_v56 }
 0x425   : > { %8621 = vmatpush1.bf16.msra.mxu1 %v13761_v5  ;;  %8581 = vmatprep.subr.bf16.mxu0 %v13354_v53  ;;  %v1536_v62 = vld [vmem:[#allocation6 + $0x23e8] sm:$0xff]  ;;  %v13642_v5 = vcombine.high %v1140_v51, %v1152_v56 }
 0x426   : > { %8622 = vmatprep.subr.bf16.mxu1 %v13738_v43  ;;  %v14026_v53 = vcombine.high %v1524_v59, %v1536_v62  ;;  %v1116_v43 = vld [vmem:[#allocation6 + $0x16c8] sm:$0xff] }
 0x427   : > { %v1128_v9 = vld [vmem:[#allocation6 + $0x1728] sm:$0xff] }
 0x428   : > { %8582 = vmatpush1.bf16.msra.mxu0 %v13353_v17  ;;  %v1500_v12 = vld [vmem:[#allocation6 + $0x22c8] sm:$0xff]  ;;  %v14025_v17 = vcombine.low %v1524_v59, %v1536_v62  ;;  %v13617_v34 = vcombine.low %v1116_v43, %v1128_v9 }
 0x429   : > { %8623 = vmatpush1.bf16.msra.mxu1 %v13737_v18  ;;  %8583 = vmatprep.subr.bf16.mxu0 %v13330_v19  ;;  %v1512_v13 = vld [vmem:[#allocation6 + $0x2328] sm:$0xff]  ;;  %v13618_v18 = vcombine.high %v1116_v43, %v1128_v9 }
 0x42a   : > { %8624 = vmatprep.subr.bf16.mxu1 %v13714_v46  ;;  %v14002_v19 = vcombine.high %v1500_v12, %v1512_v13  ;;  %v1092_v46 = vld [vmem:[#allocation6 + $0x1608] sm:$0xff] }
 0x42b   : > { %v1104_v26 = vld [vmem:[#allocation6 + $0x1668] sm:$0xff] }
 0x42c   : > { %8584 = vmatpush1.bf16.msra.mxu0 %v13329_v36  ;;  %v1476_v31 = vld [vmem:[#allocation6 + $0x2208] sm:$0xff]  ;;  %v14001_v36 = vcombine.low %v1500_v12, %v1512_v13  ;;  %v13593_v41 = vcombine.low %v1092_v46, %v1104_v26 }
 0x42d   : > { %8625 = vmatpush1.bf16.msra.mxu1 %v13713_v37  ;;  %8585 = vmatprep.subr.bf16.mxu0 %v13306_v38  ;;  %v1488_v32 = vld [vmem:[#allocation6 + $0x2268] sm:$0xff]  ;;  %v13594_v37 = vcombine.high %v1092_v46, %v1104_v26 }
 0x42e   : > { %8626 = vmatprep.subr.bf16.mxu1 %v13690_v39  ;;  %v13978_v38 = vcombine.high %v1476_v31, %v1488_v32  ;;  %v1068_v39 = vld [vmem:[#allocation6 + $0x1548] sm:$0xff] }
 0x42f   : > { %v1080_v40 = vld [vmem:[#allocation6 + $0x15a8] sm:$0xff] }
 0x430   : > { %8586 = vmatpush1.bf16.msra.mxu0 %v13305_v58  ;;  %v1452_v44 = vld [vmem:[#allocation6 + $0x2148] sm:$0xff]  ;;  %v13977_v58 = vcombine.low %v1476_v31, %v1488_v32  ;;  %v13569_v62 = vcombine.low %v1068_v39, %v1080_v40 }
 0x431   : > { %8627 = vmatpush1.bf16.msra.mxu1 %v13689_v45  ;;  %8587 = vmatprep.subr.bf16.mxu0 %v13282_v52  ;;  %v1464_v4 = vld [vmem:[#allocation6 + $0x21a8] sm:$0xff]  ;;  %v13570_v45 = vcombine.high %v1068_v39, %v1080_v40 }
 0x432   : > { %8628 = vmatprep.subr.bf16.mxu1 %v13666_v48  ;;  %v13954_v52 = vcombine.high %v1452_v44, %v1464_v4  ;;  %v1044_v48 = vld [vmem:[#allocation6 + $0x1488] sm:$0xff] }
 0x433   : > { %v1056_v51 = vld [vmem:[#allocation6 + $0x14e8] sm:$0xff] }
 0x434   : > { %8588 = vmatpush1.bf16.msra.mxu0 %v13281_v1  ;;  %v1428_v56 = vld [vmem:[#allocation6 + $0x2088] sm:$0xff]  ;;  %v13953_v1 = vcombine.low %v1452_v44, %v1464_v4  ;;  %v13545_v13 = vcombine.low %v1044_v48, %v1056_v51 }
 0x435   : > { %8629 = vmatpush1.bf16.msra.mxu1 %v13665_v3  ;;  %8589 = vmatprep.subr.bf16.mxu0 %v13642_v5  ;;  %v1440_v59 = vld [vmem:[#allocation6 + $0x20e8] sm:$0xff]  ;;  %v13546_v3 = vcombine.high %v1044_v48, %v1056_v51  ;;  %v577_v48 = vld [vmem:[#allocation6 + $0x5f0] sm:$0xff] }
 0x436   : > { %8630 = vmatprep.subr.bf16.mxu1 %v14026_v53  ;;  %v13930_v5 = vcombine.high %v1428_v56, %v1440_v59  ;;  %v1020_v53 = vld [vmem:[#allocation6 + $0x13c8] sm:$0xff]  ;;  %v949_v51 = vld [vmem:[#allocation6 + $0x1190] sm:$0xff] }
 0x437   : > { %v1032_v43 = vld [vmem:[#allocation6 + $0x1428] sm:$0xff] }
 0x438   : > { %8590 = vmatpush2.bf16.msra.mxu0 %v13641_v14  ;;  %v1404_v9 = vld [vmem:[#allocation6 + $0x1fc8] sm:$0xff]  ;;  %v13929_v14 = vcombine.low %v1428_v56, %v1440_v59  ;;  %v13521_v32 = vcombine.low %v1020_v53, %v1032_v43  ;;  %v961_v56 = vld [vmem:[#allocation6 + $0x11f0] sm:$0xff]  ;;  %v1604_v59 = vrot.slane %v15986_v8, %v15925_v25 }
 0x439   : > { %8631 = vmatpush2.bf16.msra.mxu1 %v14025_v17  ;;  %8591 = vmatprep.subr.bf16.mxu0 %v13618_v18  ;;  %v1416_v12 = vld [vmem:[#allocation6 + $0x2028] sm:$0xff]  ;;  %v13522_v17 = vcombine.high %v1020_v53, %v1032_v43  ;;  %v13452_v53 = vcombine.high %v949_v51, %v961_v56  ;;  %v541_v43 = vld [vmem:[#allocation6 + $0x4d0] sm:$0xff] }
 0x43a   : > { %8632 = vmatprep.subr.bf16.mxu1 %v14002_v19  ;;  %v13906_v18 = vcombine.high %v1404_v9, %v1416_v12  ;;  %v996_v19 = vld [vmem:[#allocation6 + $0x1308] sm:$0xff] }
 0x43b   : > { %v1008_v46 = vld [vmem:[#allocation6 + $0x1368] sm:$0xff] }
 0x43c   : > { %8592 = vmatpush2.bf16.msra.mxu0 %v13617_v34  ;;  %v1380_v26 = vld [vmem:[#allocation6 + $0x1f08] sm:$0xff]  ;;  %v13905_v34 = vcombine.low %v1404_v9, %v1416_v12  ;;  %v13497_v4 = vcombine.low %v996_v19, %v1008_v46  ;;  %v553_v9 = vld [vmem:[#allocation6 + $0x530] sm:$0xff] }
 0x43d   : > { %8633 = vmatpush2.bf16.msra.mxu1 %v14001_v36  ;;  %8593 = vmatprep.subr.bf16.mxu0 %v13594_v37  ;;  %v1392_v31 = vld [vmem:[#allocation6 + $0x1f68] sm:$0xff]  ;;  %v13498_v36 = vcombine.high %v996_v19, %v1008_v46  ;;  %v925_v12 = vld [vmem:[#allocation6 + $0x10d0] sm:$0xff]  ;;  %v13044_v19 = vcombine.high %v541_v43, %v553_v9 }
 0x43e   : > { %8634 = vmatprep.subr.bf16.mxu1 %v13978_v38  ;;  %v13882_v37 = vcombine.high %v1380_v26, %v1392_v31  ;;  %v972_v38 = vld [vmem:[#allocation6 + $0x1248] sm:$0xff] }
 0x43f   : > { %v984_v39 = vld [vmem:[#allocation6 + $0x12a8] sm:$0xff] }
 0x440   : > { %8594 = vmatpush2.bf16.msra.mxu0 %v13593_v41  ;;  %v1356_v40 = vld [vmem:[#allocation6 + $0x1e48] sm:$0xff]  ;;  %v13881_v41 = vcombine.low %v1380_v26, %v1392_v31  ;;  %v517_v31 = vld [vmem:[#allocation6 + $0x410] sm:$0xff] }
 0x441   : > { %8635 = vmatpush2.bf16.msra.mxu1 %v13977_v58  ;;  %8595 = vmatprep.subr.bf16.mxu0 %v13570_v45  ;;  %v1368_v44 = vld [vmem:[#allocation6 + $0x1ea8] sm:$0xff]  ;;  %v13474_v58 = vcombine.high %v972_v38, %v984_v39 }
 0x442   : > { %8636 = vmatprep.subr.bf16.mxu1 %v13954_v52  ;;  %v13858_v45 = vcombine.high %v1356_v40, %v1368_v44  ;;  %v565_v52 = vld [vmem:[#allocation6 + $0x590] sm:$0xff] }
 0x444   : > { %8596 = vmatpush2.bf16.msra.mxu0 %v13569_v62  ;;  %v13473_v62 = vcombine.low %v972_v38, %v984_v39  ;;  %v13043_v38 = vcombine.low %v541_v43, %v553_v9  ;;  %v469_v9 = vld [vmem:[#allocation6 + $0x290] sm:$0xff] }
 0x445   : > { %8637 = vmatpush2.bf16.msra.mxu1 %v13953_v1  ;;  %8597 = vmatprep.subr.bf16.mxu0 %v13546_v3  ;;  %v13857_v1 = vcombine.low %v1356_v40, %v1368_v44  ;;  %v13068_v3 = vcombine.high %v565_v52, %v577_v48 }
 0x446   : > { %8638 = vmatprep.subr.bf16.mxu1 %v13930_v5  ;;  %v1608_v5 = vrot.slane %v15986_v8, %v15928_v29  ;;  %v529_v8 = vld [vmem:[#allocation6 + $0x470] sm:$0xff] }
 0x448   : > { %8598 = vmatpush2.bf16.msra.mxu0 %v13545_v13  ;;  %v937_v13 = vld [vmem:[#allocation6 + $0x1130] sm:$0xff]  ;;  %v8323_v46 = vadd.f32 %v16010_v2, %v1608_v5  ;;  %v13020_v2 = vcombine.high %v517_v31, %v529_v8 }
 0x449   : > { %8639 = vmatpush2.bf16.msra.mxu1 %v13929_v14  ;;  %8599 = vmatprep.subr.bf16.mxu0 %v13522_v17  ;;  %v8321_v14 = vadd.f32 %v16005_v27, %v1604_v59  ;;  %v13067_v17 = vcombine.low %v565_v52, %v577_v48  ;;  %v13428_v26 = vcombine.high %v925_v12, %v937_v13  ;;  %v505_v52 = vld [vmem:[#allocation6 + $0x3b0] sm:$0xff] }
 0x44a   : > { %8640 = vmatprep.subr.bf16.mxu1 %v13906_v18  ;;  %v13451_v18 = vcombine.low %v949_v51, %v961_v56  ;;  %v13427_v40 = vcombine.low %v925_v12, %v937_v13  ;;  %v877_v51 = vld [vmem:[#allocation6 + $0xf50] sm:$0xff] }
 0x44b   : > { %v889_v56 = vld [vmem:[#allocation6 + $0xfb0] sm:$0xff] }
 0x44c   : > { %8600 = vmatpush2.bf16.msra.mxu0 %v13521_v32  ;;  %v13380_v43 = vcombine.high %v877_v51, %v889_v56  ;;  %v481_v12 = vld [vmem:[#allocation6 + $0x2f0] sm:$0xff] }
 0x44d   : > { %8641 = vmatpush2.bf16.msra.mxu1 %v13905_v34  ;;  %8601 = vmatprep.subr.bf16.mxu0 %v13498_v36  ;;  %v901_v34 = vld [vmem:[#allocation6 + $0x1010] sm:$0xff] }
 0x44e   : > { %8642 = vmatprep.subr.bf16.mxu1 %v13882_v37  ;;  %v913_v36 = vld [vmem:[#allocation6 + $0x1070] sm:$0xff] }
 0x44f   : > { %v13403_v5 = vcombine.low %v901_v34, %v913_v36 }
 0x450   : > { %8602 = vmatpush2.bf16.msra.mxu0 %v13497_v4 }
 0x451   : > { %8643 = vmatpush2.bf16.msra.mxu1 %v13881_v41  ;;  %8603 = vmatprep.subr.bf16.mxu0 %v13474_v58  ;;  %v13404_v58 = vcombine.high %v901_v34, %v913_v36  ;;  %v841_v34 = vld [vmem:[#allocation6 + $0xe30] sm:$0xff]  ;;  %v12971_v36 = vcombine.low %v469_v9, %v481_v12 }
 0x452   : > { %8644 = vmatprep.subr.bf16.mxu1 %v13858_v45  ;;  %v493_v45 = vld [vmem:[#allocation6 + $0x350] sm:$0xff] }
 0x454   : > { %8604 = vmatpush2.bf16.msra.mxu0 %v13473_v62  ;;  %v13019_v62 = vcombine.low %v517_v31, %v529_v8  ;;  %v445_v31 = vld [vmem:[#allocation6 + $0x1d0] sm:$0xff] }
 0x455   : > { %8645 = vmatpush2.bf16.msra.mxu1 %v13857_v1  ;;  %8655 = vmatprep.subr.bf16.mxu0 %v13068_v3  ;;  %v457_v8 = vld [vmem:[#allocation6 + $0x230] sm:$0xff] }
 0x456   : > { %8696 = vmatprep.subr.bf16.mxu1 %v13452_v53  ;;  %v12996_v53 = vcombine.high %v493_v45, %v505_v52 }
 0x457   : > { %v8361_v32 = vpop.f32.mrf.mxu0  ;;  %8606 = vmatmul.mubr.bf16.vlgmr.msra.gmra.mxu0 %v15815_v21 }
 0x458   : > { %v8362_v37 = vadd.f32 %v8361_v32, %v8321_v14  ;;  %8647 = vmatmul.mubr.bf16.vlgmr.msra.gmra.mxu1 %v15824_v33  ;;  %8656 = vmatpush1.bf16.msra.mxu0 %v13067_v17  ;;  %v8402_v27 = vpop.f32.mrf.mxu1  ;;  %v853_v14 = vld [vmem:[#allocation6 + $0xe90] sm:$0xff] }
 0x459   : > { %8697 = vmatpush1.bf16.msra.mxu1 %v13451_v18  ;;  %v8363_v39 = vpop.f32.mrf.mxu0  ;;  %8657 = vmatprep.subr.bf16.mxu0 %v13044_v19  ;;  %v865_v17 = vld [vmem:[#allocation6 + $0xef0] sm:$0xff]  ;;  %v12995_v18 = vcombine.low %v493_v45, %v505_v52  ;;  %v13379_v19 = vcombine.low %v877_v51, %v889_v56 }
 0x45a   : > { %v8364_v44 = vadd.f32 %v8363_v39, %v8323_v46  ;;  %v16022_v4 = vadd.f32 %v8402_v27, %v8362_v37  ;;  %v8404_v41 = vpop.f32.mrf.mxu1  ;;  %8698 = vmatprep.subr.bf16.mxu1 %v13428_v26  ;;  %8687 = vmatprep.mubr.bf16.mxu0 %v15803_v57  ;;  %v12972_v46 = vcombine.high %v469_v9, %v481_v12  ;;  %v829_v32 = vld [vmem:[#allocation6 + $0xdd0] sm:$0xff] }
 0x45b   : > { %v8365_v48 = vpop.f32.mrf.mxu0  ;;  %8728 = vmatprep.mubr.bf16.mxu1 %v15806_v61  ;;  %v13356_v26 = vcombine.high %v853_v14, %v865_v17  ;;  %v13355_v37 = vcombine.low %v853_v14, %v865_v17  ;;  %v12948_v27 = vcombine.high %v445_v31, %v457_v8  ;;  %v421_v39 = vld [vmem:[#allocation6 + $0x110] sm:$0xff] }
 0x45c   : > { %v16026_v59 = vadd.f32 %v8404_v41, %v8364_v44  ;;  %8658 = vmatpush1.bf16.msra.mxu0 %v13043_v38  ;;  %v8406_v1 = vpop.f32.mrf.mxu1  ;;  %v13332_v38 = vcombine.high %v829_v32, %v841_v34  ;;  %v817_v44 = vld [vmem:[#allocation6 + $0xd70] sm:$0xff]  ;;  %v12947_v41 = vcombine.low %v445_v31, %v457_v8 }
 0x45d   : > { %8699 = vmatpush1.bf16.msra.mxu1 %v13427_v40  ;;  %v8366_v3 = vpop.f32.mrf.mxu0  ;;  %8659 = vmatprep.subr.bf16.mxu0 %v13020_v2  ;;  %v433_v40 = vld [vmem:[#allocation6 + $0x170] sm:$0xff] }
 0x45e   : > { %8700 = vmatprep.subr.bf16.mxu1 %v13404_v58  ;;  %v8407_v13 = vpop.f32.mrf.mxu1  ;;  %v805_v2 = vld [vmem:[#allocation6 + $0xd10] sm:$0xff]  ;;  %v13331_v58 = vcombine.low %v829_v32, %v841_v34  ;;  %v12924_v45 = vcombine.high %v421_v39, %v433_v40  ;;  %v12923_v1 = vcombine.low %v421_v39, %v433_v40 }
 0x45f   : > { %v13308_v52 = vcombine.high %v805_v2, %v817_v44  ;;  %v397_v48 = vld [vmem:[#allocation6 + $0x50] sm:$0xff]  ;;  %v13307_v3 = vcombine.low %v805_v2, %v817_v44 }
 0x460   : > { %8660 = vmatpush1.bf16.msra.mxu0 %v13019_v62  ;;  %v409_v51 = vld [vmem:[#allocation6 + $0xb0] sm:$0xff] }
 0x461   : > { %8701 = vmatpush1.bf16.msra.mxu1 %v13403_v5  ;;  %8661 = vmatprep.subr.bf16.mxu0 %v12996_v53  ;;  %v781_v56 = vld [vmem:[#allocation6 + $0xc50] sm:$0xff]  ;;  %v12900_v5 = vcombine.high %v397_v48, %v409_v51  ;;  %v12899_v14 = vcombine.low %v397_v48, %v409_v51 }
 0x462   : > { %8702 = vmatprep.subr.bf16.mxu1 %v13380_v43  ;;  %v793_v62 = vld [vmem:[#allocation6 + $0xcb0] sm:$0xff] }
 0x463   : > { %v13284_v53 = vcombine.high %v781_v56, %v793_v62  ;;  %v757_v43 = vld [vmem:[#allocation6 + $0xb90] sm:$0xff]  ;;  %v13283_v17 = vcombine.low %v781_v56, %v793_v62 }
 0x464   : > { %8662 = vmatpush1.bf16.msra.mxu0 %v12995_v18  ;;  %v769_v9 = vld [vmem:[#allocation6 + $0xbf0] sm:$0xff] }
 0x465   : > { %8703 = vmatpush1.bf16.msra.mxu1 %v13379_v19  ;;  %8663 = vmatprep.subr.bf16.mxu0 %v12972_v46  ;;  %v1141_v12 = vld [vmem:[#allocation6 + $0x1790] sm:$0xff]  ;;  %v13260_v18 = vcombine.high %v757_v43, %v769_v9  ;;  %v13259_v32 = vcombine.low %v757_v43, %v769_v9 }
 0x466   : > { %8704 = vmatprep.subr.bf16.mxu1 %v13356_v26  ;;  %v1153_v13 = vld [vmem:[#allocation6 + $0x17f0] sm:$0xff] }
 0x467   : > { %v13644_v19 = vcombine.high %v1141_v12, %v1153_v13  ;;  %v733_v46 = vld [vmem:[#allocation6 + $0xad0] sm:$0xff]  ;;  %v13643_v34 = vcombine.low %v1141_v12, %v1153_v13 }
 0x468   : > { %8664 = vmatpush1.bf16.msra.mxu0 %v12971_v36  ;;  %v745_v26 = vld [vmem:[#allocation6 + $0xb30] sm:$0xff] }
 0x469   : > { %8705 = vmatpush1.bf16.msra.mxu1 %v13355_v37  ;;  %8665 = vmatprep.subr.bf16.mxu0 %v12948_v27  ;;  %v1117_v31 = vld [vmem:[#allocation6 + $0x16d0] sm:$0xff]  ;;  %v13236_v36 = vcombine.high %v733_v46, %v745_v26  ;;  %v13235_v2 = vcombine.low %v733_v46, %v745_v26 }
 0x46a   : > { %8706 = vmatprep.subr.bf16.mxu1 %v13332_v38  ;;  %v1129_v8 = vld [vmem:[#allocation6 + $0x1730] sm:$0xff] }
 0x46b   : > { %v13620_v37 = vcombine.high %v1117_v31, %v1129_v8  ;;  %v709_v27 = vld [vmem:[#allocation6 + $0xa10] sm:$0xff]  ;;  %v13619_v44 = vcombine.low %v1117_v31, %v1129_v8 }
 0x46c   : > { %8666 = vmatpush1.bf16.msra.mxu0 %v12947_v41  ;;  %v721_v38 = vld [vmem:[#allocation6 + $0xa70] sm:$0xff] }
 0x46d   : > { %8707 = vmatpush1.bf16.msra.mxu1 %v13331_v58  ;;  %8667 = vmatprep.subr.bf16.mxu0 %v12924_v45  ;;  %v1093_v39 = vld [vmem:[#allocation6 + $0x1610] sm:$0xff]  ;;  %v13212_v41 = vcombine.high %v709_v27, %v721_v38  ;;  %v13211_v56 = vcombine.low %v709_v27, %v721_v38 }
 0x46e   : > { %8708 = vmatprep.subr.bf16.mxu1 %v13308_v52  ;;  %v1105_v40 = vld [vmem:[#allocation6 + $0x1670] sm:$0xff] }
 0x46f   : > { %v13596_v58 = vcombine.high %v1093_v39, %v1105_v40  ;;  %v685_v45 = vld [vmem:[#allocation6 + $0x950] sm:$0xff]  ;;  %v13595_v62 = vcombine.low %v1093_v39, %v1105_v40 }
 0x470   : > { %8668 = vmatpush1.bf16.msra.mxu0 %v12923_v1  ;;  %v697_v52 = vld [vmem:[#allocation6 + $0x9b0] sm:$0xff] }
 0x471   : > { %8709 = vmatpush1.bf16.msra.mxu1 %v13307_v3  ;;  %8669 = vmatprep.subr.bf16.mxu0 %v12900_v5  ;;  %v1069_v48 = vld [vmem:[#allocation6 + $0x1550] sm:$0xff]  ;;  %v13188_v1 = vcombine.high %v685_v45, %v697_v52  ;;  %v13187_v12 = vcombine.low %v685_v45, %v697_v52 }
 0x472   : > { %8710 = vmatprep.subr.bf16.mxu1 %v13284_v53  ;;  %v1081_v51 = vld [vmem:[#allocation6 + $0x15b0] sm:$0xff] }
 0x473   : > { %v13572_v3 = vcombine.high %v1069_v48, %v1081_v51  ;;  %v661_v5 = vld [vmem:[#allocation6 + $0x890] sm:$0xff]  ;;  %v13571_v13 = vcombine.low %v1069_v48, %v1081_v51 }
 0x474   : > { %8670 = vmatpush1.bf16.msra.mxu0 %v12899_v14  ;;  %v673_v53 = vld [vmem:[#allocation6 + $0x8f0] sm:$0xff] }
 0x475   : > { %8711 = vmatpush1.bf16.msra.mxu1 %v13283_v17  ;;  %8671 = vmatprep.subr.bf16.mxu0 %v13260_v18  ;;  %v1045_v43 = vld [vmem:[#allocation6 + $0x1490] sm:$0xff]  ;;  %v13164_v14 = vcombine.high %v661_v5, %v673_v53  ;;  %v13163_v31 = vcombine.low %v661_v5, %v673_v53  ;;  %v566_v5 = vld [vmem:[#allocation6 + $0x598] sm:$0xff] }
 0x476   : > { %8712 = vmatprep.subr.bf16.mxu1 %v13644_v19  ;;  %v1057_v9 = vld [vmem:[#allocation6 + $0x14f0] sm:$0xff]  ;;  %v578_v53 = vld [vmem:[#allocation6 + $0x5f8] sm:$0xff] }
 0x477   : > { %v13548_v17 = vcombine.high %v1045_v43, %v1057_v9  ;;  %v637_v18 = vld [vmem:[#allocation6 + $0x7d0] sm:$0xff]  ;;  %v13547_v8 = vcombine.low %v1045_v43, %v1057_v9 }
 0x478   : > { %8672 = vmatpush2.bf16.msra.mxu0 %v13259_v32  ;;  %v649_v19 = vld [vmem:[#allocation6 + $0x830] sm:$0xff] }
 0x479   : > { %8713 = vmatpush2.bf16.msra.mxu1 %v13643_v34  ;;  %8673 = vmatprep.subr.bf16.mxu0 %v13236_v36  ;;  %v1021_v46 = vld [vmem:[#allocation6 + $0x13d0] sm:$0xff]  ;;  %v13140_v32 = vcombine.high %v637_v18, %v649_v19  ;;  %v13139_v39 = vcombine.low %v637_v18, %v649_v19  ;;  %v542_v19 = vld [vmem:[#allocation6 + $0x4d8] sm:$0xff] }
 0x47a   : > { %8714 = vmatprep.subr.bf16.mxu1 %v13620_v37  ;;  %v1033_v26 = vld [vmem:[#allocation6 + $0x1430] sm:$0xff] }
 0x47b   : > { %v13524_v34 = vcombine.high %v1021_v46, %v1033_v26  ;;  %v613_v36 = vld [vmem:[#allocation6 + $0x710] sm:$0xff]  ;;  %v13523_v40 = vcombine.low %v1021_v46, %v1033_v26  ;;  %v554_v46 = vld [vmem:[#allocation6 + $0x538] sm:$0xff] }
 0x47c   : > { %8674 = vmatpush2.bf16.msra.mxu0 %v13235_v2  ;;  %v625_v37 = vld [vmem:[#allocation6 + $0x770] sm:$0xff] }
 0x47d   : > { %8715 = vmatpush2.bf16.msra.mxu1 %v13619_v44  ;;  %8675 = vmatprep.subr.bf16.mxu0 %v13212_v41  ;;  %v997_v27 = vld [vmem:[#allocation6 + $0x1310] sm:$0xff]  ;;  %v13116_v2 = vcombine.high %v613_v36, %v625_v37  ;;  %v13115_v48 = vcombine.low %v613_v36, %v625_v37  ;;  %v13046_v36 = vcombine.high %v542_v19, %v554_v46 }
 0x47e   : > { %8716 = vmatprep.subr.bf16.mxu1 %v13596_v58  ;;  %v1009_v38 = vld [vmem:[#allocation6 + $0x1370] sm:$0xff] }
 0x47f   : > { %v13500_v44 = vcombine.high %v997_v27, %v1009_v38  ;;  %v589_v41 = vld [vmem:[#allocation6 + $0x650] sm:$0xff]  ;;  %v13499_v51 = vcombine.low %v997_v27, %v1009_v38 }
 0x480   : > { %8676 = vmatpush2.bf16.msra.mxu0 %v13211_v56  ;;  %v601_v58 = vld [vmem:[#allocation6 + $0x6b0] sm:$0xff] }
 0x481   : > { %8717 = vmatpush2.bf16.msra.mxu1 %v13595_v62  ;;  %8677 = vmatprep.subr.bf16.mxu0 %v13188_v1  ;;  %v973_v45 = vld [vmem:[#allocation6 + $0x1250] sm:$0xff]  ;;  %v13092_v56 = vcombine.high %v589_v41, %v601_v58  ;;  %v13091_v43 = vcombine.low %v589_v41, %v601_v58 }
 0x482   : > { %8718 = vmatprep.subr.bf16.mxu1 %v13572_v3  ;;  %v985_v52 = vld [vmem:[#allocation6 + $0x12b0] sm:$0xff] }
 0x483   : > { %v13476_v62 = vcombine.high %v973_v45, %v985_v52  ;;  %v1333_v1 = vld [vmem:[#allocation6 + $0x1d90] sm:$0xff]  ;;  %v13475_v9 = vcombine.low %v973_v45, %v985_v52  ;;  %v13045_v45 = vcombine.low %v542_v19, %v554_v46 }
 0x484   : > { %8678 = vmatpush2.bf16.msra.mxu0 %v13187_v12  ;;  %v1345_v3 = vld [vmem:[#allocation6 + $0x1df0] sm:$0xff] }
 0x485   : > { %8719 = vmatpush2.bf16.msra.mxu1 %v13571_v13  ;;  %8679 = vmatprep.subr.bf16.mxu0 %v13164_v14  ;;  %v16028_v12 = vld [vmem:[#allocation8 + $0x10] sm:$0xff]  ;;  %v13836_v13 = vcombine.high %v1333_v1, %v1345_v3  ;;  %v13070_v14 = vcombine.high %v566_v5, %v578_v53 }
 0x486   : > { %8720 = vmatprep.subr.bf16.mxu1 %v13548_v17  ;;  %v1309_v17 = vld [vmem:[#allocation6 + $0x1cd0] sm:$0xff]  ;;  %v1612_v26 = vrot.slane %v16028_v12, %v15839_v54 }
 0x487   : > { %v1321_v18 = vld [vmem:[#allocation6 + $0x1d30] sm:$0xff] }
 0x488   : > { %8680 = vmatpush2.bf16.msra.mxu0 %v13163_v31  ;;  %v13835_v31 = vcombine.low %v1333_v1, %v1345_v3  ;;  %v1285_v37 = vld [vmem:[#allocation6 + $0x1c10] sm:$0xff]  ;;  %v13811_v41 = vcombine.low %v1309_v17, %v1321_v18 }
 0x489   : > { %8721 = vmatpush2.bf16.msra.mxu1 %v13547_v8  ;;  %8681 = vmatprep.subr.bf16.mxu0 %v13140_v32  ;;  %v13069_v8 = vcombine.low %v566_v5, %v578_v53  ;;  %v13812_v32 = vcombine.high %v1309_v17, %v1321_v18  ;;  %v1297_v27 = vld [vmem:[#allocation6 + $0x1c70] sm:$0xff]  ;;  %v494_v53 = vld [vmem:[#allocation6 + $0x358] sm:$0xff] }
 0x48a   : > { %8722 = vmatprep.subr.bf16.mxu1 %v13524_v34  ;;  %v1616_v34 = vrot.slane %v16028_v12, %v15842_v63  ;;  %v13788_v52 = vcombine.high %v1285_v37, %v1297_v27  ;;  %v1261_v1 = vld [vmem:[#allocation6 + $0x1b50] sm:$0xff] }
 0x48b   : > { %v1273_v3 = vld [vmem:[#allocation6 + $0x1bb0] sm:$0xff] }
 0x48c   : > { %8682 = vmatpush2.bf16.msra.mxu0 %v13139_v39  ;;  %v518_v39 = vld [vmem:[#allocation6 + $0x418] sm:$0xff]  ;;  %v13764_v19 = vcombine.high %v1261_v1, %v1273_v3 }
 0x48d   : > { %8723 = vmatpush2.bf16.msra.mxu1 %v13523_v40  ;;  %8683 = vmatprep.subr.bf16.mxu0 %v13116_v2  ;;  %v530_v40 = vld [vmem:[#allocation6 + $0x478] sm:$0xff] }
 0x48e   : > { %8724 = vmatprep.subr.bf16.mxu1 %v13500_v44  ;;  %v13021_v18 = vcombine.low %v518_v39, %v530_v40 }
 0x490   : > { %8684 = vmatpush2.bf16.msra.mxu0 %v13115_v48 }
 0x491   : > { %8725 = vmatpush2.bf16.msra.mxu1 %v13499_v51  ;;  %8685 = vmatprep.subr.bf16.mxu0 %v13092_v56 }
 0x492   : > { %8726 = vmatprep.subr.bf16.mxu1 %v13476_v62  ;;  %v13022_v62 = vcombine.high %v518_v39, %v530_v40  ;;  %v458_v39 = vld [vmem:[#allocation6 + $0x238] sm:$0xff] }
 0x494   : > { %8686 = vmatpush2.bf16.msra.mxu0 %v13091_v43  ;;  %v506_v43 = vld [vmem:[#allocation6 + $0x3b8] sm:$0xff] }
 0x495   : > { %8727 = vmatpush2.bf16.msra.mxu1 %v13475_v9  ;;  %8737 = vmatprep.subr.bf16.mxu0 %v13836_v13  ;;  %v13787_v13 = vcombine.low %v1285_v37, %v1297_v27  ;;  %v12998_v46 = vcombine.high %v494_v53, %v506_v43  ;;  %v1213_v27 = vld [vmem:[#allocation6 + $0x19d0] sm:$0xff] }
 0x496   : > { %8778 = vmatprep.subr.bf16.mxu1 %v13070_v14 }
 0x497   : > { %v8443_v38 = vpop.f32.mrf.mxu0  ;;  %8688 = vmatmul.mubr.bf16.vlgmr.msra.gmra.mxu0 %v15812_v16 }
 0x498   : > { %v8444_v2 = vadd.f32 %v8443_v38, %v1612_v26  ;;  %8729 = vmatmul.mubr.bf16.vlgmr.msra.gmra.mxu1 %v15815_v21  ;;  %8738 = vmatpush1.bf16.msra.mxu0 %v13835_v31  ;;  %v8484_v44 = vpop.f32.mrf.mxu1  ;;  %v1237_v26 = vld [vmem:[#allocation6 + $0x1a90] sm:$0xff] }
 0x499   : > { %8779 = vmatpush1.bf16.msra.mxu1 %v13069_v8  ;;  %v8445_v58 = vpop.f32.mrf.mxu0  ;;  %8739 = vmatprep.subr.bf16.mxu0 %v13812_v32  ;;  %v1249_v31 = vld [vmem:[#allocation6 + $0x1af0] sm:$0xff]  ;;  %v470_v32 = vld [vmem:[#allocation6 + $0x298] sm:$0xff] }
 0x49a   : > { %v8446_v48 = vadd.f32 %v8445_v58, %v1616_v34  ;;  %v16036_v51 = vadd.f32 %v8484_v44, %v8444_v2  ;;  %v8486_v56 = vpop.f32.mrf.mxu1  ;;  %8780 = vmatprep.subr.bf16.mxu1 %v13046_v36  ;;  %8769 = vmatprep.mubr.bf16.mxu0 %v15817_v28  ;;  %v482_v34 = vld [vmem:[#allocation6 + $0x2f8] sm:$0xff]  ;;  %v13763_v36 = vcombine.low %v1261_v1, %v1273_v3  ;;  %v1225_v2 = vld [vmem:[#allocation6 + $0x1a30] sm:$0xff] }
 0x49b   : > { %v8447_v5 = vpop.f32.mrf.mxu0  ;;  %8810 = vmatprep.mubr.bf16.mxu1 %v15803_v57  ;;  %v12997_v57 = vcombine.low %v494_v53, %v506_v43  ;;  %v13740_v38 = vcombine.high %v1237_v26, %v1249_v31  ;;  %v12974_v37 = vcombine.high %v470_v32, %v482_v34  ;;  %v446_v44 = vld [vmem:[#allocation6 + $0x1d8] sm:$0xff]  ;;  %v13739_v40 = vcombine.low %v1237_v26, %v1249_v31  ;;  %v1165_v43 = vld [vmem:[#allocation6 + $0x1850] sm:$0xff] }
 0x49c   : > { %v16040_v9 = vadd.f32 %v8486_v56, %v8446_v48  ;;  %8740 = vmatpush1.bf16.msra.mxu0 %v13811_v41  ;;  %v8488_v14 = vpop.f32.mrf.mxu1  ;;  %v12973_v41 = vcombine.low %v470_v32, %v482_v34  ;;  %v13716_v58 = vcombine.high %v1213_v27, %v1225_v2  ;;  %v1201_v48 = vld [vmem:[#allocation6 + $0x1970] sm:$0xff]  ;;  %v422_v56 = vld [vmem:[#allocation6 + $0x118] sm:$0xff]  ;;  %v13715_v1 = vcombine.low %v1213_v27, %v1225_v2 }
 0x49d   : > { %8781 = vmatpush1.bf16.msra.mxu1 %v13045_v45  ;;  %v8448_v17 = vpop.f32.mrf.mxu0  ;;  %8741 = vmatprep.subr.bf16.mxu0 %v13788_v52  ;;  %v12950_v45 = vcombine.high %v446_v44, %v458_v39  ;;  %v1189_v52 = vld [vmem:[#allocation6 + $0x1910] sm:$0xff]  ;;  %v12949_v3 = vcombine.low %v446_v44, %v458_v39  ;;  %v398_v14 = vld [vmem:[#allocation6 + $0x58] sm:$0xff] }
 0x49e   : > { %8782 = vmatprep.subr.bf16.mxu1 %v13022_v62  ;;  %v8489_v8 = vpop.f32.mrf.mxu1  ;;  %v434_v62 = vld [vmem:[#allocation6 + $0x178] sm:$0xff]  ;;  %v13692_v5 = vcombine.high %v1189_v52, %v1201_v48  ;;  %v1525_v31 = vld [vmem:[#allocation6 + $0x2390] sm:$0xff] }
 0x49f   : > { %v12926_v53 = vcombine.high %v422_v56, %v434_v62  ;;  %v410_v17 = vld [vmem:[#allocation6 + $0xb8] sm:$0xff]  ;;  %v1537_v8 = vld [vmem:[#allocation6 + $0x23f0] sm:$0xff] }
 0x4a0   : > { %8742 = vmatpush1.bf16.msra.mxu0 %v13787_v13  ;;  %v1177_v13 = vld [vmem:[#allocation6 + $0x18b0] sm:$0xff]  ;;  %v12902_v26 = vcombine.high %v398_v14, %v410_v17  ;;  %v758_v32 = vld [vmem:[#allocation6 + $0xb98] sm:$0xff] }
 0x4a1   : > { %8783 = vmatpush1.bf16.msra.mxu1 %v13021_v18  ;;  %8743 = vmatprep.subr.bf16.mxu0 %v13764_v19  ;;  %v13691_v18 = vcombine.low %v1189_v52, %v1201_v48  ;;  %v12925_v19 = vcombine.low %v422_v56, %v434_v62  ;;  %v770_v34 = vld [vmem:[#allocation6 + $0xbf8] sm:$0xff]  ;;  %v1501_v27 = vld [vmem:[#allocation6 + $0x22d0] sm:$0xff] }
 0x4a2   : > { %8784 = vmatprep.subr.bf16.mxu1 %v12998_v46  ;;  %v13668_v46 = vcombine.high %v1165_v43, %v1177_v13  ;;  %v1513_v2 = vld [vmem:[#allocation6 + $0x2330] sm:$0xff]  ;;  %v734_v44 = vld [vmem:[#allocation6 + $0xad8] sm:$0xff] }
 0x4a3   : > { %v746_v39 = vld [vmem:[#allocation6 + $0xb38] sm:$0xff]  ;;  %v1477_v52 = vld [vmem:[#allocation6 + $0x2210] sm:$0xff] }
 0x4a4   : > { %8744 = vmatpush1.bf16.msra.mxu0 %v13763_v36  ;;  %v13667_v36 = vcombine.low %v1165_v43, %v1177_v13  ;;  %v1489_v48 = vld [vmem:[#allocation6 + $0x2270] sm:$0xff]  ;;  %v710_v56 = vld [vmem:[#allocation6 + $0xa18] sm:$0xff] }
 0x4a5   : > { %8785 = vmatpush1.bf16.msra.mxu1 %v12997_v57  ;;  %8745 = vmatprep.subr.bf16.mxu0 %v13740_v38  ;;  %v12901_v57 = vcombine.low %v398_v14, %v410_v17  ;;  %v14028_v38 = vcombine.high %v1525_v31, %v1537_v8  ;;  %v722_v62 = vld [vmem:[#allocation6 + $0xa78] sm:$0xff]  ;;  %v1453_v43 = vld [vmem:[#allocation6 + $0x2150] sm:$0xff] }
 0x4a6   : > { %8786 = vmatprep.subr.bf16.mxu1 %v12974_v37  ;;  %v13262_v37 = vcombine.high %v758_v32, %v770_v34  ;;  %v1465_v13 = vld [vmem:[#allocation6 + $0x21b0] sm:$0xff]  ;;  %v686_v14 = vld [vmem:[#allocation6 + $0x958] sm:$0xff] }
 0x4a7   : > { %v698_v17 = vld [vmem:[#allocation6 + $0x9b8] sm:$0xff] }
 0x4a8   : > { %8746 = vmatpush1.bf16.msra.mxu0 %v13739_v40  ;;  %v14027_v40 = vcombine.low %v1525_v31, %v1537_v8  ;;  %v1429_v31 = vld [vmem:[#allocation6 + $0x2090] sm:$0xff] }
 0x4a9   : > { %8787 = vmatpush1.bf16.msra.mxu1 %v12973_v41  ;;  %8747 = vmatprep.subr.bf16.mxu0 %v13716_v58  ;;  %v13261_v41 = vcombine.low %v758_v32, %v770_v34  ;;  %v14004_v58 = vcombine.high %v1501_v27, %v1513_v2  ;;  %v1441_v8 = vld [vmem:[#allocation6 + $0x20f0] sm:$0xff]  ;;  %v662_v32 = vld [vmem:[#allocation6 + $0x898] sm:$0xff] }
 0x4aa   : > { %8788 = vmatprep.subr.bf16.mxu1 %v12950_v45  ;;  %v13238_v45 = vcombine.high %v734_v44, %v746_v39  ;;  %v674_v34 = vld [vmem:[#allocation6 + $0x8f8] sm:$0xff] }
 0x4ac   : > { %8748 = vmatpush1.bf16.msra.mxu0 %v13715_v1  ;;  %v14003_v1 = vcombine.low %v1501_v27, %v1513_v2  ;;  %v1405_v27 = vld [vmem:[#allocation6 + $0x1fd0] sm:$0xff] }
 0x4ad   : > { %8789 = vmatpush1.bf16.msra.mxu1 %v12949_v3  ;;  %8749 = vmatprep.subr.bf16.mxu0 %v13692_v5  ;;  %v13237_v3 = vcombine.low %v734_v44, %v746_v39  ;;  %v13980_v5 = vcombine.high %v1477_v52, %v1489_v48  ;;  %v1417_v2 = vld [vmem:[#allocation6 + $0x2030] sm:$0xff]  ;;  %v638_v44 = vld [vmem:[#allocation6 + $0x7d8] sm:$0xff] }
 0x4ae   : > { %8790 = vmatprep.subr.bf16.mxu1 %v12926_v53  ;;  %v13214_v53 = vcombine.high %v710_v56, %v722_v62  ;;  %v650_v39 = vld [vmem:[#allocation6 + $0x838] sm:$0xff] }
 0x4b0   : > { %8750 = vmatpush1.bf16.msra.mxu0 %v13691_v18  ;;  %v13979_v18 = vcombine.low %v1477_v52, %v1489_v48  ;;  %v1381_v52 = vld [vmem:[#allocation6 + $0x1f10] sm:$0xff] }
 0x4b1   : > { %8791 = vmatpush1.bf16.msra.mxu1 %v12925_v19  ;;  %8751 = vmatprep.subr.bf16.mxu0 %v13668_v46  ;;  %v13213_v19 = vcombine.low %v710_v56, %v722_v62  ;;  %v13956_v46 = vcombine.high %v1453_v43, %v1465_v13  ;;  %v1393_v48 = vld [vmem:[#allocation6 + $0x1f70] sm:$0xff]  ;;  %v614_v56 = vld [vmem:[#allocation6 + $0x718] sm:$0xff] }
 0x4b2   : > { %8792 = vmatprep.subr.bf16.mxu1 %v12902_v26  ;;  %v13190_v26 = vcombine.high %v686_v14, %v698_v17  ;;  %v626_v62 = vld [vmem:[#allocation6 + $0x778] sm:$0xff] }
 0x4b4   : > { %8752 = vmatpush1.bf16.msra.mxu0 %v13667_v36  ;;  %v13955_v36 = vcombine.low %v1453_v43, %v1465_v13  ;;  %v1357_v43 = vld [vmem:[#allocation6 + $0x1e50] sm:$0xff] }
 0x4b5   : > { %8793 = vmatpush1.bf16.msra.mxu1 %v12901_v57  ;;  %8753 = vmatprep.subr.bf16.mxu0 %v14028_v38  ;;  %v13189_v57 = vcombine.low %v686_v14, %v698_v17  ;;  %v13932_v38 = vcombine.high %v1429_v31, %v1441_v8  ;;  %v1369_v13 = vld [vmem:[#allocation6 + $0x1eb0] sm:$0xff]  ;;  %v590_v14 = vld [vmem:[#allocation6 + $0x658] sm:$0xff] }
 0x4b6   : > { %8794 = vmatprep.subr.bf16.mxu1 %v13262_v37  ;;  %v13166_v37 = vcombine.high %v662_v32, %v674_v34  ;;  %v602_v17 = vld [vmem:[#allocation6 + $0x6b8] sm:$0xff] }
 0x4b8   : > { %8754 = vmatpush2.bf16.msra.mxu0 %v14027_v40  ;;  %v13931_v40 = vcombine.low %v1429_v31, %v1441_v8  ;;  %v950_v31 = vld [vmem:[#allocation6 + $0x1198] sm:$0xff] }
 0x4b9   : > { %8795 = vmatpush2.bf16.msra.mxu1 %v13261_v41  ;;  %8755 = vmatprep.subr.bf16.mxu0 %v14004_v58  ;;  %v13165_v41 = vcombine.low %v662_v32, %v674_v34  ;;  %v13908_v58 = vcombine.high %v1405_v27, %v1417_v2  ;;  %v962_v8 = vld [vmem:[#allocation6 + $0x11f8] sm:$0xff] }
 0x4ba   : > { %8796 = vmatprep.subr.bf16.mxu1 %v13238_v45  ;;  %v13142_v45 = vcombine.high %v638_v44, %v650_v39  ;;  %v1334_v32 = vld [vmem:[#allocation6 + $0x1d98] sm:$0xff] }
 0x4bb   : > { %v1346_v34 = vld [vmem:[#allocation6 + $0x1df8] sm:$0xff] }
 0x4bc   : > { %8756 = vmatpush2.bf16.msra.mxu0 %v14003_v1  ;;  %v13907_v1 = vcombine.low %v1405_v27, %v1417_v2  ;;  %v926_v27 = vld [vmem:[#allocation6 + $0x10d8] sm:$0xff] }
 0x4bd   : > { %8797 = vmatpush2.bf16.msra.mxu1 %v13237_v3  ;;  %8757 = vmatprep.subr.bf16.mxu0 %v13980_v5  ;;  %v13141_v3 = vcombine.low %v638_v44, %v650_v39  ;;  %v13884_v5 = vcombine.high %v1381_v52, %v1393_v48  ;;  %v938_v2 = vld [vmem:[#allocation6 + $0x1138] sm:$0xff] }
 0x4be   : > { %8798 = vmatprep.subr.bf16.mxu1 %v13214_v53  ;;  %v13118_v53 = vcombine.high %v614_v56, %v626_v62  ;;  %v1310_v44 = vld [vmem:[#allocation6 + $0x1cd8] sm:$0xff] }
 0x4bf   : > { %v1322_v39 = vld [vmem:[#allocation6 + $0x1d38] sm:$0xff] }
 0x4c0   : > { %8758 = vmatpush2.bf16.msra.mxu0 %v13979_v18  ;;  %v13883_v18 = vcombine.low %v1381_v52, %v1393_v48  ;;  %v902_v52 = vld [vmem:[#allocation6 + $0x1018] sm:$0xff] }
 0x4c1   : > { %8799 = vmatpush2.bf16.msra.mxu1 %v13213_v19  ;;  %8759 = vmatprep.subr.bf16.mxu0 %v13956_v46  ;;  %v13117_v19 = vcombine.low %v614_v56, %v626_v62  ;;  %v13860_v46 = vcombine.high %v1357_v43, %v1369_v13  ;;  %v914_v48 = vld [vmem:[#allocation6 + $0x1078] sm:$0xff] }
 0x4c2   : > { %8800 = vmatprep.subr.bf16.mxu1 %v13190_v26  ;;  %v13094_v26 = vcombine.high %v590_v14, %v602_v17  ;;  %v1286_v62 = vld [vmem:[#allocation6 + $0x1c18] sm:$0xff] }
 0x4c4   : > { %8760 = vmatpush2.bf16.msra.mxu0 %v13955_v36  ;;  %v13859_v36 = vcombine.low %v1357_v43, %v1369_v13  ;;  %v13813_v43 = vcombine.low %v1310_v44, %v1322_v39  ;;  %v13406_v13 = vcombine.high %v902_v52, %v914_v48 }
 0x4c5   : > { %8801 = vmatpush2.bf16.msra.mxu1 %v13189_v57  ;;  %8761 = vmatprep.subr.bf16.mxu0 %v13932_v38  ;;  %v13093_v57 = vcombine.low %v590_v14, %v602_v17  ;;  %v13454_v38 = vcombine.high %v950_v31, %v962_v8 }
 0x4c6   : > { %8802 = vmatprep.subr.bf16.mxu1 %v13166_v37  ;;  %v13838_v37 = vcombine.high %v1334_v32, %v1346_v34 }
 0x4c8   : > { %8762 = vmatpush2.bf16.msra.mxu0 %v13931_v40  ;;  %v13453_v40 = vcombine.low %v950_v31, %v962_v8  ;;  %v1274_v31 = vld [vmem:[#allocation6 + $0x1bb8] sm:$0xff]  ;;  %v13405_v8 = vcombine.low %v902_v52, %v914_v48 }
 0x4c9   : > { %8803 = vmatpush2.bf16.msra.mxu1 %v13165_v41  ;;  %8763 = vmatprep.subr.bf16.mxu0 %v13908_v58  ;;  %v13837_v41 = vcombine.low %v1334_v32, %v1346_v34  ;;  %v13430_v58 = vcombine.high %v926_v27, %v938_v2  ;;  %v1226_v52 = vld [vmem:[#allocation6 + $0x1a38] sm:$0xff] }
 0x4ca   : > { %8804 = vmatprep.subr.bf16.mxu1 %v13142_v45  ;;  %v13814_v45 = vcombine.high %v1310_v44, %v1322_v39 }
 0x4cc   : > { %8764 = vmatpush2.bf16.msra.mxu0 %v13907_v1  ;;  %v1298_v1 = vld [vmem:[#allocation6 + $0x1c78] sm:$0xff] }
 0x4cd   : > { %8805 = vmatpush2.bf16.msra.mxu1 %v13141_v3  ;;  %8765 = vmatprep.subr.bf16.mxu0 %v13884_v5  ;;  %v13429_v3 = vcombine.low %v926_v27, %v938_v2  ;;  %v13790_v17 = vcombine.high %v1286_v62, %v1298_v1  ;;  %v1238_v2 = vld [vmem:[#allocation6 + $0x1a98] sm:$0xff] }
 0x4ce   : > { %8806 = vmatprep.subr.bf16.mxu1 %v13118_v53 }
 0x4d0   : > { %8766 = vmatpush2.bf16.msra.mxu0 %v13883_v18  ;;  %v878_v18 = vld [vmem:[#allocation6 + $0xf58] sm:$0xff] }
 0x4d1   : > { %8807 = vmatpush2.bf16.msra.mxu1 %v13117_v19  ;;  %8767 = vmatprep.subr.bf16.mxu0 %v13860_v46  ;;  %v890_v19 = vld [vmem:[#allocation6 + $0xfb8] sm:$0xff] }
 0x4d2   : > { %8808 = vmatprep.subr.bf16.mxu1 %v13094_v26  ;;  %v1262_v26 = vld [vmem:[#allocation6 + $0x1b58] sm:$0xff]  ;;  %v13381_v44 = vcombine.low %v878_v18, %v890_v19 }
 0x4d4   : > { %8768 = vmatpush2.bf16.msra.mxu0 %v13859_v36  ;;  %v13382_v36 = vcombine.high %v878_v18, %v890_v19 }
 0x4d5   : > { %8809 = vmatpush2.bf16.msra.mxu1 %v13093_v57  ;;  %8819 = vmatprep.subr.bf16.mxu0 %v13454_v38  ;;  %v13766_v57 = vcombine.high %v1262_v26, %v1274_v31  ;;  %v854_v38 = vld [vmem:[#allocation6 + $0xe98] sm:$0xff] }
 0x4d6   : > { %8860 = vmatprep.subr.bf16.mxu1 %v13838_v37  ;;  %v866_v37 = vld [vmem:[#allocation6 + $0xef8] sm:$0xff] }
 0x4d7   : > { %v16042_v56 = vpop.f32.mrf.mxu0  ;;  %8770 = vmatmul.mubr.bf16.vlgmr.msra.gmra.mxu0 %v15824_v33  ;;  %v13358_v39 = vcombine.high %v854_v38, %v866_v37  ;;  %v13357_v48 = vcombine.low %v854_v38, %v866_v37  ;;  %v1142_v37 = vld [vmem:[#allocation6 + $0x1798] sm:$0xff] }
 0x4d8   : > { %8811 = vmatmul.mubr.bf16.vlgmr.msra.gmra.mxu1 %v15812_v16  ;;  %8820 = vmatpush1.bf16.msra.mxu0 %v13453_v40  ;;  %v16046_v5 = vpop.f32.mrf.mxu1 }
 0x4d9   : > { %8861 = vmatpush1.bf16.msra.mxu1 %v13837_v41  ;;  %v8527_v53 = vpop.f32.mrf.mxu0  ;;  %8821 = vmatprep.subr.bf16.mxu0 %v13430_v58  ;;  %v830_v41 = vld [vmem:[#allocation6 + $0xdd8] sm:$0xff] }
 0x4da   : > { %v16049_v14 = vadd.f32 %v8527_v53, %v16040_v9  ;;  %8862 = vmatprep.subr.bf16.mxu1 %v13814_v45  ;;  %v16051_v46 = vpop.f32.mrf.mxu1  ;;  %8851 = vmatprep.mubr.bf16.mxu0 %v15806_v61  ;;  %v13789_v9 = vcombine.low %v1286_v62, %v1298_v1  ;;  %v1250_v61 = vld [vmem:[#allocation6 + $0x1af8] sm:$0xff] }
 0x4db   : > { %v8529_v16 = vpop.f32.mrf.mxu0  ;;  %8892 = vmatprep.mubr.bf16.mxu1 %v15817_v28  ;;  %v13765_v28 = vcombine.low %v1262_v26, %v1274_v31  ;;  %v13742_v40 = vcombine.high %v1238_v2, %v1250_v61  ;;  %v842_v58 = vld [vmem:[#allocation6 + $0xe38] sm:$0xff]  ;;  %v13741_v62 = vcombine.low %v1238_v2, %v1250_v61 }
 0x4dc   : > { %8822 = vmatpush1.bf16.msra.mxu0 %v13429_v3  ;;  %v8570_v32 = vpop.f32.mrf.mxu1  ;;  %v1214_v45 = vld [vmem:[#allocation6 + $0x19d8] sm:$0xff]  ;;  %v13334_v1 = vcombine.high %v830_v41, %v842_v58  ;;  %v13333_v18 = vcombine.low %v830_v41, %v842_v58 }
 0x4dd   : > { %8863 = vmatpush1.bf16.msra.mxu1 %v13813_v43  ;;  %v8530_v34 = vpop.f32.mrf.mxu0  ;;  %8823 = vmatprep.subr.bf16.mxu0 %v13406_v13  ;;  %v13718_v3 = vcombine.high %v1214_v45, %v1226_v52  ;;  %v806_v53 = vld [vmem:[#allocation6 + $0xd18] sm:$0xff]  ;;  %v13717_v19 = vcombine.low %v1214_v45, %v1226_v52 }
 0x4de   : > { %8864 = vmatprep.subr.bf16.mxu1 %v13790_v17  ;;  %v8571_v27 = vpop.f32.mrf.mxu1  ;;  %v818_v43 = vld [vmem:[#allocation6 + $0xd78] sm:$0xff] }
 0x4df   : > { %v1190_v13 = vld [vmem:[#allocation6 + $0x1918] sm:$0xff]  ;;  %v13310_v16 = vcombine.high %v806_v53, %v818_v43 }
 0x4e0   : > { %8824 = vmatpush1.bf16.msra.mxu0 %v13405_v8  ;;  %v1202_v17 = vld [vmem:[#allocation6 + $0x1978] sm:$0xff] }
 0x4e1   : > { %8865 = vmatpush1.bf16.msra.mxu1 %v13789_v9  ;;  %8825 = vmatprep.subr.bf16.mxu0 %v13382_v36  ;;  %v13694_v26 = vcombine.high %v1190_v13, %v1202_v17  ;;  %v782_v31 = vld [vmem:[#allocation6 + $0xc58] sm:$0xff]  ;;  %v13309_v9 = vcombine.low %v806_v53, %v818_v43  ;;  %v13693_v36 = vcombine.low %v1190_v13, %v1202_v17 }
 0x4e2   : > { %8866 = vmatprep.subr.bf16.mxu1 %v13766_v57  ;;  %v794_v8 = vld [vmem:[#allocation6 + $0xcb8] sm:$0xff] }
 0x4e3   : > { %v1166_v32 = vld [vmem:[#allocation6 + $0x1858] sm:$0xff]  ;;  %v13286_v57 = vcombine.high %v782_v31, %v794_v8 }
 0x4e4   : > { %8826 = vmatpush1.bf16.msra.mxu0 %v13381_v44  ;;  %v1178_v34 = vld [vmem:[#allocation6 + $0x18b8] sm:$0xff]  ;;  %v13285_v44 = vcombine.low %v782_v31, %v794_v8 }
 0x4e5   : > { %8867 = vmatpush1.bf16.msra.mxu1 %v13765_v28  ;;  %8827 = vmatprep.subr.bf16.mxu0 %v13358_v39  ;;  %v13670_v38 = vcombine.high %v1166_v32, %v1178_v34  ;;  %v1154_v27 = vld [vmem:[#allocation6 + $0x17f8] sm:$0xff]  ;;  %v13669_v28 = vcombine.low %v1166_v32, %v1178_v34 }
 0x4e6   : > { %8868 = vmatprep.subr.bf16.mxu1 %v13742_v40  ;;  %v1526_v2 = vld [vmem:[#allocation6 + $0x2398] sm:$0xff]  ;;  %v13646_v39 = vcombine.high %v1142_v37, %v1154_v27 }
 0x4e7   : > { %v1538_v61 = vld [vmem:[#allocation6 + $0x23f8] sm:$0xff] }
 0x4e8   : > { %8828 = vmatpush1.bf16.msra.mxu0 %v13357_v48  ;;  %v14030_v40 = vcombine.high %v1526_v2, %v1538_v61  ;;  %v1118_v41 = vld [vmem:[#allocation6 + $0x16d8] sm:$0xff]  ;;  %v13645_v48 = vcombine.low %v1142_v37, %v1154_v27 }
 0x4e9   : > { %8869 = vmatpush1.bf16.msra.mxu1 %v13741_v62  ;;  %8829 = vmatprep.subr.bf16.mxu0 %v13334_v1  ;;  %v1130_v58 = vld [vmem:[#allocation6 + $0x1738] sm:$0xff]  ;;  %v14029_v62 = vcombine.low %v1526_v2, %v1538_v61 }
 0x4ea   : > { %8870 = vmatprep.subr.bf16.mxu1 %v13718_v3  ;;  %v1502_v45 = vld [vmem:[#allocation6 + $0x22d8] sm:$0xff]  ;;  %v13622_v1 = vcombine.high %v1118_v41, %v1130_v58 }
 0x4eb   : > { %v1514_v52 = vld [vmem:[#allocation6 + $0x2338] sm:$0xff] }
 0x4ec   : > { %8830 = vmatpush1.bf16.msra.mxu0 %v13333_v18  ;;  %v14006_v3 = vcombine.high %v1502_v45, %v1514_v52  ;;  %v1094_v53 = vld [vmem:[#allocation6 + $0x1618] sm:$0xff]  ;;  %v13621_v18 = vcombine.low %v1118_v41, %v1130_v58 }
 0x4ed   : > { %8871 = vmatpush1.bf16.msra.mxu1 %v13717_v19  ;;  %8831 = vmatprep.subr.bf16.mxu0 %v13310_v16  ;;  %v1106_v43 = vld [vmem:[#allocation6 + $0x1678] sm:$0xff]  ;;  %v14005_v19 = vcombine.low %v1502_v45, %v1514_v52 }
 0x4ee   : > { %8872 = vmatprep.subr.bf16.mxu1 %v13694_v26  ;;  %v1478_v13 = vld [vmem:[#allocation6 + $0x2218] sm:$0xff]  ;;  %v13598_v16 = vcombine.high %v1094_v53, %v1106_v43 }
 0x4ef   : > { %v1490_v17 = vld [vmem:[#allocation6 + $0x2278] sm:$0xff] }
 0x4f0   : > { %8832 = vmatpush1.bf16.msra.mxu0 %v13309_v9  ;;  %v13982_v26 = vcombine.high %v1478_v13, %v1490_v17  ;;  %v1070_v31 = vld [vmem:[#allocation6 + $0x1558] sm:$0xff]  ;;  %v13597_v9 = vcombine.low %v1094_v53, %v1106_v43 }
 0x4f1   : > { %8873 = vmatpush1.bf16.msra.mxu1 %v13693_v36  ;;  %8833 = vmatprep.subr.bf16.mxu0 %v13286_v57  ;;  %v1082_v8 = vld [vmem:[#allocation6 + $0x15b8] sm:$0xff]  ;;  %v13981_v36 = vcombine.low %v1478_v13, %v1490_v17 }
 0x4f2   : > { %8874 = vmatprep.subr.bf16.mxu1 %v13670_v38  ;;  %v1454_v32 = vld [vmem:[#allocation6 + $0x2158] sm:$0xff]  ;;  %v13574_v57 = vcombine.high %v1070_v31, %v1082_v8 }
 0x4f3   : > { %v1466_v34 = vld [vmem:[#allocation6 + $0x21b8] sm:$0xff] }
 0x4f4   : > { %8834 = vmatpush1.bf16.msra.mxu0 %v13285_v44  ;;  %v13958_v38 = vcombine.high %v1454_v32, %v1466_v34  ;;  %v1046_v37 = vld [vmem:[#allocation6 + $0x1498] sm:$0xff]  ;;  %v13573_v44 = vcombine.low %v1070_v31, %v1082_v8 }
 0x4f5   : > { %8875 = vmatpush1.bf16.msra.mxu1 %v13669_v28  ;;  %8835 = vmatprep.subr.bf16.mxu0 %v13646_v39  ;;  %v1058_v27 = vld [vmem:[#allocation6 + $0x14f8] sm:$0xff]  ;;  %v13957_v28 = vcombine.low %v1454_v32, %v1466_v34 }
 0x4f6   : > { %8876 = vmatprep.subr.bf16.mxu1 %v14030_v40  ;;  %v1430_v2 = vld [vmem:[#allocation6 + $0x2098] sm:$0xff]  ;;  %v13550_v39 = vcombine.high %v1046_v37, %v1058_v27 }
 0x4f7   : > { %v1442_v61 = vld [vmem:[#allocation6 + $0x20f8] sm:$0xff] }
 0x4f8   : > { %8836 = vmatpush2.bf16.msra.mxu0 %v13645_v48  ;;  %v13934_v40 = vcombine.high %v1430_v2, %v1442_v61  ;;  %v1022_v41 = vld [vmem:[#allocation6 + $0x13d8] sm:$0xff]  ;;  %v13549_v48 = vcombine.low %v1046_v37, %v1058_v27  ;;  %v8526_v37 = vadd.f32 %v16042_v56, %v16036_v51  ;;  %v1620_v27 = vrot.slane %v16028_v12, %v15871_v7 }
 0x4f9   : > { %8877 = vmatpush2.bf16.msra.mxu1 %v14029_v62  ;;  %8837 = vmatprep.subr.bf16.mxu0 %v13622_v1  ;;  %v1034_v58 = vld [vmem:[#allocation6 + $0x1438] sm:$0xff]  ;;  %v13933_v62 = vcombine.low %v1430_v2, %v1442_v61  ;;  %v8903_v51 = vpack.c.bf16 %v15960_v23, %v15960_v23 }
 0x4fa   : > { %8878 = vmatprep.subr.bf16.mxu1 %v14006_v3  ;;  %v1406_v45 = vld [vmem:[#allocation6 + $0x1fd8] sm:$0xff]  ;;  %v13526_v1 = vcombine.high %v1022_v41, %v1034_v58 }
 0x4fb   : > { %v1418_v52 = vld [vmem:[#allocation6 + $0x2038] sm:$0xff] }
 0x4fc   : > { %8838 = vmatpush2.bf16.msra.mxu0 %v13621_v18  ;;  %v13910_v3 = vcombine.high %v1406_v45, %v1418_v52  ;;  %v998_v53 = vld [vmem:[#allocation6 + $0x1318] sm:$0xff]  ;;  %v13525_v18 = vcombine.low %v1022_v41, %v1034_v58 }
 0x4fd   : > { %8879 = vmatpush2.bf16.msra.mxu1 %v14005_v19  ;;  %8839 = vmatprep.subr.bf16.mxu0 %v13598_v16  ;;  %v1010_v43 = vld [vmem:[#allocation6 + $0x1378] sm:$0xff]  ;;  %v13909_v19 = vcombine.low %v1406_v45, %v1418_v52  ;;  %v8901_v52 = vmul.f32 0.10206208, %v15858_v55 }
 0x4fe   : > { %8880 = vmatprep.subr.bf16.mxu1 %v13982_v26  ;;  %v1382_v13 = vld [vmem:[#allocation6 + $0x1f18] sm:$0xff]  ;;  %v13502_v16 = vcombine.high %v998_v53, %v1010_v43 }
 0x4ff   : > { %v1394_v17 = vld [vmem:[#allocation6 + $0x1f78] sm:$0xff] }
 0x500   : > { %8840 = vmatpush2.bf16.msra.mxu0 %v13597_v9  ;;  %v13886_v26 = vcombine.high %v1382_v13, %v1394_v17  ;;  %v974_v31 = vld [vmem:[#allocation6 + $0x1258] sm:$0xff]  ;;  %v13501_v9 = vcombine.low %v998_v53, %v1010_v43  ;;  %v9009_v53 = vpack.c.bf16 %v15966_v6, %v15966_v6  ;;  %v9111_v6 = vmul.f32 0.10206208, %v15884_v47 }
 0x501   : > { %8881 = vmatpush2.bf16.msra.mxu1 %v13981_v36  ;;  %8841 = vmatprep.subr.bf16.mxu0 %v13574_v57  ;;  %v986_v8 = vld [vmem:[#allocation6 + $0x12b8] sm:$0xff]  ;;  %v13885_v36 = vcombine.low %v1382_v13, %v1394_v17  ;;  %v9007_v13 = vmul.f32 0.10206208, %v15864_v0  ;;  %v9215_v0 = vmul.f32 0.10206208, %v15888_v60 }
 0x502   : > { %8882 = vmatprep.subr.bf16.mxu1 %v13958_v38  ;;  %v1358_v32 = vld [vmem:[#allocation6 + $0x1e58] sm:$0xff]  ;;  %v13478_v57 = vcombine.high %v974_v31, %v986_v8  ;;  %v13477_v2 = vcombine.low %v974_v31, %v986_v8  ;;  %v9319_v47 = vmul.f32 0.10206208, %v15912_v42  ;;  %v9425_v31 = vpack.c.bf16 %v16008_v35, %v16008_v35 }
 0x503   : > { %v1370_v34 = vld [vmem:[#allocation6 + $0x1eb8] sm:$0xff]  ;;  %v9008_v17 = vpack.c.bf16 %v9007_v13, %v9007_v13  ;;  %v9423_v60 = vmul.f32 0.10206208, %v15918_v50  ;;  %v9529_v8 = vpack.c.bf16 %v16022_v4, %v16022_v4  ;;  %v9527_v42 = vmul.f32 0.10206208, %v15938_v10 }
 0x504   : > { %8842 = vmatpush2.bf16.msra.mxu0 %v13573_v44  ;;  %v13862_v38 = vcombine.high %v1358_v32, %v1370_v34  ;;  %v13861_v61 = vcombine.low %v1358_v32, %v1370_v34  ;;  %v1624_v44 = vrot.slane %v16028_v12, %v15874_v30  ;;  %v9633_v32 = vpack.c.bf16 %v16026_v59, %v16026_v59 }
 0x505   : > { %8883 = vmatpush2.bf16.msra.mxu1 %v13957_v28  ;;  %8843 = vmatprep.subr.bf16.mxu0 %v13550_v39  ;;  %v8957_v28 = vpack.c.bf16 %v8526_v37, %v8526_v37  ;;  %v8567_v39 = vadd.f32 %v16046_v5, %v1620_v27  ;;  %v9528_v35 = vpack.c.bf16 %v9527_v42, %v9527_v42  ;;  %v9631_v50 = vmul.f32 0.10206208, %v15942_v24 }
 0x506   : > { %8884 = vmatprep.subr.bf16.mxu1 %v13934_v40  ;;  %v15579_v40 = vmov 0.0   ;;  %v8569_v56 = vadd.f32 %v16051_v46, %v1624_v44  ;;  %v1628_v4 = vrot.slane %v16028_v12, %v15891_v11  ;;  %v1632_v10 = vrot.slane %v16028_v12, %v15894_v15 }
 0x507   : > { %v8963_v58 = vsel %vm8961_vm0, %v8957_v28, 0  ;;  %v9632_v34 = vpack.c.bf16 %v9631_v50, %v9631_v50 }
 0x508   : > { %8844 = vmatpush2.bf16.msra.mxu0 %v13549_v48 }
 0x509   : > { %8885 = vmatpush2.bf16.msra.mxu1 %v13933_v62  ;;  %8845 = vmatprep.subr.bf16.mxu0 %v13526_v1  ;;  %v8902_v1 = vpack.c.bf16 %v8901_v52, %v8901_v52 }
 0x50a   : > { %8886 = vmatprep.subr.bf16.mxu1 %v13910_v3 }
 0x50c   : > { %8846 = vmatpush2.bf16.msra.mxu0 %v13525_v18  ;;  %v9113_v18 = vpack.c.bf16 %v15980_v49, %v15980_v49  ;;  %v9216_v49 = vpack.c.bf16 %v9215_v0, %v9215_v0 }
 0x50d   : > { %8887 = vmatpush2.bf16.msra.mxu1 %v13909_v19  ;;  %8847 = vmatprep.subr.bf16.mxu0 %v13502_v16  ;;  %v9112_v19 = vpack.c.bf16 %v9111_v6, %v9111_v6  ;;  %v9217_v16 = vpack.c.bf16 %v15984_v20, %v15984_v20  ;;  %v9320_v20 = vpack.c.bf16 %v9319_v47, %v9319_v47 }
 0x50e   : > { %8888 = vmatprep.subr.bf16.mxu1 %v13886_v26  ;;  %v9321_v26 = vpack.c.bf16 %v16002_v22, %v16002_v22  ;;  %v9424_v22 = vpack.c.bf16 %v9423_v60, %v9423_v60 }
 0x510   : > { %8848 = vmatpush2.bf16.msra.mxu0 %v13501_v9 }
 0x511   : > { %8889 = vmatpush2.bf16.msra.mxu1 %v13885_v36  ;;  %8849 = vmatprep.subr.bf16.mxu0 %v13478_v57 }
 0x512   : > { %8890 = vmatprep.subr.bf16.mxu1 %v13862_v38 }
 0x514   : > { %8850 = vmatpush2.bf16.msra.mxu0 %v13477_v2 }
 0x515   : > { %8891 = vmatpush2.bf16.msra.mxu1 %v13861_v61  ;;  %14466 = vmatprep.subr.bf16.mxu0 %v15579_v40 }
 0x516   : > { %14472 = vmatprep.subr.bf16.mxu1 %v15579_v40 }
 0x517   : > { %v8607_v41 = vpop.f32.mrf.mxu0  ;;  %8852 = vmatmul.mubr.bf16.vlgmr.msra.gmra.mxu0 %v15815_v21 }
 0x518   : > { %v8608_v45 = vadd.f32 %v8607_v41, %v8567_v39  ;;  %8893 = vmatmul.mubr.bf16.vlgmr.msra.gmra.mxu1 %v15824_v33  ;;  %14467 = vmatpush3.bf16.xpose.msra.mxu0 %v8903_v51  ;;  %v8648_v5 = vpop.f32.mrf.mxu1 }
 0x519   : > { %14473 = vmatpush3.bf16.msra.mxu1 %v8963_v58  ;;  %v8609_v48 = vpop.f32.mrf.mxu0  ;;  %14468 = vmatprep.mubr.msk.bf16.mxu0 %vm15580_vm1, %v15579_v40 }
 0x51a   : > { %v8610_v23 = vadd.f32 %v8609_v48, %v8569_v56  ;;  %v16073_v46 = vadd.f32 %v8648_v5, %v8608_v45  ;;  %v8650_v62 = vpop.f32.mrf.mxu1  ;;  %14478 = vmatprep.subr.bf16.mxu0 %v15579_v40  ;;  %14474 = vmatprep.mubr.msk.bf16.mxu1 %vm15580_vm1, %v15579_v40 }
 0x51b   : > { %v8611_v21 = vpop.f32.mrf.mxu0  ;;  %14484 = vmatprep.subr.bf16.mxu1 %v15579_v40 }
 0x51c   : > { %v16079_v33 = vadd.f32 %v8650_v62, %v8610_v23  ;;  %v8652_v55 = vpop.f32.mrf.mxu1  ;;  %v15299_v23 = vld [vmem:[#allocation8 + $0x10] sm:$0xff] }
 0x51d   : > { %v8612_v3 = vpop.f32.mrf.mxu0  ;;  %v1636_v62 = vrot.slane %v15299_v23, %v15925_v25  ;;  %v1640_v21 = vrot.slane %v15299_v23, %v15928_v29 }
 0x51e   : > { %v8653_v43 = vpop.f32.mrf.mxu1 }
 0x51f   : > { %14469 = vmatmul.mubr.bf16.vlgmr.msra.gmra.mxu0 %v8902_v1 }
 0x520   : > { %14479 = vmatpush3.bf16.xpose.msra.mxu0 %v9009_v53  ;;  %14480 = vmatprep.mubr.msk.bf16.mxu0 %vm15580_vm1, %v15579_v40 }
 0x521   : > { %14490 = vmatprep.subr.bf16.mxu0 %v15579_v40 }
 0x527   : > { %14481 = vmatmul.mubr.bf16.vlgmr.msra.gmra.mxu0 %v9008_v17 }
 0x528   : > { %14491 = vmatpush3.bf16.xpose.msra.mxu0 %v9113_v18  ;;  %14492 = vmatprep.mubr.msk.bf16.mxu0 %vm15580_vm1, %v15579_v40 }
 0x529   : > { %14502 = vmatprep.subr.bf16.mxu0 %v15579_v40 }
 0x52f   : > { %14493 = vmatmul.mubr.bf16.vlgmr.msra.gmra.mxu0 %v9112_v19 }
 0x530   : > { %14503 = vmatpush3.bf16.xpose.msra.mxu0 %v9217_v16  ;;  %14504 = vmatprep.mubr.msk.bf16.mxu0 %vm15580_vm1, %v15579_v40 }
 0x531   : > { %14514 = vmatprep.subr.bf16.mxu0 %v15579_v40 }
 0x537   : > { %14505 = vmatmul.mubr.bf16.vlgmr.msra.gmra.mxu0 %v9216_v49 }
 0x538   : > { %14515 = vmatpush3.bf16.xpose.msra.mxu0 %v9321_v26  ;;  %14516 = vmatprep.mubr.msk.bf16.mxu0 %vm15580_vm1, %v15579_v40 }
 0x539   : > { %14526 = vmatprep.subr.bf16.mxu0 %v15579_v40 }
 0x53f   : > { %14517 = vmatmul.mubr.bf16.vlgmr.msra.gmra.mxu0 %v9320_v20 }
 0x540   : > { %14527 = vmatpush3.bf16.xpose.msra.mxu0 %v9425_v31  ;;  %14528 = vmatprep.mubr.msk.bf16.mxu0 %vm15580_vm1, %v15579_v40 }
 0x541   : > { %14538 = vmatprep.subr.bf16.mxu0 %v15579_v40 }
 0x547   : > { %14529 = vmatmul.mubr.bf16.vlgmr.msra.gmra.mxu0 %v9424_v22 }
 0x548   : > { %14539 = vmatpush3.bf16.xpose.msra.mxu0 %v9529_v8  ;;  %14540 = vmatprep.mubr.msk.bf16.mxu0 %vm15580_vm1, %v15579_v40 }
 0x549   : > { %14550 = vmatprep.subr.bf16.mxu0 %v15579_v40 }
 0x54f   : > { %14541 = vmatmul.mubr.bf16.vlgmr.msra.gmra.mxu0 %v9528_v35 }
 0x550   : > { %14551 = vmatpush3.bf16.xpose.msra.mxu0 %v9633_v32  ;;  %14552 = vmatprep.mubr.msk.bf16.mxu0 %vm15580_vm1, %v15579_v40 }
 0x557   : > { %v8689_v9 = vpop.f32.mrf.mxu0  ;;  %14553 = vmatmul.mubr.bf16.vlgmr.msra.gmra.mxu0 %v9632_v34 }
 0x558   : > { %v8690_v36 = vadd.f32 %v8689_v9, %v1628_v4  ;;  %v8730_v57 = vpop.f32.mrf.mxu1 }
 0x559   : > { %v8691_v38 = vpop.f32.mrf.mxu0 }
 0x55a   : > { %v8692_v59 = vadd.f32 %v8691_v38, %v1632_v10  ;;  %v8731_v37 = vadd.f32 %v8730_v57, %v8690_v36  ;;  %v8732_v27 = vpop.f32.mrf.mxu1 }
 0x55b   : > { %v8693_v2 = vpop.f32.mrf.mxu0 }
 0x55c   : > { %v8733_v61 = vadd.f32 %v8732_v27, %v8692_v59  ;;  %v8734_v44 = vpop.f32.mrf.mxu1 }
 0x55d   : > { %v8694_v28 = vpop.f32.mrf.mxu0 }
 0x55e   : > { %v8735_v24 = vpop.f32.mrf.mxu1 }
 0x597   : > { %v8771_v39 = vpop.f32.mrf.mxu0 }
 0x598   : > { %v16126_v51 = vadd.f32 %v8771_v39, %v8731_v37  ;;  %v8812_v56 = vpop.f32.mrf.mxu1 }
 0x599   : > { %v8773_v41 = vpop.f32.mrf.mxu0  ;;  %v8813_v55 = vadd.f32 %v8812_v56, %v1636_v62 }
 0x59a   : > { %v16128_v58 = vadd.f32 %v8773_v41, %v8733_v61  ;;  %v8814_v12 = vpop.f32.mrf.mxu1 }
 0x59b   : > { %v8775_v45 = vpop.f32.mrf.mxu0  ;;  %v8815_v1 = vadd.f32 %v8814_v12, %v1640_v21 }
 0x59c   : > { %v8816_v5 = vpop.f32.mrf.mxu1 }
 0x59d   : > { %v8776_v52 = vpop.f32.mrf.mxu0 }
 0x59e   : > { %v8817_v48 = vpop.f32.mrf.mxu1 }
 0x5d7   : > { %v8853_v3 = vpop.f32.mrf.mxu0 }
 0x5d8   : > { %v8854_v53 = vadd.f32 %v8853_v3, %v8813_v55  ;;  %v8894_v43 = vpop.f32.mrf.mxu1 }
 0x5d9   : > { %v8855_v13 = vpop.f32.mrf.mxu0 }
 0x5da   : > { %v8856_v17 = vadd.f32 %v8855_v13, %v8815_v1  ;;  %v16132_v18 = vadd.f32 %v8894_v43, %v8854_v53  ;;  %v8896_v6 = vpop.f32.mrf.mxu1 }
 0x5db   : > { %v8857_v19 = vpop.f32.mrf.mxu0 }
 0x5dc   : > { %v16134_v16 = vadd.f32 %v8896_v6, %v8856_v17  ;;  %v8898_v0 = vpop.f32.mrf.mxu1 }
 0x5dd   : > { %v8858_v49 = vpop.f32.mrf.mxu0 }
 0x5de   : > { %v8899_v26 = vpop.f32.mrf.mxu1 }
 0x5df   : > { %v8938_v25 = vpop.f32.mrf.mxu0 }
 0x5e0   : > { %v8945_v29 = vsel %vm8944_vm2, %v8938_v25, -inf }
 0x5e1   : > { %8946 = vmax.xlane.f32.xlu0 %v8945_v29  ;;  %v14470_v47 = vpop.f32.mrf.mxu0 }
 0x5e3   : > { %v8941_v20 = vpop.f32.mrf.mxu0 }
 0x5e5   : > { %v14471_v31 = vpop.f32.mrf.mxu0 }
 0x5e7   : > { %v9044_v60 = vpop.f32.mrf.mxu0 }
 0x5e8   : > { %v9050_v22 = vsel %vm8944_vm2, %v9044_v60, -inf }
 0x5e9   : > { %9051 = vmax.xlane.f32.xlu0 %v9050_v22  ;;  %v14482_v8 = vpop.f32.mrf.mxu0 }
 0x5eb   : > { %v9047_v42 = vpop.f32.mrf.mxu0 }
 0x5ed   : > { %v14483_v35 = vpop.f32.mrf.mxu0 }
 0x5ef   : > { %v9148_v32 = vpop.f32.mrf.mxu0 }
 0x5f0   : > { %v9154_v50 = vsel %vm8944_vm2, %v9148_v32, -inf }
 0x5f1   : > { %9155 = vmax.xlane.f32.xlu1 %v9154_v50  ;;  %v14494_v4 = vpop.f32.mrf.mxu0 }
 0x5f3   : > { %v9151_v34 = vpop.f32.mrf.mxu0 }
 0x5f5   : > { %v14495_v10 = vpop.f32.mrf.mxu0 }
 0x5f7   : > { %v9252_v9 = vpop.f32.mrf.mxu0 }
 0x5f8   : > { %v9258_v36 = vsel %vm8944_vm2, %v9252_v9, -inf }
 0x5f9   : > { %9259 = vmax.xlane.f32.xlu1 %v9258_v36  ;;  %v14506_v57 = vpop.f32.mrf.mxu0 }
 0x5fb   : > { %v9255_v38 = vpop.f32.mrf.mxu0 }
 0x5fd   : > { %v14507_v59 = vpop.f32.mrf.mxu0 }
 0x5ff   : > { %v9356_v37 = vpop.f32.mrf.mxu0 }
 0x600   : > { %v9362_v27 = vsel %vm8944_vm2, %v9356_v37, -inf }
 0x601   : > { %9363 = vmax.xlane.f32.xlu0 %v9362_v27  ;;  %v14518_v2 = vpop.f32.mrf.mxu0 }
 0x603   : > { %v9359_v61 = vpop.f32.mrf.mxu0 }
 0x605   : > { %v14519_v44 = vpop.f32.mrf.mxu0 }
 0x607   : > { %v9460_v28 = vpop.f32.mrf.mxu0 }
 0x608   : > { %v9466_v24 = vsel %vm8944_vm2, %v9460_v28, -inf }
 0x609   : > { %9467 = vmax.xlane.f32.xlu1 %v9466_v24  ;;  %v14530_v39 = vpop.f32.mrf.mxu0 }
 0x60b   : > { %v9463_v56 = vpop.f32.mrf.mxu0 }
 0x60d   : > { %v14531_v41 = vpop.f32.mrf.mxu0 }
 0x60f   : > { %v9564_v12 = vpop.f32.mrf.mxu0 }
 0x610   : > { %v9570_v45 = vsel %vm8944_vm2, %v9564_v12, -inf }
 0x611   : > { %9571 = vmax.xlane.f32.xlu0 %v9570_v45  ;;  %v14542_v5 = vpop.f32.mrf.mxu0  ;;  %v14681_v45 = vld [vmem:[#allocation9 + $0x154] ss:$24 sps:$4 sm:$0xff]  }
 0x612   : > { %v14684_v5 = vld [vmem:[#allocation9 + $0x124] ss:$24 sps:$4 sm:$0xff]   ;;  %12103 = vmatprep.subr.bf16.mxu0 %v14681_v45  ;;  %v9478_v45 = vpack.c.bf16 %v16128_v58, %v16128_v58 }
 0x613   : > { %v9567_v52 = vpop.f32.mrf.mxu0 }
 0x614   : > { %v14682_v52 = vld [vmem:[#allocation9 + $0x120] ss:$24 sps:$4 sm:$0xff]  }
 0x615   : > { %v14543_v48 = vpop.f32.mrf.mxu0 }
 0x616   : > { %v14687_v48 = vld [vmem:[#allocation9 + $0xf4] ss:$24 sps:$4 sm:$0xff]  }
 0x617   : > { %v9668_v23 = vpop.f32.mrf.mxu0 }
 0x618   : > { %v9674_v62 = vsel %vm8944_vm2, %v9668_v23, -inf }
 0x619   : > { %9675 = vmax.xlane.f32.xlu1 %v9674_v62  ;;  %v14554_v21 = vpop.f32.mrf.mxu0  ;;  %v14690_v62 = vld [vmem:[#allocation9 + $0xc4] ss:$24 sps:$4 sm:$0xff]  }
 0x61a   : > { %v14688_v21 = vld [vmem:[#allocation9 + $0xc0] ss:$24 sps:$4 sm:$0xff]  }
 0x61b   : > { %v9671_v55 = vpop.f32.mrf.mxu0 }
 0x61c   : > { %v14693_v55 = vld [vmem:[#allocation9 + $0x94] ss:$24 sps:$4 sm:$0xff]  }
 0x61d   : > { %v14555_v1 = vpop.f32.mrf.mxu0 }
 0x61e   : > { %v14691_v1 = vld [vmem:[#allocation9 + $0x90] ss:$24 sps:$4 sm:$0xff]  }
 0x66a   : > { %v8947_v3 = vpop.xlane.xlu0 %8946 }
 0x66b   : > { %v8948_v53 = vsub.f32 %v8938_v25, %v8947_v3  ;;  %v14699_v3 = vld [vmem:[#allocation9 + $0x64] ss:$24 sps:$4 sm:$0xff]  }
 0x66d   : > { %v8949_v43 = vmul.f32 1.442695, %v8948_v53  ;;  %v14697_v53 = vld [vmem:[#allocation9 + $0x60] ss:$24 sps:$4 sm:$0xff]  }
 0x66f   : > { %15263 = vpow2.f32 %v8949_v43  ;;  %v14705_v43 = vld [vmem:[#allocation9 + $0x34] ss:$24 sps:$4 sm:$0xff]  }
 0x672   : > { %v9052_v13 = vpop.xlane.xlu0 %9051 }
 0x673   : > { %v9053_v17 = vsub.f32 %v9044_v60, %v9052_v13  ;;  %v14703_v13 = vld [vmem:[#allocation9 + $0x30] ss:$24 sps:$4 sm:$0xff]  }
 0x675   : > { %v9054_v6 = vmul.f32 1.442695, %v9053_v17  ;;  %v14711_v17 = vld [vmem:[#allocation9 + $0x4] ss:$24 sps:$4 sm:$0xff]  }
 0x677   : > { %15265 = vpow2.f32 %v9054_v6  ;;  %v14709_v6 = vld [vmem:[#allocation9] ss:$24 sps:$4 sm:$0xff]  }
 0x67a   : > { %v9156_v19 = vpop.xlane.xlu1 %9155 }
 0x67b   : > { %v9157_v0 = vsub.f32 %v9148_v32, %v9156_v19  ;;  %v14717_v19 = vld [vmem:[#allocation9 + $0x2d4] ss:$24 sps:$4 sm:$0xff]  }
 0x67c   : > { %v16144_v49 = vpop.eup %15263 }
 0x67d   : > { %v9158_v26 = vmul.f32 1.442695, %v9157_v0  ;;  %v8951_v29 = vsel %vm8944_vm2, %v16144_v49, 0.0  ;;  %v14715_v0 = vld [vmem:[#allocation9 + $0x2d0] ss:$24 sps:$4 sm:$0xff]  }
 0x67e   : > { %8952 = vadd.xlane.f32.xlu0 %v8951_v29  ;;  %v14721_v29 = vld [vmem:[#allocation9 + $0x2a0] ss:$24 sps:$4 sm:$0xff]  }
 0x67f   : > { %15267 = vpow2.f32 %v9158_v26  ;;  %v14723_v26 = vld [vmem:[#allocation9 + $0x2a4] ss:$24 sps:$4 sm:$0xff]  }
 0x682   : > { %v9260_v47 = vpop.xlane.xlu1 %9259 }
 0x683   : > { %v9261_v20 = vsub.f32 %v9252_v9, %v9260_v47  ;;  %v14729_v47 = vld [vmem:[#allocation9 + $0x274] ss:$24 sps:$4 sm:$0xff]  }
 0x684   : > { %v16148_v31 = vpop.eup %15265 }
 0x685   : > { %v9262_v25 = vmul.f32 1.442695, %v9261_v20  ;;  %v9056_v60 = vsel %vm8944_vm2, %v16148_v31, 0.0  ;;  %v14727_v20 = vld [vmem:[#allocation9 + $0x270] ss:$24 sps:$4 sm:$0xff]  }
 0x686   : > { %9057 = vadd.xlane.f32.xlu1 %v9056_v60 }
 0x687   : > { %15269 = vpow2.f32 %v9262_v25 }
 0x68a   : > { %v9364_v22 = vpop.xlane.xlu0 %9363 }
 0x68b   : > { %v9365_v8 = vsub.f32 %v9356_v37, %v9364_v22 }
 0x68c   : > { %v16152_v42 = vpop.eup %15267 }
 0x68d   : > { %v9366_v35 = vmul.f32 1.442695, %v9365_v8  ;;  %v9160_v32 = vsel %vm8944_vm2, %v16152_v42, 0.0  ;;  %v9062_v8 = vpack.c.bf16 %v16049_v14, %v16049_v14 }
 0x68e   : > { %9161 = vadd.xlane.f32.xlu0 %v9160_v32 }
 0x68f   : > { %15271 = vpow2.f32 %v9366_v35 }
 0x692   : > { %v9468_v50 = vpop.xlane.xlu1 %9467 }
 0x693   : > { %v9469_v4 = vsub.f32 %v9460_v28, %v9468_v50 }
 0x694   : > { %v16156_v34 = vpop.eup %15269 }
 0x695   : > { %v9470_v10 = vmul.f32 1.442695, %v9469_v4  ;;  %v9264_v9 = vsel %vm8944_vm2, %v16156_v34, 0.0  ;;  %v9067_v4 = vsel %vm8961_vm0, %v9062_v8, 0  ;;  %v14747_v8 = vld [vmem:[#allocation9 + $0x1e4] ss:$24 sps:$4 sm:$0xff]  }
 0x696   : > { %9265 = vadd.xlane.f32.xlu1 %v9264_v9  ;;  %v9166_v9 = vpack.c.bf16 %v16073_v46, %v16073_v46 }
 0x697   : > { %15273 = vpow2.f32 %v9470_v10 }
 0x69a   : > { %v9572_v36 = vpop.xlane.xlu0 %9571 }
 0x69b   : > { %v9573_v57 = vsub.f32 %v9564_v12, %v9572_v36  ;;  %v14679_v12 = vld [vmem:[#allocation9 + $0x150] ss:$24 sps:$4 sm:$0xff]  }
 0x69c   : > { %v16160_v38 = vpop.eup %15271  ;;  %12104 = vmatpush1.bf16.msra.mxu0 %v14679_v12 }
 0x69d   : > { %v9574_v59 = vmul.f32 1.442695, %v9573_v57  ;;  %v9368_v37 = vsel %vm8944_vm2, %v16160_v38, 0.0  ;;  %12105 = vmatprep.subr.bf16.mxu0 %v14684_v5  ;;  %v9171_v57 = vsel %vm8961_vm0, %v9166_v9, 0  ;;  %v14730_v9 = vld [vmem:[#allocation9 + $0x330] ss:$24 sps:$4 sm:$0xff]  }
 0x69e   : > { %9369 = vadd.xlane.f32.xlu0 %v9368_v37  ;;  %v9270_v37 = vpack.c.bf16 %v16079_v33, %v16079_v33 }
 0x69f   : > { %15275 = vpow2.f32 %v9574_v59 }
 0x6a0   : > { %12106 = vmatpush1.bf16.msra.mxu0 %v14682_v52  ;;  %v9483_v52 = vsel %vm8961_vm0, %v9478_v45, 0  ;;  %v14779_v45 = vld [vmem:[#allocation9 + $0x4b4] ss:$24 sps:$4 sm:$0xff]  }
 0x6a1   : > { %12107 = vmatprep.subr.bf16.mxu0 %v14687_v48 }
 0x6a2   : > { %v9676_v27 = vpop.xlane.xlu1 %9675 }
 0x6a3   : > { %v9677_v2 = vsub.f32 %v9668_v23, %v9676_v27  ;;  %v14685_v23 = vld [vmem:[#allocation9 + $0xf0] ss:$24 sps:$4 sm:$0xff]  }
 0x6a4   : > { %v16164_v61 = vpop.eup %15273  ;;  %12108 = vmatpush1.bf16.msra.mxu0 %v14685_v23  ;;  %v9582_v23 = vpack.c.bf16 %v16132_v18, %v16132_v18 }
 0x6a5   : > { %v9678_v44 = vmul.f32 1.442695, %v9677_v2  ;;  %v9472_v28 = vsel %vm8944_vm2, %v16164_v61, 0.0  ;;  %12109 = vmatprep.subr.bf16.mxu0 %v14690_v62  ;;  %v9275_v2 = vsel %vm8961_vm0, %v9270_v37, 0  ;;  %v14770_v37 = vld [vmem:[#allocation9 + $0x754] ss:$24 sps:$4 sm:$0xff]  }
 0x6a6   : > { %9473 = vadd.xlane.f32.xlu1 %v9472_v28  ;;  %v9374_v28 = vpack.c.bf16 %v16126_v51, %v16126_v51 }
 0x6a7   : > { %15277 = vpow2.f32 %v9678_v44 }
 0x6a8   : > { %12110 = vmatpush1.bf16.msra.mxu0 %v14688_v21  ;;  %v9587_v21 = vsel %vm8961_vm0, %v9582_v23, 0 }
 0x6a9   : > { %12111 = vmatprep.subr.bf16.mxu0 %v14693_v55 }
 0x6ac   : > { %v16168_v24 = vpop.eup %15275  ;;  %12112 = vmatpush1.bf16.msra.mxu0 %v14691_v1  ;;  %v9686_v1 = vpack.c.bf16 %v16134_v16, %v16134_v16  ;;  %v14700_v16 = vld [vmem:[#allocation9 + $0x420] ss:$24 sps:$4 sm:$0xff]  }
 0x6ad   : > { %v9576_v39 = vsel %vm8944_vm2, %v16168_v24, 0.0  ;;  %12113 = vmatprep.subr.bf16.mxu0 %v14699_v3  ;;  %v14696_v3 = vld [vmem:[#allocation9 + $0x454] ss:$24 sps:$4 sm:$0xff]  }
 0x6ae   : > { %9577 = vadd.xlane.f32.xlu0 %v9576_v39 }
 0x6b0   : > { %12114 = vmatpush1.bf16.msra.mxu0 %v14697_v53  ;;  %v9691_v53 = vsel %vm8961_vm0, %v9686_v1, 0 }
 0x6b1   : > { %12115 = vmatprep.subr.bf16.mxu0 %v14705_v43 }
 0x6b4   : > { %v16172_v56 = vpop.eup %15277  ;;  %12116 = vmatpush1.bf16.msra.mxu0 %v14703_v13 }
 0x6b5   : > { %v9680_v41 = vsel %vm8944_vm2, %v16172_v56, 0.0  ;;  %12117 = vmatprep.subr.bf16.mxu0 %v14711_v17  ;;  %v14694_v17 = vld [vmem:[#allocation9 + $0x450] ss:$24 sps:$4 sm:$0xff]  }
 0x6b6   : > { %9681 = vadd.xlane.f32.xlu1 %v9680_v41  ;;  %v9379_v41 = vsel %vm8961_vm0, %v9374_v28, 0  ;;  %v14762_v28 = vld [vmem:[#allocation9 + $0x544] ss:$24 sps:$4 sm:$0xff]  }
 0x6b8   : > { %12118 = vmatpush1.bf16.msra.mxu0 %v14709_v6 }
 0x6b9   : > { %12119 = vmatprep.subr.bf16.mxu0 %v14717_v19  ;;  %v14702_v19 = vld [vmem:[#allocation9 + $0x424] ss:$24 sps:$4 sm:$0xff]  }
 0x6bc   : > { %12120 = vmatpush2.bf16.msra.mxu0 %v14715_v0  ;;  %v14706_v0 = vld [vmem:[#allocation9 + $0x3f0] ss:$24 sps:$4 sm:$0xff]  }
 0x6bd   : > { %12121 = vmatprep.subr.bf16.mxu0 %v14723_v26  ;;  %v14714_v26 = vld [vmem:[#allocation9 + $0x3c4] ss:$24 sps:$4 sm:$0xff]  }
 0x6c0   : > { %12122 = vmatpush2.bf16.msra.mxu0 %v14721_v29  ;;  %v14735_v29 = vld [vmem:[#allocation9 + $0x244] ss:$24 sps:$4 sm:$0xff]  }
 0x6c1   : > { %12123 = vmatprep.subr.bf16.mxu0 %v14729_v47  ;;  %v14733_v47 = vld [vmem:[#allocation9 + $0x240] ss:$24 sps:$4 sm:$0xff]  }
 0x6c4   : > { %12124 = vmatpush2.bf16.msra.mxu0 %v14727_v20  ;;  %v14720_v20 = vld [vmem:[#allocation9 + $0x394] ss:$24 sps:$4 sm:$0xff]  }
 0x6c5   : > { %12125 = vmatprep.subr.bf16.mxu0 %v14735_v29 }
 0x6c8   : > { %12126 = vmatpush2.bf16.msra.mxu0 %v14733_v47 }
 0x707   : > { %v8953_v25 = vpop.xlane.xlu0 %8952 }
 0x708   : > { %15279 = vrcp.f32 %v8953_v25  ;;  %v14741_v25 = vld [vmem:[#allocation9 + $0x214] ss:$24 sps:$4 sm:$0xff]  }
 0x709   : > { %12127 = vmatprep.subr.bf16.mxu0 %v14741_v25 }
 0x70f   : > { %v9058_v60 = vpop.xlane.xlu1 %9057 }
 0x710   : > { %15281 = vrcp.f32 %v9058_v60  ;;  %v14718_v60 = vld [vmem:[#allocation9 + $0x390] ss:$24 sps:$4 sm:$0xff]  }
 0x715   : > { %v15280_v22 = vpop.eup %15279 }
 0x716   : > { %v8955_v35 = vmul.f32 %v15280_v22, %v16144_v49  ;;  %v14726_v22 = vld [vmem:[#allocation9 + $0x364] ss:$24 sps:$4 sm:$0xff]  }
 0x717   : > { %v9162_v32 = vpop.xlane.xlu0 %9161 }
 0x718   : > { %15283 = vrcp.f32 %v9162_v32  ;;  %v8956_v50 = vpack.c.bf16 %v8955_v35, %v8955_v35  ;;  %v14724_v35 = vld [vmem:[#allocation9 + $0x360] ss:$24 sps:$4 sm:$0xff]  }
 0x719   : > { %v14745_v32 = vld [vmem:[#allocation9 + $0x1e0] ss:$24 sps:$4 sm:$0xff]  }
 0x71a   : > { %14475 = vmatmul.mubr.msk.bf16.vlgmr.msra.gmra.mxu1 %vm8944_vm2, %v8956_v50  ;;  %v14732_v50 = vld [vmem:[#allocation9 + $0x334] ss:$24 sps:$4 sm:$0xff]  }
 0x71b   : > { %14485 = vmatpush3.bf16.msra.mxu1 %v9067_v4  ;;  %14486 = vmatprep.mubr.msk.bf16.mxu1 %vm15580_vm1, %v15579_v40  ;;  %v14751_v4 = vld [vmem:[#allocation9 + $0x1b0] ss:$24 sps:$4 sm:$0xff]  }
 0x71c   : > { %14496 = vmatprep.subr.bf16.mxu1 %v15579_v40 }
 0x71d   : > { %v15282_v10 = vpop.eup %15281 }
 0x71e   : > { %v9060_v14 = vmul.f32 %v15282_v10, %v16148_v31  ;;  %v14753_v10 = vld [vmem:[#allocation9 + $0x1b4] ss:$24 sps:$4 sm:$0xff]  }
 0x71f   : > { %v9266_v49 = vpop.xlane.xlu1 %9265 }
 0x720   : > { %15285 = vrcp.f32 %v9266_v49  ;;  %v9061_v36 = vpack.c.bf16 %v9060_v14, %v9060_v14  ;;  %v14738_v14 = vld [vmem:[#allocation9 + $0x304] ss:$24 sps:$4 sm:$0xff]  }
 0x721   : > { %v14759_v49 = vld [vmem:[#allocation9 + $0x184] ss:$24 sps:$4 sm:$0xff]  }
 0x722   : > { %14487 = vmatmul.mubr.msk.bf16.vlgmr.msra.gmra.mxu1 %vm8944_vm2, %v9061_v36  ;;  %v14736_v36 = vld [vmem:[#allocation9 + $0x300] ss:$24 sps:$4 sm:$0xff]  }
 0x723   : > { %14497 = vmatpush3.bf16.msra.mxu1 %v9171_v57  ;;  %14498 = vmatprep.mubr.msk.bf16.mxu1 %vm15580_vm1, %v15579_v40  ;;  %v14757_v57 = vld [vmem:[#allocation9 + $0x180] ss:$24 sps:$4 sm:$0xff]  }
 0x724   : > { %14508 = vmatprep.subr.bf16.mxu1 %v15579_v40 }
 0x725   : > { %v15284_v59 = vpop.eup %15283 }
 0x726   : > { %v9164_v46 = vmul.f32 %v15284_v59, %v16152_v42  ;;  %v14744_v59 = vld [vmem:[#allocation9 + $0x5d4] ss:$24 sps:$4 sm:$0xff]  }
 0x727   : > { %v9370_v31 = vpop.xlane.xlu0 %9369 }
 0x728   : > { %15287 = vrcp.f32 %v9370_v31  ;;  %v9165_v27 = vpack.c.bf16 %v9164_v46, %v9164_v46  ;;  %v14742_v46 = vld [vmem:[#allocation9 + $0x5d0] ss:$24 sps:$4 sm:$0xff]   ;;  %v14750_v31 = vld [vmem:[#allocation9 + $0x5a4] ss:$24 sps:$4 sm:$0xff]  }
 0x72a   : > { %14499 = vmatmul.mubr.msk.bf16.vlgmr.msra.gmra.mxu1 %vm8944_vm2, %v9165_v27  ;;  %v14748_v27 = vld [vmem:[#allocation9 + $0x5a0] ss:$24 sps:$4 sm:$0xff]  }
 0x72b   : > { %14509 = vmatpush3.bf16.msra.mxu1 %v9275_v2  ;;  %14510 = vmatprep.mubr.msk.bf16.mxu1 %vm15580_vm1, %v15579_v40  ;;  %v14756_v2 = vld [vmem:[#allocation9 + $0x574] ss:$24 sps:$4 sm:$0xff]  }
 0x72c   : > { %14520 = vmatprep.subr.bf16.mxu1 %v15579_v40 }
 0x72d   : > { %v15286_v44 = vpop.eup %15285 }
 0x72e   : > { %v9268_v33 = vmul.f32 %v15286_v44, %v16156_v34  ;;  %v14754_v44 = vld [vmem:[#allocation9 + $0x570] ss:$24 sps:$4 sm:$0xff]  }
 0x72f   : > { %v9474_v42 = vpop.xlane.xlu1 %9473 }
 0x730   : > { %15289 = vrcp.f32 %v9474_v42  ;;  %v9269_v39 = vpack.c.bf16 %v9268_v33, %v9268_v33  ;;  %v14760_v33 = vld [vmem:[#allocation9 + $0x540] ss:$24 sps:$4 sm:$0xff]   ;;  %v14767_v42 = vld [vmem:[#allocation9 + $0x514] ss:$24 sps:$4 sm:$0xff]  }
 0x732   : > { %14511 = vmatmul.mubr.msk.bf16.vlgmr.msra.gmra.mxu1 %vm8944_vm2, %v9269_v39  ;;  %v14765_v39 = vld [vmem:[#allocation9 + $0x510] ss:$24 sps:$4 sm:$0xff]  }
 0x733   : > { %14521 = vmatpush3.bf16.msra.mxu1 %v9379_v41  ;;  %14522 = vmatprep.mubr.msk.bf16.mxu1 %vm15580_vm1, %v15579_v40  ;;  %v14773_v41 = vld [vmem:[#allocation9 + $0x4e4] ss:$24 sps:$4 sm:$0xff]  }
 0x734   : > { %14532 = vmatprep.subr.bf16.mxu1 %v15579_v40 }
 0x735   : > { %v15288_v12 = vpop.eup %15287 }
 0x736   : > { %v9372_v51 = vmul.f32 %v15288_v12, %v16160_v38  ;;  %v14771_v12 = vld [vmem:[#allocation9 + $0x4e0] ss:$24 sps:$4 sm:$0xff]  }
 0x737   : > { %v9578_v34 = vpop.xlane.xlu0 %9577 }
 0x738   : > { %15291 = vrcp.f32 %v9578_v34  ;;  %v9373_v5 = vpack.c.bf16 %v9372_v51, %v9372_v51  ;;  %v14777_v51 = vld [vmem:[#allocation9 + $0x4b0] ss:$24 sps:$4 sm:$0xff]   ;;  %v14785_v34 = vld [vmem:[#allocation9 + $0x484] ss:$24 sps:$4 sm:$0xff]  }
 0x73a   : > { %14523 = vmatmul.mubr.msk.bf16.vlgmr.msra.gmra.mxu1 %vm8944_vm2, %v9373_v5  ;;  %v14783_v5 = vld [vmem:[#allocation9 + $0x480] ss:$24 sps:$4 sm:$0xff]  }
 0x73b   : > { %14533 = vmatpush3.bf16.msra.mxu1 %v9483_v52  ;;  %14534 = vmatprep.mubr.msk.bf16.mxu1 %vm15580_vm1, %v15579_v40  ;;  %v14796_v52 = vld [vmem:[#allocation9 + $0xa54] ss:$24 sps:$4 sm:$0xff]  }
 0x73c   : > { %14544 = vmatprep.subr.bf16.mxu1 %v15579_v40 }
 0x73d   : > { %v15290_v48 = vpop.eup %15289 }
 0x73e   : > { %v9476_v58 = vmul.f32 %v15290_v48, %v16164_v61 }
 0x73f   : > { %v9682_v38 = vpop.xlane.xlu1 %9681 }
 0x740   : > { %15293 = vrcp.f32 %v9682_v38  ;;  %v9477_v62 = vpack.c.bf16 %v9476_v58, %v9476_v58 }
 0x742   : > { %14535 = vmatmul.mubr.msk.bf16.vlgmr.msra.gmra.mxu1 %vm8944_vm2, %v9477_v62 }
 0x743   : > { %14545 = vmatpush3.bf16.msra.mxu1 %v9587_v21  ;;  %14546 = vmatprep.mubr.msk.bf16.mxu1 %vm15580_vm1, %v15579_v40 }
 0x744   : > { %14556 = vmatprep.subr.bf16.mxu1 %v15579_v40 }
 0x745   : > { %v15292_v55 = vpop.eup %15291 }
 0x746   : > { %v9580_v18 = vmul.f32 %v15292_v55, %v16168_v24  ;;  %v14708_v24 = vld [vmem:[#allocation9 + $0x3f4] ss:$24 sps:$4 sm:$0xff]  }
 0x748   : > { %v9581_v61 = vpack.c.bf16 %v9580_v18, %v9580_v18 }
 0x74a   : > { %14547 = vmatmul.mubr.msk.bf16.vlgmr.msra.gmra.mxu1 %vm8944_vm2, %v9581_v61 }
 0x74b   : > { %14557 = vmatpush3.bf16.msra.mxu1 %v9691_v53  ;;  %14558 = vmatprep.mubr.msk.bf16.mxu1 %vm15580_vm1, %v15579_v40  ;;  %v14712_v40 = vld [vmem:[#allocation9 + $0x3c0] ss:$24 sps:$4 sm:$0xff]  }
 0x74c   : > { %12144 = vmatprep.subr.bf16.mxu1 %v14696_v3 }
 0x74d   : > { %v15294_v43 = vpop.eup %15293 }
 0x74e   : > { %v9684_v13 = vmul.f32 %v15294_v43, %v16172_v56  ;;  %v14739_v56 = vld [vmem:[#allocation9 + $0x210] ss:$24 sps:$4 sm:$0xff]  }
 0x74f   : > { %12128 = vmatpush2.bf16.msra.mxu0 %v14739_v56  ;;  %v14780_v56 = vld [vmem:[#allocation9 + $0x6f0] ss:$24 sps:$4 sm:$0xff]  }
 0x750   : > { %v9685_v6 = vpack.c.bf16 %v9684_v13, %v9684_v13  ;;  %12129 = vmatprep.subr.bf16.mxu0 %v14747_v8  ;;  %v14786_v8 = vld [vmem:[#allocation9 + $0x6c0] ss:$24 sps:$4 sm:$0xff]  }
 0x752   : > { %14559 = vmatmul.mubr.msk.bf16.vlgmr.msra.gmra.mxu1 %vm8944_vm2, %v9685_v6 }
 0x753   : > { %12145 = vmatpush1.bf16.msra.mxu1 %v14694_v17  ;;  %12130 = vmatpush2.bf16.msra.mxu0 %v14745_v32  ;;  %v14793_v32 = vld [vmem:[#allocation9 + $0x694] ss:$24 sps:$4 sm:$0xff]  }
 0x754   : > { %12146 = vmatprep.subr.bf16.mxu1 %v14702_v19  ;;  %12131 = vmatprep.subr.bf16.mxu0 %v14753_v10  ;;  %v14768_v19 = vld [vmem:[#allocation9 + $0x750] ss:$24 sps:$4 sm:$0xff]  }
 0x757   : > { %12147 = vmatpush1.bf16.msra.mxu1 %v14700_v16  ;;  %12132 = vmatpush2.bf16.msra.mxu0 %v14751_v4 }
 0x758   : > { %12148 = vmatprep.subr.bf16.mxu1 %v14708_v24  ;;  %12133 = vmatprep.subr.bf16.mxu0 %v14759_v49  ;;  %v14776_v24 = vld [vmem:[#allocation9 + $0x724] ss:$24 sps:$4 sm:$0xff]   ;;  %v14791_v49 = vld [vmem:[#allocation9 + $0x690] ss:$24 sps:$4 sm:$0xff]  }
 0x75b   : > { %12149 = vmatpush1.bf16.msra.mxu1 %v14706_v0  ;;  %12134 = vmatpush2.bf16.msra.mxu0 %v14757_v57 }
 0x75c   : > { %12150 = vmatprep.subr.bf16.mxu1 %v14714_v26  ;;  %12185 = vmatprep.subr.bf16.mxu0 %v14770_v37  ;;  %v14774_v26 = vld [vmem:[#allocation9 + $0x720] ss:$24 sps:$4 sm:$0xff]   ;;  %v14802_v37 = vld [vmem:[#allocation9 + $0xa24] ss:$24 sps:$4 sm:$0xff]  }
 0x75f   : > { %12151 = vmatpush1.bf16.msra.mxu1 %v14712_v40  ;;  %v14782_v40 = vld [vmem:[#allocation9 + $0x6f4] ss:$24 sps:$4 sm:$0xff]  }
 0x760   : > { %12152 = vmatprep.subr.bf16.mxu1 %v14720_v20 }
 0x763   : > { %12153 = vmatpush1.bf16.msra.mxu1 %v14718_v60  ;;  %v14788_v60 = vld [vmem:[#allocation9 + $0x6c4] ss:$24 sps:$4 sm:$0xff]  }
 0x764   : > { %12154 = vmatprep.subr.bf16.mxu1 %v14726_v22 }
 0x767   : > { %12155 = vmatpush1.bf16.msra.mxu1 %v14724_v35 }
 0x768   : > { %12156 = vmatprep.subr.bf16.mxu1 %v14732_v50 }
 0x76b   : > { %12157 = vmatpush1.bf16.msra.mxu1 %v14730_v9 }
 0x76c   : > { %12158 = vmatprep.subr.bf16.mxu1 %v14738_v14 }
 0x76f   : > { %12159 = vmatpush1.bf16.msra.mxu1 %v14736_v36  ;;  %v14794_v36 = vld [vmem:[#allocation9 + $0xa50] ss:$24 sps:$4 sm:$0xff]  }
 0x770   : > { %12160 = vmatprep.subr.bf16.mxu1 %v14744_v59  ;;  %v14799_v59 = vld [vmem:[#allocation9 + $0x664] ss:$24 sps:$4 sm:$0xff]  }
 0x773   : > { %12161 = vmatpush2.bf16.msra.mxu1 %v14742_v46 }
 0x774   : > { %12162 = vmatprep.subr.bf16.mxu1 %v14750_v31  ;;  %v14797_v31 = vld [vmem:[#allocation9 + $0x660] ss:$24 sps:$4 sm:$0xff]  }
 0x777   : > { %12163 = vmatpush2.bf16.msra.mxu1 %v14748_v27  ;;  %v14800_v27 = vld [vmem:[#allocation9 + $0xa20] ss:$24 sps:$4 sm:$0xff]  }
 0x778   : > { %12164 = vmatprep.subr.bf16.mxu1 %v14756_v2 }
 0x77b   : > { %12165 = vmatpush2.bf16.msra.mxu1 %v14754_v44  ;;  %v14805_v44 = vld [vmem:[#allocation9 + $0x634] ss:$24 sps:$4 sm:$0xff]  }
 0x77c   : > { %12166 = vmatprep.subr.bf16.mxu1 %v14762_v28  ;;  %v14808_v28 = vld [vmem:[#allocation9 + $0x9f4] ss:$24 sps:$4 sm:$0xff]  }
 0x77f   : > { %12167 = vmatpush2.bf16.msra.mxu1 %v14760_v33 }
 0x780   : > { %12168 = vmatprep.subr.bf16.mxu1 %v14767_v42 }
 0x783   : > { %12169 = vmatpush2.bf16.msra.mxu1 %v14765_v39  ;;  %v14803_v39 = vld [vmem:[#allocation9 + $0x630] ss:$24 sps:$4 sm:$0xff]  }
 0x784   : > { %12170 = vmatprep.subr.bf16.mxu1 %v14773_v41  ;;  %v14806_v41 = vld [vmem:[#allocation9 + $0x9f0] ss:$24 sps:$4 sm:$0xff]  }
 0x787   : > { %12171 = vmatpush2.bf16.msra.mxu1 %v14771_v12 }
 0x788   : > { %12172 = vmatprep.subr.bf16.mxu1 %v14779_v45  ;;  %v14811_v45 = vld [vmem:[#allocation9 + $0x604] ss:$24 sps:$4 sm:$0xff]  }
 0x78b   : > { %12173 = vmatpush2.bf16.msra.mxu1 %v14777_v51  ;;  %v14814_v51 = vld [vmem:[#allocation9 + $0x9c4] ss:$24 sps:$4 sm:$0xff]  }
 0x78c   : > { %12174 = vmatprep.subr.bf16.mxu1 %v14785_v34 }
 0x78f   : > { %12175 = vmatpush2.bf16.msra.mxu1 %v14783_v5  ;;  %v14809_v5 = vld [vmem:[#allocation9 + $0x600] ss:$24 sps:$4 sm:$0xff]  }
 0x790   : > { %12226 = vmatprep.subr.bf16.mxu1 %v14796_v52  ;;  %v14812_v52 = vld [vmem:[#allocation9 + $0x9c0] ss:$24 sps:$4 sm:$0xff]  }
 0x7da   : > { %v8999_v48 = vpop.f32.mrf.mxu1 }
 0x7db   : > { %v9005_v23 = vpack.c.bf16 %v8999_v48, %v8999_v48 }
 0x7dc   : > { %v14476_v58 = vpop.f32.mrf.mxu1 }
 0x7dd   : > { %9006 = vst [vmem:[#allocation2] sm:$0xf] %v9005_v23  ;;  %v14817_v23 = vld [vmem:[#allocation9 + $0x8d4] ss:$24 sps:$4 sm:$0xff]  }
 0x7de   : > { %v9002_v38 = vpop.f32.mrf.mxu1  ;;  %v14822_v58 = vld [vmem:[#allocation9 + $0x994] ss:$24 sps:$4 sm:$0xff]  }
 0x7e0   : > { %v14477_v62 = vpop.f32.mrf.mxu1 }
 0x7e2   : > { %v9103_v21 = vpop.f32.mrf.mxu1 }
 0x7e3   : > { %v9109_v55 = vpack.c.bf16 %v9103_v21, %v9103_v21 }
 0x7e4   : > { %v14488_v1 = vpop.f32.mrf.mxu1 }
 0x7e5   : > { %9110 = vst [vmem:[#allocation2 + $0x4] sm:$0xf] %v9109_v55  ;;  %v14815_v55 = vld [vmem:[#allocation9 + $0x8d0] ss:$24 sps:$4 sm:$0xff]  }
 0x7e6   : > { %v9106_v18 = vpop.f32.mrf.mxu1 }
 0x7e7   : > { %v14820_v18 = vld [vmem:[#allocation9 + $0x990] ss:$24 sps:$4 sm:$0xff]  }
 0x7e8   : > { %v14489_v61 = vpop.f32.mrf.mxu1 }
 0x7ea   : > { %v9207_v3 = vpop.f32.mrf.mxu1 }
 0x7eb   : > { %v9213_v53 = vpack.c.bf16 %v9207_v3, %v9207_v3  ;;  %v14825_v3 = vld [vmem:[#allocation9 + $0x8a4] ss:$24 sps:$4 sm:$0xff]  }
 0x7ec   : > { %v14500_v43 = vpop.f32.mrf.mxu1  ;;  %v9735_v13 = vld [vmem:[#allocation2] sm:$0xff] }
 0x7ed   : > { %9214 = vst [vmem:[#allocation2 + $0x8] sm:$0xf] %v9213_v53  ;;  %v16233_v17 = vcombine.low %v9735_v13, %v9735_v13  ;;  %v16235_v6 = vcombine.high %v9735_v13, %v9735_v13  ;;  %v14828_v53 = vld [vmem:[#allocation9 + $0x964] ss:$24 sps:$4 sm:$0xff]   ;;  %v14823_v13 = vld [vmem:[#allocation9 + $0x8a0] ss:$24 sps:$4 sm:$0xff]  }
 0x7ee   : > { %v9210_v16 = vpop.f32.mrf.mxu1 }
 0x7ef   : > { %12135 = vmatprep.mubr.bf16.mxu0 %v16235_v6 }
 0x7f0   : > { %v14501_v0 = vpop.f32.mrf.mxu1  ;;  %12136 = vmatmul.mubr.bf16.vlgmr.msra.gmra.mxu0 %v16233_v17 }
 0x7f1   : > { %12186 = vmatpush1.bf16.msra.mxu0 %v14768_v19  ;;  %v14826_v19 = vld [vmem:[#allocation9 + $0x960] ss:$24 sps:$4 sm:$0xff]   ;;  %v14834_v0 = vld [vmem:[#allocation9 + $0x934] ss:$24 sps:$4 sm:$0xff]  }
 0x7f2   : > { %v9311_v29 = vpop.f32.mrf.mxu1  ;;  %12187 = vmatprep.subr.bf16.mxu0 %v14776_v24  ;;  %v14831_v24 = vld [vmem:[#allocation9 + $0x874] ss:$24 sps:$4 sm:$0xff]  }
 0x7f3   : > { %v9317_v47 = vpack.c.bf16 %v9311_v29, %v9311_v29 }
 0x7f4   : > { %v14512_v20 = vpop.f32.mrf.mxu1 }
 0x7f5   : > { %9318 = vst [vmem:[#allocation2 + $0xc] sm:$0xf] %v9317_v47  ;;  %12188 = vmatpush1.bf16.msra.mxu0 %v14774_v26  ;;  %v14832_v47 = vld [vmem:[#allocation9 + $0x930] ss:$24 sps:$4 sm:$0xff]  }
 0x7f6   : > { %v9314_v25 = vpop.f32.mrf.mxu1  ;;  %12189 = vmatprep.subr.bf16.mxu0 %v14782_v40  ;;  %v14829_v40 = vld [vmem:[#allocation9 + $0x870] ss:$24 sps:$4 sm:$0xff]  }
 0x7f7   : > { %v14840_v25 = vld [vmem:[#allocation9 + $0x904] ss:$24 sps:$4 sm:$0xff]  }
 0x7f8   : > { %v14513_v22 = vpop.f32.mrf.mxu1 }
 0x7f9   : > { %12190 = vmatpush1.bf16.msra.mxu0 %v14780_v56  ;;  %v14837_v56 = vld [vmem:[#allocation9 + $0x844] ss:$24 sps:$4 sm:$0xff]   ;;  %v14835_v22 = vld [vmem:[#allocation9 + $0x840] ss:$24 sps:$4 sm:$0xff]  }
 0x7fa   : > { %v9415_v35 = vpop.f32.mrf.mxu1  ;;  %12191 = vmatprep.subr.bf16.mxu0 %v14788_v60 }
 0x7fb   : > { %v9421_v50 = vpack.c.bf16 %v9415_v35, %v9415_v35  ;;  %v14843_v35 = vld [vmem:[#allocation9 + $0x814] ss:$24 sps:$4 sm:$0xff]  }
 0x7fc   : > { %v14524_v4 = vpop.f32.mrf.mxu1  ;;  %v9736_v10 = vld [vmem:[#allocation2 + $0x8] sm:$0xff] }
 0x7fd   : > { %9422 = vst [vmem:[#allocation2 + $0x10] sm:$0xf] %v9421_v50  ;;  %12192 = vmatpush1.bf16.msra.mxu0 %v14786_v8  ;;  %v16239_v9 = vcombine.low %v9736_v10, %v9736_v10  ;;  %v16241_v14 = vcombine.high %v9736_v10, %v9736_v10  ;;  %v14838_v8 = vld [vmem:[#allocation9 + $0x900] ss:$24 sps:$4 sm:$0xff]   ;;  %v14841_v4 = vld [vmem:[#allocation9 + $0x810] ss:$24 sps:$4 sm:$0xff]  }
 0x7fe   : > { %v9418_v57 = vpop.f32.mrf.mxu1  ;;  %12193 = vmatprep.subr.bf16.mxu0 %v14793_v32  ;;  %v14846_v32 = vld [vmem:[#allocation9 + $0xbd4] ss:$24 sps:$4 sm:$0xff]   ;;  %v14844_v10 = vld [vmem:[#allocation9 + $0xbd0] ss:$24 sps:$4 sm:$0xff]  }
 0x7ff   : > { %12176 = vmatprep.mubr.bf16.mxu1 %v16241_v14  ;;  %v14854_v57 = vld [vmem:[#allocation9 + $0xba4] ss:$24 sps:$4 sm:$0xff]  }
 0x800   : > { %v14525_v46 = vpop.f32.mrf.mxu1  ;;  %12177 = vmatmul.mubr.bf16.vlgmr.msra.gmra.mxu1 %v16239_v9 }
 0x801   : > { %12194 = vmatpush1.bf16.msra.mxu0 %v14791_v49  ;;  %12227 = vmatpush1.bf16.msra.mxu1 %v14794_v36  ;;  %v14851_v36 = vld [vmem:[#allocation9 + $0x7e4] ss:$24 sps:$4 sm:$0xff]   ;;  %v14857_v46 = vld [vmem:[#allocation9 + $0x7b4] ss:$24 sps:$4 sm:$0xff]  }
 0x802   : > { %v9519_v2 = vpop.f32.mrf.mxu1  ;;  %12195 = vmatprep.subr.bf16.mxu0 %v14799_v59  ;;  %12228 = vmatprep.subr.bf16.mxu1 %v14802_v37  ;;  %v14849_v59 = vld [vmem:[#allocation9 + $0x7e0] ss:$24 sps:$4 sm:$0xff]  }
 0x803   : > { %v9525_v33 = vpack.c.bf16 %v9519_v2, %v9519_v2  ;;  %v14852_v37 = vld [vmem:[#allocation9 + $0xba0] ss:$24 sps:$4 sm:$0xff]   ;;  %v14858_v2 = vld [vmem:[#allocation9 + $0xb70] ss:$24 sps:$4 sm:$0xff]  }
 0x804   : > { %v14536_v42 = vpop.f32.mrf.mxu1 }
 0x805   : > { %9526 = vst [vmem:[#allocation2 + $0x14] sm:$0xf] %v9525_v33  ;;  %12196 = vmatpush1.bf16.msra.mxu0 %v14797_v31  ;;  %12229 = vmatpush1.bf16.msra.mxu1 %v14800_v27  ;;  %v14860_v31 = vld [vmem:[#allocation9 + $0xb74] ss:$24 sps:$4 sm:$0xff]   ;;  %v14855_v27 = vld [vmem:[#allocation9 + $0x7b0] ss:$24 sps:$4 sm:$0xff]  }
 0x806   : > { %v9522_v12 = vpop.f32.mrf.mxu1  ;;  %12197 = vmatprep.subr.bf16.mxu0 %v14805_v44  ;;  %12230 = vmatprep.subr.bf16.mxu1 %v14808_v28  ;;  %v14863_v44 = vld [vmem:[#allocation9 + $0x784] ss:$24 sps:$4 sm:$0xff]   ;;  %v14861_v33 = vld [vmem:[#allocation9 + $0x780] ss:$24 sps:$4 sm:$0xff]  }
 0x807   : > { %v14866_v28 = vld [vmem:[#allocation9 + $0xb44] ss:$24 sps:$4 sm:$0xff]   ;;  %v14864_v42 = vld [vmem:[#allocation9 + $0xb40] ss:$24 sps:$4 sm:$0xff]   ;;  %v14867_v12 = vld [vmem:[#allocation9 + $0xb10] ss:$24 sps:$4 sm:$0xff]  }
 0x808   : > { %v14537_v34 = vpop.f32.mrf.mxu1 }
 0x809   : > { %12198 = vmatpush1.bf16.msra.mxu0 %v14803_v39  ;;  %12231 = vmatpush1.bf16.msra.mxu1 %v14806_v41  ;;  %v14869_v39 = vld [vmem:[#allocation9 + $0xb14] ss:$24 sps:$4 sm:$0xff]   ;;  %v14875_v34 = vld [vmem:[#allocation9 + $0xae4] ss:$24 sps:$4 sm:$0xff]  }
 0x80a   : > { %v9623_v48 = vpop.f32.mrf.mxu1  ;;  %12199 = vmatprep.subr.bf16.mxu0 %v14811_v45  ;;  %12232 = vmatprep.subr.bf16.mxu1 %v14814_v51  ;;  %v14872_v41 = vld [vmem:[#allocation9 + $0x15c] ss:$24 sps:$4 sm:$0xff]   ;;  %v14870_v45 = vld [vmem:[#allocation9 + $0x158] ss:$24 sps:$4 sm:$0xff]  }
 0x80b   : > { %v9629_v38 = vpack.c.bf16 %v9623_v48, %v9623_v48  ;;  %v14876_v48 = vld [vmem:[#allocation9 + $0x128] ss:$24 sps:$4 sm:$0xff]  }
 0x80c   : > { %v14548_v62 = vpop.f32.mrf.mxu1  ;;  %v16245_v21 = vld [vmem:[#allocation2 + $0x10] sm:$0xff] }
 0x80d   : > { %9630 = vst [vmem:[#allocation2 + $0x18] sm:$0xf] %v9629_v38  ;;  %12200 = vmatpush1.bf16.msra.mxu0 %v14809_v5  ;;  %12233 = vmatpush1.bf16.msra.mxu1 %v14812_v52  ;;  %v16249_v1 = vcombine.high %v16245_v21, %v16245_v21  ;;  %v16261_v51 = vcombine.low %v16245_v21, %v16245_v21  ;;  %v14878_v5 = vld [vmem:[#allocation9 + $0x12c] ss:$24 sps:$4 sm:$0xff]   ;;  %v14873_v52 = vld [vmem:[#allocation9 + $0xae0] ss:$24 sps:$4 sm:$0xff]  }
 0x80e   : > { %v9626_v61 = vpop.f32.mrf.mxu1  ;;  %12201 = vmatprep.subr.bf16.mxu0 %v14817_v23  ;;  %12234 = vmatprep.subr.bf16.mxu1 %v14822_v58  ;;  %v14881_v23 = vld [vmem:[#allocation9 + $0xab4] ss:$24 sps:$4 sm:$0xff]   ;;  %v14879_v38 = vld [vmem:[#allocation9 + $0xab0] ss:$24 sps:$4 sm:$0xff]   ;;  %v14887_v21 = vld [vmem:[#allocation9 + $0xa84] ss:$24 sps:$4 sm:$0xff]  }
 0x80f   : > { %12217 = vmatprep.mubr.bf16.mxu0 %v16249_v1  ;;  %v14884_v58 = vld [vmem:[#allocation9 + $0xfc] ss:$24 sps:$4 sm:$0xff]   ;;  %v14882_v62 = vld [vmem:[#allocation9 + $0xf8] ss:$24 sps:$4 sm:$0xff]   ;;  %v14888_v61 = vld [vmem:[#allocation9 + $0xc8] ss:$24 sps:$4 sm:$0xff]  }
 0x810   : > { %v14549_v43 = vpop.f32.mrf.mxu1 }
 0x811   : > { %12202 = vmatpush2.bf16.msra.mxu0 %v14815_v55  ;;  %12235 = vmatpush1.bf16.msra.mxu1 %v14820_v18  ;;  %v14890_v55 = vld [vmem:[#allocation9 + $0xcc] ss:$24 sps:$4 sm:$0xff]   ;;  %v14885_v18 = vld [vmem:[#allocation9 + $0xa80] ss:$24 sps:$4 sm:$0xff]  }
 0x812   : > { %v9727_v16 = vpop.f32.mrf.mxu1  ;;  %12203 = vmatprep.subr.bf16.mxu0 %v14825_v3  ;;  %12236 = vmatprep.subr.bf16.mxu1 %v14828_v53  ;;  %v14893_v3 = vld [vmem:[#allocation9 + $0x9c] ss:$24 sps:$4 sm:$0xff]   ;;  %v14891_v43 = vld [vmem:[#allocation9 + $0x98] ss:$24 sps:$4 sm:$0xff]  }
 0x813   : > { %v9733_v26 = vpack.c.bf16 %v9727_v16, %v9727_v16  ;;  %v14896_v53 = vld [vmem:[#allocation9 + $0x45c] ss:$24 sps:$4 sm:$0xff]   ;;  %v14899_v16 = vld [vmem:[#allocation9 + $0x6c] ss:$24 sps:$4 sm:$0xff]  }
 0x814   : > { %v14560_v29 = vpop.f32.mrf.mxu1 }
 0x815   : > { %9734 = vst [vmem:[#allocation2 + $0x1c] sm:$0xf] %v9733_v26  ;;  %12204 = vmatpush2.bf16.msra.mxu0 %v14823_v13  ;;  %12237 = vmatpush1.bf16.msra.mxu1 %v14826_v19  ;;  %v14894_v13 = vld [vmem:[#allocation9 + $0x458] ss:$24 sps:$4 sm:$0xff]   ;;  %v14900_v26 = vld [vmem:[#allocation9 + $0x428] ss:$24 sps:$4 sm:$0xff]  }
 0x816   : > { %v9730_v20 = vpop.f32.mrf.mxu1  ;;  %12205 = vmatprep.subr.bf16.mxu0 %v14831_v24  ;;  %12238 = vmatprep.subr.bf16.mxu1 %v14834_v0  ;;  %v14902_v24 = vld [vmem:[#allocation9 + $0x42c] ss:$24 sps:$4 sm:$0xff]   ;;  %v14897_v0 = vld [vmem:[#allocation9 + $0x68] ss:$24 sps:$4 sm:$0xff]   ;;  %v14905_v29 = vld [vmem:[#allocation9 + $0x3c] ss:$24 sps:$4 sm:$0xff]  }
 0x817   : > { %v14906_v20 = vld [vmem:[#allocation9 + $0x3f8] ss:$24 sps:$4 sm:$0xff]  }
 0x818   : > { %v14561_v60 = vpop.f32.mrf.mxu1 }
 0x819   : > { %12206 = vmatpush2.bf16.msra.mxu0 %v14829_v40  ;;  %12239 = vmatpush1.bf16.msra.mxu1 %v14832_v47  ;;  %v14908_v40 = vld [vmem:[#allocation9 + $0x3fc] ss:$24 sps:$4 sm:$0xff]   ;;  %v14903_v47 = vld [vmem:[#allocation9 + $0x38] ss:$24 sps:$4 sm:$0xff]   ;;  %v14909_v60 = vld [vmem:[#allocation9 + $0x8] ss:$24 sps:$4 sm:$0xff]  }
 0x81a   : > { %12207 = vmatprep.subr.bf16.mxu0 %v14837_v56  ;;  %12240 = vmatprep.subr.bf16.mxu1 %v14840_v25  ;;  %v14911_v56 = vld [vmem:[#allocation9 + $0xc] ss:$24 sps:$4 sm:$0xff]  }
 0x81b   : > { %v14914_v25 = vld [vmem:[#allocation9 + $0x3cc] ss:$24 sps:$4 sm:$0xff]  }
 0x81c   : > { %v16252_v50 = vld [vmem:[#allocation2 + $0x18] sm:$0xff] }
 0x81d   : > { %12208 = vmatpush2.bf16.msra.mxu0 %v14835_v22  ;;  %12241 = vmatpush1.bf16.msra.mxu1 %v14838_v8  ;;  %v16256_v49 = vcombine.high %v16252_v50, %v16252_v50  ;;  %v16267_v19 = vcombine.low %v16252_v50, %v16252_v50  ;;  %v14912_v22 = vld [vmem:[#allocation9 + $0x3c8] ss:$24 sps:$4 sm:$0xff]   ;;  %v14917_v8 = vld [vmem:[#allocation9 + $0x2dc] ss:$24 sps:$4 sm:$0xff]   ;;  %v14918_v50 = vld [vmem:[#allocation9 + $0x398] ss:$24 sps:$4 sm:$0xff]  }
 0x81e   : > { %12209 = vmatprep.subr.bf16.mxu0 %v14843_v35  ;;  %12242 = vmatprep.subr.bf16.mxu1 %v14846_v32  ;;  %v14920_v35 = vld [vmem:[#allocation9 + $0x39c] ss:$24 sps:$4 sm:$0xff]   ;;  %v14915_v32 = vld [vmem:[#allocation9 + $0x2d8] ss:$24 sps:$4 sm:$0xff]  }
 0x81f   : > { %12258 = vmatprep.mubr.bf16.mxu1 %v16256_v49 }
 0x821   : > { %12210 = vmatpush2.bf16.msra.mxu0 %v14841_v4  ;;  %12243 = vmatpush2.bf16.msra.mxu1 %v14844_v10  ;;  %v14923_v4 = vld [vmem:[#allocation9 + $0x2ac] ss:$24 sps:$4 sm:$0xff]  }
 0x822   : > { %12211 = vmatprep.subr.bf16.mxu0 %v14851_v36  ;;  %12244 = vmatprep.subr.bf16.mxu1 %v14854_v57  ;;  %v14926_v10 = vld [vmem:[#allocation9 + $0x36c] ss:$24 sps:$4 sm:$0xff]   ;;  %v14921_v36 = vld [vmem:[#allocation9 + $0x2a8] ss:$24 sps:$4 sm:$0xff]  }
 0x823   : > { %v14924_v57 = vld [vmem:[#allocation9 + $0x368] ss:$24 sps:$4 sm:$0xff]  }
 0x825   : > { %12212 = vmatpush2.bf16.msra.mxu0 %v14849_v59  ;;  %12245 = vmatpush2.bf16.msra.mxu1 %v14852_v37  ;;  %v14929_v59 = vld [vmem:[#allocation9 + $0x27c] ss:$24 sps:$4 sm:$0xff]  }
 0x826   : > { %12213 = vmatprep.subr.bf16.mxu0 %v14857_v46  ;;  %12246 = vmatprep.subr.bf16.mxu1 %v14860_v31  ;;  %v14932_v37 = vld [vmem:[#allocation9 + $0x33c] ss:$24 sps:$4 sm:$0xff]   ;;  %v14927_v46 = vld [vmem:[#allocation9 + $0x278] ss:$24 sps:$4 sm:$0xff]  }
 0x827   : > { %v14930_v31 = vld [vmem:[#allocation9 + $0x338] ss:$24 sps:$4 sm:$0xff]  }
 0x829   : > { %12214 = vmatpush2.bf16.msra.mxu0 %v14855_v27  ;;  %12247 = vmatpush2.bf16.msra.mxu1 %v14858_v2  ;;  %v14935_v27 = vld [vmem:[#allocation9 + $0x24c] ss:$24 sps:$4 sm:$0xff]  }
 0x82a   : > { %12215 = vmatprep.subr.bf16.mxu0 %v14863_v44  ;;  %12248 = vmatprep.subr.bf16.mxu1 %v14866_v28  ;;  %v14938_v2 = vld [vmem:[#allocation9 + $0x30c] ss:$24 sps:$4 sm:$0xff]   ;;  %v14933_v44 = vld [vmem:[#allocation9 + $0x248] ss:$24 sps:$4 sm:$0xff]  }
 0x82b   : > { %v14936_v28 = vld [vmem:[#allocation9 + $0x308] ss:$24 sps:$4 sm:$0xff]  }
 0x82d   : > { %12216 = vmatpush2.bf16.msra.mxu0 %v14861_v33  ;;  %12249 = vmatpush2.bf16.msra.mxu1 %v14864_v42  ;;  %v14941_v33 = vld [vmem:[#allocation9 + $0x21c] ss:$24 sps:$4 sm:$0xff]  }
 0x82e   : > { %12250 = vmatprep.subr.bf16.mxu1 %v14869_v39  ;;  %12267 = vmatprep.subr.bf16.mxu0 %v14872_v41  ;;  %v14944_v42 = vld [vmem:[#allocation9 + $0x5dc] ss:$24 sps:$4 sm:$0xff]   ;;  %v14939_v39 = vld [vmem:[#allocation9 + $0x218] ss:$24 sps:$4 sm:$0xff]  }
 0x82f   : > { %v14942_v41 = vld [vmem:[#allocation9 + $0x5d8] ss:$24 sps:$4 sm:$0xff]  }
 0x830   : > { %12218 = vmatmul.mubr.bf16.vlgmr.msra.gmra.mxu0 %v16261_v51 }
 0x831   : > { %12251 = vmatpush2.bf16.msra.mxu1 %v14867_v12  ;;  %12268 = vmatpush1.bf16.msra.mxu0 %v14870_v45  ;;  %v14947_v12 = vld [vmem:[#allocation9 + $0x1ec] ss:$24 sps:$4 sm:$0xff]  }
 0x832   : > { %12299 = vmatprep.mubr.bf16.mxu0 %v16235_v6  ;;  %12252 = vmatprep.subr.bf16.mxu1 %v14875_v34  ;;  %v14950_v45 = vld [vmem:[#allocation9 + $0x5ac] ss:$24 sps:$4 sm:$0xff]   ;;  %v14945_v34 = vld [vmem:[#allocation9 + $0x1e8] ss:$24 sps:$4 sm:$0xff]  }
 0x833   : > { %12269 = vmatprep.subr.bf16.mxu0 %v14878_v5  ;;  %v14948_v5 = vld [vmem:[#allocation9 + $0x5a8] ss:$24 sps:$4 sm:$0xff]  }
 0x835   : > { %12253 = vmatpush2.bf16.msra.mxu1 %v14873_v52  ;;  %12270 = vmatpush1.bf16.msra.mxu0 %v14876_v48  ;;  %v14953_v52 = vld [vmem:[#allocation9 + $0x1bc] ss:$24 sps:$4 sm:$0xff]  }
 0x836   : > { %12254 = vmatprep.subr.bf16.mxu1 %v14881_v23  ;;  %12271 = vmatprep.subr.bf16.mxu0 %v14884_v58  ;;  %v14956_v48 = vld [vmem:[#allocation9 + $0x57c] ss:$24 sps:$4 sm:$0xff]   ;;  %v14951_v23 = vld [vmem:[#allocation9 + $0x1b8] ss:$24 sps:$4 sm:$0xff]  }
 0x837   : > { %v14954_v58 = vld [vmem:[#allocation9 + $0x578] ss:$24 sps:$4 sm:$0xff]  }
 0x839   : > { %12255 = vmatpush2.bf16.msra.mxu1 %v14879_v38  ;;  %12272 = vmatpush1.bf16.msra.mxu0 %v14882_v62  ;;  %v14959_v38 = vld [vmem:[#allocation9 + $0x18c] ss:$24 sps:$4 sm:$0xff]  }
 0x83a   : > { %12256 = vmatprep.subr.bf16.mxu1 %v14887_v21  ;;  %12273 = vmatprep.subr.bf16.mxu0 %v14890_v55  ;;  %v14962_v62 = vld [vmem:[#allocation9 + $0x54c] ss:$24 sps:$4 sm:$0xff]   ;;  %v14957_v21 = vld [vmem:[#allocation9 + $0x188] ss:$24 sps:$4 sm:$0xff]  }
 0x83b   : > { %v14960_v55 = vld [vmem:[#allocation9 + $0x548] ss:$24 sps:$4 sm:$0xff]  }
 0x83d   : > { %12257 = vmatpush2.bf16.msra.mxu1 %v14885_v18  ;;  %12274 = vmatpush1.bf16.msra.mxu0 %v14888_v61  ;;  %v14965_v18 = vld [vmem:[#allocation9 + $0x51c] ss:$24 sps:$4 sm:$0xff]  }
 0x83e   : > { %12275 = vmatprep.subr.bf16.mxu0 %v14893_v3  ;;  %12308 = vmatprep.subr.bf16.mxu1 %v14896_v53  ;;  %v14968_v61 = vld [vmem:[#allocation9 + $0x75c] ss:$24 sps:$4 sm:$0xff]   ;;  %v14963_v3 = vld [vmem:[#allocation9 + $0x518] ss:$24 sps:$4 sm:$0xff]  }
 0x83f   : > { %v14966_v53 = vld [vmem:[#allocation9 + $0x758] ss:$24 sps:$4 sm:$0xff]  }
 0x840   : > { %12259 = vmatmul.mubr.bf16.vlgmr.msra.gmra.mxu1 %v16267_v19 }
 0x841   : > { %12276 = vmatpush1.bf16.msra.mxu0 %v14891_v43  ;;  %12309 = vmatpush1.bf16.msra.mxu1 %v14894_v13  ;;  %v14971_v43 = vld [vmem:[#allocation9 + $0x4ec] ss:$24 sps:$4 sm:$0xff]  }
 0x842   : > { %12340 = vmatprep.mubr.bf16.mxu1 %v16241_v14  ;;  %12277 = vmatprep.subr.bf16.mxu0 %v14899_v16  ;;  %v14974_v13 = vld [vmem:[#allocation9 + $0x72c] ss:$24 sps:$4 sm:$0xff]   ;;  %v14969_v16 = vld [vmem:[#allocation9 + $0x4e8] ss:$24 sps:$4 sm:$0xff]  }
 0x843   : > { %12310 = vmatprep.subr.bf16.mxu1 %v14902_v24  ;;  %v14972_v24 = vld [vmem:[#allocation9 + $0x728] ss:$24 sps:$4 sm:$0xff]  }
 0x845   : > { %12278 = vmatpush1.bf16.msra.mxu0 %v14897_v0  ;;  %12311 = vmatpush1.bf16.msra.mxu1 %v14900_v26  ;;  %v14977_v0 = vld [vmem:[#allocation9 + $0x4bc] ss:$24 sps:$4 sm:$0xff]  }
 0x846   : > { %12279 = vmatprep.subr.bf16.mxu0 %v14905_v29  ;;  %12312 = vmatprep.subr.bf16.mxu1 %v14908_v40  ;;  %v14980_v26 = vld [vmem:[#allocation9 + $0x6fc] ss:$24 sps:$4 sm:$0xff]   ;;  %v14975_v29 = vld [vmem:[#allocation9 + $0x4b8] ss:$24 sps:$4 sm:$0xff]  }
 0x847   : > { %v14978_v40 = vld [vmem:[#allocation9 + $0x6f8] ss:$24 sps:$4 sm:$0xff]  }
 0x849   : > { %12280 = vmatpush1.bf16.msra.mxu0 %v14903_v47  ;;  %12313 = vmatpush1.bf16.msra.mxu1 %v14906_v20  ;;  %v14983_v47 = vld [vmem:[#allocation9 + $0x48c] ss:$24 sps:$4 sm:$0xff]  }
 0x84a   : > { %12281 = vmatprep.subr.bf16.mxu0 %v14911_v56  ;;  %12314 = vmatprep.subr.bf16.mxu1 %v14914_v25  ;;  %v14986_v20 = vld [vmem:[#allocation9 + $0x6cc] ss:$24 sps:$4 sm:$0xff]   ;;  %v14981_v56 = vld [vmem:[#allocation9 + $0x488] ss:$24 sps:$4 sm:$0xff]  }
 0x84b   : > { %v14984_v25 = vld [vmem:[#allocation9 + $0x6c8] ss:$24 sps:$4 sm:$0xff]  }
 0x84d   : > { %12282 = vmatpush1.bf16.msra.mxu0 %v14909_v60  ;;  %12315 = vmatpush1.bf16.msra.mxu1 %v14912_v22  ;;  %v14989_v60 = vld [vmem:[#allocation9 + $0x69c] ss:$24 sps:$4 sm:$0xff]  }
 0x84e   : > { %12283 = vmatprep.subr.bf16.mxu0 %v14917_v8  ;;  %12316 = vmatprep.subr.bf16.mxu1 %v14920_v35  ;;  %v14992_v22 = vld [vmem:[#allocation9 + $0xa5c] ss:$24 sps:$4 sm:$0xff]   ;;  %v14987_v8 = vld [vmem:[#allocation9 + $0x698] ss:$24 sps:$4 sm:$0xff]  }
 0x84f   : > { %v14990_v35 = vld [vmem:[#allocation9 + $0xa58] ss:$24 sps:$4 sm:$0xff]  }
 0x851   : > { %12284 = vmatpush2.bf16.msra.mxu0 %v14915_v32  ;;  %12317 = vmatpush1.bf16.msra.mxu1 %v14918_v50  ;;  %v14995_v32 = vld [vmem:[#allocation9 + $0x66c] ss:$24 sps:$4 sm:$0xff]  }
 0x852   : > { %12285 = vmatprep.subr.bf16.mxu0 %v14923_v4  ;;  %12318 = vmatprep.subr.bf16.mxu1 %v14926_v10  ;;  %v14998_v50 = vld [vmem:[#allocation9 + $0xa2c] ss:$24 sps:$4 sm:$0xff]   ;;  %v14993_v4 = vld [vmem:[#allocation9 + $0x668] ss:$24 sps:$4 sm:$0xff]  }
 0x853   : > { %v14996_v10 = vld [vmem:[#allocation9 + $0xa28] ss:$24 sps:$4 sm:$0xff]  }
 0x855   : > { %12286 = vmatpush2.bf16.msra.mxu0 %v14921_v36  ;;  %12319 = vmatpush1.bf16.msra.mxu1 %v14924_v57  ;;  %v15001_v36 = vld [vmem:[#allocation9 + $0x63c] ss:$24 sps:$4 sm:$0xff]  }
 0x856   : > { %12287 = vmatprep.subr.bf16.mxu0 %v14929_v59  ;;  %12320 = vmatprep.subr.bf16.mxu1 %v14932_v37  ;;  %v15004_v57 = vld [vmem:[#allocation9 + $0x9fc] ss:$24 sps:$4 sm:$0xff]   ;;  %v14999_v59 = vld [vmem:[#allocation9 + $0x638] ss:$24 sps:$4 sm:$0xff]  }
 0x857   : > { %v15002_v37 = vld [vmem:[#allocation9 + $0x9f8] ss:$24 sps:$4 sm:$0xff]  }
 0x859   : > { %12288 = vmatpush2.bf16.msra.mxu0 %v14927_v46  ;;  %12321 = vmatpush1.bf16.msra.mxu1 %v14930_v31  ;;  %v15007_v46 = vld [vmem:[#allocation9 + $0x60c] ss:$24 sps:$4 sm:$0xff]  }
 0x85a   : > { %12289 = vmatprep.subr.bf16.mxu0 %v14935_v27  ;;  %12322 = vmatprep.subr.bf16.mxu1 %v14938_v2  ;;  %v15010_v31 = vld [vmem:[#allocation9 + $0x9cc] ss:$24 sps:$4 sm:$0xff]   ;;  %v15005_v27 = vld [vmem:[#allocation9 + $0x608] ss:$24 sps:$4 sm:$0xff]  }
 0x85b   : > { %v15008_v2 = vld [vmem:[#allocation9 + $0x9c8] ss:$24 sps:$4 sm:$0xff]  }
 0x85d   : > { %12290 = vmatpush2.bf16.msra.mxu0 %v14933_v44  ;;  %12323 = vmatpush1.bf16.msra.mxu1 %v14936_v28  ;;  %v15013_v44 = vld [vmem:[#allocation9 + $0x8dc] ss:$24 sps:$4 sm:$0xff]  }
 0x85e   : > { %12291 = vmatprep.subr.bf16.mxu0 %v14941_v33  ;;  %12324 = vmatprep.subr.bf16.mxu1 %v14944_v42  ;;  %v15016_v28 = vld [vmem:[#allocation9 + $0x99c] ss:$24 sps:$4 sm:$0xff]   ;;  %v15011_v33 = vld [vmem:[#allocation9 + $0x8d8] ss:$24 sps:$4 sm:$0xff]  }
 0x85f   : > { %v15014_v42 = vld [vmem:[#allocation9 + $0x998] ss:$24 sps:$4 sm:$0xff]  }
 0x861   : > { %12292 = vmatpush2.bf16.msra.mxu0 %v14939_v39  ;;  %12325 = vmatpush2.bf16.msra.mxu1 %v14942_v41  ;;  %v15019_v39 = vld [vmem:[#allocation9 + $0x8ac] ss:$24 sps:$4 sm:$0xff]  }
 0x862   : > { %12293 = vmatprep.subr.bf16.mxu0 %v14947_v12  ;;  %12326 = vmatprep.subr.bf16.mxu1 %v14950_v45  ;;  %v15022_v41 = vld [vmem:[#allocation9 + $0x96c] ss:$24 sps:$4 sm:$0xff]   ;;  %v15017_v12 = vld [vmem:[#allocation9 + $0x8a8] ss:$24 sps:$4 sm:$0xff]  }
 0x863   : > { %v15020_v45 = vld [vmem:[#allocation9 + $0x968] ss:$24 sps:$4 sm:$0xff]  }
 0x865   : > { %12294 = vmatpush2.bf16.msra.mxu0 %v14945_v34  ;;  %12327 = vmatpush2.bf16.msra.mxu1 %v14948_v5  ;;  %v15025_v34 = vld [vmem:[#allocation9 + $0x87c] ss:$24 sps:$4 sm:$0xff]  }
 0x866   : > { %12295 = vmatprep.subr.bf16.mxu0 %v14953_v52  ;;  %12328 = vmatprep.subr.bf16.mxu1 %v14956_v48  ;;  %v15028_v5 = vld [vmem:[#allocation9 + $0x93c] ss:$24 sps:$4 sm:$0xff]   ;;  %v15023_v52 = vld [vmem:[#allocation9 + $0x878] ss:$24 sps:$4 sm:$0xff]  }
 0x867   : > { %v15026_v48 = vld [vmem:[#allocation9 + $0x938] ss:$24 sps:$4 sm:$0xff]  }
 0x869   : > { %12296 = vmatpush2.bf16.msra.mxu0 %v14951_v23  ;;  %12329 = vmatpush2.bf16.msra.mxu1 %v14954_v58  ;;  %v15031_v23 = vld [vmem:[#allocation9 + $0x84c] ss:$24 sps:$4 sm:$0xff]  }
 0x86a   : > { %12297 = vmatprep.subr.bf16.mxu0 %v14959_v38  ;;  %12330 = vmatprep.subr.bf16.mxu1 %v14962_v62  ;;  %v15034_v58 = vld [vmem:[#allocation9 + $0x90c] ss:$24 sps:$4 sm:$0xff]   ;;  %v15029_v38 = vld [vmem:[#allocation9 + $0x848] ss:$24 sps:$4 sm:$0xff]  }
 0x86b   : > { %v15032_v62 = vld [vmem:[#allocation9 + $0x908] ss:$24 sps:$4 sm:$0xff]  }
 0x86d   : > { %12298 = vmatpush2.bf16.msra.mxu0 %v14957_v21  ;;  %12331 = vmatpush2.bf16.msra.mxu1 %v14960_v55  ;;  %v15037_v21 = vld [vmem:[#allocation9 + $0x81c] ss:$24 sps:$4 sm:$0xff]  }
 0x86e   : > { %12332 = vmatprep.subr.bf16.mxu1 %v14965_v18  ;;  %12349 = vmatprep.subr.bf16.mxu0 %v14968_v61  ;;  %v15040_v55 = vld [vmem:[#allocation9 + $0xbdc] ss:$24 sps:$4 sm:$0xff]   ;;  %v15035_v18 = vld [vmem:[#allocation9 + $0x818] ss:$24 sps:$4 sm:$0xff]  }
 0x86f   : > { %v15038_v61 = vld [vmem:[#allocation9 + $0xbd8] ss:$24 sps:$4 sm:$0xff]  }
 0x870   : > { %12300 = vmatmul.mubr.bf16.vlgmr.msra.gmra.mxu0 %v16233_v17 }
 0x871   : > { %12333 = vmatpush2.bf16.msra.mxu1 %v14963_v3  ;;  %12350 = vmatpush1.bf16.msra.mxu0 %v14966_v53  ;;  %v15043_v3 = vld [vmem:[#allocation9 + $0x7ec] ss:$24 sps:$4 sm:$0xff]  }
 0x872   : > { %12381 = vmatprep.mubr.bf16.mxu0 %v16249_v1  ;;  %12334 = vmatprep.subr.bf16.mxu1 %v14971_v43  ;;  %v15046_v53 = vld [vmem:[#allocation9 + $0xbac] ss:$24 sps:$4 sm:$0xff]   ;;  %v15041_v43 = vld [vmem:[#allocation9 + $0x7e8] ss:$24 sps:$4 sm:$0xff]  }
 0x873   : > { %12351 = vmatprep.subr.bf16.mxu0 %v14974_v13  ;;  %v15044_v13 = vld [vmem:[#allocation9 + $0xba8] ss:$24 sps:$4 sm:$0xff]  }
 0x875   : > { %12335 = vmatpush2.bf16.msra.mxu1 %v14969_v16  ;;  %12352 = vmatpush1.bf16.msra.mxu0 %v14972_v24  ;;  %v15049_v16 = vld [vmem:[#allocation9 + $0x7bc] ss:$24 sps:$4 sm:$0xff]  }
 0x876   : > { %12336 = vmatprep.subr.bf16.mxu1 %v14977_v0  ;;  %12353 = vmatprep.subr.bf16.mxu0 %v14980_v26  ;;  %v15052_v24 = vld [vmem:[#allocation9 + $0xb7c] ss:$24 sps:$4 sm:$0xff]   ;;  %v15047_v0 = vld [vmem:[#allocation9 + $0x7b8] ss:$24 sps:$4 sm:$0xff]  }
 0x877   : > { %v15050_v26 = vld [vmem:[#allocation9 + $0xb78] ss:$24 sps:$4 sm:$0xff]  }
 0x879   : > { %12337 = vmatpush2.bf16.msra.mxu1 %v14975_v29  ;;  %12354 = vmatpush1.bf16.msra.mxu0 %v14978_v40  ;;  %v15055_v29 = vld [vmem:[#allocation9 + $0x78c] ss:$24 sps:$4 sm:$0xff]  }
 0x87a   : > { %12338 = vmatprep.subr.bf16.mxu1 %v14983_v47  ;;  %12355 = vmatprep.subr.bf16.mxu0 %v14986_v20  ;;  %v15058_v40 = vld [vmem:[#allocation9 + $0xb4c] ss:$24 sps:$4 sm:$0xff]   ;;  %v15053_v47 = vld [vmem:[#allocation9 + $0x788] ss:$24 sps:$4 sm:$0xff]  }
 0x87b   : > { %v15056_v20 = vld [vmem:[#allocation9 + $0xb48] ss:$24 sps:$4 sm:$0xff]  }
 0x87d   : > { %12339 = vmatpush2.bf16.msra.mxu1 %v14981_v56  ;;  %12356 = vmatpush1.bf16.msra.mxu0 %v14984_v25  ;;  %v15061_v56 = vld [vmem:[#allocation9 + $0xb1c] ss:$24 sps:$4 sm:$0xff]  }
 0x87e   : > { %12357 = vmatprep.subr.bf16.mxu0 %v14989_v60  ;;  %12390 = vmatprep.subr.bf16.mxu1 %v14992_v22  ;;  %v15064_v25 = vld [vmem:[#allocation9 + $0x164] ss:$24 sps:$4 sm:$0xff]   ;;  %v15059_v60 = vld [vmem:[#allocation9 + $0xb18] ss:$24 sps:$4 sm:$0xff]  }
 0x87f   : > { %v15062_v22 = vld [vmem:[#allocation9 + $0x160] ss:$24 sps:$4 sm:$0xff]  }
 0x880   : > { %12341 = vmatmul.mubr.bf16.vlgmr.msra.gmra.mxu1 %v16239_v9 }
 0x881   : > { %12358 = vmatpush1.bf16.msra.mxu0 %v14987_v8  ;;  %12391 = vmatpush1.bf16.msra.mxu1 %v14990_v35  ;;  %v15067_v8 = vld [vmem:[#allocation9 + $0xaec] ss:$24 sps:$4 sm:$0xff]  }
 0x882   : > { %12422 = vmatprep.mubr.bf16.mxu1 %v16256_v49  ;;  %12359 = vmatprep.subr.bf16.mxu0 %v14995_v32  ;;  %v15070_v35 = vld [vmem:[#allocation9 + $0x134] ss:$24 sps:$4 sm:$0xff]  }
 0x883   : > { %12392 = vmatprep.subr.bf16.mxu1 %v14998_v50  ;;  %v15065_v50 = vld [vmem:[#allocation9 + $0xae8] ss:$24 sps:$4 sm:$0xff]  }
 0x885   : > { %12360 = vmatpush1.bf16.msra.mxu0 %v14993_v4  ;;  %12393 = vmatpush1.bf16.msra.mxu1 %v14996_v10  ;;  %v15068_v4 = vld [vmem:[#allocation9 + $0x130] ss:$24 sps:$4 sm:$0xff]  }
 0x886   : > { %12361 = vmatprep.subr.bf16.mxu0 %v15001_v36  ;;  %12394 = vmatprep.subr.bf16.mxu1 %v15004_v57  ;;  %v15073_v36 = vld [vmem:[#allocation9 + $0xabc] ss:$24 sps:$4 sm:$0xff]  }
 0x887   : > { %v15076_v57 = vld [vmem:[#allocation9 + $0x104] ss:$24 sps:$4 sm:$0xff]  }
 0x889   : > { %12362 = vmatpush1.bf16.msra.mxu0 %v14999_v59  ;;  %12395 = vmatpush1.bf16.msra.mxu1 %v15002_v37  ;;  %v15071_v37 = vld [vmem:[#allocation9 + $0xab8] ss:$24 sps:$4 sm:$0xff]  }
 0x88a   : > { %12363 = vmatprep.subr.bf16.mxu0 %v15007_v46  ;;  %12396 = vmatprep.subr.bf16.mxu1 %v15010_v31  ;;  %v15074_v46 = vld [vmem:[#allocation9 + $0x100] ss:$24 sps:$4 sm:$0xff]  }
 0x88d   : > { %12364 = vmatpush1.bf16.msra.mxu0 %v15005_v27  ;;  %12397 = vmatpush1.bf16.msra.mxu1 %v15008_v2  ;;  %v15079_v27 = vld [vmem:[#allocation9 + $0xa8c] ss:$24 sps:$4 sm:$0xff]  }
 0x88e   : > { %12365 = vmatprep.subr.bf16.mxu0 %v15013_v44  ;;  %12398 = vmatprep.subr.bf16.mxu1 %v15016_v28  ;;  %v15082_v2 = vld [vmem:[#allocation9 + $0xd4] ss:$24 sps:$4 sm:$0xff]   ;;  %v16277_v44 = vld [vmem:[#allocation11] sm:$0x3f]  ;;  %v15080_v28 = vld [vmem:[#allocation9 + $0xd0] ss:$24 sps:$4 sm:$0xff]  }
 0x891   : > { %12366 = vmatpush2.bf16.msra.mxu0 %v15011_v33  ;;  %12399 = vmatpush1.bf16.msra.mxu1 %v15014_v42  ;;  %v15085_v33 = vld [vmem:[#allocation9 + $0xa4] ss:$24 sps:$4 sm:$0xff]  }
 0x892   : > { %12367 = vmatprep.subr.bf16.mxu0 %v15019_v39  ;;  %12400 = vmatprep.subr.bf16.mxu1 %v15022_v41  ;;  %v15088_v42 = vld [vmem:[#allocation9 + $0x464] ss:$24 sps:$4 sm:$0xff]   ;;  %v10128_v39 = vrot.slane %v16277_v44, %v15839_v54  ;;  %v10132_v41 = vrot.slane %v16277_v44, %v15842_v63 }
 0x895   : > { %12368 = vmatpush2.bf16.msra.mxu0 %v15017_v12  ;;  %12401 = vmatpush1.bf16.msra.mxu1 %v15020_v45  ;;  %v15083_v12 = vld [vmem:[#allocation9 + $0xa0] ss:$24 sps:$4 sm:$0xff]  }
 0x896   : > { %12369 = vmatprep.subr.bf16.mxu0 %v15025_v34  ;;  %12402 = vmatprep.subr.bf16.mxu1 %v15028_v5  ;;  %v15086_v45 = vld [vmem:[#allocation9 + $0x460] ss:$24 sps:$4 sm:$0xff]   ;;  %v15091_v34 = vld [vmem:[#allocation9 + $0x74] ss:$24 sps:$4 sm:$0xff]  }
 0x899   : > { %12370 = vmatpush2.bf16.msra.mxu0 %v15023_v52  ;;  %12403 = vmatpush1.bf16.msra.mxu1 %v15026_v48  ;;  %v15094_v52 = vld [vmem:[#allocation9 + $0x434] ss:$24 sps:$4 sm:$0xff]  }
 0x89a   : > { %12371 = vmatprep.subr.bf16.mxu0 %v15031_v23  ;;  %12404 = vmatprep.subr.bf16.mxu1 %v15034_v58 }
 0x89d   : > { %12372 = vmatpush2.bf16.msra.mxu0 %v15029_v38  ;;  %12405 = vmatpush1.bf16.msra.mxu1 %v15032_v62  ;;  %v15089_v38 = vld [vmem:[#allocation9 + $0x70] ss:$24 sps:$4 sm:$0xff]  }
 0x89e   : > { %12373 = vmatprep.subr.bf16.mxu0 %v15037_v21  ;;  %12406 = vmatprep.subr.bf16.mxu1 %v15040_v55  ;;  %v15092_v62 = vld [vmem:[#allocation9 + $0x430] ss:$24 sps:$4 sm:$0xff]   ;;  %v15097_v55 = vld [vmem:[#allocation9 + $0x44] ss:$24 sps:$4 sm:$0xff]  }
 0x8a1   : > { %12374 = vmatpush2.bf16.msra.mxu0 %v15035_v18  ;;  %12407 = vmatpush2.bf16.msra.mxu1 %v15038_v61  ;;  %v15100_v18 = vld [vmem:[#allocation9 + $0x404] ss:$24 sps:$4 sm:$0xff]  }
 0x8a2   : > { %12375 = vmatprep.subr.bf16.mxu0 %v15043_v3  ;;  %12408 = vmatprep.subr.bf16.mxu1 %v15046_v53  ;;  %v15095_v53 = vld [vmem:[#allocation9 + $0x40] ss:$24 sps:$4 sm:$0xff]  }
 0x8a5   : > { %12376 = vmatpush2.bf16.msra.mxu0 %v15041_v43  ;;  %12409 = vmatpush2.bf16.msra.mxu1 %v15044_v13  ;;  %v15098_v43 = vld [vmem:[#allocation9 + $0x400] ss:$24 sps:$4 sm:$0xff]  }
 0x8a6   : > { %12377 = vmatprep.subr.bf16.mxu0 %v15049_v16  ;;  %12410 = vmatprep.subr.bf16.mxu1 %v15052_v24  ;;  %v15103_v16 = vld [vmem:[#allocation9 + $0x14] ss:$24 sps:$4 sm:$0xff]  }
 0x8a7   : > { %v15106_v24 = vld [vmem:[#allocation9 + $0x3d4] ss:$24 sps:$4 sm:$0xff]  }
 0x8a9   : > { %12378 = vmatpush2.bf16.msra.mxu0 %v15047_v0  ;;  %12411 = vmatpush2.bf16.msra.mxu1 %v15050_v26  ;;  %v15104_v0 = vld [vmem:[#allocation9 + $0x3d0] ss:$24 sps:$4 sm:$0xff]   ;;  %v15109_v26 = vld [vmem:[#allocation9 + $0x2e4] ss:$24 sps:$4 sm:$0xff]  }
 0x8aa   : > { %12379 = vmatprep.subr.bf16.mxu0 %v15055_v29  ;;  %12412 = vmatprep.subr.bf16.mxu1 %v15058_v40  ;;  %v15112_v29 = vld [vmem:[#allocation9 + $0x3a4] ss:$24 sps:$4 sm:$0xff]   ;;  %v15107_v40 = vld [vmem:[#allocation9 + $0x2e0] ss:$24 sps:$4 sm:$0xff]  }
 0x8ad   : > { %12380 = vmatpush2.bf16.msra.mxu0 %v15053_v47  ;;  %12413 = vmatpush2.bf16.msra.mxu1 %v15056_v20  ;;  %v15110_v47 = vld [vmem:[#allocation9 + $0x3a0] ss:$24 sps:$4 sm:$0xff]   ;;  %v15115_v20 = vld [vmem:[#allocation9 + $0x2b4] ss:$24 sps:$4 sm:$0xff]  }
 0x8ae   : > { %12414 = vmatprep.subr.bf16.mxu1 %v15061_v56  ;;  %12431 = vmatprep.subr.bf16.mxu0 %v15064_v25  ;;  %v15118_v56 = vld [vmem:[#allocation9 + $0x374] ss:$24 sps:$4 sm:$0xff]   ;;  %v15113_v25 = vld [vmem:[#allocation9 + $0x2b0] ss:$24 sps:$4 sm:$0xff]  }
 0x8b0   : > { %12382 = vmatmul.mubr.bf16.vlgmr.msra.gmra.mxu0 %v16261_v51  ;;  %v12137_v32 = vpop.f32.mrf.mxu0 }
 0x8b1   : > { %12415 = vmatpush2.bf16.msra.mxu1 %v15059_v60  ;;  %12432 = vmatpush1.bf16.msra.mxu0 %v15062_v22  ;;  %v12138_v5 = vadd.f32 %v12137_v32, %v10128_v39  ;;  %v15116_v60 = vld [vmem:[#allocation9 + $0x370] ss:$24 sps:$4 sm:$0xff]   ;;  %v15121_v22 = vld [vmem:[#allocation9 + $0x284] ss:$24 sps:$4 sm:$0xff]   ;;  %v15122_v32 = vld [vmem:[#allocation9 + $0x340] ss:$24 sps:$4 sm:$0xff]  }
 0x8b2   : > { %12463 = vmatprep.mubr.bf16.mxu0 %v16235_v6  ;;  %v12139_v10 = vpop.f32.mrf.mxu0  ;;  %12416 = vmatprep.subr.bf16.mxu1 %v15067_v8  ;;  %v15077_v6 = vld [vmem:[#allocation9 + $0xa88] ss:$24 sps:$4 sm:$0xff]   ;;  %v15124_v8 = vld [vmem:[#allocation9 + $0x344] ss:$24 sps:$4 sm:$0xff]  }
 0x8b3   : > { %12433 = vmatprep.subr.bf16.mxu0 %v15070_v35  ;;  %v12140_v23 = vadd.f32 %v12139_v10, %v10132_v41  ;;  %v15119_v35 = vld [vmem:[#allocation9 + $0x280] ss:$24 sps:$4 sm:$0xff]   ;;  %v15125_v10 = vld [vmem:[#allocation9 + $0x250] ss:$24 sps:$4 sm:$0xff]   ;;  %v15151_v41 = vld [vmem:[#allocation9 + $0x194] ss:$24 sps:$4 sm:$0xff]  }
 0x8b4   : > { %v12141_v59 = vpop.f32.mrf.mxu0  ;;  %v15146_v39 = vld [vmem:[#allocation9 + $0x580] ss:$24 sps:$4 sm:$0xff]  }
 0x8b5   : > { %12417 = vmatpush2.bf16.msra.mxu1 %v15065_v50  ;;  %12434 = vmatpush1.bf16.msra.mxu0 %v15068_v4  ;;  %v15127_v50 = vld [vmem:[#allocation9 + $0x254] ss:$24 sps:$4 sm:$0xff]   ;;  %v15136_v59 = vld [vmem:[#allocation9 + $0x5e4] ss:$24 sps:$4 sm:$0xff]  }
 0x8b6   : > { %v12142_v31 = vpop.f32.mrf.mxu0  ;;  %12418 = vmatprep.subr.bf16.mxu1 %v15073_v36  ;;  %12435 = vmatprep.subr.bf16.mxu0 %v15076_v57  ;;  %v15130_v4 = vld [vmem:[#allocation9 + $0x314] ss:$24 sps:$4 sm:$0xff]   ;;  %v15128_v36 = vld [vmem:[#allocation9 + $0x310] ss:$24 sps:$4 sm:$0xff]   ;;  %v15133_v57 = vld [vmem:[#allocation9 + $0x224] ss:$24 sps:$4 sm:$0xff]  }
 0x8b7   : > { %v15139_v31 = vld [vmem:[#allocation9 + $0x1f4] ss:$24 sps:$4 sm:$0xff]  }
 0x8b9   : > { %12419 = vmatpush2.bf16.msra.mxu1 %v15071_v37  ;;  %12436 = vmatpush1.bf16.msra.mxu0 %v15074_v46  ;;  %v15131_v37 = vld [vmem:[#allocation9 + $0x220] ss:$24 sps:$4 sm:$0xff]  }
 0x8ba   : > { %12420 = vmatprep.subr.bf16.mxu1 %v15079_v27  ;;  %12437 = vmatprep.subr.bf16.mxu0 %v15082_v2  ;;  %v15134_v46 = vld [vmem:[#allocation9 + $0x5e0] ss:$24 sps:$4 sm:$0xff]   ;;  %v15142_v27 = vld [vmem:[#allocation9 + $0x5b4] ss:$24 sps:$4 sm:$0xff]   ;;  %v15137_v2 = vld [vmem:[#allocation9 + $0x1f0] ss:$24 sps:$4 sm:$0xff]  }
 0x8bd   : > { %12421 = vmatpush2.bf16.msra.mxu1 %v15077_v6  ;;  %12438 = vmatpush1.bf16.msra.mxu0 %v15080_v28  ;;  %v15140_v6 = vld [vmem:[#allocation9 + $0x5b0] ss:$24 sps:$4 sm:$0xff]   ;;  %v15145_v28 = vld [vmem:[#allocation9 + $0x1c4] ss:$24 sps:$4 sm:$0xff]  }
 0x8be   : > { %12439 = vmatprep.subr.bf16.mxu0 %v15085_v33  ;;  %12472 = vmatprep.subr.bf16.mxu1 %v15088_v42  ;;  %v15148_v33 = vld [vmem:[#allocation9 + $0x584] ss:$24 sps:$4 sm:$0xff]   ;;  %v15143_v42 = vld [vmem:[#allocation9 + $0x1c0] ss:$24 sps:$4 sm:$0xff]  }
 0x8c0   : > { %12423 = vmatmul.mubr.bf16.vlgmr.msra.gmra.mxu1 %v16267_v19  ;;  %v12178_v48 = vpop.f32.mrf.mxu1 }
 0x8c1   : > { %v16284_v58 = vadd.f32 %v12178_v48, %v12138_v5  ;;  %12440 = vmatpush1.bf16.msra.mxu0 %v15083_v12  ;;  %12473 = vmatpush1.bf16.msra.mxu1 %v15086_v45  ;;  %v15154_v12 = vld [vmem:[#allocation9 + $0x554] ss:$24 sps:$4 sm:$0xff]   ;;  %v15149_v45 = vld [vmem:[#allocation9 + $0x190] ss:$24 sps:$4 sm:$0xff]   ;;  %v15157_v5 = vld [vmem:[#allocation9 + $0x524] ss:$24 sps:$4 sm:$0xff]  }
 0x8c2   : > { %12504 = vmatprep.mubr.bf16.mxu1 %v16241_v14  ;;  %v12180_v21 = vpop.f32.mrf.mxu1  ;;  %12441 = vmatprep.subr.bf16.mxu0 %v15091_v34  ;;  %v15101_v14 = vld [vmem:[#allocation9 + $0x10] ss:$24 sps:$4 sm:$0xff]   ;;  %v15155_v48 = vld [vmem:[#allocation9 + $0x520] ss:$24 sps:$4 sm:$0xff]  }
 0x8c3   : > { %v16287_v61 = vadd.f32 %v12180_v21, %v12140_v23  ;;  %12474 = vmatprep.subr.bf16.mxu1 %v15094_v52  ;;  %v15152_v34 = vld [vmem:[#allocation9 + $0x550] ss:$24 sps:$4 sm:$0xff]   ;;  %v15160_v52 = vld [vmem:[#allocation9 + $0x764] ss:$24 sps:$4 sm:$0xff]   ;;  %v15158_v23 = vld [vmem:[#allocation9 + $0x760] ss:$24 sps:$4 sm:$0xff]  }
 0x8c4   : > { %v12182_v3 = vpop.f32.mrf.mxu1 }
 0x8c5   : > { %12442 = vmatpush1.bf16.msra.mxu0 %v15089_v38  ;;  %12475 = vmatpush1.bf16.msra.mxu1 %v15092_v62  ;;  %v15163_v38 = vld [vmem:[#allocation9 + $0x4f4] ss:$24 sps:$4 sm:$0xff]   ;;  %v15164_v3 = vld [vmem:[#allocation9 + $0x730] ss:$24 sps:$4 sm:$0xff]  }
 0x8c6   : > { %v12183_v13 = vpop.f32.mrf.mxu1  ;;  %12443 = vmatprep.subr.bf16.mxu0 %v15097_v55  ;;  %12476 = vmatprep.subr.bf16.mxu1 %v15100_v18  ;;  %v15166_v62 = vld [vmem:[#allocation9 + $0x734] ss:$24 sps:$4 sm:$0xff]   ;;  %v15161_v18 = vld [vmem:[#allocation9 + $0x4f0] ss:$24 sps:$4 sm:$0xff]  }
 0x8c7   : > { %v15172_v13 = vld [vmem:[#allocation9 + $0x704] ss:$24 sps:$4 sm:$0xff]  }
 0x8c9   : > { %12444 = vmatpush1.bf16.msra.mxu0 %v15095_v53  ;;  %12477 = vmatpush1.bf16.msra.mxu1 %v15098_v43  ;;  %v15169_v43 = vld [vmem:[#allocation9 + $0x4c4] ss:$24 sps:$4 sm:$0xff]  }
 0x8ca   : > { %12445 = vmatprep.subr.bf16.mxu0 %v15103_v16  ;;  %12478 = vmatprep.subr.bf16.mxu1 %v15106_v24 }
 0x8cd   : > { %12446 = vmatpush1.bf16.msra.mxu0 %v15101_v14  ;;  %12479 = vmatpush1.bf16.msra.mxu1 %v15104_v0  ;;  %v15167_v14 = vld [vmem:[#allocation9 + $0x4c0] ss:$24 sps:$4 sm:$0xff]  }
 0x8ce   : > { %12447 = vmatprep.subr.bf16.mxu0 %v15109_v26  ;;  %12480 = vmatprep.subr.bf16.mxu1 %v15112_v29  ;;  %v15178_v26 = vld [vmem:[#allocation9 + $0x6d4] ss:$24 sps:$4 sm:$0xff]   ;;  %v15176_v29 = vld [vmem:[#allocation9 + $0x6d0] ss:$24 sps:$4 sm:$0xff]  }
 0x8d1   : > { %12448 = vmatpush2.bf16.msra.mxu0 %v15107_v40  ;;  %12481 = vmatpush1.bf16.msra.mxu1 %v15110_v47  ;;  %v15181_v40 = vld [vmem:[#allocation9 + $0x6a4] ss:$24 sps:$4 sm:$0xff]  }
 0x8d2   : > { %12449 = vmatprep.subr.bf16.mxu0 %v15115_v20  ;;  %12482 = vmatprep.subr.bf16.mxu1 %v15118_v56  ;;  %v15184_v47 = vld [vmem:[#allocation9 + $0xa64] ss:$24 sps:$4 sm:$0xff]   ;;  %v15182_v20 = vld [vmem:[#allocation9 + $0xa60] ss:$24 sps:$4 sm:$0xff]   ;;  %v15187_v56 = vld [vmem:[#allocation9 + $0x674] ss:$24 sps:$4 sm:$0xff]  }
 0x8d5   : > { %12450 = vmatpush2.bf16.msra.mxu0 %v15113_v25  ;;  %12483 = vmatpush1.bf16.msra.mxu1 %v15116_v60  ;;  %v15190_v25 = vld [vmem:[#allocation9 + $0xa34] ss:$24 sps:$4 sm:$0xff]  }
 0x8d6   : > { %12451 = vmatprep.subr.bf16.mxu0 %v15121_v22  ;;  %12484 = vmatprep.subr.bf16.mxu1 %v15124_v8  ;;  %v15185_v8 = vld [vmem:[#allocation9 + $0x670] ss:$24 sps:$4 sm:$0xff]  }
 0x8d9   : > { %12452 = vmatpush2.bf16.msra.mxu0 %v15119_v35  ;;  %12485 = vmatpush1.bf16.msra.mxu1 %v15122_v32  ;;  %v15188_v35 = vld [vmem:[#allocation9 + $0xa30] ss:$24 sps:$4 sm:$0xff]  }
 0x8da   : > { %12453 = vmatprep.subr.bf16.mxu0 %v15127_v50  ;;  %12486 = vmatprep.subr.bf16.mxu1 %v15130_v4  ;;  %v15193_v50 = vld [vmem:[#allocation9 + $0x644] ss:$24 sps:$4 sm:$0xff]  }
 0x8db   : > { %v15196_v4 = vld [vmem:[#allocation9 + $0xa04] ss:$24 sps:$4 sm:$0xff]  }
 0x8dd   : > { %12454 = vmatpush2.bf16.msra.mxu0 %v15125_v10  ;;  %12487 = vmatpush1.bf16.msra.mxu1 %v15128_v36 }
 0x8de   : > { %12455 = vmatprep.subr.bf16.mxu0 %v15133_v57  ;;  %12488 = vmatprep.subr.bf16.mxu1 %v15136_v59  ;;  %v15191_v57 = vld [vmem:[#allocation9 + $0x640] ss:$24 sps:$4 sm:$0xff]  }
 0x8e1   : > { %12456 = vmatpush2.bf16.msra.mxu0 %v15131_v37  ;;  %12489 = vmatpush2.bf16.msra.mxu1 %v15134_v46  ;;  %v15199_v37 = vld [vmem:[#allocation9 + $0x614] ss:$24 sps:$4 sm:$0xff]  }
 0x8e2   : > { %12457 = vmatprep.subr.bf16.mxu0 %v15139_v31  ;;  %12490 = vmatprep.subr.bf16.mxu1 %v15142_v27  ;;  %v15202_v46 = vld [vmem:[#allocation9 + $0x9d4] ss:$24 sps:$4 sm:$0xff]   ;;  %v15200_v31 = vld [vmem:[#allocation9 + $0x9d0] ss:$24 sps:$4 sm:$0xff]   ;;  %v15205_v27 = vld [vmem:[#allocation9 + $0x8e4] ss:$24 sps:$4 sm:$0xff]  }
 0x8e5   : > { %12458 = vmatpush2.bf16.msra.mxu0 %v15137_v2  ;;  %12491 = vmatpush2.bf16.msra.mxu1 %v15140_v6  ;;  %v15208_v2 = vld [vmem:[#allocation9 + $0x9a4] ss:$24 sps:$4 sm:$0xff]   ;;  %v15203_v6 = vld [vmem:[#allocation9 + $0x8e0] ss:$24 sps:$4 sm:$0xff]  }
 0x8e6   : > { %12459 = vmatprep.subr.bf16.mxu0 %v15145_v28  ;;  %12492 = vmatprep.subr.bf16.mxu1 %v15148_v33  ;;  %v15206_v28 = vld [vmem:[#allocation9 + $0x9a0] ss:$24 sps:$4 sm:$0xff]   ;;  %v15211_v33 = vld [vmem:[#allocation9 + $0x8b4] ss:$24 sps:$4 sm:$0xff]  }
 0x8e9   : > { %12460 = vmatpush2.bf16.msra.mxu0 %v15143_v42  ;;  %12493 = vmatpush2.bf16.msra.mxu1 %v15146_v39  ;;  %v15214_v42 = vld [vmem:[#allocation9 + $0x974] ss:$24 sps:$4 sm:$0xff]   ;;  %v15209_v39 = vld [vmem:[#allocation9 + $0x8b0] ss:$24 sps:$4 sm:$0xff]  }
 0x8ea   : > { %12461 = vmatprep.subr.bf16.mxu0 %v15151_v41  ;;  %12494 = vmatprep.subr.bf16.mxu1 %v15154_v12  ;;  %v15212_v41 = vld [vmem:[#allocation9 + $0x970] ss:$24 sps:$4 sm:$0xff]   ;;  %v15217_v12 = vld [vmem:[#allocation9 + $0x884] ss:$24 sps:$4 sm:$0xff]  }
 0x8ed   : > { %12462 = vmatpush2.bf16.msra.mxu0 %v15149_v45  ;;  %12495 = vmatpush2.bf16.msra.mxu1 %v15152_v34  ;;  %v15220_v45 = vld [vmem:[#allocation9 + $0x944] ss:$24 sps:$4 sm:$0xff]   ;;  %v15215_v34 = vld [vmem:[#allocation9 + $0x880] ss:$24 sps:$4 sm:$0xff]  }
 0x8ee   : > { %12496 = vmatprep.subr.bf16.mxu1 %v15157_v5  ;;  %12513 = vmatprep.subr.bf16.mxu0 %v15160_v52  ;;  %v15218_v5 = vld [vmem:[#allocation9 + $0x940] ss:$24 sps:$4 sm:$0xff]   ;;  %v15223_v52 = vld [vmem:[#allocation9 + $0x854] ss:$24 sps:$4 sm:$0xff]  }
 0x8f0   : > { %v12219_v21 = vpop.f32.mrf.mxu0  ;;  %12464 = vmatmul.mubr.bf16.vlgmr.msra.gmra.mxu0 %v16233_v17  ;;  %v15170_v17 = vld [vmem:[#allocation9 + $0x700] ss:$24 sps:$4 sm:$0xff]  }
 0x8f1   : > { %v12220_v55 = vadd.f32 %v12219_v21, %v16284_v58  ;;  %12497 = vmatpush2.bf16.msra.mxu1 %v15155_v48  ;;  %12514 = vmatpush1.bf16.msra.mxu0 %v15158_v23  ;;  %v15175_v58 = vld [vmem:[#allocation9 + $0x494] ss:$24 sps:$4 sm:$0xff]   ;;  %v15221_v23 = vld [vmem:[#allocation9 + $0x850] ss:$24 sps:$4 sm:$0xff]   ;;  %v15232_v21 = vld [vmem:[#allocation9 + $0xbe4] ss:$24 sps:$4 sm:$0xff]  }
 0x8f2   : > { %12545 = vmatprep.mubr.bf16.mxu0 %v16249_v1  ;;  %v12221_v53 = vpop.f32.mrf.mxu0  ;;  %12498 = vmatprep.subr.bf16.mxu1 %v15163_v38  ;;  %v15173_v1 = vld [vmem:[#allocation9 + $0x490] ss:$24 sps:$4 sm:$0xff]   ;;  %v15226_v48 = vld [vmem:[#allocation9 + $0x914] ss:$24 sps:$4 sm:$0xff]  }
 0x8f3   : > { %v12222_v16 = vadd.f32 %v12221_v53, %v16287_v61  ;;  %12515 = vmatprep.subr.bf16.mxu0 %v15166_v62  ;;  %v15179_v61 = vld [vmem:[#allocation9 + $0x6a0] ss:$24 sps:$4 sm:$0xff]   ;;  %v15224_v38 = vld [vmem:[#allocation9 + $0x910] ss:$24 sps:$4 sm:$0xff]   ;;  %v15229_v62 = vld [vmem:[#allocation9 + $0x824] ss:$24 sps:$4 sm:$0xff]  }
 0x8f4   : > { %v12223_v24 = vpop.f32.mrf.mxu0  ;;  %v15238_v53 = vld [vmem:[#allocation9 + $0xbb4] ss:$24 sps:$4 sm:$0xff]  }
 0x8f5   : > { %12499 = vmatpush2.bf16.msra.mxu1 %v15161_v18  ;;  %12516 = vmatpush1.bf16.msra.mxu0 %v15164_v3  ;;  %v15230_v18 = vld [vmem:[#allocation9 + $0xbe0] ss:$24 sps:$4 sm:$0xff]   ;;  %v15235_v3 = vld [vmem:[#allocation9 + $0x7f4] ss:$24 sps:$4 sm:$0xff]   ;;  %v15244_v24 = vld [vmem:[#allocation9 + $0xb84] ss:$24 sps:$4 sm:$0xff]  }
 0x8f6   : > { %v12224_v0 = vpop.f32.mrf.mxu0  ;;  %12500 = vmatprep.subr.bf16.mxu1 %v15169_v43  ;;  %12517 = vmatprep.subr.bf16.mxu0 %v15172_v13  ;;  %v15233_v43 = vld [vmem:[#allocation9 + $0x7f0] ss:$24 sps:$4 sm:$0xff]  }
 0x8f7   : > { %v15236_v13 = vld [vmem:[#allocation9 + $0xbb0] ss:$24 sps:$4 sm:$0xff]   ;;  %v15247_v0 = vld [vmem:[#allocation9 + $0x794] ss:$24 sps:$4 sm:$0xff]  }
 0x8f9   : > { %12501 = vmatpush2.bf16.msra.mxu1 %v15167_v14  ;;  %12518 = vmatpush1.bf16.msra.mxu0 %v15170_v17  ;;  %v15239_v14 = vld [vmem:[#allocation9 + $0x7c0] ss:$24 sps:$4 sm:$0xff]  }
 0x8fa   : > { %12502 = vmatprep.subr.bf16.mxu1 %v15175_v58  ;;  %12519 = vmatprep.subr.bf16.mxu0 %v15178_v26  ;;  %v15242_v17 = vld [vmem:[#allocation9 + $0xb80] ss:$24 sps:$4 sm:$0xff]   ;;  %v15250_v58 = vld [vmem:[#allocation9 + $0xb54] ss:$24 sps:$4 sm:$0xff]   ;;  %v15245_v26 = vld [vmem:[#allocation9 + $0x790] ss:$24 sps:$4 sm:$0xff]  }
 0x8fd   : > { %12503 = vmatpush2.bf16.msra.mxu1 %v15173_v1  ;;  %12520 = vmatpush1.bf16.msra.mxu0 %v15176_v29  ;;  %v15248_v1 = vld [vmem:[#allocation9 + $0xb50] ss:$24 sps:$4 sm:$0xff]   ;;  %v15253_v29 = vld [vmem:[#allocation9 + $0xb24] ss:$24 sps:$4 sm:$0xff]  }
 0x8fe   : > { %12521 = vmatprep.subr.bf16.mxu0 %v15181_v40  ;;  %12554 = vmatprep.subr.bf16.mxu1 %v15184_v47  ;;  %v15251_v40 = vld [vmem:[#allocation9 + $0xb20] ss:$24 sps:$4 sm:$0xff]   ;;  %v15256_v47 = vld [vmem:[#allocation9 + $0xaf4] ss:$24 sps:$4 sm:$0xff]  }
 0x900   : > { %v12260_v60 = vpop.f32.mrf.mxu1  ;;  %12505 = vmatmul.mubr.bf16.vlgmr.msra.gmra.mxu1 %v16239_v9  ;;  %v15194_v9 = vld [vmem:[#allocation9 + $0xa00] ss:$24 sps:$4 sm:$0xff]  }
 0x901   : > { %v16294_v22 = vadd.f32 %v12260_v60, %v12220_v55  ;;  %12522 = vmatpush1.bf16.msra.mxu0 %v15179_v61  ;;  %12555 = vmatpush1.bf16.msra.mxu1 %v15182_v20  ;;  %v15227_v55 = vld [vmem:[#allocation9 + $0x820] ss:$24 sps:$4 sm:$0xff]   ;;  %v15254_v20 = vld [vmem:[#allocation9 + $0xaf0] ss:$24 sps:$4 sm:$0xff]  }
 0x902   : > { %12586 = vmatprep.mubr.bf16.mxu1 %v16256_v49  ;;  %v12262_v32 = vpop.f32.mrf.mxu1  ;;  %12523 = vmatprep.subr.bf16.mxu0 %v15187_v56  ;;  %v15197_v49 = vld [vmem:[#allocation9 + $0x610] ss:$24 sps:$4 sm:$0xff]  }
 0x903   : > { %v16297_v10 = vadd.f32 %v12262_v32, %v12222_v16  ;;  %12556 = vmatprep.subr.bf16.mxu1 %v15190_v25  ;;  %v15241_v16 = vld [vmem:[#allocation9 + $0x7c4] ss:$24 sps:$4 sm:$0xff]   ;;  %v15262_v32 = vld [vmem:[#allocation9 + $0xa94] ss:$24 sps:$4 sm:$0xff]  }
 0x904   : > { %v12264_v36 = vpop.f32.mrf.mxu1  ;;  %v15259_v25 = vld [vmem:[#allocation9 + $0xac4] ss:$24 sps:$4 sm:$0xff]  }
 0x905   : > { %12524 = vmatpush1.bf16.msra.mxu0 %v15185_v8  ;;  %12557 = vmatpush1.bf16.msra.mxu1 %v15188_v35  ;;  %v15257_v8 = vld [vmem:[#allocation9 + $0xac0] ss:$24 sps:$4 sm:$0xff]  }
 0x906   : > { %v12265_v59 = vpop.f32.mrf.mxu1  ;;  %12525 = vmatprep.subr.bf16.mxu0 %v15193_v50  ;;  %12558 = vmatprep.subr.bf16.mxu1 %v15196_v4  ;;  %v15260_v50 = vld [vmem:[#allocation9 + $0xa90] ss:$24 sps:$4 sm:$0xff]   ;;  %v10136_v4 = vrot.slane %v16277_v44, %v15871_v7 }
 0x909   : > { %12526 = vmatpush1.bf16.msra.mxu0 %v15191_v57  ;;  %12559 = vmatpush1.bf16.msra.mxu1 %v15194_v9 }
 0x90a   : > { %12527 = vmatprep.subr.bf16.mxu0 %v15199_v37  ;;  %12560 = vmatprep.subr.bf16.mxu1 %v15202_v46 }
 0x90d   : > { %12528 = vmatpush1.bf16.msra.mxu0 %v15197_v49  ;;  %12561 = vmatpush1.bf16.msra.mxu1 %v15200_v31 }
 0x90e   : > { %12529 = vmatprep.subr.bf16.mxu0 %v15205_v27  ;;  %12562 = vmatprep.subr.bf16.mxu1 %v15208_v2 }
 0x911   : > { %12530 = vmatpush2.bf16.msra.mxu0 %v15203_v6  ;;  %12563 = vmatpush1.bf16.msra.mxu1 %v15206_v28 }
 0x912   : > { %12531 = vmatprep.subr.bf16.mxu0 %v15211_v33  ;;  %12564 = vmatprep.subr.bf16.mxu1 %v15214_v42 }
 0x915   : > { %12532 = vmatpush2.bf16.msra.mxu0 %v15209_v39  ;;  %12565 = vmatpush1.bf16.msra.mxu1 %v15212_v41 }
 0x916   : > { %12533 = vmatprep.subr.bf16.mxu0 %v15217_v12  ;;  %12566 = vmatprep.subr.bf16.mxu1 %v15220_v45 }
 0x919   : > { %12534 = vmatpush2.bf16.msra.mxu0 %v15215_v34  ;;  %12567 = vmatpush1.bf16.msra.mxu1 %v15218_v5 }
 0x91a   : > { %12535 = vmatprep.subr.bf16.mxu0 %v15223_v52  ;;  %12568 = vmatprep.subr.bf16.mxu1 %v15226_v48 }
 0x91d   : > { %12536 = vmatpush2.bf16.msra.mxu0 %v15221_v23  ;;  %12569 = vmatpush1.bf16.msra.mxu1 %v15224_v38 }
 0x91e   : > { %12537 = vmatprep.subr.bf16.mxu0 %v15229_v62  ;;  %12570 = vmatprep.subr.bf16.mxu1 %v15232_v21 }
 0x921   : > { %12538 = vmatpush2.bf16.msra.mxu0 %v15227_v55  ;;  %12571 = vmatpush2.bf16.msra.mxu1 %v15230_v18 }
 0x922   : > { %12539 = vmatprep.subr.bf16.mxu0 %v15235_v3  ;;  %12572 = vmatprep.subr.bf16.mxu1 %v15238_v53 }
 0x925   : > { %12540 = vmatpush2.bf16.msra.mxu0 %v15233_v43  ;;  %12573 = vmatpush2.bf16.msra.mxu1 %v15236_v13  ;;  %v10144_v13 = vrot.slane %v16277_v44, %v15891_v11 }
 0x926   : > { %12541 = vmatprep.subr.bf16.mxu0 %v15241_v16  ;;  %12574 = vmatprep.subr.bf16.mxu1 %v15244_v24  ;;  %v15300_v16 = vld [vmem:[%s15784_s2 + $0x8] sm:$0xff] }
 0x927   : > { %v12596_v24 = vadd.f32 %v15300_v16, %v16297_v10 }
 0x929   : > { %12542 = vmatpush2.bf16.msra.mxu0 %v15239_v14  ;;  %12575 = vmatpush2.bf16.msra.mxu1 %v15242_v17  ;;  %v10148_v14 = vrot.slane %v16277_v44, %v15894_v15  ;;  %v15301_v17 = vld [vmem:[%s15784_s2] sm:$0xff] }
 0x92a   : > { %12543 = vmatprep.subr.bf16.mxu0 %v15247_v0  ;;  %12576 = vmatprep.subr.bf16.mxu1 %v15250_v58  ;;  %v12595_v0 = vadd.f32 %v15301_v17, %v16294_v22  ;;  %v15302_v58 = vld [vmem:[%s15784_s2 + $0x10] sm:$0xff] }
 0x92d   : > { %12544 = vmatpush2.bf16.msra.mxu0 %v15245_v26  ;;  %12577 = vmatpush2.bf16.msra.mxu1 %v15248_v1 }
 0x92e   : > { %12578 = vmatprep.subr.bf16.mxu1 %v15253_v29  ;;  %v12601_v29 = vadd.f32 %v12596_v24, %v12595_v0 }
 0x930   : > { %v12301_v61 = vpop.f32.mrf.mxu0  ;;  %12546 = vmatmul.mubr.bf16.vlgmr.msra.gmra.mxu0 %v16261_v51  ;;  %v10140_v51 = vrot.slane %v16277_v44, %v15874_v30 }
 0x931   : > { %12579 = vmatpush2.bf16.msra.mxu1 %v15251_v40  ;;  %v12302_v36 = vadd.f32 %v12301_v61, %v10136_v4 }
 0x932   : > { %v12303_v56 = vpop.f32.mrf.mxu0  ;;  %12580 = vmatprep.subr.bf16.mxu1 %v15256_v47 }
 0x933   : > { %v12304_v9 = vadd.f32 %v12303_v56, %v10140_v51 }
 0x934   : > { %v12305_v60 = vpop.f32.mrf.mxu0 }
 0x935   : > { %12581 = vmatpush2.bf16.msra.mxu1 %v15254_v20  ;;  %v15303_v20 = vld [vmem:[%s15784_s2 + $0x18] sm:$0xff] }
 0x936   : > { %v12306_v35 = vpop.f32.mrf.mxu0  ;;  %12582 = vmatprep.subr.bf16.mxu1 %v15259_v25 }
 0x939   : > { %12583 = vmatpush2.bf16.msra.mxu1 %v15257_v8 }
 0x93a   : > { %12584 = vmatprep.subr.bf16.mxu1 %v15262_v32 }
 0x93d   : > { %12585 = vmatpush2.bf16.msra.mxu1 %v15260_v50  ;;  %v15304_v50 = vld [vmem:[%s15784_s2 + $0x20] sm:$0xff] }
 0x940   : > { %v12342_v57 = vpop.f32.mrf.mxu1  ;;  %12587 = vmatmul.mubr.bf16.vlgmr.msra.gmra.mxu1 %v16267_v19 }
 0x941   : > { %v12343_v59 = vadd.f32 %v12342_v57, %v12302_v36  ;;  %v15305_v36 = vld [vmem:[%s15784_s2 + $0x28] sm:$0xff] }
 0x942   : > { %v12344_v37 = vpop.f32.mrf.mxu1 }
 0x943   : > { %v12345_v46 = vadd.f32 %v12344_v37, %v12304_v9 }
 0x944   : > { %v12346_v49 = vpop.f32.mrf.mxu1 }
 0x946   : > { %v12347_v31 = vpop.f32.mrf.mxu1 }
 0x970   : > { %v12383_v27 = vpop.f32.mrf.mxu0 }
 0x971   : > { %v12384_v2 = vadd.f32 %v12383_v27, %v12343_v59 }
 0x972   : > { %v12385_v6 = vpop.f32.mrf.mxu0 }
 0x973   : > { %v12386_v28 = vadd.f32 %v12385_v6, %v12345_v46 }
 0x974   : > { %v12387_v33 = vpop.f32.mrf.mxu0 }
 0x976   : > { %v12388_v42 = vpop.f32.mrf.mxu0 }
 0x980   : > { %v12424_v39 = vpop.f32.mrf.mxu1 }
 0x981   : > { %v12425_v41 = vadd.f32 %v12424_v39, %v12384_v2 }
 0x982   : > { %v12426_v12 = vpop.f32.mrf.mxu1 }
 0x983   : > { %v12427_v45 = vadd.f32 %v12426_v12, %v12386_v28  ;;  %v12597_v26 = vadd.f32 %v15302_v58, %v12425_v41 }
 0x984   : > { %v12428_v34 = vpop.f32.mrf.mxu1 }
 0x985   : > { %v12602_v61 = vadd.f32 %v12601_v29, %v12597_v26  ;;  %v12598_v56 = vadd.f32 %v15303_v20, %v12427_v45 }
 0x986   : > { %v12429_v5 = vpop.f32.mrf.mxu1 }
 0x987   : > { %v12603_v32 = vadd.f32 %v12602_v61, %v12598_v56 }
 0x9b0   : > { %v12465_v19 = vpop.f32.mrf.mxu0 }
 0x9b1   : > { %v12466_v1 = vadd.f32 %v12465_v19, %v10144_v13 }
 0x9b2   : > { %v12467_v52 = vpop.f32.mrf.mxu0 }
 0x9b3   : > { %v12468_v40 = vadd.f32 %v12467_v52, %v10148_v14 }
 0x9b4   : > { %v12469_v48 = vpop.f32.mrf.mxu0 }
 0x9b6   : > { %v12470_v23 = vpop.f32.mrf.mxu0 }
 0x9c0   : > { %v12506_v38 = vpop.f32.mrf.mxu1 }
 0x9c1   : > { %v12507_v47 = vadd.f32 %v12506_v38, %v12466_v1 }
 0x9c2   : > { %v12508_v62 = vpop.f32.mrf.mxu1 }
 0x9c3   : > { %v12509_v25 = vadd.f32 %v12508_v62, %v12468_v40 }
 0x9c4   : > { %v12510_v21 = vpop.f32.mrf.mxu1 }
 0x9c6   : > { %v12511_v55 = vpop.f32.mrf.mxu1 }
 0x9c7   : > { %v12638_v55 = vld [vmem:[#allocation12] sm:$0x3f] }
 0x9c8   : > { %v12655_v13 = vrot.slane %v12638_v55, %v15874_v30  ;;  %v12659_v16 = vrot.slane %v12638_v55, %v15891_v11 }
 0x9f0   : > { %v12547_v18 = vpop.f32.mrf.mxu0 }
 0x9f1   : > { %v12548_v60 = vadd.f32 %v12547_v18, %v12507_v47  ;;  %v12676_v18 = vld [vmem:[#allocation14] sm:$0x3f] }
 0x9f2   : > { %v12549_v3 = vpop.f32.mrf.mxu0  ;;  %v12681_v17 = vrot.slane %v12676_v18, %v15839_v54  ;;  %v12689_v58 = vrot.slane %v12676_v18, %v15871_v7 }
 0x9f3   : > { %v12550_v8 = vadd.f32 %v12549_v3, %v12509_v25  ;;  %v12643_v3 = vrot.slane %v12638_v55, %v15839_v54  ;;  %v12701_v25 = vrot.slane %v12676_v18, %v15894_v15 }
 0x9f4   : > { %v12551_v53 = vpop.f32.mrf.mxu0 }
 0x9f5   : > { %v12647_v53 = vrot.slane %v12638_v55, %v15842_v63 }
 0x9f6   : > { %v12552_v43 = vpop.f32.mrf.mxu0 }
 0x9f7   : > { %v12651_v43 = vrot.slane %v12638_v55, %v15871_v7 }
 0xa00   : > { %v12588_v10 = vpop.f32.mrf.mxu1 }
 0xa01   : > { %v12589_v35 = vadd.f32 %v12588_v10, %v12548_v60 }
 0xa02   : > { %v12590_v44 = vpop.f32.mrf.mxu1 }
 0xa03   : > { %v12599_v22 = vadd.f32 %v15304_v50, %v12589_v35  ;;  %v12591_v4 = vadd.f32 %v12590_v44, %v12550_v8 }
 0xa04   : > { %v12592_v51 = vpop.f32.mrf.mxu1 }
 0xa05   : > { %v12600_v57 = vadd.f32 %v15305_v36, %v12591_v4  ;;  %v12604_v9 = vadd.f32 %v12603_v32, %v12599_v22 }
 0xa06   : > { %v12593_v59 = vpop.f32.mrf.mxu1 }
 0xa07   : > { %v12605_v37 = vadd.f32 %v12604_v9, %v12600_v57 }
 0xa09   : > { %12606 = vadd.xlane.f32.xlu0 %v12605_v37 }
 0xa92   : > { %v12607_v46 = vpop.xlane.xlu0 %12606 }
 0xa93   : > { %v12609_v49 = vmul.f32 0.0013020834, %v12607_v46 }
 0xa95   : > { %v12610_v31 = vsub.f32 %v12595_v0, %v12609_v49  ;;  %v12611_v27 = vsub.f32 %v12596_v24, %v12609_v49  ;;  %v12612_v2 = vsub.f32 %v12597_v26, %v12609_v49  ;;  %v12613_v6 = vsub.f32 %v12598_v56, %v12609_v49 }
 0xa96   : > { %v12614_v42 = vsub.f32 %v12599_v22, %v12609_v49  ;;  %v12615_v12 = vsub.f32 %v12600_v57, %v12609_v49  ;;  %v12663_v24 = vrot.slane %v12638_v55, %v15894_v15  ;;  %v12685_v0 = vrot.slane %v12676_v18, %v15842_v63 }
 0xa97   : > { %v12616_v28 = vmul.f32 %v12610_v31, %v12610_v31  ;;  %v12617_v33 = vmul.f32 %v12611_v27, %v12611_v27  ;;  %v12618_v39 = vmul.f32 %v12612_v2, %v12612_v2  ;;  %v12619_v45 = vmul.f32 %v12613_v6, %v12613_v6 }
 0xa98   : > { %v12620_v5 = vmul.f32 %v12614_v42, %v12614_v42  ;;  %v12621_v52 = vmul.f32 %v12615_v12, %v12615_v12  ;;  %v12693_v26 = vrot.slane %v12676_v18, %v15874_v30  ;;  %v12697_v56 = vrot.slane %v12676_v18, %v15891_v11 }
 0xa99   : > { %v12622_v41 = vadd.f32 %v12617_v33, %v12616_v28 }
 0xa9b   : > { %v12623_v34 = vadd.f32 %v12622_v41, %v12618_v39 }
 0xa9d   : > { %v12624_v19 = vadd.f32 %v12623_v34, %v12619_v45 }
 0xa9f   : > { %v12625_v48 = vadd.f32 %v12624_v19, %v12620_v5 }
 0xaa1   : > { %v12626_v23 = vadd.f32 %v12625_v48, %v12621_v52 }
 0xaa3   : > { %12627 = vadd.xlane.f32.xlu1 %v12626_v23 }
 0xb2c   : > { %v12628_v38 = vpop.xlane.xlu1 %12627 }
 0xb2d   : > { %v12629_v62 = vmul.f32 0.0013020834, %v12628_v38 }
 0xb2f   : > { %v12630_v21 = vadd.f32 1e-05, %v12629_v62 }
 0xb31   : > { %15295 = vrsqrt.f32 %v12630_v21 }
 0xb3e   : > { %v15296_v14 = vpop.eup %15295 }
 0xb3f   : > { %v12632_v1 = vmul.f32 %v15296_v14, %v12610_v31  ;;  %v12633_v29 = vmul.f32 %v15296_v14, %v12611_v27  ;;  %v12634_v40 = vmul.f32 %v15296_v14, %v12612_v2  ;;  %v12635_v47 = vmul.f32 %v15296_v14, %v12613_v6 }
 0xb40   : > { %v12636_v61 = vmul.f32 %v15296_v14, %v12614_v42  ;;  %v12637_v20 = vmul.f32 %v15296_v14, %v12615_v12 }
 0xb41   : > { %v12670_v60 = vmul.f32 %v12643_v3, %v12632_v1  ;;  %v12671_v54 = vmul.f32 %v12647_v53, %v12633_v29  ;;  %v12672_v10 = vmul.f32 %v12651_v43, %v12634_v40  ;;  %v12673_v63 = vmul.f32 %v12655_v13, %v12635_v47 }
 0xb42   : > { %v12674_v7 = vmul.f32 %v12659_v16, %v12636_v61  ;;  %v12675_v30 = vmul.f32 %v12663_v24, %v12637_v20 }
 0xb43   : > { %v12708_v8 = vadd.f32 %v12681_v17, %v12670_v60  ;;  %v12709_v35 = vadd.f32 %v12685_v0, %v12671_v54  ;;  %v12710_v44 = vadd.f32 %v12689_v58, %v12672_v10  ;;  %v12711_v32 = vadd.f32 %v12693_v26, %v12673_v63 }
 0xb44   : > { %v12712_v50 = vadd.f32 %v12697_v56, %v12674_v7  ;;  %v12713_v11 = vadd.f32 %v12701_v25, %v12675_v30 }
 0xb45   : > { %12714 = vst [vmem:[%s373_s17] sm:$0xff] %v12708_v8  ;;  %12715 = vst [vmem:[%s373_s17 + $0x8] sm:$0xff] %v12709_v35 }
 0xb46   : > { %12716 = vst [vmem:[%s373_s17 + $0x10] sm:$0xff] %v12710_v44  ;;  %12717 = vst [vmem:[%s373_s17 + $0x18] sm:$0xff] %v12711_v32 }
 0xb47   : > { %12718 = vst [vmem:[%s373_s17 + $0x20] sm:$0xff] %v12712_v50  ;;  %12719 = vst [vmem:[%s373_s17 + $0x28] sm:$0xff] %v12713_v11 }
 0xb48   : > { %15503 = shalt.err (!%p15500_p13)
}
 0xb49   : > { %s15504_s18 = scalar_lea.hbm %s16335_s30, 768  ;;  %s15508_s15 = scalar_lea.hbm %s16385_s7, 1536 }
 0xb4a   : > { %p15505_p5 = scmp.ne.s32.totalorder %s16335_s30, %s15504_s18  ;;  %p15509_p3 = scmp.lt.s32.totalorder %s16335_s30, %s16385_s7 }
 0xb4b   : > { %p15510_p10 = scmp.lt.s32.totalorder %s15508_s15, %s15504_s18 }
 0xb4c   : > { %p15506_p8 = pnand %p15505_p5, %p16410_p6 }
 0xb4d   : > { %p15511_p11 = por %p15510_p10, %p15509_p3 }
 0xb4e   : > { %p15507_p9 = pneg %p15506_p8 }
 0xb50   : > { %p15512_p12 = pnand %p15511_p11, %p15507_p9 }
 0xb52   : > { %15515 = shalt.err (!%p15512_p12)
}
 0xb53   : > { %14592 = dma.vmem_to_hbm [thread:$0]  (%p16410_p6), %s16337_s22, 768, %s16335_s30, %s12721_s14  }
 0xb54 PF: > { %s12747_s8 = sand.u32 1, %s15554_s24   ;;  %p16411_p0 = scmp.ne.s32.totalorder %s16400_s20, 0 }
 0xb55   : > { %p16412_p2 = scmp.ge.s32.totalorder %s15566_s27, 2  ;;  %s12748_s17 = scalar_lea.sflag [#allocation5], %s12747_s8 }
 0xb57   : > { %p14618_p1 = pnand %p16412_p2, %p16411_p0 }
 0xb59   : > { %p14619_p4 = pneg %p14618_p1 }
 0xb5b   : > { %15549 = dma.done.wait (%p14619_p4), %s12748_s17, 768  }
 0xb5c   : > { %15551 = vsyncadd (%p14619_p4), %s12748_s17, 4294966528  ;;  %p23_p7 = scmp.ge.s32.totalorder %s15721_s11, 4   ;;  %s16413_s24 = smov %s15558_s25 }
 0xb5d   : > { %s16414_s25 = smov %s15562_s26  ;;  %s16415_s26 = smov %s15732_s16 }
 0xb5e   : > { %s16416_s27 = smov %s15721_s11  ;;  %25 = sbr.rel (!%p23_p7) target bundleno = 11 (0xb), region = 117 }
 0xb63   :  { %12753 = vsyncpa [#allocation4], 1 }
 0xb64   :  { %12755 = vsyncpa [#allocation4 + $0x1], 1 }
 0xb65   :  { %12756 = vsyncpa [#allocation7], 1 }
 0xb66   :  { %12757 = vsyncpa [#allocation10], 1 }
 0xb67   :  { %12758 = vsyncpa [#allocation13], 1 }
 0xb68   :  { %12759 = vsyncpa [#allocation5], 1 }
 0xb69   :  { %12761 = vsyncpa [#allocation5 + $0x1], 1 }

</bundles_post_ra>
